<compile_context>
chip_gen: v5e
topology: v5e:2x2
jax: 0.10.0
libtpu: 0.0.40
codegen_flags: <defaults>
</compile_context>

<pallas_src>
import numpy as np
import jax
import jax.numpy as jnp
from jax import lax
from jax.experimental import pallas as pl
from jax.experimental.pallas import tpu as pltpu

# ----------------------------- model dimensions -----------------------------
DIM = 32            # MoCo embedding dim (small synthetic value)
MOMENTUM = 0.999    # m
EPS = 1e-12         # F.normalize default eps
C_IN, C_F = 4, 8
D, H, W = 3, 7, 7   # feature map exactly matches MaxPool3d kernel (3,7,7)
N = 2               # batch

# ------------------------- in-kernel conv layout -----------------------------
DP, HP, WP = D + 2, H + 2, W + 2    # padded spatial: 5, 9, 9
P = DP * HP * WP                    # 405 flattened padded positions
SEG = 512                           # per-sample lane segment (>= P, mult of 128)
LANES = N * SEG                     # 1024
CI_PAD = 8                          # input channels padded to a sublane tile
NTAP = 27
X_ROWS = 3 * CI_PAD                 # 8 (q img) + 8 (k img) + 1 mask + 7 pad = 24
NEG = -1e30                         # additive mask value for invalid positions

# ------------------------- packed parameter slab -----------------------------
SLAB_R, SLAB_C = 256, 16
ROW_CB = NTAP * C_F                 # 216: conv bias rows start
ROW_FC = ROW_CB + C_F               # 224: fc rows start


def _mask_row_np():
    """Additive mask over one 512-lane segment, tiled for N samples."""
    m = np.full((DP, HP, WP), NEG, np.float32)
    m[:D, :H, :W] = 0.0              # valid conv-output positions (147 of 405)
    m = np.concatenate([m.reshape(P), np.full((SEG - P,), NEG, np.float32)])
    return np.tile(m, N)[None, :]    # (1, LANES)


_MASK_NP = _mask_row_np()


# ------------------------------- fused kernel --------------------------------
def _moco_kernel(x_ref, qs_ref, ks_ref, w2_ref, b2_ref, out_ref, nks_ref):
    # ---- momentum update: k <- m*k + (1-m)*q, whole packed slab at once ----
    nks_ref[...] = MOMENTUM * ks_ref[...] + (1.0 - MOMENTUM) * qs_ref[...]

    # ---- Conv3d(3x3x3, pad 1) via 27 static lane-rolls of the padded input.
    # x rows 0:8 = query image channels, 8:16 = key image channels; lanes hold
    # the flattened padded volume, one 512-lane segment per batch sample.
    # For a tap at offset (a,b,c): padded[d+a, h+b, w+c] lives at flat index
    # p + s with s = a*81 + b*9 + c, so a lane roll by -s aligns it with the
    # output position p.  Both samples are rolled/matmul'd in one push.
    imgs = x_ref[0:2 * CI_PAD, :]                           # (16, LANES)
    acc_q = jnp.zeros((C_F, LANES), jnp.float32)
    acc_k = jnp.zeros((C_F, LANES), jnp.float32)
    t = 0
    for a in range(3):
        for b in range(3):
            for c in range(3):
                s = a * (HP * WP) + b * WP + c
                xr = imgs if s == 0 else pltpu.roll(imgs, LANES - s, axis=1)
                r0, r1 = t * C_F, (t + 1) * C_F
                wq = qs_ref[r0:r1, 0:CI_PAD]                # (C_F, CI_PAD)
                wk = nks_ref[r0:r1, 0:CI_PAD]               # fresh key weights
                acc_q = acc_q + jnp.dot(wq, xr[0:CI_PAD, :],
                                        preferred_element_type=jnp.float32)
                acc_k = acc_k + jnp.dot(wk, xr[CI_PAD:2 * CI_PAD, :],
                                        preferred_element_type=jnp.float32)
                t += 1

    # ---- global max pool over the 147 valid positions (additive -inf mask on
    # pad / out-of-window lanes), one lane reduce per 512-lane sample segment.
    maskrow = x_ref[2 * CI_PAD:2 * CI_PAD + 1, :]           # (1, LANES)
    mq = acc_q + maskrow
    mk = acc_k + maskrow
    pool_q = jnp.concatenate(
        [jnp.max(mq[:, n * SEG:(n + 1) * SEG], axis=1, keepdims=True)
         for n in range(N)], axis=1)                        # (C_F, N)
    pool_k = jnp.concatenate(
        [jnp.max(mk[:, n * SEG:(n + 1) * SEG], axis=1, keepdims=True)
         for n in range(N)], axis=1)

    # ---- heads, column orientation (features x samples).  Per-channel conv
    # bias commutes with the spatial max, so it is added post-pool.
    qcb = qs_ref[ROW_CB:ROW_FC, 0:1]                        # (C_F, 1)
    q1w = qs_ref[ROW_FC:ROW_FC + DIM, 0:C_F]                # (DIM, C_F)
    q1b = qs_ref[ROW_FC:ROW_FC + DIM, C_F:C_F + 1]          # (DIM, 1)
    kcb = nks_ref[ROW_CB:ROW_FC, 0:1]
    k1w = nks_ref[ROW_FC:ROW_FC + DIM, 0:C_F]
    k1b = nks_ref[ROW_FC:ROW_FC + DIM, C_F:C_F + 1]

    hq = jnp.dot(q1w, pool_q + qcb,
                 preferred_element_type=jnp.float32) + q1b  # (DIM, N)
    hk = jnp.dot(k1w, pool_k + kcb,
                 preferred_element_type=jnp.float32) + k1b
    hk = jnp.maximum(hk, 0.0)                               # ReLU (key head)
    kk = jnp.dot(w2_ref[...], hk,
                 preferred_element_type=jnp.float32) + b2_ref[...]

    ones_row = jnp.ones((1, DIM), jnp.float32)

    def l2n(v):  # F.normalize(dim=1) in (DIM, N) column orientation
        ss = jnp.dot(ones_row, v * v, preferred_element_type=jnp.float32)
        return v * lax.rsqrt(jnp.maximum(ss, EPS * EPS))

    out_ref[0] = l2n(hq)
    out_ref[1] = l2n(kk)


# ---------------------------------- glue -------------------------------------
def _full_spec(shape):
    nd = len(shape)
    return pl.BlockSpec(shape, lambda i, _n=nd: (0,) * _n)


def _pack_one_image(im):
    """(N, C_IN, D, H, W) -> (CI_PAD, LANES) lane-dense padded layout."""
    xp = jnp.pad(im, ((0, 0), (0, 0), (1, 1), (1, 1), (1, 1)))   # (N,C,5,9,9)
    xp = xp.reshape(N, C_IN, P)
    xp = jnp.pad(xp, ((0, 0), (0, 0), (0, SEG - P)))             # (N,C,512)
    xp = jnp.transpose(xp, (1, 0, 2)).reshape(C_IN, LANES)       # (C, 1024)
    return jnp.pad(xp, ((0, CI_PAD - C_IN), (0, 0)))             # (8, 1024)


def _pack_inputs(im_q, im_k):
    return jnp.concatenate(
        [_pack_one_image(im_q),
         _pack_one_image(im_k),
         jnp.asarray(_MASK_NP),
         jnp.zeros((X_ROWS - 2 * CI_PAD - 1, LANES), jnp.float32)], axis=0)


def pack_encoder_slab(conv_w, conv_b, fc_w, fc_b):
    """conv_w (C_F,C_IN,3,3,3), conv_b (C_F,), fc_w (DIM,C_F), fc_b (DIM,)."""
    w = jnp.transpose(conv_w.reshape(C_F, C_IN, NTAP), (2, 0, 1))
    w = w.reshape(NTAP * C_F, C_IN)                    # row = tap*C_F + out_ch
    slab = jnp.zeros((SLAB_R, SLAB_C), jnp.float32)
    slab = slab.at[0:NTAP * C_F, 0:C_IN].set(w)
    slab = slab.at[ROW_CB:ROW_FC, 0].set(conv_b)
    slab = slab.at[ROW_FC:ROW_FC + DIM, 0:C_F].set(fc_w)
    slab = slab.at[ROW_FC:ROW_FC + DIM, C_F].set(fc_b)
    return slab


def init_raw_params(key):
    ks = jax.random.split(key, 10)
    sc = 0.1
    return {
        "q_conv_w": sc * jax.random.normal(ks[0], (C_F, C_IN, 3, 3, 3), jnp.float32),
        "q_conv_b": sc * jax.random.normal(ks[1], (C_F,), jnp.float32),
        "q_cls_w":  sc * jax.random.normal(ks[2], (DIM, C_F), jnp.float32),
        "q_cls_b":  sc * jax.random.normal(ks[3], (DIM,), jnp.float32),
        "k_conv_w": sc * jax.random.normal(ks[4], (C_F, C_IN, 3, 3, 3), jnp.float32),
        "k_conv_b": sc * jax.random.normal(ks[5], (C_F,), jnp.float32),
        "k_fc1_w":  sc * jax.random.normal(ks[6], (DIM, C_F), jnp.float32),
        "k_fc1_b":  sc * jax.random.normal(ks[7], (DIM,), jnp.float32),
        "k_fc2_w":  sc * jax.random.normal(ks[8], (DIM, DIM), jnp.float32),
        "k_fc2_b":  sc * jax.random.normal(ks[9], (DIM,), jnp.float32),
    }


def pack_params(raw):
    return {
        "q_slab": pack_encoder_slab(raw["q_conv_w"], raw["q_conv_b"],
                                    raw["q_cls_w"], raw["q_cls_b"]),
        "k_slab": pack_encoder_slab(raw["k_conv_w"], raw["k_conv_b"],
                                    raw["k_fc1_w"], raw["k_fc1_b"]),
        "k_fc2_w": raw["k_fc2_w"],
        "k_fc2_b": raw["k_fc2_b"].reshape(DIM, 1),
    }


@jax.jit
def moco_forward(params, im_q, im_k):
    x = _pack_inputs(im_q, im_k)
    out_shape = (
        jax.ShapeDtypeStruct((2, DIM, N), jnp.float32),     # stacked [q, k]
        jax.ShapeDtypeStruct((SLAB_R, SLAB_C), jnp.float32),  # updated k slab
    )
    qk, new_k_slab = pl.pallas_call(
        _moco_kernel,
        out_shape=out_shape,
        grid=(1,),
        in_specs=[
            _full_spec((X_ROWS, LANES)),
            _full_spec((SLAB_R, SLAB_C)),
            _full_spec((SLAB_R, SLAB_C)),
            _full_spec((DIM, DIM)),
            _full_spec((DIM, 1)),
        ],
        out_specs=[
            _full_spec((2, DIM, N)),
            _full_spec((SLAB_R, SLAB_C)),
        ],
        compiler_params=pltpu.CompilerParams(
            dimension_semantics=("arbitrary",)),
    )(x, params["q_slab"], params["k_slab"], params["k_fc2_w"], params["k_fc2_b"])

    new_params = dict(params)
    new_params["k_slab"] = new_k_slab
    return qk[0].T, qk[1].T, new_params


# ------------------------ pure-JAX reference (checks) ------------------------
def reference_forward(raw, im_q, im_k):
    hp = lax.Precision.HIGHEST

    def conv(x, w, b):
        y = lax.conv_general_dilated(
            x, w, (1, 1, 1), ((1, 1), (1, 1), (1, 1)),
            dimension_numbers=("NCDHW", "OIDHW", "NCDHW"), precision=hp)
        return y + b.reshape(1, C_F, 1, 1, 1)

    def gmax(y):
        return jnp.max(y, axis=(2, 3, 4))

    def norm(v):
        return v / jnp.maximum(jnp.linalg.norm(v, axis=1, keepdims=True), EPS)

    q = gmax(conv(im_q, raw["q_conv_w"], raw["q_conv_b"]))
    q = jnp.dot(q, raw["q_cls_w"].T, precision=hp) + raw["q_cls_b"]
    q = norm(q)

    m = MOMENTUM
    kw = m * raw["k_conv_w"] + (1.0 - m) * raw["q_conv_w"]
    kb = m * raw["k_conv_b"] + (1.0 - m) * raw["q_conv_b"]
    k1w = m * raw["k_fc1_w"] + (1.0 - m) * raw["q_cls_w"]
    k1b = m * raw["k_fc1_b"] + (1.0 - m) * raw["q_cls_b"]
    k = gmax(conv(im_k, kw, kb))
    k = jnp.maximum(jnp.dot(k, k1w.T, precision=hp) + k1b, 0.0)
    k = jnp.dot(k, raw["k_fc2_w"].T, precision=hp) + raw["k_fc2_b"]
    k = norm(k)
    return q, k


if __name__ == "__main__":
    key = jax.random.PRNGKey(0)
    kp, kq, kk = jax.random.split(key, 3)
    raw = init_raw_params(kp)
    params = pack_params(raw)
    im_q = jax.random.normal(kq, (N, C_IN, D, H, W), jnp.float32)
    im_k = jax.random.normal(kk, (N, C_IN, D, H, W), jnp.float32)

    q, k, new_params = moco_forward(params, im_q, im_k)
    jax.block_until_ready((q, k, new_params))

    assert q.shape == (N, DIM) and k.shape == (N, DIM)
    # both outputs are L2-normalized along dim=1
    assert jnp.allclose(jnp.linalg.norm(q, axis=1), 1.0, atol=1e-5)
    assert jnp.allclose(jnp.linalg.norm(k, axis=1), 1.0, atol=1e-5)
    # momentum update semantics: param_k <- m*param_k + (1-m)*param_q
    expect_slab = MOMENTUM * params["k_slab"] + (1.0 - MOMENTUM) * params["q_slab"]
    assert jnp.allclose(new_params["k_slab"], expect_slab, atol=1e-6)
    # full forward vs. a pure-JAX reference of the same synthetic encoders
    # (tolerance is loose enough to absorb MXU multi-pass f32 rounding, while
    #  any structural/layout bug would show up as O(0.1..1) differences).
    q_ref, k_ref = reference_forward(raw, im_q, im_k)
    assert jnp.allclose(q, q_ref, atol=5e-3), (q, q_ref)
    assert jnp.allclose(k, k_ref, atol=5e-3), (k, k_ref)
    print("KERNEL_OK")
</pallas_src>

<mosaic_0001>
module attributes {stable_mosaic.version = 11 : i64} {
  func.func @_moco_kernel(%arg0: i32, %arg1: memref<24x1024xf32, #tpu.memory_space<vmem>>, %arg2: memref<256x16xf32, #tpu.memory_space<vmem>>, %arg3: memref<256x16xf32, #tpu.memory_space<vmem>>, %arg4: memref<32x32xf32, #tpu.memory_space<vmem>>, %arg5: memref<32x1xf32, #tpu.memory_space<vmem>>, %arg6: memref<2x32x2xf32, #tpu.memory_space<vmem>>, %arg7: memref<256x16xf32, #tpu.memory_space<vmem>>) attributes {dimension_semantics = [#tpu.dimension_semantics<arbitrary>], iteration_bounds = array<i64: 1>, scalar_prefetch = 0 : i64, scratch_operands = 0 : i64, tpu.core_type = #tpu.core_type<tc>, window_params = [{pipeline_mode = #tpu.pipeline_mode<synchronous>, transform_indices = @transform_0, window_bounds = array<i64: 24, 1024>}, {pipeline_mode = #tpu.pipeline_mode<synchronous>, transform_indices = @transform_1, window_bounds = array<i64: 256, 16>}, {pipeline_mode = #tpu.pipeline_mode<synchronous>, transform_indices = @transform_2, window_bounds = array<i64: 256, 16>}, {pipeline_mode = #tpu.pipeline_mode<synchronous>, transform_indices = @transform_3, window_bounds = array<i64: 32, 32>}, {pipeline_mode = #tpu.pipeline_mode<synchronous>, transform_indices = @transform_4, window_bounds = array<i64: 32, 1>}, {pipeline_mode = #tpu.pipeline_mode<synchronous>, transform_indices = @transform_5, window_bounds = array<i64: 2, 32, 2>}, {pipeline_mode = #tpu.pipeline_mode<synchronous>, transform_indices = @transform_6, window_bounds = array<i64: 256, 16>}]} {
    %c0 = arith.constant 0 : index
    %c0_0 = arith.constant 0 : index
    %0 = vector.load %arg3[%c0, %c0_0] : memref<256x16xf32, #tpu.memory_space<vmem>>, vector<256x16xf32>
    %cst = arith.constant 9.990000e-01 : f32
    %1 = vector.broadcast %cst : f32 to vector<256x16xf32>
    %2 = arith.mulf %1, %0 : vector<256x16xf32>
    %c0_1 = arith.constant 0 : index
    %c0_2 = arith.constant 0 : index
    %3 = vector.load %arg2[%c0_1, %c0_2] : memref<256x16xf32, #tpu.memory_space<vmem>>, vector<256x16xf32>
    %cst_3 = arith.constant 1.000000e-03 : f32
    %4 = vector.broadcast %cst_3 : f32 to vector<256x16xf32>
    %5 = arith.mulf %4, %3 : vector<256x16xf32>
    %6 = arith.addf %2, %5 : vector<256x16xf32>
    %c0_4 = arith.constant 0 : index
    %c0_5 = arith.constant 0 : index
    %7 = vector.load %arg7[%c0_4, %c0_5] : memref<256x16xf32, #tpu.memory_space<vmem>>, vector<256x16xf32>
    tpu.vector_store %arg7[%c0_4, %c0_5], %6 {strides = array<i32>} : memref<256x16xf32, #tpu.memory_space<vmem>>, vector<256x16xf32>,
    %c0_6 = arith.constant 0 : index
    %c0_7 = arith.constant 0 : index
    %8 = vector.load %arg1[%c0_6, %c0_7] : memref<24x1024xf32, #tpu.memory_space<vmem>>, vector<16x1024xf32>
    %cst_8 = arith.constant 0.000000e+00 : f32
    %9 = vector.broadcast %cst_8 : f32 to vector<8x1024xf32>
    %cst_9 = arith.constant 0.000000e+00 : f32
    %10 = vector.broadcast %cst_9 : f32 to vector<8x1024xf32>
    %c0_10 = arith.constant 0 : index
    %c0_11 = arith.constant 0 : index
    %11 = vector.load %arg2[%c0_10, %c0_11] : memref<256x16xf32, #tpu.memory_space<vmem>>, vector<8x8xf32>
    %c0_12 = arith.constant 0 : index
    %c0_13 = arith.constant 0 : index
    %12 = vector.load %arg7[%c0_12, %c0_13] : memref<256x16xf32, #tpu.memory_space<vmem>>, vector<8x8xf32>
    %13 = vector.extract_strided_slice %8 {offsets = [0, 0], sizes = [8, 1024], strides = [1, 1]} : vector<16x1024xf32> to vector<8x1024xf32>
    %cst_14 = arith.constant dense<0.000000e+00> : vector<8x1024xf32>
    %14 = tpu.matmul %11, %13, %cst_14 {dimension_numbers = #tpu.dot_dimension_numbers<[1], [0], [0], [1], [0, 0, 1, 1], [], []>} : vector<8x8xf32>, vector<8x1024xf32>, vector<8x1024xf32> -> vector<8x1024xf32>
    %15 = arith.addf %9, %14 : vector<8x1024xf32>
    %16 = vector.extract_strided_slice %8 {offsets = [8, 0], sizes = [8, 1024], strides = [1, 1]} : vector<16x1024xf32> to vector<8x1024xf32>
    %cst_15 = arith.constant dense<0.000000e+00> : vector<8x1024xf32>
    %17 = tpu.matmul %12, %16, %cst_15 {dimension_numbers = #tpu.dot_dimension_numbers<[1], [0], [0], [1], [0, 0, 1, 1], [], []>} : vector<8x8xf32>, vector<8x1024xf32>, vector<8x1024xf32> -> vector<8x1024xf32>
    %18 = arith.addf %10, %17 : vector<8x1024xf32>
    %c1023_i32 = arith.constant 1023 : i32
    %19 = tpu.dynamic_rotate %8 by %c1023_i32 dim 1 : vector<16x1024xf32>, i32 -> vector<16x1024xf32>
    %c8 = arith.constant 8 : index
    %c0_16 = arith.constant 0 : index
    %20 = vector.load %arg2[%c8, %c0_16] : memref<256x16xf32, #tpu.memory_space<vmem>>, vector<8x8xf32>
    %c8_17 = arith.constant 8 : index
    %c0_18 = arith.constant 0 : index
    %21 = vector.load %arg7[%c8_17, %c0_18] : memref<256x16xf32, #tpu.memory_space<vmem>>, vector<8x8xf32>
    %22 = vector.extract_strided_slice %19 {offsets = [0, 0], sizes = [8, 1024], strides = [1, 1]} : vector<16x1024xf32> to vector<8x1024xf32>
    %cst_19 = arith.constant dense<0.000000e+00> : vector<8x1024xf32>
    %23 = tpu.matmul %20, %22, %cst_19 {dimension_numbers = #tpu.dot_dimension_numbers<[1], [0], [0], [1], [0, 0, 1, 1], [], []>} : vector<8x8xf32>, vector<8x1024xf32>, vector<8x1024xf32> -> vector<8x1024xf32>
    %24 = arith.addf %15, %23 : vector<8x1024xf32>
    %25 = vector.extract_strided_slice %19 {offsets = [8, 0], sizes = [8, 1024], strides = [1, 1]} : vector<16x1024xf32> to vector<8x1024xf32>
    %cst_20 = arith.constant dense<0.000000e+00> : vector<8x1024xf32>
    %26 = tpu.matmul %21, %25, %cst_20 {dimension_numbers = #tpu.dot_dimension_numbers<[1], [0], [0], [1], [0, 0, 1, 1], [], []>} : vector<8x8xf32>, vector<8x1024xf32>, vector<8x1024xf32> -> vector<8x1024xf32>
    %27 = arith.addf %18, %26 : vector<8x1024xf32>
    %c1022_i32 = arith.constant 1022 : i32
    %28 = tpu.dynamic_rotate %8 by %c1022_i32 dim 1 : vector<16x1024xf32>, i32 -> vector<16x1024xf32>
    %c16 = arith.constant 16 : index
    %c0_21 = arith.constant 0 : index
    %29 = vector.load %arg2[%c16, %c0_21] : memref<256x16xf32, #tpu.memory_space<vmem>>, vector<8x8xf32>
    %c16_22 = arith.constant 16 : index
    %c0_23 = arith.constant 0 : index
    %30 = vector.load %arg7[%c16_22, %c0_23] : memref<256x16xf32, #tpu.memory_space<vmem>>, vector<8x8xf32>
    %31 = vector.extract_strided_slice %28 {offsets = [0, 0], sizes = [8, 1024], strides = [1, 1]} : vector<16x1024xf32> to vector<8x1024xf32>
    %cst_24 = arith.constant dense<0.000000e+00> : vector<8x1024xf32>
    %32 = tpu.matmul %29, %31, %cst_24 {dimension_numbers = #tpu.dot_dimension_numbers<[1], [0], [0], [1], [0, 0, 1, 1], [], []>} : vector<8x8xf32>, vector<8x1024xf32>, vector<8x1024xf32> -> vector<8x1024xf32>
    %33 = arith.addf %24, %32 : vector<8x1024xf32>
    %34 = vector.extract_strided_slice %28 {offsets = [8, 0], sizes = [8, 1024], strides = [1, 1]} : vector<16x1024xf32> to vector<8x1024xf32>
    %cst_25 = arith.constant dense<0.000000e+00> : vector<8x1024xf32>
    %35 = tpu.matmul %30, %34, %cst_25 {dimension_numbers = #tpu.dot_dimension_numbers<[1], [0], [0], [1], [0, 0, 1, 1], [], []>} : vector<8x8xf32>, vector<8x1024xf32>, vector<8x1024xf32> -> vector<8x1024xf32>
    %36 = arith.addf %27, %35 : vector<8x1024xf32>
    %c1015_i32 = arith.constant 1015 : i32
    %37 = tpu.dynamic_rotate %8 by %c1015_i32 dim 1 : vector<16x1024xf32>, i32 -> vector<16x1024xf32>
    %c24 = arith.constant 24 : index
    %c0_26 = arith.constant 0 : index
    %38 = vector.load %arg2[%c24, %c0_26] : memref<256x16xf32, #tpu.memory_space<vmem>>, vector<8x8xf32>
    %c24_27 = arith.constant 24 : index
    %c0_28 = arith.constant 0 : index
    %39 = vector.load %arg7[%c24_27, %c0_28] : memref<256x16xf32, #tpu.memory_space<vmem>>, vector<8x8xf32>
    %40 = vector.extract_strided_slice %37 {offsets = [0, 0], sizes = [8, 1024], strides = [1, 1]} : vector<16x1024xf32> to vector<8x1024xf32>
    %cst_29 = arith.constant dense<0.000000e+00> : vector<8x1024xf32>
    %41 = tpu.matmul %38, %40, %cst_29 {dimension_numbers = #tpu.dot_dimension_numbers<[1], [0], [0], [1], [0, 0, 1, 1], [], []>} : vector<8x8xf32>, vector<8x1024xf32>, vector<8x1024xf32> -> vector<8x1024xf32>
    %42 = arith.addf %33, %41 : vector<8x1024xf32>
    %43 = vector.extract_strided_slice %37 {offsets = [8, 0], sizes = [8, 1024], strides = [1, 1]} : vector<16x1024xf32> to vector<8x1024xf32>
    %cst_30 = arith.constant dense<0.000000e+00> : vector<8x1024xf32>
    %44 = tpu.matmul %39, %43, %cst_30 {dimension_numbers = #tpu.dot_dimension_numbers<[1], [0], [0], [1], [0, 0, 1, 1], [], []>} : vector<8x8xf32>, vector<8x1024xf32>, vector<8x1024xf32> -> vector<8x1024xf32>
    %45 = arith.addf %36, %44 : vector<8x1024xf32>
    %c1014_i32 = arith.constant 1014 : i32
    %46 = tpu.dynamic_rotate %8 by %c1014_i32 dim 1 : vector<16x1024xf32>, i32 -> vector<16x1024xf32>
    %c32 = arith.constant 32 : index
    %c0_31 = arith.constant 0 : index
    %47 = vector.load %arg2[%c32, %c0_31] : memref<256x16xf32, #tpu.memory_space<vmem>>, vector<8x8xf32>
    %c32_32 = arith.constant 32 : index
    %c0_33 = arith.constant 0 : index
    %48 = vector.load %arg7[%c32_32, %c0_33] : memref<256x16xf32, #tpu.memory_space<vmem>>, vector<8x8xf32>
    %49 = vector.extract_strided_slice %46 {offsets = [0, 0], sizes = [8, 1024], strides = [1, 1]} : vector<16x1024xf32> to vector<8x1024xf32>
    %cst_34 = arith.constant dense<0.000000e+00> : vector<8x1024xf32>
    %50 = tpu.matmul %47, %49, %cst_34 {dimension_numbers = #tpu.dot_dimension_numbers<[1], [0], [0], [1], [0, 0, 1, 1], [], []>} : vector<8x8xf32>, vector<8x1024xf32>, vector<8x1024xf32> -> vector<8x1024xf32>
    %51 = arith.addf %42, %50 : vector<8x1024xf32>
    %52 = vector.extract_strided_slice %46 {offsets = [8, 0], sizes = [8, 1024], strides = [1, 1]} : vector<16x1024xf32> to vector<8x1024xf32>
    %cst_35 = arith.constant dense<0.000000e+00> : vector<8x1024xf32>
    %53 = tpu.matmul %48, %52, %cst_35 {dimension_numbers = #tpu.dot_dimension_numbers<[1], [0], [0], [1], [0, 0, 1, 1], [], []>} : vector<8x8xf32>, vector<8x1024xf32>, vector<8x1024xf32> -> vector<8x1024xf32>
    %54 = arith.addf %45, %53 : vector<8x1024xf32>
    %c1013_i32 = arith.constant 1013 : i32
    %55 = tpu.dynamic_rotate %8 by %c1013_i32 dim 1 : vector<16x1024xf32>, i32 -> vector<16x1024xf32>
    %c40 = arith.constant 40 : index
    %c0_36 = arith.constant 0 : index
    %56 = vector.load %arg2[%c40, %c0_36] : memref<256x16xf32, #tpu.memory_space<vmem>>, vector<8x8xf32>
    %c40_37 = arith.constant 40 : index
    %c0_38 = arith.constant 0 : index
    %57 = vector.load %arg7[%c40_37, %c0_38] : memref<256x16xf32, #tpu.memory_space<vmem>>, vector<8x8xf32>
    %58 = vector.extract_strided_slice %55 {offsets = [0, 0], sizes = [8, 1024], strides = [1, 1]} : vector<16x1024xf32> to vector<8x1024xf32>
    %cst_39 = arith.constant dense<0.000000e+00> : vector<8x1024xf32>
    %59 = tpu.matmul %56, %58, %cst_39 {dimension_numbers = #tpu.dot_dimension_numbers<[1], [0], [0], [1], [0, 0, 1, 1], [], []>} : vector<8x8xf32>, vector<8x1024xf32>, vector<8x1024xf32> -> vector<8x1024xf32>
    %60 = arith.addf %51, %59 : vector<8x1024xf32>
    %61 = vector.extract_strided_slice %55 {offsets = [8, 0], sizes = [8, 1024], strides = [1, 1]} : vector<16x1024xf32> to vector<8x1024xf32>
    %cst_40 = arith.constant dense<0.000000e+00> : vector<8x1024xf32>
    %62 = tpu.matmul %57, %61, %cst_40 {dimension_numbers = #tpu.dot_dimension_numbers<[1], [0], [0], [1], [0, 0, 1, 1], [], []>} : vector<8x8xf32>, vector<8x1024xf32>, vector<8x1024xf32> -> vector<8x1024xf32>
    %63 = arith.addf %54, %62 : vector<8x1024xf32>
    %c1006_i32 = arith.constant 1006 : i32
    %64 = tpu.dynamic_rotate %8 by %c1006_i32 dim 1 : vector<16x1024xf32>, i32 -> vector<16x1024xf32>
    %c48 = arith.constant 48 : index
    %c0_41 = arith.constant 0 : index
    %65 = vector.load %arg2[%c48, %c0_41] : memref<256x16xf32, #tpu.memory_space<vmem>>, vector<8x8xf32>
    %c48_42 = arith.constant 48 : index
    %c0_43 = arith.constant 0 : index
    %66 = vector.load %arg7[%c48_42, %c0_43] : memref<256x16xf32, #tpu.memory_space<vmem>>, vector<8x8xf32>
    %67 = vector.extract_strided_slice %64 {offsets = [0, 0], sizes = [8, 1024], strides = [1, 1]} : vector<16x1024xf32> to vector<8x1024xf32>
    %cst_44 = arith.constant dense<0.000000e+00> : vector<8x1024xf32>
    %68 = tpu.matmul %65, %67, %cst_44 {dimension_numbers = #tpu.dot_dimension_numbers<[1], [0], [0], [1], [0, 0, 1, 1], [], []>} : vector<8x8xf32>, vector<8x1024xf32>, vector<8x1024xf32> -> vector<8x1024xf32>
    %69 = arith.addf %60, %68 : vector<8x1024xf32>
    %70 = vector.extract_strided_slice %64 {offsets = [8, 0], sizes = [8, 1024], strides = [1, 1]} : vector<16x1024xf32> to vector<8x1024xf32>
    %cst_45 = arith.constant dense<0.000000e+00> : vector<8x1024xf32>
    %71 = tpu.matmul %66, %70, %cst_45 {dimension_numbers = #tpu.dot_dimension_numbers<[1], [0], [0], [1], [0, 0, 1, 1], [], []>} : vector<8x8xf32>, vector<8x1024xf32>, vector<8x1024xf32> -> vector<8x1024xf32>
    %72 = arith.addf %63, %71 : vector<8x1024xf32>
    %c1005_i32 = arith.constant 1005 : i32
    %73 = tpu.dynamic_rotate %8 by %c1005_i32 dim 1 : vector<16x1024xf32>, i32 -> vector<16x1024xf32>
    %c56 = arith.constant 56 : index
    %c0_46 = arith.constant 0 : index
    %74 = vector.load %arg2[%c56, %c0_46] : memref<256x16xf32, #tpu.memory_space<vmem>>, vector<8x8xf32>
    %c56_47 = arith.constant 56 : index
    %c0_48 = arith.constant 0 : index
    %75 = vector.load %arg7[%c56_47, %c0_48] : memref<256x16xf32, #tpu.memory_space<vmem>>, vector<8x8xf32>
    %76 = vector.extract_strided_slice %73 {offsets = [0, 0], sizes = [8, 1024], strides = [1, 1]} : vector<16x1024xf32> to vector<8x1024xf32>
    %cst_49 = arith.constant dense<0.000000e+00> : vector<8x1024xf32>
    %77 = tpu.matmul %74, %76, %cst_49 {dimension_numbers = #tpu.dot_dimension_numbers<[1], [0], [0], [1], [0, 0, 1, 1], [], []>} : vector<8x8xf32>, vector<8x1024xf32>, vector<8x1024xf32> -> vector<8x1024xf32>
    %78 = arith.addf %69, %77 : vector<8x1024xf32>
    %79 = vector.extract_strided_slice %73 {offsets = [8, 0], sizes = [8, 1024], strides = [1, 1]} : vector<16x1024xf32> to vector<8x1024xf32>
    %cst_50 = arith.constant dense<0.000000e+00> : vector<8x1024xf32>
    %80 = tpu.matmul %75, %79, %cst_50 {dimension_numbers = #tpu.dot_dimension_numbers<[1], [0], [0], [1], [0, 0, 1, 1], [], []>} : vector<8x8xf32>, vector<8x1024xf32>, vector<8x1024xf32> -> vector<8x1024xf32>
    %81 = arith.addf %72, %80 : vector<8x1024xf32>
    %c1004_i32 = arith.constant 1004 : i32
    %82 = tpu.dynamic_rotate %8 by %c1004_i32 dim 1 : vector<16x1024xf32>, i32 -> vector<16x1024xf32>
    %c64 = arith.constant 64 : index
    %c0_51 = arith.constant 0 : index
    %83 = vector.load %arg2[%c64, %c0_51] : memref<256x16xf32, #tpu.memory_space<vmem>>, vector<8x8xf32>
    %c64_52 = arith.constant 64 : index
    %c0_53 = arith.constant 0 : index
    %84 = vector.load %arg7[%c64_52, %c0_53] : memref<256x16xf32, #tpu.memory_space<vmem>>, vector<8x8xf32>
    %85 = vector.extract_strided_slice %82 {offsets = [0, 0], sizes = [8, 1024], strides = [1, 1]} : vector<16x1024xf32> to vector<8x1024xf32>
    %cst_54 = arith.constant dense<0.000000e+00> : vector<8x1024xf32>
    %86 = tpu.matmul %83, %85, %cst_54 {dimension_numbers = #tpu.dot_dimension_numbers<[1], [0], [0], [1], [0, 0, 1, 1], [], []>} : vector<8x8xf32>, vector<8x1024xf32>, vector<8x1024xf32> -> vector<8x1024xf32>
    %87 = arith.addf %78, %86 : vector<8x1024xf32>
    %88 = vector.extract_strided_slice %82 {offsets = [8, 0], sizes = [8, 1024], strides = [1, 1]} : vector<16x1024xf32> to vector<8x1024xf32>
    %cst_55 = arith.constant dense<0.000000e+00> : vector<8x1024xf32>
    %89 = tpu.matmul %84, %88, %cst_55 {dimension_numbers = #tpu.dot_dimension_numbers<[1], [0], [0], [1], [0, 0, 1, 1], [], []>} : vector<8x8xf32>, vector<8x1024xf32>, vector<8x1024xf32> -> vector<8x1024xf32>
    %90 = arith.addf %81, %89 : vector<8x1024xf32>
    %c943_i32 = arith.constant 943 : i32
    %91 = tpu.dynamic_rotate %8 by %c943_i32 dim 1 : vector<16x1024xf32>, i32 -> vector<16x1024xf32>
    %c72 = arith.constant 72 : index
    %c0_56 = arith.constant 0 : index
    %92 = vector.load %arg2[%c72, %c0_56] : memref<256x16xf32, #tpu.memory_space<vmem>>, vector<8x8xf32>
    %c72_57 = arith.constant 72 : index
    %c0_58 = arith.constant 0 : index
    %93 = vector.load %arg7[%c72_57, %c0_58] : memref<256x16xf32, #tpu.memory_space<vmem>>, vector<8x8xf32>
    %94 = vector.extract_strided_slice %91 {offsets = [0, 0], sizes = [8, 1024], strides = [1, 1]} : vector<16x1024xf32> to vector<8x1024xf32>
    %cst_59 = arith.constant dense<0.000000e+00> : vector<8x1024xf32>
    %95 = tpu.matmul %92, %94, %cst_59 {dimension_numbers = #tpu.dot_dimension_numbers<[1], [0], [0], [1], [0, 0, 1, 1], [], []>} : vector<8x8xf32>, vector<8x1024xf32>, vector<8x1024xf32> -> vector<8x1024xf32>
    %96 = arith.addf %87, %95 : vector<8x1024xf32>
    %97 = vector.extract_strided_slice %91 {offsets = [8, 0], sizes = [8, 1024], strides = [1, 1]} : vector<16x1024xf32> to vector<8x1024xf32>
    %cst_60 = arith.constant dense<0.000000e+00> : vector<8x1024xf32>
    %98 = tpu.matmul %93, %97, %cst_60 {dimension_numbers = #tpu.dot_dimension_numbers<[1], [0], [0], [1], [0, 0, 1, 1], [], []>} : vector<8x8xf32>, vector<8x1024xf32>, vector<8x1024xf32> -> vector<8x1024xf32>
    %99 = arith.addf %90, %98 : vector<8x1024xf32>
    %c942_i32 = arith.constant 942 : i32
    %100 = tpu.dynamic_rotate %8 by %c942_i32 dim 1 : vector<16x1024xf32>, i32 -> vector<16x1024xf32>
    %c80 = arith.constant 80 : index
    %c0_61 = arith.constant 0 : index
    %101 = vector.load %arg2[%c80, %c0_61] : memref<256x16xf32, #tpu.memory_space<vmem>>, vector<8x8xf32>
    %c80_62 = arith.constant 80 : index
    %c0_63 = arith.constant 0 : index
    %102 = vector.load %arg7[%c80_62, %c0_63] : memref<256x16xf32, #tpu.memory_space<vmem>>, vector<8x8xf32>
    %103 = vector.extract_strided_slice %100 {offsets = [0, 0], sizes = [8, 1024], strides = [1, 1]} : vector<16x1024xf32> to vector<8x1024xf32>
    %cst_64 = arith.constant dense<0.000000e+00> : vector<8x1024xf32>
    %104 = tpu.matmul %101, %103, %cst_64 {dimension_numbers = #tpu.dot_dimension_numbers<[1], [0], [0], [1], [0, 0, 1, 1], [], []>} : vector<8x8xf32>, vector<8x1024xf32>, vector<8x1024xf32> -> vector<8x1024xf32>
    %105 = arith.addf %96, %104 : vector<8x1024xf32>
    %106 = vector.extract_strided_slice %100 {offsets = [8, 0], sizes = [8, 1024], strides = [1, 1]} : vector<16x1024xf32> to vector<8x1024xf32>
    %cst_65 = arith.constant dense<0.000000e+00> : vector<8x1024xf32>
    %107 = tpu.matmul %102, %106, %cst_65 {dimension_numbers = #tpu.dot_dimension_numbers<[1], [0], [0], [1], [0, 0, 1, 1], [], []>} : vector<8x8xf32>, vector<8x1024xf32>, vector<8x1024xf32> -> vector<8x1024xf32>
    %108 = arith.addf %99, %107 : vector<8x1024xf32>
    %c941_i32 = arith.constant 941 : i32
    %109 = tpu.dynamic_rotate %8 by %c941_i32 dim 1 : vector<16x1024xf32>, i32 -> vector<16x1024xf32>
    %c88 = arith.constant 88 : index
    %c0_66 = arith.constant 0 : index
    %110 = vector.load %arg2[%c88, %c0_66] : memref<256x16xf32, #tpu.memory_space<vmem>>, vector<8x8xf32>
    %c88_67 = arith.constant 88 : index
    %c0_68 = arith.constant 0 : index
    %111 = vector.load %arg7[%c88_67, %c0_68] : memref<256x16xf32, #tpu.memory_space<vmem>>, vector<8x8xf32>
    %112 = vector.extract_strided_slice %109 {offsets = [0, 0], sizes = [8, 1024], strides = [1, 1]} : vector<16x1024xf32> to vector<8x1024xf32>
    %cst_69 = arith.constant dense<0.000000e+00> : vector<8x1024xf32>
    %113 = tpu.matmul %110, %112, %cst_69 {dimension_numbers = #tpu.dot_dimension_numbers<[1], [0], [0], [1], [0, 0, 1, 1], [], []>} : vector<8x8xf32>, vector<8x1024xf32>, vector<8x1024xf32> -> vector<8x1024xf32>
    %114 = arith.addf %105, %113 : vector<8x1024xf32>
    %115 = vector.extract_strided_slice %109 {offsets = [8, 0], sizes = [8, 1024], strides = [1, 1]} : vector<16x1024xf32> to vector<8x1024xf32>
    %cst_70 = arith.constant dense<0.000000e+00> : vector<8x1024xf32>
    %116 = tpu.matmul %111, %115, %cst_70 {dimension_numbers = #tpu.dot_dimension_numbers<[1], [0], [0], [1], [0, 0, 1, 1], [], []>} : vector<8x8xf32>, vector<8x1024xf32>, vector<8x1024xf32> -> vector<8x1024xf32>
    %117 = arith.addf %108, %116 : vector<8x1024xf32>
    %c934_i32 = arith.constant 934 : i32
    %118 = tpu.dynamic_rotate %8 by %c934_i32 dim 1 : vector<16x1024xf32>, i32 -> vector<16x1024xf32>
    %c96 = arith.constant 96 : index
    %c0_71 = arith.constant 0 : index
    %119 = vector.load %arg2[%c96, %c0_71] : memref<256x16xf32, #tpu.memory_space<vmem>>, vector<8x8xf32>
    %c96_72 = arith.constant 96 : index
    %c0_73 = arith.constant 0 : index
    %120 = vector.load %arg7[%c96_72, %c0_73] : memref<256x16xf32, #tpu.memory_space<vmem>>, vector<8x8xf32>
    %121 = vector.extract_strided_slice %118 {offsets = [0, 0], sizes = [8, 1024], strides = [1, 1]} : vector<16x1024xf32> to vector<8x1024xf32>
    %cst_74 = arith.constant dense<0.000000e+00> : vector<8x1024xf32>
    %122 = tpu.matmul %119, %121, %cst_74 {dimension_numbers = #tpu.dot_dimension_numbers<[1], [0], [0], [1], [0, 0, 1, 1], [], []>} : vector<8x8xf32>, vector<8x1024xf32>, vector<8x1024xf32> -> vector<8x1024xf32>
    %123 = arith.addf %114, %122 : vector<8x1024xf32>
    %124 = vector.extract_strided_slice %118 {offsets = [8, 0], sizes = [8, 1024], strides = [1, 1]} : vector<16x1024xf32> to vector<8x1024xf32>
    %cst_75 = arith.constant dense<0.000000e+00> : vector<8x1024xf32>
    %125 = tpu.matmul %120, %124, %cst_75 {dimension_numbers = #tpu.dot_dimension_numbers<[1], [0], [0], [1], [0, 0, 1, 1], [], []>} : vector<8x8xf32>, vector<8x1024xf32>, vector<8x1024xf32> -> vector<8x1024xf32>
    %126 = arith.addf %117, %125 : vector<8x1024xf32>
    %c933_i32 = arith.constant 933 : i32
    %127 = tpu.dynamic_rotate %8 by %c933_i32 dim 1 : vector<16x1024xf32>, i32 -> vector<16x1024xf32>
    %c104 = arith.constant 104 : index
    %c0_76 = arith.constant 0 : index
    %128 = vector.load %arg2[%c104, %c0_76] : memref<256x16xf32, #tpu.memory_space<vmem>>, vector<8x8xf32>
    %c104_77 = arith.constant 104 : index
    %c0_78 = arith.constant 0 : index
    %129 = vector.load %arg7[%c104_77, %c0_78] : memref<256x16xf32, #tpu.memory_space<vmem>>, vector<8x8xf32>
    %130 = vector.extract_strided_slice %127 {offsets = [0, 0], sizes = [8, 1024], strides = [1, 1]} : vector<16x1024xf32> to vector<8x1024xf32>
    %cst_79 = arith.constant dense<0.000000e+00> : vector<8x1024xf32>
    %131 = tpu.matmul %128, %130, %cst_79 {dimension_numbers = #tpu.dot_dimension_numbers<[1], [0], [0], [1], [0, 0, 1, 1], [], []>} : vector<8x8xf32>, vector<8x1024xf32>, vector<8x1024xf32> -> vector<8x1024xf32>
    %132 = arith.addf %123, %131 : vector<8x1024xf32>
    %133 = vector.extract_strided_slice %127 {offsets = [8, 0], sizes = [8, 1024], strides = [1, 1]} : vector<16x1024xf32> to vector<8x1024xf32>
    %cst_80 = arith.constant dense<0.000000e+00> : vector<8x1024xf32>
    %134 = tpu.matmul %129, %133, %cst_80 {dimension_numbers = #tpu.dot_dimension_numbers<[1], [0], [0], [1], [0, 0, 1, 1], [], []>} : vector<8x8xf32>, vector<8x1024xf32>, vector<8x1024xf32> -> vector<8x1024xf32>
    %135 = arith.addf %126, %134 : vector<8x1024xf32>
    %c932_i32 = arith.constant 932 : i32
    %136 = tpu.dynamic_rotate %8 by %c932_i32 dim 1 : vector<16x1024xf32>, i32 -> vector<16x1024xf32>
    %c112 = arith.constant 112 : index
    %c0_81 = arith.constant 0 : index
    %137 = vector.load %arg2[%c112, %c0_81] : memref<256x16xf32, #tpu.memory_space<vmem>>, vector<8x8xf32>
    %c112_82 = arith.constant 112 : index
    %c0_83 = arith.constant 0 : index
    %138 = vector.load %arg7[%c112_82, %c0_83] : memref<256x16xf32, #tpu.memory_space<vmem>>, vector<8x8xf32>
    %139 = vector.extract_strided_slice %136 {offsets = [0, 0], sizes = [8, 1024], strides = [1, 1]} : vector<16x1024xf32> to vector<8x1024xf32>
    %cst_84 = arith.constant dense<0.000000e+00> : vector<8x1024xf32>
    %140 = tpu.matmul %137, %139, %cst_84 {dimension_numbers = #tpu.dot_dimension_numbers<[1], [0], [0], [1], [0, 0, 1, 1], [], []>} : vector<8x8xf32>, vector<8x1024xf32>, vector<8x1024xf32> -> vector<8x1024xf32>
    %141 = arith.addf %132, %140 : vector<8x1024xf32>
    %142 = vector.extract_strided_slice %136 {offsets = [8, 0], sizes = [8, 1024], strides = [1, 1]} : vector<16x1024xf32> to vector<8x1024xf32>
    %cst_85 = arith.constant dense<0.000000e+00> : vector<8x1024xf32>
    %143 = tpu.matmul %138, %142, %cst_85 {dimension_numbers = #tpu.dot_dimension_numbers<[1], [0], [0], [1], [0, 0, 1, 1], [], []>} : vector<8x8xf32>, vector<8x1024xf32>, vector<8x1024xf32> -> vector<8x1024xf32>
    %144 = arith.addf %135, %143 : vector<8x1024xf32>
    %c925_i32 = arith.constant 925 : i32
    %145 = tpu.dynamic_rotate %8 by %c925_i32 dim 1 : vector<16x1024xf32>, i32 -> vector<16x1024xf32>
    %c120 = arith.constant 120 : index
    %c0_86 = arith.constant 0 : index
    %146 = vector.load %arg2[%c120, %c0_86] : memref<256x16xf32, #tpu.memory_space<vmem>>, vector<8x8xf32>
    %c120_87 = arith.constant 120 : index
    %c0_88 = arith.constant 0 : index
    %147 = vector.load %arg7[%c120_87, %c0_88] : memref<256x16xf32, #tpu.memory_space<vmem>>, vector<8x8xf32>
    %148 = vector.extract_strided_slice %145 {offsets = [0, 0], sizes = [8, 1024], strides = [1, 1]} : vector<16x1024xf32> to vector<8x1024xf32>
    %cst_89 = arith.constant dense<0.000000e+00> : vector<8x1024xf32>
    %149 = tpu.matmul %146, %148, %cst_89 {dimension_numbers = #tpu.dot_dimension_numbers<[1], [0], [0], [1], [0, 0, 1, 1], [], []>} : vector<8x8xf32>, vector<8x1024xf32>, vector<8x1024xf32> -> vector<8x1024xf32>
    %150 = arith.addf %141, %149 : vector<8x1024xf32>
    %151 = vector.extract_strided_slice %145 {offsets = [8, 0], sizes = [8, 1024], strides = [1, 1]} : vector<16x1024xf32> to vector<8x1024xf32>
    %cst_90 = arith.constant dense<0.000000e+00> : vector<8x1024xf32>
    %152 = tpu.matmul %147, %151, %cst_90 {dimension_numbers = #tpu.dot_dimension_numbers<[1], [0], [0], [1], [0, 0, 1, 1], [], []>} : vector<8x8xf32>, vector<8x1024xf32>, vector<8x1024xf32> -> vector<8x1024xf32>
    %153 = arith.addf %144, %152 : vector<8x1024xf32>
    %c924_i32 = arith.constant 924 : i32
    %154 = tpu.dynamic_rotate %8 by %c924_i32 dim 1 : vector<16x1024xf32>, i32 -> vector<16x1024xf32>
    %c128 = arith.constant 128 : index
    %c0_91 = arith.constant 0 : index
    %155 = vector.load %arg2[%c128, %c0_91] : memref<256x16xf32, #tpu.memory_space<vmem>>, vector<8x8xf32>
    %c128_92 = arith.constant 128 : index
    %c0_93 = arith.constant 0 : index
    %156 = vector.load %arg7[%c128_92, %c0_93] : memref<256x16xf32, #tpu.memory_space<vmem>>, vector<8x8xf32>
    %157 = vector.extract_strided_slice %154 {offsets = [0, 0], sizes = [8, 1024], strides = [1, 1]} : vector<16x1024xf32> to vector<8x1024xf32>
    %cst_94 = arith.constant dense<0.000000e+00> : vector<8x1024xf32>
    %158 = tpu.matmul %155, %157, %cst_94 {dimension_numbers = #tpu.dot_dimension_numbers<[1], [0], [0], [1], [0, 0, 1, 1], [], []>} : vector<8x8xf32>, vector<8x1024xf32>, vector<8x1024xf32> -> vector<8x1024xf32>
    %159 = arith.addf %150, %158 : vector<8x1024xf32>
    %160 = vector.extract_strided_slice %154 {offsets = [8, 0], sizes = [8, 1024], strides = [1, 1]} : vector<16x1024xf32> to vector<8x1024xf32>
    %cst_95 = arith.constant dense<0.000000e+00> : vector<8x1024xf32>
    %161 = tpu.matmul %156, %160, %cst_95 {dimension_numbers = #tpu.dot_dimension_numbers<[1], [0], [0], [1], [0, 0, 1, 1], [], []>} : vector<8x8xf32>, vector<8x1024xf32>, vector<8x1024xf32> -> vector<8x1024xf32>
    %162 = arith.addf %153, %161 : vector<8x1024xf32>
    %c923_i32 = arith.constant 923 : i32
    %163 = tpu.dynamic_rotate %8 by %c923_i32 dim 1 : vector<16x1024xf32>, i32 -> vector<16x1024xf32>
    %c136 = arith.constant 136 : index
    %c0_96 = arith.constant 0 : index
    %164 = vector.load %arg2[%c136, %c0_96] : memref<256x16xf32, #tpu.memory_space<vmem>>, vector<8x8xf32>
    %c136_97 = arith.constant 136 : index
    %c0_98 = arith.constant 0 : index
    %165 = vector.load %arg7[%c136_97, %c0_98] : memref<256x16xf32, #tpu.memory_space<vmem>>, vector<8x8xf32>
    %166 = vector.extract_strided_slice %163 {offsets = [0, 0], sizes = [8, 1024], strides = [1, 1]} : vector<16x1024xf32> to vector<8x1024xf32>
    %cst_99 = arith.constant dense<0.000000e+00> : vector<8x1024xf32>
    %167 = tpu.matmul %164, %166, %cst_99 {dimension_numbers = #tpu.dot_dimension_numbers<[1], [0], [0], [1], [0, 0, 1, 1], [], []>} : vector<8x8xf32>, vector<8x1024xf32>, vector<8x1024xf32> -> vector<8x1024xf32>
    %168 = arith.addf %159, %167 : vector<8x1024xf32>
    %169 = vector.extract_strided_slice %163 {offsets = [8, 0], sizes = [8, 1024], strides = [1, 1]} : vector<16x1024xf32> to vector<8x1024xf32>
    %cst_100 = arith.constant dense<0.000000e+00> : vector<8x1024xf32>
    %170 = tpu.matmul %165, %169, %cst_100 {dimension_numbers = #tpu.dot_dimension_numbers<[1], [0], [0], [1], [0, 0, 1, 1], [], []>} : vector<8x8xf32>, vector<8x1024xf32>, vector<8x1024xf32> -> vector<8x1024xf32>
    %171 = arith.addf %162, %170 : vector<8x1024xf32>
    %c862_i32 = arith.constant 862 : i32
    %172 = tpu.dynamic_rotate %8 by %c862_i32 dim 1 : vector<16x1024xf32>, i32 -> vector<16x1024xf32>
    %c144 = arith.constant 144 : index
    %c0_101 = arith.constant 0 : index
    %173 = vector.load %arg2[%c144, %c0_101] : memref<256x16xf32, #tpu.memory_space<vmem>>, vector<8x8xf32>
    %c144_102 = arith.constant 144 : index
    %c0_103 = arith.constant 0 : index
    %174 = vector.load %arg7[%c144_102, %c0_103] : memref<256x16xf32, #tpu.memory_space<vmem>>, vector<8x8xf32>
    %175 = vector.extract_strided_slice %172 {offsets = [0, 0], sizes = [8, 1024], strides = [1, 1]} : vector<16x1024xf32> to vector<8x1024xf32>
    %cst_104 = arith.constant dense<0.000000e+00> : vector<8x1024xf32>
    %176 = tpu.matmul %173, %175, %cst_104 {dimension_numbers = #tpu.dot_dimension_numbers<[1], [0], [0], [1], [0, 0, 1, 1], [], []>} : vector<8x8xf32>, vector<8x1024xf32>, vector<8x1024xf32> -> vector<8x1024xf32>
    %177 = arith.addf %168, %176 : vector<8x1024xf32>
    %178 = vector.extract_strided_slice %172 {offsets = [8, 0], sizes = [8, 1024], strides = [1, 1]} : vector<16x1024xf32> to vector<8x1024xf32>
    %cst_105 = arith.constant dense<0.000000e+00> : vector<8x1024xf32>
    %179 = tpu.matmul %174, %178, %cst_105 {dimension_numbers = #tpu.dot_dimension_numbers<[1], [0], [0], [1], [0, 0, 1, 1], [], []>} : vector<8x8xf32>, vector<8x1024xf32>, vector<8x1024xf32> -> vector<8x1024xf32>
    %180 = arith.addf %171, %179 : vector<8x1024xf32>
    %c861_i32 = arith.constant 861 : i32
    %181 = tpu.dynamic_rotate %8 by %c861_i32 dim 1 : vector<16x1024xf32>, i32 -> vector<16x1024xf32>
    %c152 = arith.constant 152 : index
    %c0_106 = arith.constant 0 : index
    %182 = vector.load %arg2[%c152, %c0_106] : memref<256x16xf32, #tpu.memory_space<vmem>>, vector<8x8xf32>
    %c152_107 = arith.constant 152 : index
    %c0_108 = arith.constant 0 : index
    %183 = vector.load %arg7[%c152_107, %c0_108] : memref<256x16xf32, #tpu.memory_space<vmem>>, vector<8x8xf32>
    %184 = vector.extract_strided_slice %181 {offsets = [0, 0], sizes = [8, 1024], strides = [1, 1]} : vector<16x1024xf32> to vector<8x1024xf32>
    %cst_109 = arith.constant dense<0.000000e+00> : vector<8x1024xf32>
    %185 = tpu.matmul %182, %184, %cst_109 {dimension_numbers = #tpu.dot_dimension_numbers<[1], [0], [0], [1], [0, 0, 1, 1], [], []>} : vector<8x8xf32>, vector<8x1024xf32>, vector<8x1024xf32> -> vector<8x1024xf32>
    %186 = arith.addf %177, %185 : vector<8x1024xf32>
    %187 = vector.extract_strided_slice %181 {offsets = [8, 0], sizes = [8, 1024], strides = [1, 1]} : vector<16x1024xf32> to vector<8x1024xf32>
    %cst_110 = arith.constant dense<0.000000e+00> : vector<8x1024xf32>
    %188 = tpu.matmul %183, %187, %cst_110 {dimension_numbers = #tpu.dot_dimension_numbers<[1], [0], [0], [1], [0, 0, 1, 1], [], []>} : vector<8x8xf32>, vector<8x1024xf32>, vector<8x1024xf32> -> vector<8x1024xf32>
    %189 = arith.addf %180, %188 : vector<8x1024xf32>
    %c860_i32 = arith.constant 860 : i32
    %190 = tpu.dynamic_rotate %8 by %c860_i32 dim 1 : vector<16x1024xf32>, i32 -> vector<16x1024xf32>
    %c160 = arith.constant 160 : index
    %c0_111 = arith.constant 0 : index
    %191 = vector.load %arg2[%c160, %c0_111] : memref<256x16xf32, #tpu.memory_space<vmem>>, vector<8x8xf32>
    %c160_112 = arith.constant 160 : index
    %c0_113 = arith.constant 0 : index
    %192 = vector.load %arg7[%c160_112, %c0_113] : memref<256x16xf32, #tpu.memory_space<vmem>>, vector<8x8xf32>
    %193 = vector.extract_strided_slice %190 {offsets = [0, 0], sizes = [8, 1024], strides = [1, 1]} : vector<16x1024xf32> to vector<8x1024xf32>
    %cst_114 = arith.constant dense<0.000000e+00> : vector<8x1024xf32>
    %194 = tpu.matmul %191, %193, %cst_114 {dimension_numbers = #tpu.dot_dimension_numbers<[1], [0], [0], [1], [0, 0, 1, 1], [], []>} : vector<8x8xf32>, vector<8x1024xf32>, vector<8x1024xf32> -> vector<8x1024xf32>
    %195 = arith.addf %186, %194 : vector<8x1024xf32>
    %196 = vector.extract_strided_slice %190 {offsets = [8, 0], sizes = [8, 1024], strides = [1, 1]} : vector<16x1024xf32> to vector<8x1024xf32>
    %cst_115 = arith.constant dense<0.000000e+00> : vector<8x1024xf32>
    %197 = tpu.matmul %192, %196, %cst_115 {dimension_numbers = #tpu.dot_dimension_numbers<[1], [0], [0], [1], [0, 0, 1, 1], [], []>} : vector<8x8xf32>, vector<8x1024xf32>, vector<8x1024xf32> -> vector<8x1024xf32>
    %198 = arith.addf %189, %197 : vector<8x1024xf32>
    %c853_i32 = arith.constant 853 : i32
    %199 = tpu.dynamic_rotate %8 by %c853_i32 dim 1 : vector<16x1024xf32>, i32 -> vector<16x1024xf32>
    %c168 = arith.constant 168 : index
    %c0_116 = arith.constant 0 : index
    %200 = vector.load %arg2[%c168, %c0_116] : memref<256x16xf32, #tpu.memory_space<vmem>>, vector<8x8xf32>
    %c168_117 = arith.constant 168 : index
    %c0_118 = arith.constant 0 : index
    %201 = vector.load %arg7[%c168_117, %c0_118] : memref<256x16xf32, #tpu.memory_space<vmem>>, vector<8x8xf32>
    %202 = vector.extract_strided_slice %199 {offsets = [0, 0], sizes = [8, 1024], strides = [1, 1]} : vector<16x1024xf32> to vector<8x1024xf32>
    %cst_119 = arith.constant dense<0.000000e+00> : vector<8x1024xf32>
    %203 = tpu.matmul %200, %202, %cst_119 {dimension_numbers = #tpu.dot_dimension_numbers<[1], [0], [0], [1], [0, 0, 1, 1], [], []>} : vector<8x8xf32>, vector<8x1024xf32>, vector<8x1024xf32> -> vector<8x1024xf32>
    %204 = arith.addf %195, %203 : vector<8x1024xf32>
    %205 = vector.extract_strided_slice %199 {offsets = [8, 0], sizes = [8, 1024], strides = [1, 1]} : vector<16x1024xf32> to vector<8x1024xf32>
    %cst_120 = arith.constant dense<0.000000e+00> : vector<8x1024xf32>
    %206 = tpu.matmul %201, %205, %cst_120 {dimension_numbers = #tpu.dot_dimension_numbers<[1], [0], [0], [1], [0, 0, 1, 1], [], []>} : vector<8x8xf32>, vector<8x1024xf32>, vector<8x1024xf32> -> vector<8x1024xf32>
    %207 = arith.addf %198, %206 : vector<8x1024xf32>
    %c852_i32 = arith.constant 852 : i32
    %208 = tpu.dynamic_rotate %8 by %c852_i32 dim 1 : vector<16x1024xf32>, i32 -> vector<16x1024xf32>
    %c176 = arith.constant 176 : index
    %c0_121 = arith.constant 0 : index
    %209 = vector.load %arg2[%c176, %c0_121] : memref<256x16xf32, #tpu.memory_space<vmem>>, vector<8x8xf32>
    %c176_122 = arith.constant 176 : index
    %c0_123 = arith.constant 0 : index
    %210 = vector.load %arg7[%c176_122, %c0_123] : memref<256x16xf32, #tpu.memory_space<vmem>>, vector<8x8xf32>
    %211 = vector.extract_strided_slice %208 {offsets = [0, 0], sizes = [8, 1024], strides = [1, 1]} : vector<16x1024xf32> to vector<8x1024xf32>
    %cst_124 = arith.constant dense<0.000000e+00> : vector<8x1024xf32>
    %212 = tpu.matmul %209, %211, %cst_124 {dimension_numbers = #tpu.dot_dimension_numbers<[1], [0], [0], [1], [0, 0, 1, 1], [], []>} : vector<8x8xf32>, vector<8x1024xf32>, vector<8x1024xf32> -> vector<8x1024xf32>
    %213 = arith.addf %204, %212 : vector<8x1024xf32>
    %214 = vector.extract_strided_slice %208 {offsets = [8, 0], sizes = [8, 1024], strides = [1, 1]} : vector<16x1024xf32> to vector<8x1024xf32>
    %cst_125 = arith.constant dense<0.000000e+00> : vector<8x1024xf32>
    %215 = tpu.matmul %210, %214, %cst_125 {dimension_numbers = #tpu.dot_dimension_numbers<[1], [0], [0], [1], [0, 0, 1, 1], [], []>} : vector<8x8xf32>, vector<8x1024xf32>, vector<8x1024xf32> -> vector<8x1024xf32>
    %216 = arith.addf %207, %215 : vector<8x1024xf32>
    %c851_i32 = arith.constant 851 : i32
    %217 = tpu.dynamic_rotate %8 by %c851_i32 dim 1 : vector<16x1024xf32>, i32 -> vector<16x1024xf32>
    %c184 = arith.constant 184 : index
    %c0_126 = arith.constant 0 : index
    %218 = vector.load %arg2[%c184, %c0_126] : memref<256x16xf32, #tpu.memory_space<vmem>>, vector<8x8xf32>
    %c184_127 = arith.constant 184 : index
    %c0_128 = arith.constant 0 : index
    %219 = vector.load %arg7[%c184_127, %c0_128] : memref<256x16xf32, #tpu.memory_space<vmem>>, vector<8x8xf32>
    %220 = vector.extract_strided_slice %217 {offsets = [0, 0], sizes = [8, 1024], strides = [1, 1]} : vector<16x1024xf32> to vector<8x1024xf32>
    %cst_129 = arith.constant dense<0.000000e+00> : vector<8x1024xf32>
    %221 = tpu.matmul %218, %220, %cst_129 {dimension_numbers = #tpu.dot_dimension_numbers<[1], [0], [0], [1], [0, 0, 1, 1], [], []>} : vector<8x8xf32>, vector<8x1024xf32>, vector<8x1024xf32> -> vector<8x1024xf32>
    %222 = arith.addf %213, %221 : vector<8x1024xf32>
    %223 = vector.extract_strided_slice %217 {offsets = [8, 0], sizes = [8, 1024], strides = [1, 1]} : vector<16x1024xf32> to vector<8x1024xf32>
    %cst_130 = arith.constant dense<0.000000e+00> : vector<8x1024xf32>
    %224 = tpu.matmul %219, %223, %cst_130 {dimension_numbers = #tpu.dot_dimension_numbers<[1], [0], [0], [1], [0, 0, 1, 1], [], []>} : vector<8x8xf32>, vector<8x1024xf32>, vector<8x1024xf32> -> vector<8x1024xf32>
    %225 = arith.addf %216, %224 : vector<8x1024xf32>
    %c844_i32 = arith.constant 844 : i32
    %226 = tpu.dynamic_rotate %8 by %c844_i32 dim 1 : vector<16x1024xf32>, i32 -> vector<16x1024xf32>
    %c192 = arith.constant 192 : index
    %c0_131 = arith.constant 0 : index
    %227 = vector.load %arg2[%c192, %c0_131] : memref<256x16xf32, #tpu.memory_space<vmem>>, vector<8x8xf32>
    %c192_132 = arith.constant 192 : index
    %c0_133 = arith.constant 0 : index
    %228 = vector.load %arg7[%c192_132, %c0_133] : memref<256x16xf32, #tpu.memory_space<vmem>>, vector<8x8xf32>
    %229 = vector.extract_strided_slice %226 {offsets = [0, 0], sizes = [8, 1024], strides = [1, 1]} : vector<16x1024xf32> to vector<8x1024xf32>
    %cst_134 = arith.constant dense<0.000000e+00> : vector<8x1024xf32>
    %230 = tpu.matmul %227, %229, %cst_134 {dimension_numbers = #tpu.dot_dimension_numbers<[1], [0], [0], [1], [0, 0, 1, 1], [], []>} : vector<8x8xf32>, vector<8x1024xf32>, vector<8x1024xf32> -> vector<8x1024xf32>
    %231 = arith.addf %222, %230 : vector<8x1024xf32>
    %232 = vector.extract_strided_slice %226 {offsets = [8, 0], sizes = [8, 1024], strides = [1, 1]} : vector<16x1024xf32> to vector<8x1024xf32>
    %cst_135 = arith.constant dense<0.000000e+00> : vector<8x1024xf32>
    %233 = tpu.matmul %228, %232, %cst_135 {dimension_numbers = #tpu.dot_dimension_numbers<[1], [0], [0], [1], [0, 0, 1, 1], [], []>} : vector<8x8xf32>, vector<8x1024xf32>, vector<8x1024xf32> -> vector<8x1024xf32>
    %234 = arith.addf %225, %233 : vector<8x1024xf32>
    %c843_i32 = arith.constant 843 : i32
    %235 = tpu.dynamic_rotate %8 by %c843_i32 dim 1 : vector<16x1024xf32>, i32 -> vector<16x1024xf32>
    %c200 = arith.constant 200 : index
    %c0_136 = arith.constant 0 : index
    %236 = vector.load %arg2[%c200, %c0_136] : memref<256x16xf32, #tpu.memory_space<vmem>>, vector<8x8xf32>
    %c200_137 = arith.constant 200 : index
    %c0_138 = arith.constant 0 : index
    %237 = vector.load %arg7[%c200_137, %c0_138] : memref<256x16xf32, #tpu.memory_space<vmem>>, vector<8x8xf32>
    %238 = vector.extract_strided_slice %235 {offsets = [0, 0], sizes = [8, 1024], strides = [1, 1]} : vector<16x1024xf32> to vector<8x1024xf32>
    %cst_139 = arith.constant dense<0.000000e+00> : vector<8x1024xf32>
    %239 = tpu.matmul %236, %238, %cst_139 {dimension_numbers = #tpu.dot_dimension_numbers<[1], [0], [0], [1], [0, 0, 1, 1], [], []>} : vector<8x8xf32>, vector<8x1024xf32>, vector<8x1024xf32> -> vector<8x1024xf32>
    %240 = arith.addf %231, %239 : vector<8x1024xf32>
    %241 = vector.extract_strided_slice %235 {offsets = [8, 0], sizes = [8, 1024], strides = [1, 1]} : vector<16x1024xf32> to vector<8x1024xf32>
    %cst_140 = arith.constant dense<0.000000e+00> : vector<8x1024xf32>
    %242 = tpu.matmul %237, %241, %cst_140 {dimension_numbers = #tpu.dot_dimension_numbers<[1], [0], [0], [1], [0, 0, 1, 1], [], []>} : vector<8x8xf32>, vector<8x1024xf32>, vector<8x1024xf32> -> vector<8x1024xf32>
    %243 = arith.addf %234, %242 : vector<8x1024xf32>
    %c842_i32 = arith.constant 842 : i32
    %244 = tpu.dynamic_rotate %8 by %c842_i32 dim 1 : vector<16x1024xf32>, i32 -> vector<16x1024xf32>
    %c208 = arith.constant 208 : index
    %c0_141 = arith.constant 0 : index
    %245 = vector.load %arg2[%c208, %c0_141] : memref<256x16xf32, #tpu.memory_space<vmem>>, vector<8x8xf32>
    %c208_142 = arith.constant 208 : index
    %c0_143 = arith.constant 0 : index
    %246 = vector.load %arg7[%c208_142, %c0_143] : memref<256x16xf32, #tpu.memory_space<vmem>>, vector<8x8xf32>
    %247 = vector.extract_strided_slice %244 {offsets = [0, 0], sizes = [8, 1024], strides = [1, 1]} : vector<16x1024xf32> to vector<8x1024xf32>
    %cst_144 = arith.constant dense<0.000000e+00> : vector<8x1024xf32>
    %248 = tpu.matmul %245, %247, %cst_144 {dimension_numbers = #tpu.dot_dimension_numbers<[1], [0], [0], [1], [0, 0, 1, 1], [], []>} : vector<8x8xf32>, vector<8x1024xf32>, vector<8x1024xf32> -> vector<8x1024xf32>
    %249 = arith.addf %240, %248 : vector<8x1024xf32>
    %250 = vector.extract_strided_slice %244 {offsets = [8, 0], sizes = [8, 1024], strides = [1, 1]} : vector<16x1024xf32> to vector<8x1024xf32>
    %cst_145 = arith.constant dense<0.000000e+00> : vector<8x1024xf32>
    %251 = tpu.matmul %246, %250, %cst_145 {dimension_numbers = #tpu.dot_dimension_numbers<[1], [0], [0], [1], [0, 0, 1, 1], [], []>} : vector<8x8xf32>, vector<8x1024xf32>, vector<8x1024xf32> -> vector<8x1024xf32>
    %252 = arith.addf %243, %251 : vector<8x1024xf32>
    %c16_146 = arith.constant 16 : index
    %c0_147 = arith.constant 0 : index
    %253 = vector.load %arg1[%c16_146, %c0_147] : memref<24x1024xf32, #tpu.memory_space<vmem>>, vector<1x1024xf32>
    %254 = vector.broadcast %253 : vector<1x1024xf32> to vector<8x1024xf32>
    %255 = arith.addf %249, %254 : vector<8x1024xf32>
    %256 = vector.broadcast %253 : vector<1x1024xf32> to vector<8x1024xf32>
    %257 = arith.addf %252, %256 : vector<8x1024xf32>
    %258 = vector.extract_strided_slice %255 {offsets = [0, 0], sizes = [8, 512], strides = [1, 1]} : vector<8x1024xf32> to vector<8x512xf32>
    %cst_148 = arith.constant dense<0xFF800000> : vector<8xf32>
    %259 = vector.multi_reduction <maximumf>, %258, %cst_148 [1] : vector<8x512xf32> to vector<8xf32>
    %260 = vector.shape_cast %259 : vector<8xf32> to vector<8x1xf32>
    %261 = vector.extract_strided_slice %255 {offsets = [0, 512], sizes = [8, 512], strides = [1, 1]} : vector<8x1024xf32> to vector<8x512xf32>
    %cst_149 = arith.constant dense<0xFF800000> : vector<8xf32>
    %262 = vector.multi_reduction <maximumf>, %261, %cst_149 [1] : vector<8x512xf32> to vector<8xf32>
    %263 = vector.shape_cast %262 : vector<8xf32> to vector<8x1xf32>
    %264 = tpu.concatenate %260, %263 in 1 : vector<8x1xf32>, vector<8x1xf32> -> vector<8x2xf32>
    %265 = vector.extract_strided_slice %257 {offsets = [0, 0], sizes = [8, 512], strides = [1, 1]} : vector<8x1024xf32> to vector<8x512xf32>
    %cst_150 = arith.constant dense<0xFF800000> : vector<8xf32>
    %266 = vector.multi_reduction <maximumf>, %265, %cst_150 [1] : vector<8x512xf32> to vector<8xf32>
    %267 = vector.shape_cast %266 : vector<8xf32> to vector<8x1xf32>
    %268 = vector.extract_strided_slice %257 {offsets = [0, 512], sizes = [8, 512], strides = [1, 1]} : vector<8x1024xf32> to vector<8x512xf32>
    %cst_151 = arith.constant dense<0xFF800000> : vector<8xf32>
    %269 = vector.multi_reduction <maximumf>, %268, %cst_151 [1] : vector<8x512xf32> to vector<8xf32>
    %270 = vector.shape_cast %269 : vector<8xf32> to vector<8x1xf32>
    %271 = tpu.concatenate %267, %270 in 1 : vector<8x1xf32>, vector<8x1xf32> -> vector<8x2xf32>
    %c216 = arith.constant 216 : index
    %c0_152 = arith.constant 0 : index
    %272 = vector.load %arg2[%c216, %c0_152] : memref<256x16xf32, #tpu.memory_space<vmem>>, vector<8x1xf32>
    %c224 = arith.constant 224 : index
    %c0_153 = arith.constant 0 : index
    %273 = vector.load %arg2[%c224, %c0_153] : memref<256x16xf32, #tpu.memory_space<vmem>>, vector<32x8xf32>
    %c224_154 = arith.constant 224 : index
    %c8_155 = arith.constant 8 : index
    %274 = vector.load %arg2[%c224_154, %c8_155] : memref<256x16xf32, #tpu.memory_space<vmem>>, vector<32x1xf32>
    %c216_156 = arith.constant 216 : index
    %c0_157 = arith.constant 0 : index
    %275 = vector.load %arg7[%c216_156, %c0_157] : memref<256x16xf32, #tpu.memory_space<vmem>>, vector<8x1xf32>
    %c224_158 = arith.constant 224 : index
    %c0_159 = arith.constant 0 : index
    %276 = vector.load %arg7[%c224_158, %c0_159] : memref<256x16xf32, #tpu.memory_space<vmem>>, vector<32x8xf32>
    %c224_160 = arith.constant 224 : index
    %c8_161 = arith.constant 8 : index
    %277 = vector.load %arg7[%c224_160, %c8_161] : memref<256x16xf32, #tpu.memory_space<vmem>>, vector<32x1xf32>
    %278 = vector.broadcast %272 : vector<8x1xf32> to vector<8x2xf32>
    %279 = arith.addf %264, %278 : vector<8x2xf32>
    %cst_162 = arith.constant dense<0.000000e+00> : vector<32x2xf32>
    %280 = tpu.matmul %273, %279, %cst_162 {dimension_numbers = #tpu.dot_dimension_numbers<[1], [0], [0], [1], [0, 0, 1, 1], [], []>} : vector<32x8xf32>, vector<8x2xf32>, vector<32x2xf32> -> vector<32x2xf32>
    %281 = vector.broadcast %274 : vector<32x1xf32> to vector<32x2xf32>
    %282 = arith.addf %280, %281 : vector<32x2xf32>
    %283 = vector.broadcast %275 : vector<8x1xf32> to vector<8x2xf32>
    %284 = arith.addf %271, %283 : vector<8x2xf32>
    %cst_163 = arith.constant dense<0.000000e+00> : vector<32x2xf32>
    %285 = tpu.matmul %276, %284, %cst_163 {dimension_numbers = #tpu.dot_dimension_numbers<[1], [0], [0], [1], [0, 0, 1, 1], [], []>} : vector<32x8xf32>, vector<8x2xf32>, vector<32x2xf32> -> vector<32x2xf32>
    %286 = vector.broadcast %277 : vector<32x1xf32> to vector<32x2xf32>
    %287 = arith.addf %285, %286 : vector<32x2xf32>
    %cst_164 = arith.constant 0.000000e+00 : f32
    %288 = vector.broadcast %cst_164 : f32 to vector<32x2xf32>
    %289 = arith.maximumf %287, %288 : vector<32x2xf32>
    %c0_165 = arith.constant 0 : index
    %c0_166 = arith.constant 0 : index
    %290 = vector.load %arg4[%c0_165, %c0_166] : memref<32x32xf32, #tpu.memory_space<vmem>>, vector<32x32xf32>
    %cst_167 = arith.constant dense<0.000000e+00> : vector<32x2xf32>
    %291 = tpu.matmul %290, %289, %cst_167 {dimension_numbers = #tpu.dot_dimension_numbers<[1], [0], [0], [1], [0, 0, 1, 1], [], []>} : vector<32x32xf32>, vector<32x2xf32>, vector<32x2xf32> -> vector<32x2xf32>
    %c0_168 = arith.constant 0 : index
    %c0_169 = arith.constant 0 : index
    %292 = vector.load %arg5[%c0_168, %c0_169] : memref<32x1xf32, #tpu.memory_space<vmem>>, vector<32x1xf32>
    %293 = vector.broadcast %292 : vector<32x1xf32> to vector<32x2xf32>
    %294 = arith.addf %291, %293 : vector<32x2xf32>
    %cst_170 = arith.constant 1.000000e+00 : f32
    %295 = vector.broadcast %cst_170 : f32 to vector<1x32xf32>
    %296 = arith.mulf %282, %282 : vector<32x2xf32>
    %cst_171 = arith.constant dense<0.000000e+00> : vector<1x2xf32>
    %297 = tpu.matmul %295, %296, %cst_171 {dimension_numbers = #tpu.dot_dimension_numbers<[1], [0], [0], [1], [0, 0, 1, 1], [], []>} : vector<1x32xf32>, vector<32x2xf32>, vector<1x2xf32> -> vector<1x2xf32>
    %cst_172 = arith.constant 1.000000e-24 : f32
    %298 = vector.broadcast %cst_172 : f32 to vector<1x2xf32>
    %299 = arith.maximumf %297, %298 : vector<1x2xf32>
    %300 = math.rsqrt %299 : vector<1x2xf32>
    %301 = vector.broadcast %300 : vector<1x2xf32> to vector<32x2xf32>
    %302 = arith.mulf %282, %301 : vector<32x2xf32>
    %c0_173 = arith.constant 0 : index
    %c0_174 = arith.constant 0 : index
    %c0_175 = arith.constant 0 : index
    %303 = vector.load %arg6[%c0_173, %c0_174, %c0_175] : memref<2x32x2xf32, #tpu.memory_space<vmem>>, vector<1x32x2xf32>
    %304 = vector.shape_cast %303 : vector<1x32x2xf32> to vector<32x2xf32>
    %305 = vector.shape_cast %302 : vector<32x2xf32> to vector<1x32x2xf32>
    tpu.vector_store %arg6[%c0_173, %c0_174, %c0_175], %305 {strides = array<i32>} : memref<2x32x2xf32, #tpu.memory_space<vmem>>, vector<1x32x2xf32>,
    %306 = arith.mulf %294, %294 : vector<32x2xf32>
    %cst_176 = arith.constant dense<0.000000e+00> : vector<1x2xf32>
    %307 = tpu.matmul %295, %306, %cst_176 {dimension_numbers = #tpu.dot_dimension_numbers<[1], [0], [0], [1], [0, 0, 1, 1], [], []>} : vector<1x32xf32>, vector<32x2xf32>, vector<1x2xf32> -> vector<1x2xf32>
    %cst_177 = arith.constant 1.000000e-24 : f32
    %308 = vector.broadcast %cst_177 : f32 to vector<1x2xf32>
    %309 = arith.maximumf %307, %308 : vector<1x2xf32>
    %310 = math.rsqrt %309 : vector<1x2xf32>
    %311 = vector.broadcast %310 : vector<1x2xf32> to vector<32x2xf32>
    %312 = arith.mulf %294, %311 : vector<32x2xf32>
    %c1 = arith.constant 1 : index
    %c0_178 = arith.constant 0 : index
    %c0_179 = arith.constant 0 : index
    %313 = vector.load %arg6[%c1, %c0_178, %c0_179] : memref<2x32x2xf32, #tpu.memory_space<vmem>>, vector<1x32x2xf32>
    %314 = vector.shape_cast %313 : vector<1x32x2xf32> to vector<32x2xf32>
    %315 = vector.shape_cast %312 : vector<32x2xf32> to vector<1x32x2xf32>
    tpu.vector_store %arg6[%c1, %c0_178, %c0_179], %315 {strides = array<i32>} : memref<2x32x2xf32, #tpu.memory_space<vmem>>, vector<1x32x2xf32>,
    return
  }
  func.func @transform_0(%arg0: i32) -> (i32, i32) {
    %c0_i32 = arith.constant 0 : i32
    %c0_i32_0 = arith.constant 0 : i32
    %c0_i32_1 = arith.constant 0 : i32
    return %c0_i32, %c0_i32_0 : i32, i32
  }
  func.func @transform_1(%arg0: i32) -> (i32, i32) {
    %c0_i32 = arith.constant 0 : i32
    %c0_i32_0 = arith.constant 0 : i32
    %c0_i32_1 = arith.constant 0 : i32
    return %c0_i32, %c0_i32_0 : i32, i32
  }
  func.func @transform_2(%arg0: i32) -> (i32, i32) {
    %c0_i32 = arith.constant 0 : i32
    %c0_i32_0 = arith.constant 0 : i32
    %c0_i32_1 = arith.constant 0 : i32
    return %c0_i32, %c0_i32_0 : i32, i32
  }
  func.func @transform_3(%arg0: i32) -> (i32, i32) {
    %c0_i32 = arith.constant 0 : i32
    %c0_i32_0 = arith.constant 0 : i32
    %c0_i32_1 = arith.constant 0 : i32
    return %c0_i32, %c0_i32_0 : i32, i32
  }
  func.func @transform_4(%arg0: i32) -> (i32, i32) {
    %c0_i32 = arith.constant 0 : i32
    %c0_i32_0 = arith.constant 0 : i32
    %c0_i32_1 = arith.constant 0 : i32
    return %c0_i32, %c0_i32_0 : i32, i32
  }
  func.func @transform_5(%arg0: i32) -> (i32, i32, i32) {
    %c0_i32 = arith.constant 0 : i32
    %c0_i32_0 = arith.constant 0 : i32
    %c0_i32_1 = arith.constant 0 : i32
    %c0_i32_2 = arith.constant 0 : i32
    return %c0_i32, %c0_i32_0, %c0_i32_1 : i32, i32, i32
  }
  func.func @transform_6(%arg0: i32) -> (i32, i32) {
    %c0_i32 = arith.constant 0 : i32
    %c0_i32_0 = arith.constant 0 : i32
    %c0_i32_1 = arith.constant 0 : i32
    return %c0_i32, %c0_i32_0 : i32, i32
  }
}

</mosaic_0001>

<bundles_post_ra>
// kernel: moco_forward.1
= control target key start
LH: loop header
LB: loop body
LE: loop exit
PB: predicated region body
PF: predicated region fallthrough
CT: control target
= control target key end

     0   :  { %s12727_s29 = smov 127   ;;  %s12728_s7 = smov 126   ;;  %v265_v26 = vlaneseq  ;;  %vm182_vm1 = vcmask 130048   ;;  %vm286_vm2 = vcmask 64512   ;;  %s17698_s0 = inlined_call_operand.vmem [shape: f32[24,1024], index: 0, kind: input, shape index: {}]   ;;  %s17699_s1 = inlined_call_operand.vmem [shape: f32[256,16], index: 1, kind: input, shape index: {}]   ;;  %s17700_s2 = inlined_call_operand.vmem [shape: f32[256,16], index: 2, kind: input, shape index: {}]   ;;  %s17701_s6 = inlined_call_operand.vmem [shape: f32[256,16], index: 6, kind: output, shape index: {1}]   ;;  %s17702_s4 = inlined_call_operand.vmem [shape: f32[32,1], index: 4, kind: input, shape index: {}]   ;;  %s17703_s3 = inlined_call_operand.vmem [shape: f32[32,32], index: 3, kind: input, shape index: {}]   ;;  %s17704_s5 = inlined_call_operand.vmem [shape: f32[2,32,2], index: 5, kind: output, shape index: {0}]  }
   0x1   :  { %v12794_v0 = vld [vmem:[%s17698_s0 + $0x20] sm:$0xff]  ;;  %v12799_v1 = vld [vmem:[%s17698_s0 + $0x30] sm:$0xff]  ;;  %v12811_v4 = vld [vmem:[%s17698_s0 + $0x8] sm:$0xff]  ;;  %s12730_s8 = smov 118   ;;  %s12731_s21 = smov 117  }
   0x2   :  { %v12804_v2 = vld [vmem:[%s17698_s0] sm:$0xff]  ;;  %v11626_v3 = vpack.i.bf16 %v12799_v1, %v12794_v0  ;;  %v12818_v6 = vld [vmem:[%s17698_s0 + $0x28] sm:$0xff]  ;;  %v12823_v7 = vld [vmem:[%s17698_s0 + $0x38] sm:$0xff]  ;;  %v12907_v24 = vpack.i.bf16 %v12799_v1, %v12811_v4  ;;  %v12942_v29 = vand.u32 127, %v265_v26  ;;  %s12733_s15 = smov 109   ;;  %s12734_s22 = smov 108  }
   0x3   :  { %v11616_v5 = vpack.i.bf16 %v12811_v4, %v12804_v2  ;;  %v12828_v8 = vld [vmem:[%s17698_s0 + $0x50] sm:$0xff]  ;;  %v12833_v9 = vld [vmem:[%s17698_s0 + $0x58] sm:$0xff]  ;;  %v12851_v13 = vpack.i.bf16 %v12818_v6, %v12823_v7  ;;  %v12861_v15 = vld [vmem:[%s17698_s0 + $0x40] sm:$0xff]  ;;  %v12912_v25 = vpack.i.bf16 %v12804_v2, %v12794_v0  ;;  %s12737_s12 = smov 45   ;;  %s12739_s30 = smov 37  }
   0x4   :  { %11627 = vrot.lane.b32.xlu1 %v11626_v3, %s12727_s29  ;;  %v12838_v10 = vld [vmem:[%s17698_s0 + $0x10] sm:$0xff]  ;;  %v12843_v11 = vld [vmem:[%s17698_s0 + $0x18] sm:$0xff]  ;;  %v12847_v12 = vpack.i.bf16 %v12833_v9, %v12828_v8  ;;  %v12866_v16 = vld [vmem:[%s17698_s0 + $0x60] sm:$0xff]  ;;  %vm267_vm0 = vcmp.lt.s32.totalorder %v12942_v29, 127  ;;  %vm971_vm3 = vcmp.lt.s32.totalorder %v12942_v29, 126  ;;  %vm1364_vm4 = vcmp.lt.s32.totalorder %v12942_v29, 119 }
   0x5   :  { %11617 = vrot.lane.b32.xlu0 %v11616_v5, %s12727_s29  ;;  %v12856_v14 = vpack.i.bf16 %v12843_v11, %v12838_v10  ;;  %v12871_v17 = vpack.i.bf16 %v12861_v15, %v12866_v16  ;;  %v12877_v18 = vld [vmem:[%s17698_s0 + $0x68] sm:$0xff]  ;;  %v12882_v19 = vld [vmem:[%s17698_s0 + $0x78] sm:$0xff]  ;;  %v12892_v21 = vld [vmem:[%s17698_s0 + $0x70] sm:$0xff]  ;;  %vm1757_vm5 = vcmp.lt.s32.totalorder %v12942_v29, 118  ;;  %vm2150_vm6 = vcmp.lt.s32.totalorder %v12942_v29, 117  ;;  %s12740_s19 = smov 36  }
   0x6   :  { %11637 = vrot.lane.b32.xlu2 %v12847_v12, %s12727_s29  ;;  %v12887_v20 = vld [vmem:[%s17698_s0 + $0x48] sm:$0xff]  ;;  %v12896_v22 = vpack.i.bf16 %v12877_v18, %v12882_v19  ;;  %v12976_v51 = vld [vmem:[%s17699_s1] sm:$0xff]  ;;  %vm2543_vm7 = vcmp.lt.s32.totalorder %v12942_v29, 110  ;;  %vm2936_vm8 = vcmp.lt.s32.totalorder %v12942_v29, 109  ;;  %vm3329_vm9 = vcmp.lt.s32.totalorder %v12942_v29, 108  ;;  %s12741_s25 = smov 29  }
   0x7   :  { %v12901_v23 = vpack.i.bf16 %v12892_v21, %v12887_v20  ;;  %v12937_v27 = vld [vmem:[%s17699_s1 + $0x8] sm:$0xff]  ;;  %v22_v52 = vld [vmem:[%s17700_s2] sm:$0xff]  ;;  %v118_v55 = vmul.f32 0.001, %v12976_v51  ;;  %vm3722_vm10 = vcmp.lt.s32.totalorder %v12942_v29, 47  ;;  %vm4115_vm11 = vcmp.lt.s32.totalorder %v12942_v29, 46 }
   0x8   :  { %v23_v28 = vld [vmem:[%s17700_s2 + $0x8] sm:$0xff]  ;;  %v119_v31 = vmul.f32 0.001, %v12937_v27  ;;  %v54_v54 = vmul.f32 0.999, %v22_v52  ;;  %vm4508_vm12 = vcmp.lt.s32.totalorder %v12942_v29, 45 }
   0x9   :  { %v55_v30 = vmul.f32 0.999, %v23_v28  ;;  %s12742_s13 = smov 28   ;;  %vm4901_vm13 = vcmp.lt.s32.totalorder %v12942_v29, 38  ;;  %s12743_s26 = smov 27   ;;  %vm5294_vm14 = vcmp.lt.s32.totalorder %v12942_v29, 37 }
   0xa   :  { %v150_v58 = vadd.f32 %v118_v55, %v54_v54  ;;  %s12744_s11 = smov 94   ;;  %vm5687_vm15 = vcmp.lt.s32.totalorder %v12942_v29, 36  ;;  %s12746_s28 = smov 92  }
   0xb   :  { %v151_v32 = vadd.f32 %v119_v31, %v55_v30  ;;  %s12747_s18 = smov 85   ;;  %s12749_s16 = smov 83  }
   0xc   :  { %11632 = vrot.lane.b32.xlu1 %v12851_v13, %s12727_s29  ;;  %183 = vst.msk [vmem:[%s17701_s6] sm:$0xff] %vm182_vm1, %v150_v58 }
   0xd   :  { %11622 = vrot.lane.b32.xlu0 %v12856_v14, %s12727_s29  ;;  %184 = vst.msk [vmem:[%s17701_s6 + $0x8] sm:$0xff] %vm182_vm1, %v151_v32 }
   0xe   :  { %11642 = vrot.lane.b32.xlu2 %v12871_v17, %s12727_s29 }
  0x14   :  { %11652 = vrot.lane.b32.xlu1 %v12896_v22, %s12727_s29 }
  0x15   :  { %11647 = vrot.lane.b32.xlu0 %v12901_v23, %s12727_s29  ;;  %s12729_s29 = smov 119  }
  0x16   :  { %11657 = vrot.lane.b32.xlu2 %v12856_v14, %s12728_s7 }
  0x1c   :  { %11667 = vrot.lane.b32.xlu1 %v12907_v24, %s12728_s7 }
  0x1d   :  { %11662 = vrot.lane.b32.xlu0 %v12912_v25, %s12728_s7 }
  0x1e   :  { %11672 = vrot.lane.b32.xlu2 %v12851_v13, %s12728_s7 }
  0x24   :  { %11682 = vrot.lane.b32.xlu1 %v12871_v17, %s12728_s7 }
  0x25   :  { %11677 = vrot.lane.b32.xlu0 %v12847_v12, %s12728_s7 }
  0x26   :  { %11687 = vrot.lane.b32.xlu2 %v12901_v23, %s12728_s7 }
  0x2c   :  { %11697 = vrot.lane.b32.xlu1 %v12856_v14, %s12729_s29 }
  0x2d   :  { %11692 = vrot.lane.b32.xlu0 %v12896_v22, %s12728_s7  ;;  %s12732_s7 = smov 110  }
  0x2e   :  { %11702 = vrot.lane.b32.xlu2 %v12912_v25, %s12729_s29 }
  0x34   :  { %11712 = vrot.lane.b32.xlu1 %v12851_v13, %s12729_s29 }
  0x35   :  { %11707 = vrot.lane.b32.xlu0 %v12907_v24, %s12729_s29 }
  0x36   :  { %11717 = vrot.lane.b32.xlu2 %v12847_v12, %s12729_s29 }
  0x3c   :  { %11727 = vrot.lane.b32.xlu1 %v12901_v23, %s12729_s29 }
  0x3d   :  { %11722 = vrot.lane.b32.xlu0 %v12871_v17, %s12729_s29 }
  0x3e   :  { %11732 = vrot.lane.b32.xlu2 %v12896_v22, %s12729_s29  ;;  %s12735_s29 = smov 47  }
  0x44   :  { %11742 = vrot.lane.b32.xlu1 %v12912_v25, %s12730_s8 }
  0x45   :  { %11737 = vrot.lane.b32.xlu0 %v12856_v14, %s12730_s8 }
  0x46   :  { %11747 = vrot.lane.b32.xlu2 %v12907_v24, %s12730_s8 }
  0x4c   :  { %11757 = vrot.lane.b32.xlu1 %v12847_v12, %s12730_s8 }
  0x4d   :  { %11752 = vrot.lane.b32.xlu0 %v12851_v13, %s12730_s8 }
  0x4e   :  { %11762 = vrot.lane.b32.xlu2 %v12871_v17, %s12730_s8 }
  0x54   :  { %11772 = vrot.lane.b32.xlu1 %v12896_v22, %s12730_s8 }
  0x55   :  { %11767 = vrot.lane.b32.xlu0 %v12901_v23, %s12730_s8 }
  0x56   :  { %11777 = vrot.lane.b32.xlu2 %v12856_v14, %s12731_s21 }
  0x5c   :  { %11787 = vrot.lane.b32.xlu1 %v12907_v24, %s12731_s21 }
  0x5d   :  { %11782 = vrot.lane.b32.xlu0 %v12912_v25, %s12731_s21 }
  0x5e   :  { %11792 = vrot.lane.b32.xlu2 %v12851_v13, %s12731_s21 }
  0x60   :  { %v12959_v38 = vpop.permute.xlu2 %11637 }
  0x61   :  { %v11640_v3 = vunpack.i.h.bf16 %v12959_v38 }
  0x64   :  { %11802 = vrot.lane.b32.xlu1 %v12871_v17, %s12731_s21 }
  0x65   :  { %11797 = vrot.lane.b32.xlu0 %v12847_v12, %s12731_s21 }
  0x66   :  { %11807 = vrot.lane.b32.xlu2 %v12901_v23, %s12731_s21 }
  0x68   :  { %v11643_v59 = vpop.permute.xlu2 %11642 }
  0x69   :  { %v11645_v61 = vunpack.i.h.bf16 %v11643_v59 }
  0x6c   :  { %11817 = vrot.lane.b32.xlu1 %v12856_v14, %s12732_s7 }
  0x6d   :  { %11812 = vrot.lane.b32.xlu0 %v12896_v22, %s12731_s21  ;;  %s12738_s21 = smov 38  }
  0x6e   :  { %11822 = vrot.lane.b32.xlu2 %v12912_v25, %s12732_s7 }
  0x70   :  { %v11658_v32 = vpop.permute.xlu2 %11657 }
  0x74   :  { %11832 = vrot.lane.b32.xlu1 %v12851_v13, %s12732_s7 }
  0x75   :  { %11827 = vrot.lane.b32.xlu0 %v12907_v24, %s12732_s7 }
  0x76   :  { %v11628_v33 = vpop.permute.xlu1 %11627  ;;  %11837 = vrot.lane.b32.xlu2 %v12847_v12, %s12732_s7 }
  0x77   :  { %v11618_v34 = vpop.permute.xlu0 %11617  ;;  %v11629_v39 = vunpack.i.l.bf16 %v11628_v33  ;;  %v11630_v41 = vunpack.i.h.bf16 %v11628_v33  ;;  %v13070_v33 = vld [vmem:[%s17699_s1 + $0x10] sm:$0xff] }
  0x78   :  { %v11620_v35 = vunpack.i.h.bf16 %v11618_v34  ;;  %v11619_v36 = vunpack.i.l.bf16 %v11618_v34  ;;  %v24_v34 = vld [vmem:[%s17700_s2 + $0x10] sm:$0xff] }
  0x7a   :  { %v280_v37 = vsel %vm267_vm0, %v11619_v36, %v11620_v35 }
  0x7b   :  { %305 = vmatpush.msra.mxu3 %v280_v37 }
  0x7c   :  { %11135 = vmatmul.msk.f32.vlgmr.msra.gmra.mxu3 %vm286_vm2, %v12937_v27  ;;  %11847 = vrot.lane.b32.xlu1 %v12901_v23, %s12732_s7 }
  0x7d   :  { %11842 = vrot.lane.b32.xlu0 %v12871_v17, %s12732_s7 }
  0x7e   :  { %v11633_v40 = vpop.permute.xlu1 %11632  ;;  %11852 = vrot.lane.b32.xlu2 %v12896_v22, %s12732_s7  ;;  %s12748_s7 = smov 84  }
  0x7f   :  { %v11635_v42 = vunpack.i.h.bf16 %v11633_v40  ;;  %v11623_v43 = vpop.permute.xlu0 %11622  ;;  %v11634_v44 = vunpack.i.l.bf16 %v11633_v40 }
  0x80   :  { %v11625_v45 = vunpack.i.h.bf16 %v11623_v43  ;;  %v11624_v46 = vunpack.i.l.bf16 %v11623_v43 }
  0x81   :  { %v272_v47 = vsel %vm267_vm0, %v11629_v39, %v11635_v42  ;;  %v270_v53 = vsel %vm267_vm0, %v11635_v42, %v11630_v41  ;;  %v268_v56 = vsel %vm267_vm0, %v11630_v41, %v11634_v44  ;;  %v282_v57 = vsel %vm267_vm0, %v11634_v44, %v11619_v36 }
  0x82   :  { %v278_v48 = vsel %vm267_vm0, %v11620_v35, %v11624_v46  ;;  %v276_v49 = vsel %vm267_vm0, %v11624_v46, %v11625_v45  ;;  %v274_v50 = vsel %vm267_vm0, %v11625_v45, %v11629_v39  ;;  %385 = vmatpush.msra.mxu0 %v272_v47  ;;  %v56_v35 = vmul.f32 0.999, %v24_v34 }
  0x83   :  { %325 = vmatpush.msra.mxu1 %v278_v48  ;;  %345 = vmatpush.msra.mxu2 %v276_v49  ;;  %v120_v36 = vmul.f32 0.001, %v13070_v33  ;;  %v11659_v42 = vunpack.i.l.bf16 %v11658_v32 }
  0x84   :  { %365 = vmatpush.msrb.mxu3 %v274_v50  ;;  %11136 = vmatmul.msk.f32.vlgmr.msra.gmra.mxu1 %vm286_vm2, %v12937_v27 }
  0x85   :  { %11137 = vmatmul.msk.f32.vlgmr.msra.gmra.mxu2 %vm286_vm2, %v12937_v27  ;;  %11138 = vmatmul.msk.f32.vlgmr.msrb.gmra.mxu3 %vm286_vm2, %v12937_v27 }
  0x86   :  { %11139 = vmatmul.msk.f32.vlgmr.msra.gmra.mxu0 %vm286_vm2, %v12937_v27  ;;  %405 = vmatpush.msrb.mxu1 %v270_v53 }
  0x87   :  { %425 = vmatpush.msrb.mxu2 %v268_v56  ;;  %445 = vmatpush.msra.mxu3 %v282_v57  ;;  %v11648_v60 = vpop.permute.xlu0 %11647 }
  0x88   :  { %468 = vmatpush.msrb.mxu0 %v12804_v2  ;;  %488 = vmatpush.msra.mxu1 %v12811_v4  ;;  %v11649_v62 = vunpack.i.l.bf16 %v11648_v60  ;;  %v11639_v2 = vunpack.i.l.bf16 %v12959_v38  ;;  %v11644_v4 = vunpack.i.l.bf16 %v11643_v59  ;;  %v11650_v26 = vunpack.i.h.bf16 %v11648_v60 }
  0x89   :  { %508 = vmatpush.msra.mxu2 %v12838_v10  ;;  %528 = vmatpush.msrb.mxu3 %v12843_v11 }
  0x8a   :  { %548 = vmatpush.msra.mxu0 %v12794_v0  ;;  %v281_v63 = vsel %vm267_vm0, %v11645_v61, %v11649_v62  ;;  %v11653_v0 = vpop.permute.xlu1 %11652  ;;  %v279_v10 = vsel %vm267_vm0, %v11649_v62, %v11639_v2  ;;  %v13148_v62 = vld [vmem:[%s17699_s1 + $0x18] sm:$0xff]  ;;  %11862 = vrot.lane.b32.xlu1 %v12912_v25, %s12733_s15 }
  0x8b   :  { %v11655_v5 = vunpack.i.h.bf16 %v11653_v0  ;;  %v11654_v11 = vunpack.i.l.bf16 %v11653_v0  ;;  %11857 = vrot.lane.b32.xlu0 %v12856_v14, %s12733_s15  ;;  %11867 = vrot.lane.b32.xlu2 %v12907_v24, %s12733_s15 }
  0x8c   :  { %11140 = vmatmul.msk.f32.vlgmr.msrb.gmra.mxu1 %vm286_vm2, %v12937_v27 }
  0x8d   :  { %11141 = vmatmul.msk.f32.vlgmr.msrb.gmra.mxu2 %vm286_vm2, %v12937_v27  ;;  %11142 = vmatmul.msk.f32.vlgmr.msra.gmra.mxu3 %vm286_vm2, %v12937_v27  ;;  %v285_v27 = vld [vmem:[%s17701_s6 + $0x8] sm:$0xff]  ;;  %v283_v28 = vsel %vm267_vm0, %v11654_v11, %v11645_v61  ;;  %v271_v30 = vsel %vm267_vm0, %v11655_v5, %v11650_v26  ;;  %v269_v31 = vsel %vm267_vm0, %v11650_v26, %v11654_v11 }
  0x8e   :  { %11143 = vmatmul.msk.f32.vlgmr.msrb.gmra.mxu0 %vm286_vm2, %v12976_v51  ;;  %568 = vmatpush.msrb.mxu1 %v12818_v6  ;;  %v277_v6 = vsel %vm267_vm0, %v11639_v2, %v11640_v3 }
  0x8f   :  { %588 = vmatpush.msrb.mxu2 %v12799_v1  ;;  %608 = vmatpush.msra.mxu3 %v12823_v7  ;;  %v275_v1 = vsel %vm267_vm0, %v11640_v3, %v11644_v4  ;;  %v273_v7 = vsel %vm267_vm0, %v11644_v4, %v11655_v5  ;;  %v11663_v38 = vpop.permute.xlu0 %11662  ;;  %v121_v3 = vmul.f32 0.001, %v13148_v62  ;;  %vm6080_vm0 = vcmp.lt.s32.totalorder %v12942_v29, 29 }
  0x90   :  { %631 = vmatpush.msrb.mxu0 %v281_v63  ;;  %v11665_v40 = vunpack.i.h.bf16 %v11663_v38  ;;  %v11664_v41 = vunpack.i.l.bf16 %v11663_v38  ;;  %v25_v63 = vld [vmem:[%s17700_s2 + $0x18] sm:$0xff] }
  0x91   :  { %v57_v2 = vmul.f32 0.999, %v25_v63 }
  0x92   :  { %v11668_v37 = vpop.permute.xlu1 %11667  ;;  %11877 = vrot.lane.b32.xlu1 %v12847_v12, %s12733_s15 }
  0x93   :  { %v11669_v39 = vunpack.i.l.bf16 %v11668_v37  ;;  %v11670_v49 = vunpack.i.h.bf16 %v11668_v37  ;;  %11872 = vrot.lane.b32.xlu0 %v12851_v13, %s12733_s15  ;;  %11882 = vrot.lane.b32.xlu2 %v12871_v17, %s12733_s15 }
  0x94   :  { %11144 = vmatmul.msk.f32.vlgmr.msra.gmra.mxu1 %vm286_vm2, %v12976_v51 }
  0x95   :  { %11145 = vmatmul.msk.f32.vlgmr.msra.gmra.mxu2 %vm286_vm2, %v12976_v51  ;;  %11146 = vmatmul.msk.f32.vlgmr.msrb.gmra.mxu3 %vm286_vm2, %v12976_v51 }
  0x96   :  { %11147 = vmatmul.msk.f32.vlgmr.msra.gmra.mxu0 %vm286_vm2, %v12976_v51  ;;  %651 = vmatpush.msra.mxu1 %v279_v10 }
  0x97   :  { %671 = vmatpush.msra.mxu2 %v277_v6  ;;  %691 = vmatpush.msrb.mxu3 %v275_v1  ;;  %v11678_v44 = vpop.permute.xlu0 %11677  ;;  %v153_v6 = vadd.f32 %v121_v3, %v57_v2 }
  0x98   :  { %711 = vmatpush.msra.mxu0 %v273_v7  ;;  %v11680_v58 = vunpack.i.h.bf16 %v11678_v44  ;;  %v11679_v59 = vunpack.i.l.bf16 %v11678_v44 }
  0x99   :  { %186 = vst.msk [vmem:[%s17701_s6 + $0x18] sm:$0xff] %vm182_vm1, %v153_v6 }
  0x9a   :  { %v11683_v47 = vpop.permute.xlu1 %11682  ;;  %v981_v5 = vsel %vm971_vm3, %v11679_v59, %v11680_v58  ;;  %11892 = vrot.lane.b32.xlu1 %v12896_v22, %s12733_s15 }
  0x9b   :  { %v11684_v57 = vunpack.i.l.bf16 %v11683_v47  ;;  %11887 = vrot.lane.b32.xlu0 %v12901_v23, %s12733_s15  ;;  %11897 = vrot.lane.b32.xlu2 %v12856_v14, %s12734_s22  ;;  %s12736_s15 = smov 46  }
  0x9c   :  { %11148 = vmatmul.msk.f32.vlgmr.msrb.gmra.mxu1 %vm286_vm2, %v12976_v51 }
  0x9d   :  { %11149 = vmatmul.msk.f32.vlgmr.msrb.gmra.mxu2 %vm286_vm2, %v12976_v51  ;;  %11150 = vmatmul.msk.f32.vlgmr.msra.gmra.mxu3 %vm286_vm2, %v12976_v51  ;;  %v11685_v51 = vunpack.i.h.bf16 %v11683_v47  ;;  %v979_v0 = vsel %vm971_vm3, %v11680_v58, %v11684_v57 }
  0x9e   :  { %11151 = vmatmul.msk.f32.vlgmr.msrb.gmra.mxu0 %vm286_vm2, %v285_v27  ;;  %771 = vmatpush.msra.mxu3 %v283_v28 }
  0x9f   :  { %731 = vmatpush.msrb.mxu1 %v271_v30  ;;  %751 = vmatpush.msrb.mxu2 %v269_v31  ;;  %v11693_v55 = vpop.permute.xlu0 %11692 }
  0xa0   :  { %794 = vmatpush.msrb.mxu0 %v12861_v15  ;;  %v152_v15 = vadd.f32 %v120_v36, %v56_v35  ;;  %v11695_v60 = vunpack.i.h.bf16 %v11693_v55  ;;  %v11694_v11 = vunpack.i.l.bf16 %v11693_v55  ;;  %v13248_v55 = vld [vmem:[%s17699_s1 + $0x20] sm:$0xff] }
  0xa2   :  { %185 = vst.msk [vmem:[%s17701_s6 + $0x10] sm:$0xff] %vm182_vm1, %v152_v15  ;;  %v11698_v61 = vpop.permute.xlu1 %11697  ;;  %v977_v10 = vsel %vm971_vm3, %v11684_v57, %v11695_v60  ;;  %v987_v31 = vsel %vm971_vm3, %v11694_v11, %v11685_v51  ;;  %11907 = vrot.lane.b32.xlu1 %v12907_v24, %s12734_s22 }
  0xa3   :  { %v11700_v15 = vunpack.i.h.bf16 %v11698_v61  ;;  %v11699_v38 = vunpack.i.l.bf16 %v11698_v61  ;;  %11902 = vrot.lane.b32.xlu0 %v12912_v25, %s12734_s22  ;;  %11912 = vrot.lane.b32.xlu2 %v12851_v13, %s12734_s22 }
  0xa4   :  { %11152 = vmatmul.msk.f32.vlgmr.msra.gmra.mxu1 %vm286_vm2, %v285_v27 }
  0xa5   :  { %11153 = vmatmul.msk.f32.vlgmr.msra.gmra.mxu2 %vm286_vm2, %v285_v27  ;;  %11154 = vmatmul.msk.f32.vlgmr.msrb.gmra.mxu3 %vm286_vm2, %v285_v27 }
  0xa6   :  { %11155 = vmatmul.msk.f32.vlgmr.msra.gmra.mxu0 %vm286_vm2, %v285_v27  ;;  %814 = vmatpush.msra.mxu1 %v12887_v20  ;;  %v11660_v20 = vunpack.i.h.bf16 %v11658_v32 }
  0xa7   :  { %834 = vmatpush.msra.mxu2 %v12828_v8  ;;  %854 = vmatpush.msrb.mxu3 %v12833_v9  ;;  %v232_v8 = vld [vmem:[%s17701_s6] sm:$0xff]  ;;  %v11673_v9 = vpop.permute.xlu2 %11672  ;;  %v11708_v7 = vpop.permute.xlu0 %11707 }
  0xa8   :  { %874 = vmatpush.msra.mxu0 %v12866_v16  ;;  %v984_v16 = vsel %vm971_vm3, %v11665_v40, %v11669_v39  ;;  %v11675_v43 = vunpack.i.h.bf16 %v11673_v9  ;;  %v978_v45 = vsel %vm971_vm3, %v11660_v20, %v11664_v41  ;;  %v11674_v48 = vunpack.i.l.bf16 %v11673_v9 }
  0xa9   :  { %v11709_v28 = vunpack.i.l.bf16 %v11708_v7  ;;  %v989_v30 = vld [vmem:[%s17701_s6 + $0x10] sm:$0xff]  ;;  %v1373_v9 = vsel %vm1364_vm4, %v11699_v38, %v11700_v15 }
  0xaa   :  { %v986_v52 = vsel %vm971_vm3, %v11674_v48, %v11665_v40  ;;  %v974_v53 = vsel %vm971_vm3, %v11675_v43, %v11670_v49  ;;  %v972_v54 = vsel %vm971_vm3, %v11670_v49, %v11674_v48  ;;  %v11713_v35 = vpop.permute.xlu1 %11712  ;;  %11922 = vrot.lane.b32.xlu1 %v12871_v17, %s12734_s22 }
  0xab   :  { %11917 = vrot.lane.b32.xlu0 %v12847_v12, %s12734_s22  ;;  %11927 = vrot.lane.b32.xlu2 %v12901_v23, %s12734_s22 }
  0xac   :  { %11156 = vmatmul.msk.f32.vlgmr.msrb.gmra.mxu1 %vm286_vm2, %v285_v27 }
  0xad   :  { %11157 = vmatmul.msk.f32.vlgmr.msrb.gmra.mxu2 %vm286_vm2, %v285_v27  ;;  %11158 = vmatmul.msk.f32.vlgmr.msra.gmra.mxu3 %vm286_vm2, %v285_v27 }
  0xae   :  { %11159 = vmatmul.msk.f32.vlgmr.msrb.gmra.mxu0 %vm286_vm2, %v232_v8  ;;  %894 = vmatpush.msrb.mxu1 %v12877_v18  ;;  %v982_v18 = vsel %vm971_vm3, %v11669_v39, %v11659_v42  ;;  %v11715_v39 = vunpack.i.h.bf16 %v11713_v35 }
  0xaf   :  { %914 = vmatpush.msrb.mxu2 %v12892_v21  ;;  %934 = vmatpush.msra.mxu3 %v12882_v19  ;;  %v980_v19 = vsel %vm971_vm3, %v11659_v42, %v11660_v20  ;;  %v976_v21 = vsel %vm971_vm3, %v11664_v41, %v11675_v43  ;;  %v13123_v46 = vpop.permute.xlu2 %11687  ;;  %v11723_v41 = vpop.permute.xlu0 %11722  ;;  %v11714_v42 = vunpack.i.l.bf16 %v11713_v35  ;;  %v11710_v43 = vunpack.i.h.bf16 %v11708_v7 }
  0xb0   :  { %1008 = vmatpush.msrb.mxu0 %v984_v16  ;;  %v11689_v50 = vunpack.i.l.bf16 %v13123_v46  ;;  %v11690_v26 = vunpack.i.h.bf16 %v13123_v46  ;;  %v11724_v49 = vunpack.i.l.bf16 %v11723_v41 }
  0xb2   :  { %v985_v56 = vsel %vm971_vm3, %v11685_v51, %v11689_v50  ;;  %v983_v4 = vsel %vm971_vm3, %v11689_v50, %v11679_v59  ;;  %v975_v32 = vsel %vm971_vm3, %v11695_v60, %v11690_v26  ;;  %v973_v34 = vsel %vm971_vm3, %v11690_v26, %v11694_v11  ;;  %v13214_v20 = vpop.permute.xlu1 %11727  ;;  %11937 = vrot.lane.b32.xlu1 %v12856_v14, %s12735_s29 }
  0xb3   :  { %v11729_v44 = vunpack.i.l.bf16 %v13214_v20  ;;  %v122_v59 = vmul.f32 0.001, %v13248_v55  ;;  %v11730_v3 = vunpack.i.h.bf16 %v13214_v20  ;;  %11932 = vrot.lane.b32.xlu0 %v12896_v22, %s12734_s22  ;;  %vm6473_vm3 = vcmp.lt.s32.totalorder %v12942_v29, 28 }
  0xb4   :  { %11160 = vmatmul.msk.f32.vlgmr.msra.gmra.mxu1 %vm286_vm2, %v232_v8 }
  0xb5   :  { %11161 = vmatmul.msk.f32.vlgmr.msra.gmra.mxu2 %vm286_vm2, %v232_v8  ;;  %11162 = vmatmul.msk.f32.vlgmr.msrb.gmra.mxu3 %vm286_vm2, %v232_v8 }
  0xb6   :  { %11163 = vmatmul.msk.f32.vlgmr.msra.gmra.mxu0 %vm286_vm2, %v232_v8  ;;  %1068 = vmatpush.msrb.mxu3 %v978_v45  ;;  %v11725_v45 = vunpack.i.h.bf16 %v11723_v41 }
  0xb7   :  { %1028 = vmatpush.msra.mxu1 %v982_v18  ;;  %1048 = vmatpush.msra.mxu2 %v980_v19  ;;  %v11703_v1 = vpop.permute.xlu2 %11702  ;;  %v1367_v19 = vsel %vm1364_vm4, %v11715_v39, %v11710_v43 }
  0xb8   :  { %1088 = vmatpush.msra.mxu0 %v976_v21  ;;  %v11705_v27 = vunpack.i.h.bf16 %v11703_v1  ;;  %v11704_v37 = vunpack.i.l.bf16 %v11703_v1  ;;  %v1365_v21 = vsel %vm1364_vm4, %v11710_v43, %v11714_v42  ;;  %v1378_v47 = vsel %vm1364_vm4, %v11725_v45, %v11729_v44 }
  0xba   :  { %v1377_v36 = vsel %vm1364_vm4, %v11705_v27, %v11709_v28  ;;  %v1371_v40 = vsel %vm1364_vm4, %v11700_v15, %v11704_v37  ;;  %v1369_v16 = vsel %vm1364_vm4, %v11704_v37, %v11715_v39  ;;  %v1379_v18 = vsel %vm1364_vm4, %v11714_v42, %v11705_v27  ;;  %v11743_v61 = vpop.permute.xlu1 %11742 }
  0xbb   :  { %v11744_v26 = vunpack.i.l.bf16 %v11743_v61  ;;  %11947 = vrot.lane.b32.xlu0 %v12907_v24, %s12735_s29 }
  0xbc   :  { %11164 = vmatmul.msk.f32.vlgmr.msrb.gmra.mxu1 %vm286_vm2, %v232_v8 }
  0xbd   :  { %11165 = vmatmul.msk.f32.vlgmr.msrb.gmra.mxu2 %vm286_vm2, %v232_v8  ;;  %11166 = vmatmul.msk.f32.vlgmr.msra.gmra.mxu3 %vm286_vm2, %v232_v8  ;;  %v1375_v8 = vsel %vm1364_vm4, %v11709_v28, %v11699_v38 }
  0xbe   :  { %11167 = vmatmul.msk.f32.vlgmr.msrb.gmra.mxu0 %vm286_vm2, %v13070_v33  ;;  %1148 = vmatpush.msra.mxu3 %v986_v52  ;;  %v11738_v52 = vpop.permute.xlu0 %11737 }
  0xbf   :  { %1108 = vmatpush.msrb.mxu1 %v974_v53  ;;  %1128 = vmatpush.msrb.mxu2 %v972_v54  ;;  %v26_v53 = vld [vmem:[%s17700_s2 + $0x20] sm:$0xff]  ;;  %v11740_v27 = vunpack.i.h.bf16 %v11738_v52  ;;  %v11739_v28 = vunpack.i.l.bf16 %v11738_v52 }
  0xc0   :  { %1179 = vmatpush.msrb.mxu0 %v985_v56  ;;  %v58_v56 = vmul.f32 0.999, %v26_v53 }
  0xc2   :  { %v154_v2 = vadd.f32 %v122_v59, %v58_v56 }
  0xc4   :  { %11168 = vmatmul.msk.f32.vlgmr.msra.gmra.mxu1 %vm286_vm2, %v13070_v33  ;;  %187 = vst.msk [vmem:[%s17701_s6 + $0x20] sm:$0xff] %vm182_vm1, %v154_v2 }
  0xc5   :  { %11169 = vmatmul.msk.f32.vlgmr.msra.gmra.mxu2 %vm286_vm2, %v13070_v33  ;;  %11170 = vmatmul.msk.f32.vlgmr.msrb.gmra.mxu3 %vm286_vm2, %v13070_v33 }
  0xc6   :  { %11171 = vmatmul.msk.f32.vlgmr.msra.gmra.mxu0 %vm286_vm2, %v13070_v33  ;;  %1239 = vmatpush.msrb.mxu3 %v979_v0  ;;  %v11753_v7 = vpop.permute.xlu0 %11752 }
  0xc7   :  { %1199 = vmatpush.msra.mxu1 %v983_v4  ;;  %1219 = vmatpush.msra.mxu2 %v981_v5  ;;  %v11745_v4 = vunpack.i.h.bf16 %v11743_v61  ;;  %v11754_v37 = vunpack.i.l.bf16 %v11753_v7 }
  0xc8   :  { %1259 = vmatpush.msra.mxu0 %v977_v10  ;;  %v1382_v10 = vld [vmem:[%s17701_s6 + $0x18] sm:$0xff] }
  0xcc   :  { %11172 = vmatmul.msk.f32.vlgmr.msrb.gmra.mxu1 %vm286_vm2, %v13070_v33 }
  0xcd   :  { %11173 = vmatmul.msk.f32.vlgmr.msrb.gmra.mxu2 %vm286_vm2, %v13070_v33  ;;  %11174 = vmatmul.msk.f32.vlgmr.msra.gmra.mxu3 %vm286_vm2, %v13070_v33  ;;  %v11718_v33 = vpop.permute.xlu2 %11717 }
  0xce   :  { %11175 = vmatmul.msk.f32.vlgmr.msrb.gmra.mxu0 %vm286_vm2, %v989_v30  ;;  %1319 = vmatpush.msra.mxu3 %v987_v31  ;;  %v11720_v48 = vunpack.i.h.bf16 %v11718_v33  ;;  %v11719_v50 = vunpack.i.l.bf16 %v11718_v33  ;;  %v11758_v31 = vpop.permute.xlu1 %11757  ;;  %v13309_v15 = vpop.permute.xlu0 %11767 }
  0xcf   :  { %1279 = vmatpush.msrb.mxu1 %v975_v32  ;;  %1299 = vmatpush.msrb.mxu2 %v973_v34  ;;  %v1766_v34 = vsel %vm1757_vm5, %v11739_v28, %v11740_v27  ;;  %v11769_v33 = vunpack.i.l.bf16 %v13309_v15  ;;  %v11760_v20 = vunpack.i.h.bf16 %v11758_v31  ;;  %v11759_v42 = vunpack.i.l.bf16 %v11758_v31 }
  0xd0   :  { %1401 = vmatpush.msrb.mxu0 %v1377_v36  ;;  %v1372_v54 = vsel %vm1364_vm4, %v11720_v48, %v11724_v49  ;;  %v1376_v57 = vsel %vm1364_vm4, %v11729_v44, %v11719_v50  ;;  %v1374_v58 = vsel %vm1364_vm4, %v11719_v50, %v11720_v48  ;;  %v11770_v56 = vunpack.i.h.bf16 %v13309_v15 }
  0xd1   :  { %v1769_v22 = vsel %vm1757_vm5, %v11769_v33, %v11759_v42  ;;  %v1767_v48 = vsel %vm1757_vm5, %v11759_v42, %v11760_v20 }
  0xd4   :  { %11176 = vmatmul.msk.f32.vlgmr.msra.gmra.mxu1 %vm286_vm2, %v989_v30 }
  0xd5   :  { %11177 = vmatmul.msk.f32.vlgmr.msra.gmra.mxu2 %vm286_vm2, %v989_v30  ;;  %11178 = vmatmul.msk.f32.vlgmr.msrb.gmra.mxu3 %vm286_vm2, %v989_v30  ;;  %v11733_v46 = vpop.permute.xlu2 %11732 }
  0xd6   :  { %11179 = vmatmul.msk.f32.vlgmr.msra.gmra.mxu0 %vm286_vm2, %v989_v30  ;;  %1461 = vmatpush.msrb.mxu3 %v1371_v40  ;;  %v11735_v51 = vunpack.i.h.bf16 %v11733_v46  ;;  %v11734_v0 = vunpack.i.l.bf16 %v11733_v46  ;;  %v1772_v40 = vsel %vm1757_vm5, %v11754_v37, %v11745_v4  ;;  %v13351_v46 = vld [vmem:[%s17699_s1 + $0x28] sm:$0xff]  ;;  %v13370_v52 = vpop.permute.xlu0 %11782 }
  0xd7   :  { %1421 = vmatpush.msra.mxu1 %v1375_v8  ;;  %1441 = vmatpush.msra.mxu2 %v1373_v9  ;;  %v11785_v61 = vunpack.i.h.bf16 %v13370_v52 }
  0xd8   :  { %1481 = vmatpush.msra.mxu0 %v1369_v16  ;;  %v1370_v60 = vsel %vm1364_vm4, %v11724_v49, %v11735_v51  ;;  %v1380_v6 = vsel %vm1364_vm4, %v11734_v0, %v11725_v45  ;;  %v1368_v25 = vsel %vm1364_vm4, %v11735_v51, %v11730_v3  ;;  %v1366_v1 = vsel %vm1364_vm4, %v11730_v3, %v11734_v0  ;;  %v11773_v16 = vpop.permute.xlu1 %11772 }
  0xd9   :  { %v11775_v44 = vunpack.i.h.bf16 %v11773_v16  ;;  %v123_v49 = vmul.f32 0.001, %v13351_v46  ;;  %v11774_v53 = vunpack.i.l.bf16 %v11773_v16  ;;  %vm6866_vm4 = vcmp.lt.s32.totalorder %v12942_v29, 27 }
  0xdb   :  { %v1761_v24 = vsel %vm1757_vm5, %v11775_v44, %v11770_v56  ;;  %v1759_v0 = vsel %vm1757_vm5, %v11770_v56, %v11774_v53 }
  0xdc   :  { %11180 = vmatmul.msk.f32.vlgmr.msrb.gmra.mxu1 %vm286_vm2, %v989_v30 }
  0xdd   :  { %11181 = vmatmul.msk.f32.vlgmr.msrb.gmra.mxu2 %vm286_vm2, %v989_v30  ;;  %11182 = vmatmul.msk.f32.vlgmr.msra.gmra.mxu3 %vm286_vm2, %v989_v30  ;;  %v11748_v63 = vpop.permute.xlu2 %11747  ;;  %v11755_v30 = vunpack.i.h.bf16 %v11753_v7 }
  0xde   :  { %11183 = vmatmul.msk.f32.vlgmr.msrb.gmra.mxu0 %vm286_vm2, %v13148_v62  ;;  %1541 = vmatpush.msra.mxu3 %v1379_v18  ;;  %v11749_v5 = vunpack.i.l.bf16 %v11748_v63  ;;  %v11750_v38 = vunpack.i.h.bf16 %v11748_v63  ;;  %v27_v18 = vld [vmem:[%s17700_s2 + $0x28] sm:$0xff]  ;;  %v13397_v63 = vld [vmem:[%s17701_s6 + $0x20] sm:$0xff] }
  0xdf   :  { %1501 = vmatpush.msrb.mxu1 %v1367_v19  ;;  %1521 = vmatpush.msrb.mxu2 %v1365_v21  ;;  %v1762_v35 = vsel %vm1757_vm5, %v11744_v26, %v11755_v30 }
  0xe0   :  { %1572 = vmatpush.msrb.mxu0 %v1378_v47  ;;  %v1770_v11 = vsel %vm1757_vm5, %v11745_v4, %v11749_v5  ;;  %v1768_v32 = vsel %vm1757_vm5, %v11749_v5, %v11739_v28  ;;  %v1760_v8 = vsel %vm1757_vm5, %v11755_v30, %v11750_v38  ;;  %v1758_v9 = vsel %vm1757_vm5, %v11750_v38, %v11754_v37  ;;  %v13368_v51 = vpop.permute.xlu1 %11787  ;;  %v12663_v4 = vld [vmem:[%s17698_s0 + $0x28] sm:$0xff]  ;;  %v12664_v5 = vld [vmem:[%s17698_s0 + $0x38] sm:$0xff]  ;;  %v12667_v37 = vld [vmem:[%s17698_s0 + $0x40] sm:$0xff] }
  0xe1   :  { %v59_v47 = vmul.f32 0.999, %v27_v18  ;;  %v12668_v38 = vld [vmem:[%s17698_s0 + $0x60] sm:$0xff] }
  0xe4   :  { %11184 = vmatmul.msk.f32.vlgmr.msra.gmra.mxu1 %vm286_vm2, %v13148_v62 }
  0xe5   :  { %11185 = vmatmul.msk.f32.vlgmr.msra.gmra.mxu2 %vm286_vm2, %v13148_v62  ;;  %11186 = vmatmul.msk.f32.vlgmr.msrb.gmra.mxu3 %vm286_vm2, %v13148_v62  ;;  %v13307_v36 = vpop.permute.xlu2 %11762 }
  0xe6   :  { %11187 = vmatmul.msk.f32.vlgmr.msra.gmra.mxu0 %vm286_vm2, %v13148_v62  ;;  %1632 = vmatpush.msrb.mxu3 %v1372_v54  ;;  %v11765_v39 = vunpack.i.h.bf16 %v13307_v36  ;;  %v11764_v41 = vunpack.i.l.bf16 %v13307_v36  ;;  %v155_v54 = vadd.f32 %v123_v49, %v59_v47  ;;  %v12666_v36 = vld [vmem:[%s17698_s0 + $0x70] sm:$0xff]  ;;  %v12670_v49 = vld [vmem:[%s17698_s0] sm:$0xff] }
  0xe7   :  { %1592 = vmatpush.msra.mxu1 %v1376_v57  ;;  %1612 = vmatpush.msra.mxu2 %v1374_v58 }
  0xe8   :  { %1652 = vmatpush.msra.mxu0 %v1370_v60  ;;  %v1771_v17 = vsel %vm1757_vm5, %v11765_v39, %v11769_v33  ;;  %v1765_v21 = vsel %vm1757_vm5, %v11760_v20, %v11764_v41  ;;  %v1763_v50 = vsel %vm1757_vm5, %v11764_v41, %v11775_v44  ;;  %v11789_v60 = vunpack.i.l.bf16 %v13368_v51  ;;  %188 = vst.msk [vmem:[%s17701_s6 + $0x28] sm:$0xff] %vm182_vm1, %v155_v54 }
  0xe9   :  { %v1773_v13 = vsel %vm1757_vm5, %v11774_v53, %v11765_v39  ;;  %v13476_v39 = vpack.i.bf16 %v12667_v37, %v12668_v38 }
  0xea   :  { %v2163_v3 = vsel %vm2150_vm6, %v11785_v61, %v11789_v60 }
  0xeb   :  { %11962 = vrot.lane.b32.xlu0 %v13476_v39, %s12735_s29 }
  0xec   :  { %11188 = vmatmul.msk.f32.vlgmr.msrb.gmra.mxu1 %vm286_vm2, %v13148_v62 }
  0xed   :  { %11189 = vmatmul.msk.f32.vlgmr.msrb.gmra.mxu2 %vm286_vm2, %v13148_v62  ;;  %11190 = vmatmul.msk.f32.vlgmr.msra.gmra.mxu3 %vm286_vm2, %v13148_v62  ;;  %v1764_v62 = vsel %vm1757_vm5, %v11740_v27, %v11744_v26  ;;  %v13339_v45 = vpop.permute.xlu2 %11777  ;;  %v13438_v27 = vpop.permute.xlu0 %11797  ;;  %vm7259_vm5 = vcmp.lt.s32.totalorder %v12942_v29, 94 }
  0xee   :  { %11191 = vmatmul.msk.f32.vlgmr.msrb.gmra.mxu0 %vm286_vm2, %v1382_v10  ;;  %1712 = vmatpush.msra.mxu3 %v1380_v6  ;;  %v11784_v6 = vunpack.i.l.bf16 %v13370_v52  ;;  %v11779_v7 = vunpack.i.l.bf16 %v13339_v45  ;;  %v11800_v52 = vunpack.i.h.bf16 %v13438_v27  ;;  %v11799_v56 = vunpack.i.l.bf16 %v13438_v27  ;;  %v12672_v27 = vld [vmem:[%s17698_s0 + $0x18] sm:$0xff] }
  0xef   :  { %1672 = vmatpush.msrb.mxu1 %v1368_v25  ;;  %1692 = vmatpush.msrb.mxu2 %v1366_v1 }
  0xf0   :  { %1794 = vmatpush.msrb.mxu0 %v1770_v11  ;;  %v2161_v31 = vsel %vm2150_vm6, %v11789_v60, %v11779_v7 }
  0xf4   :  { %11192 = vmatmul.msk.f32.vlgmr.msra.gmra.mxu1 %vm286_vm2, %v1382_v10 }
  0xf5   :  { %11193 = vmatmul.msk.f32.vlgmr.msra.gmra.mxu2 %vm286_vm2, %v1382_v10  ;;  %11194 = vmatmul.msk.f32.vlgmr.msrb.gmra.mxu3 %vm286_vm2, %v1382_v10  ;;  %v11793_v2 = vpop.permute.xlu2 %11792  ;;  %v13505_v47 = vpop.permute.xlu0 %11812 }
  0xf6   :  { %11195 = vmatmul.msk.f32.vlgmr.msra.gmra.mxu0 %vm286_vm2, %v1382_v10  ;;  %1854 = vmatpush.msrb.mxu3 %v1764_v62  ;;  %v11795_v26 = vunpack.i.h.bf16 %v11793_v2  ;;  %v11794_v33 = vunpack.i.l.bf16 %v11793_v2 }
  0xf7   :  { %1814 = vmatpush.msra.mxu1 %v1768_v32  ;;  %1834 = vmatpush.msra.mxu2 %v1766_v34  ;;  %v13458_v32 = vpop.permute.xlu1 %11802 }
  0xf8   :  { %1874 = vmatpush.msra.mxu0 %v1762_v35  ;;  %v2155_v23 = vsel %vm2150_vm6, %v11784_v6, %v11795_v26  ;;  %v12665_v35 = vld [vmem:[%s17698_s0 + $0x48] sm:$0xff]  ;;  %v11805_v41 = vunpack.i.h.bf16 %v13458_v32 }
  0xf9   :  { %v13468_v15 = vpack.i.bf16 %v12666_v36, %v12665_v35 }
  0xfc   :  { %11196 = vmatmul.msk.f32.vlgmr.msrb.gmra.mxu1 %vm286_vm2, %v1382_v10 }
  0xfd   :  { %11197 = vmatmul.msk.f32.vlgmr.msrb.gmra.mxu2 %vm286_vm2, %v1382_v10  ;;  %11198 = vmatmul.msk.f32.vlgmr.msra.gmra.mxu3 %vm286_vm2, %v1382_v10  ;;  %v13423_v10 = vpack.i.bf16 %v12663_v4, %v12664_v5  ;;  %v13460_v34 = vpop.permute.xlu2 %11807 }
  0xfe   :  { %11199 = vmatmul.msk.f32.vlgmr.msrb.gmra.mxu0 %vm286_vm2, %v13248_v55  ;;  %1934 = vmatpush.msra.mxu3 %v1772_v40  ;;  %v11790_v40 = vunpack.i.h.bf16 %v13368_v51  ;;  %v11809_v42 = vunpack.i.l.bf16 %v13460_v34  ;;  %v11804_v51 = vunpack.i.l.bf16 %v13458_v32 }
  0xff   :  { %v13330_v12 = vpop.f32.mrf.mxu3  ;;  %1894 = vmatpush.msrb.mxu1 %v1760_v8  ;;  %1914 = vmatpush.msrb.mxu2 %v1758_v9 }
 0x100   :  { %1965 = vmatpush.msrb.mxu0 %v1771_v17  ;;  %11952 = vrot.lane.b32.xlu1 %v13423_v10, %s12735_s29  ;;  %v2153_v18 = vsel %vm2150_vm6, %v11795_v26, %v11790_v40  ;;  %v2158_v2 = vsel %vm2150_vm6, %v11800_v52, %v11804_v51  ;;  %v2162_v5 = vsel %vm2150_vm6, %v11809_v42, %v11799_v56  ;;  %v12671_v26 = vld [vmem:[%s17698_s0 + $0x10] sm:$0xff] }
 0x101   :  { %v13335_v43 = vpop.f32.mrf.mxu1 }
 0x103   :  { %v13344_v19 = vpop.f32.mrf.mxu0 }
 0x104   :  { %11200 = vmatmul.msk.f32.vlgmr.msra.gmra.mxu1 %vm286_vm2, %v13248_v55 }
 0x105   :  { %11201 = vmatmul.msk.f32.vlgmr.msra.gmra.mxu2 %vm286_vm2, %v13248_v55  ;;  %11202 = vmatmul.msk.f32.vlgmr.msrb.gmra.mxu3 %vm286_vm2, %v13248_v55 }
 0x106   :  { %11203 = vmatmul.msk.f32.vlgmr.msra.gmra.mxu0 %vm286_vm2, %v13248_v55  ;;  %2025 = vmatpush.msrb.mxu3 %v1765_v21  ;;  %v2151_v21 = vsel %vm2150_vm6, %v11790_v40, %v11794_v33 }
 0x107   :  { %1985 = vmatpush.msra.mxu1 %v1769_v22  ;;  %2005 = vmatpush.msra.mxu2 %v1767_v48  ;;  %v2164_v22 = vsel %vm2150_vm6, %v11805_v41, %v11809_v42  ;;  %v12669_v48 = vld [vmem:[%s17698_s0 + $0x20] sm:$0xff] }
 0x108   :  { %v13373_v57 = vpop.f32.mrf.mxu2  ;;  %v13375_v58 = vpop.f32.mrf.mxu3  ;;  %2045 = vmatpush.msra.mxu0 %v1763_v50  ;;  %11967 = vrot.lane.b32.xlu1 %v13468_v15, %s12735_s29  ;;  %v13523_v50 = vpack.i.bf16 %v12670_v49, %v12669_v48 }
 0x109   :  { %v13379_v59 = vpop.f32.mrf.mxu1 }
 0x10a   :  { %11942 = vrot.lane.b32.xlu2 %v13523_v50, %s12735_s29 }
 0x10b   :  { %v13392_v14 = vpop.f32.mrf.mxu0 }
 0x10c   :  { %11204 = vmatmul.msk.f32.vlgmr.msrb.gmra.mxu1 %vm286_vm2, %v13248_v55 }
 0x10d   :  { %11205 = vmatmul.msk.f32.vlgmr.msrb.gmra.mxu2 %vm286_vm2, %v13248_v55  ;;  %11206 = vmatmul.msk.f32.vlgmr.msra.gmra.mxu3 %vm286_vm2, %v13248_v55  ;;  %v11780_v55 = vunpack.i.h.bf16 %v13339_v45  ;;  %v2165_v45 = vsel %vm2150_vm6, %v11794_v33, %v11785_v61  ;;  %v11815_v61 = vunpack.i.h.bf16 %v13505_v47 }
 0x10e   :  { %11207 = vmatmul.msk.f32.vlgmr.msrb.gmra.mxu0 %vm286_vm2, %v13397_v63  ;;  %2105 = vmatpush.msra.mxu3 %v1773_v13  ;;  %v13544_v13 = vld [vmem:[%s17699_s1 + $0x30] sm:$0xff] }
 0x10f   :  { %2065 = vmatpush.msrb.mxu1 %v1761_v24  ;;  %2085 = vmatpush.msrb.mxu2 %v1759_v0  ;;  %v2157_v30 = vsel %vm2150_vm6, %v11780_v55, %v11784_v6  ;;  %v2159_v62 = vsel %vm2150_vm6, %v11779_v7, %v11780_v55  ;;  %v28_v24 = vld [vmem:[%s17700_s2 + $0x30] sm:$0xff]  ;;  %v124_v4 = vmul.f32 0.001, %v13544_v13  ;;  %v2160_v55 = vsel %vm2150_vm6, %v11799_v56, %v11800_v52  ;;  %v13570_v7 = vpop.permute.xlu0 %11827 }
 0x110   :  { %v13427_v25 = vpop.f32.mrf.mxu2  ;;  %v13429_v1 = vpop.f32.mrf.mxu3  ;;  %2187 = vmatpush.msrb.mxu0 %v2163_v3  ;;  %v60_v3 = vmul.f32 0.999, %v28_v24  ;;  %v2156_v6 = vsel %vm2150_vm6, %v11804_v51, %v11815_v61  ;;  %11982 = vrot.lane.b32.xlu1 %v13523_v50, %s12736_s15  ;;  %v11829_v38 = vunpack.i.l.bf16 %v13570_v7 }
 0x111   :  { %v13434_v11 = vpop.f32.mrf.mxu1 }
 0x113   :  { %v13440_v28 = vpop.f32.mrf.mxu0 }
 0x114   :  { %11208 = vmatmul.msk.f32.vlgmr.msra.gmra.mxu1 %vm286_vm2, %v13397_v63 }
 0x115   :  { %11209 = vmatmul.msk.f32.vlgmr.msra.gmra.mxu2 %vm286_vm2, %v13397_v63  ;;  %11210 = vmatmul.msk.f32.vlgmr.msrb.gmra.mxu3 %vm286_vm2, %v13397_v63 }
 0x116   :  { %11211 = vmatmul.msk.f32.vlgmr.msra.gmra.mxu0 %vm286_vm2, %v13397_v63  ;;  %2247 = vmatpush.msrb.mxu3 %v2157_v30  ;;  %v13578_v30 = vpack.i.bf16 %v12672_v27, %v12671_v26 }
 0x117   :  { %2207 = vmatpush.msra.mxu1 %v2161_v31  ;;  %2227 = vmatpush.msra.mxu2 %v2159_v62  ;;  %v11814_v31 = vunpack.i.l.bf16 %v13505_v47  ;;  %v11810_v62 = vunpack.i.h.bf16 %v13460_v34  ;;  %v13600_v34 = vld [vmem:[%s17701_s6 + $0x28] sm:$0xff] }
 0x118   :  { %v510_v8 = vpop.f32.mrf.mxu2  ;;  %v530_v9 = vpop.f32.mrf.mxu3  ;;  %2267 = vmatpush.msra.mxu0 %v2155_v23  ;;  %11977 = vrot.lane.b32.xlu0 %v13578_v30, %s12736_s15 }
 0x119   :  { %v13482_v16 = vadd.f32 %v510_v8, %v13373_v57  ;;  %v13485_v17 = vadd.f32 %v530_v9, %v13375_v58  ;;  %v13487_v20 = vpop.f32.mrf.mxu1  ;;  %v2166_v40 = vsel %vm2150_vm6, %v11814_v31, %v11805_v41  ;;  %v2154_v8 = vsel %vm2150_vm6, %v11815_v61, %v11810_v62  ;;  %v12673_v41 = vld [vmem:[%s17698_s0 + $0x50] sm:$0xff] }
 0x11a   :  { %v2152_v9 = vsel %vm2150_vm6, %v11810_v62, %v11814_v31  ;;  %vm7652_vm6 = vcmp.lt.s32.totalorder %v12942_v29, 93 }
 0x11b   :  { %v13493_v44 = vpop.f32.mrf.mxu0 }
 0x11c   :  { %11212 = vmatmul.msk.f32.vlgmr.msrb.gmra.mxu1 %vm286_vm2, %v13397_v63 }
 0x11d   :  { %11213 = vmatmul.msk.f32.vlgmr.msrb.gmra.mxu2 %vm286_vm2, %v13397_v63  ;;  %11214 = vmatmul.msk.f32.vlgmr.msra.gmra.mxu3 %vm286_vm2, %v13397_v63  ;;  %v13539_v63 = vpop.permute.xlu1 %11817 }
 0x11e   :  { %11215 = vmatmul.msk.f32.vlgmr.msrb.gmra.mxu0 %vm286_vm2, %v13351_v46  ;;  %2327 = vmatpush.msra.mxu3 %v2165_v45  ;;  %v12674_v45 = vld [vmem:[%s17698_s0 + $0x58] sm:$0xff]  ;;  %v11819_v48 = vunpack.i.l.bf16 %v13539_v63 }
 0x11f   :  { %2287 = vmatpush.msrb.mxu1 %v2153_v18  ;;  %2307 = vmatpush.msrb.mxu2 %v2151_v21  ;;  %v13628_v18 = vpack.i.bf16 %v12674_v45, %v12673_v41 }
 0x120   :  { %v590_v53 = vpop.f32.mrf.mxu2  ;;  %v610_v54 = vpop.f32.mrf.mxu3  ;;  %2358 = vmatpush.msrb.mxu0 %v2164_v22  ;;  %11992 = vrot.lane.b32.xlu0 %v13423_v10, %s12736_s15  ;;  %v2554_v56 = vsel %vm2543_vm7, %v11829_v38, %v11819_v48 }
 0x121   :  { %v13531_v57 = vadd.f32 %v590_v53, %v13427_v25  ;;  %v13534_v58 = vadd.f32 %v610_v54, %v13429_v1  ;;  %v13536_v60 = vpop.f32.mrf.mxu1  ;;  %v156_v25 = vadd.f32 %v124_v4, %v60_v3  ;;  %v13568_v1 = vpop.permute.xlu2 %11822  ;;  %11957 = vrot.lane.b32.xlu2 %v13628_v18, %s12735_s29  ;;  %v12675_v4 = vld [vmem:[%s17698_s0 + $0x68] sm:$0xff]  ;;  %11997 = vrot.lane.b32.xlu1 %v13628_v18, %s12736_s15 }
 0x122   :  { %v11825_v37 = vunpack.i.h.bf16 %v13568_v1  ;;  %v11824_v21 = vunpack.i.l.bf16 %v13568_v1 }
 0x123   :  { %v13549_v0 = vpop.f32.mrf.mxu0  ;;  %189 = vst.msk [vmem:[%s17701_s6 + $0x30] sm:$0xff] %vm182_vm1, %v156_v25 }
 0x124   :  { %11216 = vmatmul.msk.f32.vlgmr.msra.gmra.mxu1 %vm286_vm2, %v13351_v46  ;;  %v2556_v32 = vsel %vm2543_vm7, %v11825_v37, %v11829_v38 }
 0x125   :  { %11217 = vmatmul.msk.f32.vlgmr.msra.gmra.mxu2 %vm286_vm2, %v13351_v46  ;;  %11218 = vmatmul.msk.f32.vlgmr.msrb.gmra.mxu3 %vm286_vm2, %v13351_v46  ;;  %v11833_v42 = vpop.permute.xlu1 %11832 }
 0x126   :  { %11219 = vmatmul.msk.f32.vlgmr.msra.gmra.mxu0 %vm286_vm2, %v13351_v46  ;;  %2418 = vmatpush.msrb.mxu3 %v2158_v2  ;;  %v11835_v51 = vunpack.i.h.bf16 %v11833_v42  ;;  %v13661_v2 = vpop.permute.xlu0 %11842  ;;  %v11834_v3 = vunpack.i.l.bf16 %v11833_v42  ;;  %v12678_v42 = vld [vmem:[%s17698_s0 + $0x8] sm:$0xff] }
 0x127   :  { %2378 = vmatpush.msra.mxu1 %v2162_v5  ;;  %2398 = vmatpush.msra.mxu2 %v2160_v55  ;;  %v12676_v5 = vld [vmem:[%s17698_s0 + $0x78] sm:$0xff]  ;;  %v11844_v41 = vunpack.i.l.bf16 %v13661_v2 }
 0x128   :  { %v673_v23 = vpop.f32.mrf.mxu2  ;;  %v693_v35 = vpop.f32.mrf.mxu3  ;;  %2438 = vmatpush.msra.mxu0 %v2156_v6  ;;  %v13669_v55 = vpack.i.bf16 %v12675_v4, %v12676_v5  ;;  %v11830_v6 = vunpack.i.h.bf16 %v13570_v7  ;;  %12007 = vrot.lane.b32.xlu0 %v13468_v15, %s12736_s15 }
 0x129   :  { %v13588_v36 = vpop.f32.mrf.mxu1  ;;  %v13639_v52 = vpop.permute.xlu2 %11837 }
 0x12a   :  { %11972 = vrot.lane.b32.xlu2 %v13669_v55, %s12735_s29  ;;  %12012 = vrot.lane.b32.xlu1 %v13669_v55, %s12736_s15 }
 0x12b   :  { %v13595_v33 = vpop.f32.mrf.mxu0 }
 0x12c   :  { %11220 = vmatmul.msk.f32.vlgmr.msrb.gmra.mxu1 %vm286_vm2, %v13351_v46 }
 0x12d   :  { %11221 = vmatmul.msk.f32.vlgmr.msrb.gmra.mxu2 %vm286_vm2, %v13351_v46  ;;  %11222 = vmatmul.msk.f32.vlgmr.msra.gmra.mxu3 %vm286_vm2, %v13351_v46  ;;  %v11820_v46 = vunpack.i.h.bf16 %v13539_v63  ;;  %v2548_v63 = vsel %vm2543_vm7, %v11824_v21, %v11835_v51  ;;  %v13659_v24 = vpop.permute.xlu1 %11847 }
 0x12e   :  { %11223 = vmatmul.msk.f32.vlgmr.msrb.gmra.mxu0 %vm286_vm2, %v13600_v34  ;;  %2498 = vmatpush.msra.mxu3 %v2166_v40  ;;  %v11849_v38 = vunpack.i.l.bf16 %v13659_v24  ;;  %v11845_v40 = vunpack.i.h.bf16 %v13661_v2 }
 0x12f   :  { %2458 = vmatpush.msrb.mxu1 %v2154_v8  ;;  %2478 = vmatpush.msrb.mxu2 %v2152_v9  ;;  %v2550_v54 = vsel %vm2543_vm7, %v11820_v46, %v11824_v21  ;;  %v2552_v61 = vsel %vm2543_vm7, %v11819_v48, %v11820_v46  ;;  %v2544_v8 = vsel %vm2543_vm7, %v11830_v6, %v11834_v3  ;;  %v11839_v21 = vunpack.i.l.bf16 %v13639_v52 }
 0x130   :  { %v753_v47 = vpop.f32.mrf.mxu2  ;;  %v773_v22 = vpop.f32.mrf.mxu3  ;;  %2580 = vmatpush.msrb.mxu0 %v2556_v32  ;;  %v2557_v1 = vsel %vm2543_vm7, %v11845_v40, %v11849_v38  ;;  %12022 = vrot.lane.b32.xlu0 %v13523_v50, %s12737_s12 }
 0x131   :  { %v13635_v49 = vpop.f32.mrf.mxu1  ;;  %v13698_v9 = vpop.permute.xlu2 %11852  ;;  %v2555_v5 = vsel %vm2543_vm7, %v11849_v38, %v11839_v21 }
 0x133   :  { %v13641_v53 = vpop.f32.mrf.mxu0 }
 0x134   :  { %11224 = vmatmul.msk.f32.vlgmr.msra.gmra.mxu1 %vm286_vm2, %v13600_v34 }
 0x135   :  { %11225 = vmatmul.msk.f32.vlgmr.msra.gmra.mxu2 %vm286_vm2, %v13600_v34  ;;  %11226 = vmatmul.msk.f32.vlgmr.msrb.gmra.mxu3 %vm286_vm2, %v13600_v34 }
 0x136   :  { %11227 = vmatmul.msk.f32.vlgmr.msra.gmra.mxu0 %vm286_vm2, %v13600_v34  ;;  %2640 = vmatpush.msrb.mxu3 %v2550_v54 }
 0x137   :  { %2600 = vmatpush.msra.mxu1 %v2554_v56  ;;  %2620 = vmatpush.msra.mxu2 %v2552_v61  ;;  %v11855_v56 = vunpack.i.h.bf16 %v13698_v9  ;;  %v13732_v61 = vpop.permute.xlu0 %11857 }
 0x138   :  { %v836_v25 = vpop.f32.mrf.mxu2  ;;  %v856_v26 = vpop.f32.mrf.mxu3  ;;  %2660 = vmatpush.msra.mxu0 %v2548_v63  ;;  %12037 = vrot.lane.b32.xlu0 %v13628_v18, %s12737_s12 }
 0x139   :  { %v13674_v27 = vadd.f32 %v836_v25, %v673_v23  ;;  %v13676_v31 = vadd.f32 %v856_v26, %v693_v35  ;;  %v13678_v62 = vpop.f32.mrf.mxu1  ;;  %v2558_v23 = vsel %vm2543_vm7, %v11834_v3, %v11825_v37  ;;  %v2546_v35 = vsel %vm2543_vm7, %v11835_v51, %v11830_v6  ;;  %v12677_v37 = vld [vmem:[%s17698_s0 + $0x30] sm:$0xff]  ;;  %v13763_v38 = vpop.permute.xlu2 %11867 }
 0x13a   :  { %17727 = vst [vmem:[#allocation2_spill] sm:$0xff] %v13678_v62  ;;  %v13716_v32 = vpack.i.bf16 %v12677_v37, %v12678_v42  ;;  %v2549_v25 = vsel %vm2543_vm7, %v11844_v41, %v11855_v56 }
 0x13b   :  { %v13686_v7 = vpop.f32.mrf.mxu0 }
 0x13c   :  { %17728 = vst [vmem:[#allocation3_spill] sm:$0xff] %v13686_v7  ;;  %11228 = vmatmul.msk.f32.vlgmr.msrb.gmra.mxu1 %vm286_vm2, %v13600_v34  ;;  %11987 = vrot.lane.b32.xlu2 %v13716_v32, %s12736_s15 }
 0x13d   :  { %11229 = vmatmul.msk.f32.vlgmr.msrb.gmra.mxu2 %vm286_vm2, %v13600_v34  ;;  %11230 = vmatmul.msk.f32.vlgmr.msra.gmra.mxu3 %vm286_vm2, %v13600_v34  ;;  %v11840_v34 = vunpack.i.h.bf16 %v13639_v52  ;;  %v13737_v52 = vld [vmem:[%s17699_s1 + $0x38] sm:$0xff] }
 0x13e   :  { %11231 = vmatmul.msk.f32.vlgmr.msrb.gmra.mxu0 %vm286_vm2, %v13544_v13  ;;  %2720 = vmatpush.msra.mxu3 %v2558_v23  ;;  %v125_v4 = vmul.f32 0.001, %v13737_v52  ;;  %v13761_v23 = vpop.permute.xlu1 %11862 }
 0x13f   :  { %2680 = vmatpush.msrb.mxu1 %v2546_v35  ;;  %2700 = vmatpush.msrb.mxu2 %v2544_v8  ;;  %v2551_v63 = vsel %vm2543_vm7, %v11840_v34, %v11844_v41  ;;  %v2553_v6 = vsel %vm2543_vm7, %v11839_v21, %v11840_v34  ;;  %v11854_v35 = vunpack.i.l.bf16 %v13698_v9  ;;  %v11850_v8 = vunpack.i.h.bf16 %v13659_v24 }
 0x140   :  { %v916_v45 = vpop.f32.mrf.mxu2  ;;  %v936_v46 = vpop.f32.mrf.mxu3  ;;  %2751 = vmatpush.msrb.mxu0 %v2557_v1  ;;  %12027 = vrot.lane.b32.xlu1 %v13716_v32, %s12737_s12  ;;  %v11865_v41 = vunpack.i.h.bf16 %v13761_v23 }
 0x141   :  { %v13723_v48 = vadd.f32 %v916_v45, %v753_v47  ;;  %v13725_v51 = vadd.f32 %v936_v46, %v773_v22  ;;  %v13727_v54 = vpop.f32.mrf.mxu1  ;;  %v29_v47 = vld [vmem:[%s17700_s2 + $0x38] sm:$0xff]  ;;  %v11869_v45 = vunpack.i.l.bf16 %v13763_v38  ;;  %v2547_v46 = vsel %vm2543_vm7, %v11855_v56, %v11850_v8  ;;  %12052 = vrot.lane.b32.xlu0 %v13669_v55, %s12737_s12 }
 0x142   :  { %17729 = vst [vmem:[#allocation4_spill] sm:$0xff] %v13727_v54  ;;  %v61_v3 = vmul.f32 0.999, %v29_v47  ;;  %v2545_v21 = vsel %vm2543_vm7, %v11850_v8, %v11854_v35  ;;  %v11873_v47 = vpop.permute.xlu0 %11872  ;;  %v11860_v56 = vunpack.i.h.bf16 %v13732_v61  ;;  %v13837_v8 = vpop.permute.xlu2 %11882 }
 0x143   :  { %v13742_v22 = vpop.f32.mrf.mxu0  ;;  %v2949_v2 = vsel %vm2936_vm8, %v11865_v41, %v11869_v45 }
 0x144   :  { %17730 = vst [vmem:[#allocation5_spill] sm:$0xff] %v13742_v22  ;;  %11232 = vmatmul.msk.f32.vlgmr.msra.gmra.mxu1 %vm286_vm2, %v13544_v13  ;;  %v157_v26 = vadd.f32 %v125_v4, %v61_v3  ;;  %v11859_v4 = vunpack.i.l.bf16 %v13732_v61  ;;  %12002 = vrot.lane.b32.xlu2 %v13476_v39, %s12736_s15 }
 0x145   :  { %11233 = vmatmul.msk.f32.vlgmr.msra.gmra.mxu2 %vm286_vm2, %v13544_v13  ;;  %11234 = vmatmul.msk.f32.vlgmr.msrb.gmra.mxu3 %vm286_vm2, %v13544_v13 }
 0x146   :  { %11235 = vmatmul.msk.f32.vlgmr.msra.gmra.mxu0 %vm286_vm2, %v13544_v13  ;;  %2811 = vmatpush.msrb.mxu3 %v2551_v63  ;;  %190 = vst.msk [vmem:[%s17701_s6 + $0x38] sm:$0xff] %vm182_vm1, %v157_v26  ;;  %v13821_v26 = vpop.permute.xlu1 %11877 }
 0x147   :  { %2771 = vmatpush.msra.mxu1 %v2555_v5  ;;  %2791 = vmatpush.msra.mxu2 %v2553_v6 }
 0x148   :  { %v1050_v1 = vpop.f32.mrf.mxu2  ;;  %v1070_v37 = vpop.f32.mrf.mxu3  ;;  %2831 = vmatpush.msra.mxu0 %v2549_v25  ;;  %v11875_v25 = vunpack.i.h.bf16 %v11873_v47  ;;  %12042 = vrot.lane.b32.xlu1 %v13476_v39, %s12737_s12 }
 0x149   :  { %v13774_v42 = vadd.f32 %v1050_v1, %v13482_v16  ;;  %v13777_v9 = vadd.f32 %v1070_v37, %v13485_v17  ;;  %v13779_v34 = vpop.f32.mrf.mxu1  ;;  %v2561_v16 = vld [vmem:[%s17701_s6 + $0x30] sm:$0xff]  ;;  %v2559_v17 = vsel %vm2543_vm7, %v11854_v35, %v11845_v40  ;;  %v11864_v40 = vunpack.i.l.bf16 %v13761_v23  ;;  %12067 = vrot.lane.b32.xlu0 %v13716_v32, %s12738_s21 }
 0x14a   :  { %17731 = vst [vmem:[#allocation6_spill] sm:$0xff] %v13779_v34  ;;  %v2947_v35 = vsel %vm2936_vm8, %v11869_v45, %v11859_v4  ;;  %v13839_v1 = vpop.permute.xlu0 %11887  ;;  %v11874_v37 = vunpack.i.l.bf16 %v11873_v47  ;;  %v11870_v45 = vunpack.i.h.bf16 %v13763_v38  ;;  %v11885_v47 = vunpack.i.h.bf16 %v13837_v8 }
 0x14b   :  { %v13786_v24 = vpop.f32.mrf.mxu0  ;;  %v2943_v61 = vsel %vm2936_vm8, %v11860_v56, %v11864_v40  ;;  %vm8045_vm7 = vcmp.lt.s32.totalorder %v12942_v29, 92 }
 0x14c   :  { %17732 = vst [vmem:[#allocation7_spill] sm:$0xff] %v13786_v24  ;;  %11236 = vmatmul.msk.f32.vlgmr.msrb.gmra.mxu1 %vm286_vm2, %v13544_v13  ;;  %12017 = vrot.lane.b32.xlu2 %v13578_v30, %s12737_s12 }
 0x14d   :  { %11237 = vmatmul.msk.f32.vlgmr.msrb.gmra.mxu2 %vm286_vm2, %v13544_v13  ;;  %11238 = vmatmul.msk.f32.vlgmr.msra.gmra.mxu3 %vm286_vm2, %v13544_v13 }
 0x14e   :  { %11239 = vmatmul.msk.f32.vlgmr.msrb.gmra.mxu0 %vm286_vm2, %v2561_v16  ;;  %2891 = vmatpush.msra.mxu3 %v2559_v17 }
 0x14f   :  { %2851 = vmatpush.msrb.mxu1 %v2547_v46  ;;  %2871 = vmatpush.msrb.mxu2 %v2545_v21 }
 0x150   :  { %v1130_v63 = vpop.f32.mrf.mxu2  ;;  %v1150_v3 = vpop.f32.mrf.mxu3  ;;  %2973 = vmatpush.msrb.mxu0 %v2949_v2  ;;  %12057 = vrot.lane.b32.xlu1 %v13578_v30, %s12738_s21 }
 0x151   :  { %v13814_v13 = vadd.f32 %v1130_v63, %v13531_v57  ;;  %v13817_v5 = vadd.f32 %v1150_v3, %v13534_v58  ;;  %v13819_v6 = vpop.f32.mrf.mxu1  ;;  %v2945_v57 = vsel %vm2936_vm8, %v11859_v4, %v11860_v56  ;;  %v2941_v58 = vsel %vm2936_vm8, %v11864_v40, %v11875_v25  ;;  %v13865_v3 = vpop.permute.xlu1 %11892  ;;  %12082 = vrot.lane.b32.xlu0 %v13476_v39, %s12738_s21 }
 0x152   :  { %17733 = vst [vmem:[#allocation8_spill] sm:$0xff] %v13819_v6  ;;  %v11889_v56 = vunpack.i.l.bf16 %v13839_v1  ;;  %v2951_v63 = vsel %vm2936_vm8, %v11874_v37, %v11865_v41  ;;  %v11880_v41 = vunpack.i.h.bf16 %v13821_v26 }
 0x153   :  { %v13823_v23 = vpop.f32.mrf.mxu0 }
 0x154   :  { %17734 = vst [vmem:[#allocation9_spill] sm:$0xff] %v13823_v23  ;;  %11240 = vmatmul.msk.f32.vlgmr.msra.gmra.mxu1 %vm286_vm2, %v2561_v16  ;;  %v2950_v4 = vsel %vm2936_vm8, %v11885_v47, %v11889_v56  ;;  %12032 = vrot.lane.b32.xlu2 %v13423_v10, %s12737_s12 }
 0x155   :  { %11241 = vmatmul.msk.f32.vlgmr.msra.gmra.mxu2 %vm286_vm2, %v2561_v16  ;;  %11242 = vmatmul.msk.f32.vlgmr.msrb.gmra.mxu3 %vm286_vm2, %v2561_v16 }
 0x156   :  { %11243 = vmatmul.msk.f32.vlgmr.msra.gmra.mxu0 %vm286_vm2, %v2561_v16  ;;  %3033 = vmatpush.msrb.mxu3 %v2943_v61 }
 0x157   :  { %2993 = vmatpush.msra.mxu1 %v2947_v35  ;;  %3013 = vmatpush.msra.mxu2 %v2945_v57  ;;  %v11879_v57 = vunpack.i.l.bf16 %v13821_v26  ;;  %v13896_v26 = vld [vmem:[%s17699_s1 + $0x40] sm:$0xff] }
 0x158   :  { %v1221_v17 = vpop.f32.mrf.mxu2  ;;  %v1241_v46 = vpop.f32.mrf.mxu3  ;;  %3053 = vmatpush.msra.mxu0 %v2941_v58  ;;  %12072 = vrot.lane.b32.xlu1 %v13423_v10, %s12738_s21 }
 0x159   :  { %v13845_v21 = vadd.f32 %v1221_v17, %v13674_v27  ;;  %v13848_v2 = vadd.f32 %v1241_v46, %v13676_v31  ;;  %v13850_v40 = vpop.f32.mrf.mxu1  ;;  %v2939_v27 = vsel %vm2936_vm8, %v11875_v25, %v11870_v45  ;;  %v2937_v31 = vsel %vm2936_vm8, %v11870_v45, %v11874_v37  ;;  %v13891_v17 = vpop.permute.xlu2 %11897  ;;  %12097 = vrot.lane.b32.xlu0 %v13578_v30, %s12739_s30 }
 0x15a   :  { %17735 = vst [vmem:[#allocation10_spill] sm:$0xff] %v13850_v40  ;;  %v11884_v25 = vunpack.i.l.bf16 %v13837_v8  ;;  %v11895_v45 = vunpack.i.h.bf16 %v13865_v3 }
 0x15b   :  { %v13856_v38 = vpop.f32.mrf.mxu0 }
 0x15c   :  { %17736 = vst [vmem:[#allocation11_spill] sm:$0xff] %v13856_v38  ;;  %11244 = vmatmul.msk.f32.vlgmr.msrb.gmra.mxu1 %vm286_vm2, %v2561_v16  ;;  %v2944_v46 = vsel %vm2936_vm8, %v11880_v41, %v11884_v25  ;;  %12047 = vrot.lane.b32.xlu2 %v13468_v15, %s12737_s12  ;;  %s12750_s12 = smov 76  }
 0x15d   :  { %11245 = vmatmul.msk.f32.vlgmr.msrb.gmra.mxu2 %vm286_vm2, %v2561_v16  ;;  %11246 = vmatmul.msk.f32.vlgmr.msra.gmra.mxu3 %vm286_vm2, %v2561_v16 }
 0x15e   :  { %11247 = vmatmul.msk.f32.vlgmr.msrb.gmra.mxu0 %vm286_vm2, %v13737_v52  ;;  %3113 = vmatpush.msra.mxu3 %v2951_v63 }
 0x15f   :  { %3073 = vmatpush.msrb.mxu1 %v2939_v27  ;;  %3093 = vmatpush.msrb.mxu2 %v2937_v31  ;;  %v126_v27 = vmul.f32 0.001, %v13896_v26  ;;  %v2948_v31 = vsel %vm2936_vm8, %v11889_v56, %v11879_v57  ;;  %v13922_v56 = vpop.permute.xlu0 %11902 }
 0x160   :  { %v1301_v61 = vpop.f32.mrf.mxu2  ;;  %v1321_v35 = vpop.f32.mrf.mxu3  ;;  %3144 = vmatpush.msrb.mxu0 %v2950_v4  ;;  %v2946_v4 = vsel %vm2936_vm8, %v11879_v57, %v11880_v41  ;;  %v11894_v41 = vunpack.i.l.bf16 %v13865_v3  ;;  %12087 = vrot.lane.b32.xlu1 %v13468_v15, %s12738_s21 }
 0x161   :  { %v13881_v16 = vadd.f32 %v1301_v61, %v13723_v48  ;;  %v13884_v58 = vadd.f32 %v1321_v35, %v13725_v51  ;;  %v13886_v37 = vpop.f32.mrf.mxu1  ;;  %v30_v48 = vld [vmem:[%s17700_s2 + $0x40] sm:$0xff]  ;;  %v2942_v61 = vsel %vm2936_vm8, %v11884_v25, %v11895_v45  ;;  %v11890_v25 = vunpack.i.h.bf16 %v13839_v1  ;;  %12112 = vrot.lane.b32.xlu0 %v13423_v10, %s12739_s30 }
 0x162   :  { %17737 = vst [vmem:[#allocation12_spill] sm:$0xff] %v13886_v37  ;;  %v62_v63 = vmul.f32 0.999, %v30_v48  ;;  %v13920_v48 = vpop.permute.xlu1 %11907 }
 0x163   :  { %v13901_v51 = vpop.f32.mrf.mxu0 }
 0x164   :  { %17738 = vst [vmem:[#allocation13_spill] sm:$0xff] %v13901_v51  ;;  %11248 = vmatmul.msk.f32.vlgmr.msra.gmra.mxu1 %vm286_vm2, %v13737_v52  ;;  %v158_v35 = vadd.f32 %v126_v27, %v62_v63  ;;  %12062 = vrot.lane.b32.xlu2 %v13523_v50, %s12738_s21 }
 0x165   :  { %11249 = vmatmul.msk.f32.vlgmr.msra.gmra.mxu2 %vm286_vm2, %v13737_v52  ;;  %11250 = vmatmul.msk.f32.vlgmr.msrb.gmra.mxu3 %vm286_vm2, %v13737_v52 }
 0x166   :  { %11251 = vmatmul.msk.f32.vlgmr.msra.gmra.mxu0 %vm286_vm2, %v13737_v52  ;;  %3204 = vmatpush.msrb.mxu3 %v2944_v46  ;;  %191 = vst.msk [vmem:[%s17701_s6 + $0x40] sm:$0xff] %vm182_vm1, %v158_v35  ;;  %v2938_v35 = vsel %vm2936_vm8, %v11890_v25, %v11894_v41 }
 0x167   :  { %3164 = vmatpush.msra.mxu1 %v2948_v31  ;;  %3184 = vmatpush.msra.mxu2 %v2946_v4  ;;  %v11909_v31 = vunpack.i.l.bf16 %v13920_v48  ;;  %v11905_v4 = vunpack.i.h.bf16 %v13922_v56 }
 0x168   :  { %v1443_v57 = vpop.f32.mrf.mxu2  ;;  %v1463_v63 = vpop.f32.mrf.mxu3  ;;  %3224 = vmatpush.msra.mxu0 %v2942_v61  ;;  %v2940_v61 = vsel %vm2936_vm8, %v11895_v45, %v11890_v25  ;;  %v11904_v45 = vunpack.i.l.bf16 %v13922_v56  ;;  %12102 = vrot.lane.b32.xlu1 %v13523_v50, %s12739_s30 }
 0x169   :  { %v13933_v46 = vadd.f32 %v1443_v57, %v13774_v42  ;;  %v13936_v3 = vadd.f32 %v1463_v63, %v13777_v9  ;;  %v13938_v27 = vpop.f32.mrf.mxu1  ;;  %v2954_v42 = vld [vmem:[%s17701_s6 + $0x38] sm:$0xff]  ;;  %v2952_v9 = vsel %vm2936_vm8, %v11894_v41, %v11885_v47  ;;  %v11913_v57 = vpop.permute.xlu2 %11912  ;;  %v3342_v8 = vsel %vm3329_vm9, %v11905_v4, %v11909_v31  ;;  %12127 = vrot.lane.b32.xlu0 %v13468_v15, %s12739_s30 }
 0x16a   :  { %17739 = vst [vmem:[#allocation14_spill] sm:$0xff] %v13938_v27  ;;  %v11900_v47 = vunpack.i.h.bf16 %v13891_v17  ;;  %v11899_v63 = vunpack.i.l.bf16 %v13891_v17  ;;  %v11915_v27 = vunpack.i.h.bf16 %v11913_v57  ;;  %v11918_v56 = vpop.permute.xlu0 %11917  ;;  %vm8438_vm8 = vcmp.lt.s32.totalorder %v12942_v29, 85 }
 0x16b   :  { %v13947_v1 = vpop.f32.mrf.mxu0 }
 0x16c   :  { %17740 = vst [vmem:[#allocation15_spill] sm:$0xff] %v13947_v1  ;;  %11252 = vmatmul.msk.f32.vlgmr.msrb.gmra.mxu1 %vm286_vm2, %v13737_v52  ;;  %v3336_v17 = vsel %vm3329_vm9, %v11900_v47, %v11904_v45  ;;  %12077 = vrot.lane.b32.xlu2 %v13628_v18, %s12738_s21 }
 0x16d   :  { %11253 = vmatmul.msk.f32.vlgmr.msrb.gmra.mxu2 %vm286_vm2, %v13737_v52  ;;  %11254 = vmatmul.msk.f32.vlgmr.msra.gmra.mxu3 %vm286_vm2, %v13737_v52  ;;  %v3347_v50 = vld [vmem:[%s17701_s6 + $0x40] sm:$0xff] }
 0x16e   :  { %11255 = vmatmul.msk.f32.vlgmr.msrb.gmra.mxu0 %vm286_vm2, %v2954_v42  ;;  %3284 = vmatpush.msra.mxu3 %v2952_v9 }
 0x16f   :  { %3244 = vmatpush.msrb.mxu1 %v2940_v61  ;;  %3264 = vmatpush.msrb.mxu2 %v2938_v35  ;;  %v3334_v35 = vsel %vm3329_vm9, %v11904_v45, %v11915_v27 }
 0x170   :  { %v1523_v41 = vpop.f32.mrf.mxu2  ;;  %v1543_v25 = vpop.f32.mrf.mxu3  ;;  %3366 = vmatpush.msrb.mxu0 %v3342_v8  ;;  %12117 = vrot.lane.b32.xlu1 %v13628_v18, %s12739_s30 }
 0x171   :  { %v13975_v52 = vadd.f32 %v1523_v41, %v13814_v13  ;;  %v13978_v1 = vadd.f32 %v1543_v25, %v13817_v5  ;;  %v13980_v9 = vpop.f32.mrf.mxu1  ;;  %v3340_v13 = vsel %vm3329_vm9, %v11909_v31, %v11899_v63  ;;  %v3338_v5 = vsel %vm3329_vm9, %v11899_v63, %v11900_v47  ;;  %v13998_v8 = vpop.permute.xlu1 %11922 }
 0x172   :  { %17741 = vst [vmem:[#allocation16_spill] sm:$0xff] %v13980_v9  ;;  %v14000_v41 = vpop.permute.xlu2 %11927  ;;  %v11914_v25 = vunpack.i.l.bf16 %v11913_v57  ;;  %v11910_v31 = vunpack.i.h.bf16 %v13920_v48  ;;  %v17705_v57 = vunpack.i.h.bf16 %v13998_v8 }
 0x173   :  { %v13984_v61 = vpop.f32.mrf.mxu0 }
 0x174   :  { %17742 = vst [vmem:[#allocation17_spill] sm:$0xff] %v13984_v61  ;;  %11256 = vmatmul.msk.f32.vlgmr.msra.gmra.mxu1 %vm286_vm2, %v2954_v42  ;;  %12092 = vrot.lane.b32.xlu2 %v13669_v55, %s12738_s21  ;;  %s12752_s21 = smov 74  }
 0x175   :  { %11257 = vmatmul.msk.f32.vlgmr.msra.gmra.mxu2 %vm286_vm2, %v2954_v42  ;;  %11258 = vmatmul.msk.f32.vlgmr.msrb.gmra.mxu3 %vm286_vm2, %v2954_v42 }
 0x176   :  { %11259 = vmatmul.msk.f32.vlgmr.msra.gmra.mxu0 %vm286_vm2, %v2954_v42  ;;  %3426 = vmatpush.msrb.mxu3 %v3336_v17 }
 0x177   :  { %3386 = vmatpush.msra.mxu1 %v3340_v13  ;;  %3406 = vmatpush.msra.mxu2 %v3338_v5  ;;  %v11929_v13 = vunpack.i.l.bf16 %v14000_v41  ;;  %v3344_v5 = vsel %vm3329_vm9, %v11914_v25, %v11905_v4  ;;  %v11924_v4 = vunpack.i.l.bf16 %v13998_v8 }
 0x178   :  { %v1614_v47 = vpop.f32.mrf.mxu2  ;;  %v1634_v63 = vpop.f32.mrf.mxu3  ;;  %3446 = vmatpush.msra.mxu0 %v3334_v35  ;;  %12132 = vrot.lane.b32.xlu1 %v13669_v55, %s12739_s30 }
 0x179   :  { %v14006_v45 = vadd.f32 %v1614_v47, %v13845_v21  ;;  %v14009_v17 = vadd.f32 %v1634_v63, %v13848_v2  ;;  %v14011_v61 = vpop.f32.mrf.mxu1  ;;  %v3332_v21 = vsel %vm3329_vm9, %v11915_v27, %v11910_v31  ;;  %v3330_v2 = vsel %vm3329_vm9, %v11910_v31, %v11914_v25  ;;  %v11933_v35 = vpop.permute.xlu0 %11932 }
 0x17a   :  { %17743 = vst [vmem:[#allocation18_spill] sm:$0xff] %v14011_v61  ;;  %v3343_v39 = vsel %vm3329_vm9, %v17705_v57, %v11929_v13  ;;  %v11920_v27 = vunpack.i.h.bf16 %v11918_v56  ;;  %v11919_v47 = vunpack.i.l.bf16 %v11918_v56  ;;  %v31_v56 = vld [vmem:[%s17700_s2 + $0x48] sm:$0xff]  ;;  %v11934_v61 = vunpack.i.l.bf16 %v11933_v35 }
 0x17b   :  { %v14017_v48 = vpop.f32.mrf.mxu0 }
 0x17c   :  { %17744 = vst [vmem:[#allocation19_spill] sm:$0xff] %v14017_v48  ;;  %11260 = vmatmul.msk.f32.vlgmr.msrb.gmra.mxu1 %vm286_vm2, %v2954_v42  ;;  %v14045_v48 = vpop.permute.xlu1 %11937  ;;  %12107 = vrot.lane.b32.xlu2 %v13716_v32, %s12739_s30 }
 0x17d   :  { %11261 = vmatmul.msk.f32.vlgmr.msrb.gmra.mxu2 %vm286_vm2, %v2954_v42  ;;  %11262 = vmatmul.msk.f32.vlgmr.msra.gmra.mxu3 %vm286_vm2, %v2954_v42 }
 0x17e   :  { %11263 = vmatmul.msk.f32.vlgmr.msrb.gmra.mxu0 %vm286_vm2, %v13896_v26  ;;  %3506 = vmatpush.msra.mxu3 %v3344_v5  ;;  %v11935_v5 = vunpack.i.h.bf16 %v11933_v35 }
 0x17f   :  { %3466 = vmatpush.msrb.mxu1 %v3332_v21  ;;  %3486 = vmatpush.msrb.mxu2 %v3330_v2  ;;  %v14050_v21 = vld [vmem:[%s17699_s1 + $0x48] sm:$0xff] }
 0x180   :  { %v1694_v25 = vpop.f32.mrf.mxu2  ;;  %v1714_v31 = vpop.f32.mrf.mxu3  ;;  %3537 = vmatpush.msrb.mxu0 %v3343_v39  ;;  %v127_v39 = vmul.f32 0.001, %v14050_v21  ;;  %12147 = vrot.lane.b32.xlu1 %v13716_v32, %s12740_s19 }
 0x181   :  { %v14038_v42 = vadd.f32 %v1694_v25, %v13881_v16  ;;  %v14041_v63 = vadd.f32 %v1714_v31, %v13884_v58  ;;  %v14043_v57 = vpop.f32.mrf.mxu1  ;;  %v3337_v16 = vsel %vm3329_vm9, %v11920_v27, %v11924_v4  ;;  %v63_v58 = vmul.f32 0.999, %v31_v56 }
 0x182   :  { %17745 = vst [vmem:[#allocation20_spill] sm:$0xff] %v14043_v57  ;;  %v3341_v25 = vsel %vm3329_vm9, %v11929_v13, %v11919_v47  ;;  %v3339_v31 = vsel %vm3329_vm9, %v11919_v47, %v11920_v27  ;;  %v3335_v56 = vsel %vm3329_vm9, %v11924_v4, %v11935_v5  ;;  %v14074_v57 = vpop.permute.xlu2 %11942  ;;  %v14076_v13 = vpop.permute.xlu0 %11947  ;;  %v11930_v27 = vunpack.i.h.bf16 %v14000_v41 }
 0x183   :  { %v14055_v2 = vpop.f32.mrf.mxu0 }
 0x184   :  { %17746 = vst [vmem:[#allocation21_spill] sm:$0xff] %v14055_v2  ;;  %11264 = vmatmul.msk.f32.vlgmr.msra.gmra.mxu1 %vm286_vm2, %v13896_v26  ;;  %v159_v2 = vadd.f32 %v127_v39, %v63_v58  ;;  %v11945_v39 = vunpack.i.h.bf16 %v14074_v57  ;;  %v3331_v30 = vsel %vm3329_vm9, %v11930_v27, %v11934_v61 }
 0x185   :  { %11265 = vmatmul.msk.f32.vlgmr.msra.gmra.mxu2 %vm286_vm2, %v13896_v26  ;;  %11266 = vmatmul.msk.f32.vlgmr.msrb.gmra.mxu3 %vm286_vm2, %v13896_v26 }
 0x186   :  { %11267 = vmatmul.msk.f32.vlgmr.msra.gmra.mxu0 %vm286_vm2, %v13896_v26  ;;  %3597 = vmatpush.msrb.mxu3 %v3337_v16  ;;  %192 = vst.msk [vmem:[%s17701_s6 + $0x48] sm:$0xff] %vm182_vm1, %v159_v2  ;;  %v11949_v2 = vunpack.i.l.bf16 %v14076_v13 }
 0x187   :  { %3557 = vmatpush.msra.mxu1 %v3341_v25  ;;  %3577 = vmatpush.msra.mxu2 %v3339_v31  ;;  %v3333_v25 = vsel %vm3329_vm9, %v11935_v5, %v11930_v27  ;;  %v11953_v31 = vpop.permute.xlu1 %11952  ;;  %v11944_v5 = vunpack.i.l.bf16 %v14074_v57 }
 0x188   :  { %v1836_v4 = vpop.f32.mrf.mxu2  ;;  %v1856_v47 = vpop.f32.mrf.mxu3  ;;  %3617 = vmatpush.msra.mxu0 %v3335_v56  ;;  %v11940_v56 = vunpack.i.h.bf16 %v14045_v48 }
 0x189   :  { %v14086_v16 = vadd.f32 %v1836_v4, %v13933_v46  ;;  %v14089_v35 = vadd.f32 %v1856_v47, %v13936_v3  ;;  %v14091_v58 = vpop.f32.mrf.mxu1  ;;  %v17749_v46 = vunpack.i.h.bf16 %v13998_v8  ;;  %v3735_v8 = vsel %vm3722_vm10, %v11945_v39, %v11949_v2 }
 0x18a   :  { %17747 = vst [vmem:[#allocation22_spill] sm:$0xff] %v14091_v58  ;;  %v11939_v4 = vunpack.i.l.bf16 %v14045_v48  ;;  %v14135_v57 = vpop.permute.xlu2 %11957  ;;  %v3729_v48 = vsel %vm3722_vm10, %v11940_v56, %v11944_v5 }
 0x18b   :  { %v14098_v41 = vpop.f32.mrf.mxu0  ;;  %v3345_v3 = vsel %vm3329_vm9, %v11934_v61, %v17749_v46  ;;  %vm8831_vm9 = vcmp.lt.s32.totalorder %v12942_v29, 84 }
 0x18c   :  { %17748 = vst [vmem:[#allocation23_spill] sm:$0xff] %v14098_v41  ;;  %11268 = vmatmul.msk.f32.vlgmr.msrb.gmra.mxu1 %vm286_vm2, %v13896_v26 }
 0x18d   :  { %11269 = vmatmul.msk.f32.vlgmr.msrb.gmra.mxu2 %vm286_vm2, %v13896_v26  ;;  %11270 = vmatmul.msk.f32.vlgmr.msra.gmra.mxu3 %vm286_vm2, %v13896_v26  ;;  %v14280_v32 = vld [vmem:[%s17701_s6 + $0x48] sm:$0xff] }
 0x18e   :  { %11271 = vmatmul.msk.f32.vlgmr.msrb.gmra.mxu0 %vm286_vm2, %v3347_v50  ;;  %3677 = vmatpush.msra.mxu3 %v3345_v3  ;;  %v11955_v3 = vunpack.i.h.bf16 %v11953_v31 }
 0x18f   :  { %3637 = vmatpush.msrb.mxu1 %v3333_v25  ;;  %3657 = vmatpush.msrb.mxu2 %v3331_v30  ;;  %v14151_v30 = vpop.permute.xlu1 %11967 }
 0x190   :  { %v1916_v61 = vpop.f32.mrf.mxu2  ;;  %v1936_v27 = vpop.f32.mrf.mxu3  ;;  %3759 = vmatpush.msrb.mxu0 %v3735_v8  ;;  %v3727_v10 = vsel %vm3722_vm10, %v11944_v5, %v11955_v3 }
 0x191   :  { %v14126_v26 = vadd.f32 %v1916_v61, %v13975_v52  ;;  %v14129_v47 = vadd.f32 %v1936_v27, %v13978_v1  ;;  %v14131_v46 = vpop.f32.mrf.mxu1  ;;  %v3733_v52 = vsel %vm3722_vm10, %v11949_v2, %v11939_v4  ;;  %v3731_v1 = vsel %vm3722_vm10, %v11939_v4, %v11940_v56  ;;  %v14153_v8 = vpop.permute.xlu0 %11962 }
 0x192   :  { %17750 = vst [vmem:[#allocation24_spill] sm:$0xff] %v14131_v46  ;;  %v11954_v61 = vunpack.i.l.bf16 %v11953_v31  ;;  %v11950_v2 = vunpack.i.h.bf16 %v14076_v13  ;;  %v11969_v31 = vunpack.i.l.bf16 %v14151_v30 }
 0x193   :  { %v14137_v25 = vpop.f32.mrf.mxu0 }
 0x194   :  { %17751 = vst [vmem:[#allocation25_spill] sm:$0xff] %v14137_v25  ;;  %11272 = vmatmul.msk.f32.vlgmr.msra.gmra.mxu1 %vm286_vm2, %v3347_v50  ;;  %v3737_v18 = vsel %vm3722_vm10, %v11954_v61, %v11945_v39  ;;  %v11960_v39 = vunpack.i.h.bf16 %v14135_v57 }
 0x195   :  { %11273 = vmatmul.msk.f32.vlgmr.msra.gmra.mxu2 %vm286_vm2, %v3347_v50  ;;  %11274 = vmatmul.msk.f32.vlgmr.msrb.gmra.mxu3 %vm286_vm2, %v3347_v50 }
 0x196   :  { %11275 = vmatmul.msk.f32.vlgmr.msra.gmra.mxu0 %vm286_vm2, %v3347_v50  ;;  %3819 = vmatpush.msrb.mxu3 %v3729_v48 }
 0x197   :  { %3779 = vmatpush.msra.mxu1 %v3733_v52  ;;  %3799 = vmatpush.msra.mxu2 %v3731_v1  ;;  %v17706_v52 = vunpack.i.h.bf16 %v14153_v8  ;;  %v14181_v1 = vpop.permute.xlu2 %11972 }
 0x198   :  { %v2007_v56 = vpop.f32.mrf.mxu2  ;;  %v2027_v27 = vpop.f32.mrf.mxu3  ;;  %3839 = vmatpush.msra.mxu0 %v3727_v10 }
 0x199   :  { %v14159_v5 = vadd.f32 %v2007_v56, %v14006_v45  ;;  %v14162_v4 = vadd.f32 %v2027_v27, %v14009_v17  ;;  %v14164_v48 = vpop.f32.mrf.mxu1  ;;  %v3725_v45 = vsel %vm3722_vm10, %v11955_v3, %v11950_v2  ;;  %v3723_v17 = vsel %vm3722_vm10, %v11950_v2, %v11954_v61 }
 0x19a   :  { %17752 = vst [vmem:[#allocation26_spill] sm:$0xff] %v14164_v48  ;;  %v3736_v15 = vsel %vm3722_vm10, %v17706_v52, %v11969_v31  ;;  %v11964_v3 = vunpack.i.l.bf16 %v14153_v8  ;;  %v11959_v2 = vunpack.i.l.bf16 %v14135_v57  ;;  %v14212_v57 = vld [vmem:[%s17699_s1 + $0x50] sm:$0xff] }
 0x19b   :  { %v14172_v13 = vpop.f32.mrf.mxu0 }
 0x19c   :  { %17753 = vst [vmem:[#allocation27_spill] sm:$0xff] %v14172_v13  ;;  %11276 = vmatmul.msk.f32.vlgmr.msrb.gmra.mxu1 %vm286_vm2, %v3347_v50  ;;  %v3732_v52 = vsel %vm3722_vm10, %v11959_v2, %v11960_v39 }
 0x19d   :  { %11277 = vmatmul.msk.f32.vlgmr.msrb.gmra.mxu2 %vm286_vm2, %v3347_v50  ;;  %11278 = vmatmul.msk.f32.vlgmr.msra.gmra.mxu3 %vm286_vm2, %v3347_v50 }
 0x19e   :  { %11279 = vmatmul.msk.f32.vlgmr.msrb.gmra.mxu0 %vm286_vm2, %v14050_v21  ;;  %3899 = vmatpush.msra.mxu3 %v3737_v18  ;;  %v11975_v18 = vunpack.i.h.bf16 %v14181_v1 }
 0x19f   :  { %3859 = vmatpush.msrb.mxu1 %v3725_v45  ;;  %3879 = vmatpush.msrb.mxu2 %v3723_v17  ;;  %v14207_v45 = vpop.permute.xlu0 %11977  ;;  %v3730_v17 = vsel %vm3722_vm10, %v11960_v39, %v11964_v3  ;;  %v14243_v39 = vld [vmem:[%s17698_s0 + $0x20] sm:$0xff] }
 0x1a0   :  { %v2087_v10 = vpop.f32.mrf.mxu2  ;;  %v2107_v61 = vpop.f32.mrf.mxu3  ;;  %3930 = vmatpush.msrb.mxu0 %v3736_v15 }
 0x1a1   :  { %v14197_v50 = vadd.f32 %v2087_v10, %v14038_v42  ;;  %v14200_v56 = vadd.f32 %v2107_v61, %v14041_v63  ;;  %v14202_v27 = vpop.f32.mrf.mxu1  ;;  %v32_v42 = vld [vmem:[%s17700_s2 + $0x50] sm:$0xff]  ;;  %v128_v10 = vmul.f32 0.001, %v14212_v57  ;;  %v3734_v61 = vsel %vm3722_vm10, %v11969_v31, %v11959_v2  ;;  %v14238_v31 = vpop.permute.xlu2 %11987  ;;  %v14248_v2 = vld [vmem:[%s17698_s0] sm:$0xff] }
 0x1a2   :  { %17754 = vst [vmem:[#allocation28_spill] sm:$0xff] %v14202_v27  ;;  %v64_v15 = vmul.f32 0.999, %v32_v42  ;;  %v3728_v42 = vsel %vm3722_vm10, %v11964_v3, %v11975_v18  ;;  %v14236_v27 = vpop.permute.xlu1 %11982  ;;  %v14252_v3 = vpack.i.bf16 %v14248_v2, %v14243_v39 }
 0x1a3   :  { %v14217_v63 = vpop.f32.mrf.mxu0 }
 0x1a4   :  { %17755 = vst [vmem:[#allocation29_spill] sm:$0xff] %v14217_v63  ;;  %11280 = vmatmul.msk.f32.vlgmr.msra.gmra.mxu1 %vm286_vm2, %v14050_v21  ;;  %v160_v63 = vadd.f32 %v128_v10, %v64_v15  ;;  %v11970_v15 = vunpack.i.h.bf16 %v14151_v30  ;;  %12142 = vrot.lane.b32.xlu0 %v14252_v3, %s12740_s19 }
 0x1a5   :  { %11281 = vmatmul.msk.f32.vlgmr.msra.gmra.mxu2 %vm286_vm2, %v14050_v21  ;;  %11282 = vmatmul.msk.f32.vlgmr.msrb.gmra.mxu3 %vm286_vm2, %v14050_v21 }
 0x1a6   :  { %11283 = vmatmul.msk.f32.vlgmr.msra.gmra.mxu0 %vm286_vm2, %v14050_v21  ;;  %3990 = vmatpush.msrb.mxu3 %v3730_v17  ;;  %v11974_v17 = vunpack.i.l.bf16 %v14181_v1  ;;  %193 = vst.msk [vmem:[%s17701_s6 + $0x50] sm:$0xff] %vm182_vm1, %v160_v63  ;;  %v11989_v63 = vunpack.i.l.bf16 %v14238_v31 }
 0x1a7   :  { %3950 = vmatpush.msra.mxu1 %v3734_v61  ;;  %3970 = vmatpush.msra.mxu2 %v3732_v52  ;;  %v17707_v61 = vunpack.i.h.bf16 %v14236_v27 }
 0x1a8   :  { %v2229_v10 = vpop.f32.mrf.mxu2  ;;  %v2249_v13 = vpop.f32.mrf.mxu3  ;;  %4010 = vmatpush.msra.mxu0 %v3728_v42  ;;  %v3724_v42 = vsel %vm3722_vm10, %v11970_v15, %v11974_v17 }
 0x1a9   :  { %v14263_v48 = vadd.f32 %v2229_v10, %v14086_v16  ;;  %v14266_v1 = vadd.f32 %v2249_v13, %v14089_v35  ;;  %v14268_v52 = vpop.f32.mrf.mxu1  ;;  %v17758_v16 = vunpack.i.h.bf16 %v14153_v8  ;;  %v3726_v13 = vsel %vm3722_vm10, %v11975_v18, %v11970_v15  ;;  %v11993_v10 = vpop.permute.xlu0 %11992  ;;  %v12681_v18 = vld [vmem:[%s17698_s0 + $0x40] sm:$0xff] }
 0x1aa   :  { %17756 = vst [vmem:[#allocation30_spill] sm:$0xff] %v14268_v52  ;;  %v4128_v8 = vsel %vm4115_vm11, %v17707_v61, %v11989_v63  ;;  %v11995_v25 = vunpack.i.h.bf16 %v11993_v10  ;;  %v14323_v46 = vpop.permute.xlu1 %11997 }
 0x1ab   :  { %v14275_v30 = vpop.f32.mrf.mxu0  ;;  %v3738_v35 = vsel %vm3722_vm10, %v11974_v17, %v17758_v16  ;;  %v12682_v17 = vld [vmem:[%s17698_s0 + $0x60] sm:$0xff]  ;;  %v11980_v16 = vunpack.i.h.bf16 %v14207_v45  ;;  %vm9224_vm10 = vcmp.lt.s32.totalorder %v12942_v29, 83 }
 0x1ac   :  { %17757 = vst [vmem:[#allocation31_spill] sm:$0xff] %v14275_v30  ;;  %11284 = vmatmul.msk.f32.vlgmr.msrb.gmra.mxu1 %vm286_vm2, %v14050_v21  ;;  %v14308_v15 = vpack.i.bf16 %v12681_v18, %v12682_v17 }
 0x1ad   :  { %11285 = vmatmul.msk.f32.vlgmr.msrb.gmra.mxu2 %vm286_vm2, %v14050_v21  ;;  %11286 = vmatmul.msk.f32.vlgmr.msra.gmra.mxu3 %vm286_vm2, %v14050_v21  ;;  %v11984_v21 = vunpack.i.l.bf16 %v14236_v27 }
 0x1ae   :  { %11287 = vmatmul.msk.f32.vlgmr.msrb.gmra.mxu0 %vm286_vm2, %v14280_v32  ;;  %4070 = vmatpush.msra.mxu3 %v3738_v35  ;;  %v11979_v35 = vunpack.i.l.bf16 %v14207_v45 }
 0x1af   :  { %4030 = vmatpush.msrb.mxu1 %v3726_v13  ;;  %4050 = vmatpush.msrb.mxu2 %v3724_v42  ;;  %v4122_v45 = vsel %vm4115_vm11, %v11980_v16, %v11984_v21 }
 0x1b0   :  { %v2309_v61 = vpop.f32.mrf.mxu2  ;;  %v2329_v30 = vpop.f32.mrf.mxu3  ;;  %4152 = vmatpush.msrb.mxu0 %v4128_v8  ;;  %12122 = vrot.lane.b32.xlu2 %v14308_v15, %s12739_s30  ;;  %v12684_v8 = vld [vmem:[%s17698_s0 + $0x58] sm:$0xff] }
 0x1b1   :  { %v14316_v52 = vadd.f32 %v2309_v61, %v14126_v26  ;;  %v14319_v18 = vadd.f32 %v2329_v30, %v14129_v47  ;;  %v14321_v17 = vpop.f32.mrf.mxu1  ;;  %v4126_v26 = vsel %vm4115_vm11, %v11989_v63, %v11979_v35  ;;  %v4124_v47 = vsel %vm4115_vm11, %v11979_v35, %v11980_v16  ;;  %v14343_v30 = vpop.permute.xlu2 %12002  ;;  %v14350_v63 = vld [vmem:[%s17698_s0 + $0x50] sm:$0xff]  ;;  %12162 = vrot.lane.b32.xlu1 %v14308_v15, %s12740_s19 }
 0x1b2   :  { %17759 = vst [vmem:[#allocation32_spill] sm:$0xff] %v14321_v17  ;;  %v4120_v61 = vsel %vm4115_vm11, %v11984_v21, %v11995_v25  ;;  %v14345_v42 = vpop.permute.xlu0 %12007  ;;  %v14356_v16 = vpack.i.bf16 %v12684_v8, %v14350_v63  ;;  %v11994_v21 = vunpack.i.l.bf16 %v11993_v10  ;;  %v11990_v35 = vunpack.i.h.bf16 %v14238_v31  ;;  %v14405_v8 = vld [vmem:[%s17698_s0 + $0x18] sm:$0xff] }
 0x1b3   :  { %v14325_v13 = vpop.f32.mrf.mxu0  ;;  %v17708_v10 = vunpack.i.h.bf16 %v14343_v30 }
 0x1b4   :  { %17760 = vst [vmem:[#allocation33_spill] sm:$0xff] %v14325_v13  ;;  %11288 = vmatmul.msk.f32.vlgmr.msra.gmra.mxu1 %vm286_vm2, %v14280_v32  ;;  %12157 = vrot.lane.b32.xlu0 %v14356_v16, %s12740_s19 }
 0x1b5   :  { %11289 = vmatmul.msk.f32.vlgmr.msra.gmra.mxu2 %vm286_vm2, %v14280_v32  ;;  %11290 = vmatmul.msk.f32.vlgmr.msrb.gmra.mxu3 %vm286_vm2, %v14280_v32 }
 0x1b6   :  { %11291 = vmatmul.msk.f32.vlgmr.msra.gmra.mxu0 %vm286_vm2, %v14280_v32  ;;  %4212 = vmatpush.msrb.mxu3 %v4122_v45 }
 0x1b7   :  { %4172 = vmatpush.msra.mxu1 %v4126_v26  ;;  %4192 = vmatpush.msra.mxu2 %v4124_v47  ;;  %v12009_v26 = vunpack.i.l.bf16 %v14345_v42  ;;  %v17763_v47 = vunpack.i.h.bf16 %v14236_v27 }
 0x1b8   :  { %v2400_v45 = vpop.f32.mrf.mxu2  ;;  %v2420_v13 = vpop.f32.mrf.mxu3  ;;  %4232 = vmatpush.msra.mxu0 %v4120_v61 }
 0x1b9   :  { %v14362_v17 = vadd.f32 %v2400_v45, %v14159_v5  ;;  %v14365_v41 = vadd.f32 %v2420_v13, %v14162_v4  ;;  %v14367_v58 = vpop.f32.mrf.mxu1  ;;  %v4130_v5 = vsel %vm4115_vm11, %v11994_v21, %v17763_v47  ;;  %v4118_v4 = vsel %vm4115_vm11, %v11995_v25, %v11990_v35  ;;  %v14385_v61 = vpop.permute.xlu1 %12012  ;;  %v14400_v25 = vld [vmem:[%s17698_s0 + $0x10] sm:$0xff] }
 0x1ba   :  { %17761 = vst [vmem:[#allocation34_spill] sm:$0xff] %v14367_v58  ;;  %v4116_v13 = vsel %vm4115_vm11, %v11990_v35, %v11994_v21  ;;  %v4129_v27 = vsel %vm4115_vm11, %v17708_v10, %v12009_v26  ;;  %v12000_v21 = vunpack.i.h.bf16 %v14323_v46  ;;  %v12004_v35 = vunpack.i.l.bf16 %v14343_v30 }
 0x1bb   :  { %v14373_v31 = vpop.f32.mrf.mxu0  ;;  %v12015_v9 = vunpack.i.h.bf16 %v14385_v61 }
 0x1bc   :  { %17762 = vst [vmem:[#allocation35_spill] sm:$0xff] %v14373_v31  ;;  %11292 = vmatmul.msk.f32.vlgmr.msrb.gmra.mxu1 %vm286_vm2, %v14280_v32  ;;  %12172 = vrot.lane.b32.xlu0 %v13669_v55, %s12740_s19 }
 0x1bd   :  { %11293 = vmatmul.msk.f32.vlgmr.msrb.gmra.mxu2 %vm286_vm2, %v14280_v32  ;;  %11294 = vmatmul.msk.f32.vlgmr.msra.gmra.mxu3 %vm286_vm2, %v14280_v32  ;;  %v14409_v32 = vpack.i.bf16 %v14405_v8, %v14400_v25 }
 0x1be   :  { %11295 = vmatmul.msk.f32.vlgmr.msrb.gmra.mxu0 %vm286_vm2, %v14212_v57  ;;  %4292 = vmatpush.msra.mxu3 %v4130_v5  ;;  %v11999_v5 = vunpack.i.l.bf16 %v14323_v46  ;;  %v14432_v46 = vld [vmem:[%s17699_s1 + $0x58] sm:$0xff] }
 0x1bf   :  { %4252 = vmatpush.msrb.mxu1 %v4118_v4  ;;  %4272 = vmatpush.msrb.mxu2 %v4116_v13  ;;  %v14427_v4 = vpop.permute.xlu2 %12017  ;;  %v4123_v13 = vsel %vm4115_vm11, %v12000_v21, %v12004_v35 }
 0x1c0   :  { %v2480_v45 = vpop.f32.mrf.mxu2  ;;  %v2500_v47 = vpop.f32.mrf.mxu3  ;;  %4323 = vmatpush.msrb.mxu0 %v4129_v27  ;;  %12137 = vrot.lane.b32.xlu2 %v14409_v32, %s12740_s19  ;;  %v4127_v55 = vsel %vm4115_vm11, %v12009_v26, %v11999_v5  ;;  %v12019_v6 = vunpack.i.l.bf16 %v14427_v4 }
 0x1c1   :  { %v14417_v10 = vadd.f32 %v2480_v45, %v14197_v50  ;;  %v14420_v31 = vadd.f32 %v2500_v47, %v14200_v56  ;;  %v14422_v58 = vpop.f32.mrf.mxu1  ;;  %v33_v50 = vld [vmem:[%s17700_s2 + $0x58] sm:$0xff]  ;;  %v129_v45 = vmul.f32 0.001, %v14432_v46  ;;  %v4125_v47 = vsel %vm4115_vm11, %v11999_v5, %v12000_v21  ;;  %v14458_v26 = vpop.permute.xlu0 %12022  ;;  %v14464_v5 = vld [vmem:[%s17698_s0 + $0x28] sm:$0xff]  ;;  %12177 = vrot.lane.b32.xlu1 %v14409_v32, %s12741_s25 }
 0x1c2   :  { %17764 = vst [vmem:[#allocation36_spill] sm:$0xff] %v14422_v58  ;;  %v65_v27 = vmul.f32 0.999, %v33_v50  ;;  %v4121_v50 = vsel %vm4115_vm11, %v12004_v35, %v12015_v9  ;;  %v14456_v58 = vpop.permute.xlu1 %12027  ;;  %v12014_v21 = vunpack.i.l.bf16 %v14385_v61  ;;  %v14469_v35 = vld [vmem:[%s17698_s0 + $0x38] sm:$0xff]  ;;  %v14478_v61 = vld [vmem:[%s17698_s0 + $0x30] sm:$0xff] }
 0x1c3   :  { %v14437_v56 = vpop.f32.mrf.mxu0  ;;  %v12029_v23 = vunpack.i.l.bf16 %v14456_v58 }
 0x1c4   :  { %17765 = vst [vmem:[#allocation37_spill] sm:$0xff] %v14437_v56  ;;  %11296 = vmatmul.msk.f32.vlgmr.msra.gmra.mxu1 %vm286_vm2, %v14212_v57  ;;  %v161_v56 = vadd.f32 %v129_v45, %v65_v27  ;;  %v14483_v27 = vld [vmem:[%s17698_s0 + $0x8] sm:$0xff] }
 0x1c5   :  { %11297 = vmatmul.msk.f32.vlgmr.msra.gmra.mxu2 %vm286_vm2, %v14212_v57  ;;  %11298 = vmatmul.msk.f32.vlgmr.msrb.gmra.mxu3 %vm286_vm2, %v14212_v57  ;;  %v14487_v45 = vpack.i.bf16 %v14478_v61, %v14483_v27 }
 0x1c6   :  { %11299 = vmatmul.msk.f32.vlgmr.msra.gmra.mxu0 %vm286_vm2, %v14212_v57  ;;  %4383 = vmatpush.msrb.mxu3 %v4123_v13  ;;  %v14473_v13 = vpack.i.bf16 %v14464_v5, %v14469_v35  ;;  %194 = vst.msk [vmem:[%s17701_s6 + $0x58] sm:$0xff] %vm182_vm1, %v161_v56  ;;  %v12025_v56 = vunpack.i.h.bf16 %v14458_v26 }
 0x1c7   :  { %4343 = vmatpush.msra.mxu1 %v4127_v55  ;;  %4363 = vmatpush.msra.mxu2 %v4125_v47  ;;  %v12010_v55 = vunpack.i.h.bf16 %v14345_v42 }
 0x1c8   :  { %v2622_v47 = vpop.f32.mrf.mxu2  ;;  %v2642_v51 = vpop.f32.mrf.mxu3  ;;  %4403 = vmatpush.msra.mxu0 %v4121_v50  ;;  %12152 = vrot.lane.b32.xlu2 %v14473_v13, %s12740_s19 }
 0x1c9   :  { %v14497_v37 = vadd.f32 %v2622_v47, %v14263_v48  ;;  %v14500_v38 = vadd.f32 %v2642_v51, %v14266_v1  ;;  %v14502_v40 = vpop.f32.mrf.mxu1  ;;  %12187 = vrot.lane.b32.xlu0 %v14487_v45, %s12741_s25  ;;  %v4133_v51 = vld [vmem:[%s17701_s6 + $0x50] sm:$0xff]  ;;  %v17768_v48 = vunpack.i.h.bf16 %v14343_v30  ;;  %v4119_v50 = vsel %vm4115_vm11, %v12015_v9, %v12010_v55  ;;  %v14536_v9 = vld [vmem:[%s17698_s0 + $0x48] sm:$0xff]  ;;  %12192 = vrot.lane.b32.xlu1 %v14473_v13, %s12741_s25 }
 0x1ca   :  { %17766 = vst [vmem:[#allocation38_spill] sm:$0xff] %v14502_v40  ;;  %v4117_v47 = vsel %vm4115_vm11, %v12010_v55, %v12014_v21  ;;  %v12033_v40 = vpop.permute.xlu2 %12032  ;;  %v4521_v30 = vsel %vm4508_vm12, %v12025_v56, %v12029_v23 }
 0x1cb   :  { %v14511_v42 = vpop.f32.mrf.mxu0  ;;  %v4131_v1 = vsel %vm4115_vm11, %v12014_v21, %v17768_v48  ;;  %v12692_v21 = vld [vmem:[%s17698_s0 + $0x70] sm:$0xff]  ;;  %v12024_v48 = vunpack.i.l.bf16 %v14458_v26  ;;  %v12035_v22 = vunpack.i.h.bf16 %v12033_v40  ;;  %v12038_v26 = vpop.permute.xlu0 %12037  ;;  %vm9617_vm11 = vcmp.lt.s32.totalorder %v12942_v29, 76 }
 0x1cc   :  { %17767 = vst [vmem:[#allocation39_spill] sm:$0xff] %v14511_v42  ;;  %11300 = vmatmul.msk.f32.vlgmr.msrb.gmra.mxu1 %vm286_vm2, %v14212_v57  ;;  %v14542_v55 = vpack.i.bf16 %v12692_v21, %v14536_v9 }
 0x1cd   :  { %11301 = vmatmul.msk.f32.vlgmr.msrb.gmra.mxu2 %vm286_vm2, %v14212_v57  ;;  %11302 = vmatmul.msk.f32.vlgmr.msra.gmra.mxu3 %vm286_vm2, %v14212_v57  ;;  %v12020_v57 = vunpack.i.h.bf16 %v14427_v4 }
 0x1ce   :  { %11303 = vmatmul.msk.f32.vlgmr.msrb.gmra.mxu0 %vm286_vm2, %v4133_v51  ;;  %4463 = vmatpush.msra.mxu3 %v4131_v1 }
 0x1cf   :  { %4423 = vmatpush.msrb.mxu1 %v4119_v50  ;;  %4443 = vmatpush.msrb.mxu2 %v4117_v47  ;;  %v4515_v4 = vsel %vm4508_vm12, %v12020_v57, %v12024_v48  ;;  %v14573_v47 = vpop.permute.xlu1 %12042 }
 0x1d0   :  { %v2702_v42 = vpop.f32.mrf.mxu2  ;;  %v2722_v1 = vpop.f32.mrf.mxu3  ;;  %4545 = vmatpush.msrb.mxu0 %v4521_v30  ;;  %12167 = vrot.lane.b32.xlu2 %v14542_v55, %s12740_s19 }
 0x1d1   :  { %v14550_v24 = vadd.f32 %v2702_v42, %v14316_v52  ;;  %v14553_v21 = vadd.f32 %v2722_v1, %v14319_v18  ;;  %v14555_v34 = vpop.f32.mrf.mxu1  ;;  %v4519_v52 = vsel %vm4508_vm12, %v12029_v23, %v12019_v6  ;;  %v4517_v18 = vsel %vm4508_vm12, %v12019_v6, %v12020_v57  ;;  %12207 = vrot.lane.b32.xlu1 %v14542_v55, %s12741_s25 }
 0x1d2   :  { %17769 = vst [vmem:[#allocation40_spill] sm:$0xff] %v14555_v34  ;;  %v4513_v42 = vsel %vm4508_vm12, %v12024_v48, %v12035_v22  ;;  %v14575_v30 = vpop.permute.xlu2 %12047  ;;  %v12034_v1 = vunpack.i.l.bf16 %v12033_v40  ;;  %v12030_v23 = vunpack.i.h.bf16 %v14456_v58  ;;  %v17709_v40 = vunpack.i.h.bf16 %v14573_v47  ;;  %12202 = vrot.lane.b32.xlu0 %v14308_v15, %s12741_s25 }
 0x1d3   :  { %v14559_v50 = vpop.f32.mrf.mxu0 }
 0x1d4   :  { %17770 = vst [vmem:[#allocation41_spill] sm:$0xff] %v14559_v50  ;;  %11304 = vmatmul.msk.f32.vlgmr.msra.gmra.mxu1 %vm286_vm2, %v4133_v51 }
 0x1d5   :  { %11305 = vmatmul.msk.f32.vlgmr.msra.gmra.mxu2 %vm286_vm2, %v4133_v51  ;;  %11306 = vmatmul.msk.f32.vlgmr.msrb.gmra.mxu3 %vm286_vm2, %v4133_v51 }
 0x1d6   :  { %11307 = vmatmul.msk.f32.vlgmr.msra.gmra.mxu0 %vm286_vm2, %v4133_v51  ;;  %4605 = vmatpush.msrb.mxu3 %v4515_v4 }
 0x1d7   :  { %4565 = vmatpush.msra.mxu1 %v4519_v52  ;;  %4585 = vmatpush.msra.mxu2 %v4517_v18  ;;  %v12049_v52 = vunpack.i.l.bf16 %v14575_v30  ;;  %v4523_v18 = vsel %vm4508_vm12, %v12034_v1, %v12025_v56  ;;  %v12044_v56 = vunpack.i.l.bf16 %v14573_v47  ;;  %v14620_v34 = vpop.permute.xlu1 %12057 }
 0x1d8   :  { %v2793_v6 = vpop.f32.mrf.mxu2  ;;  %v2813_v57 = vpop.f32.mrf.mxu3  ;;  %4625 = vmatpush.msra.mxu0 %v4513_v42  ;;  %12182 = vrot.lane.b32.xlu2 %v14252_v3, %s12741_s25 }
 0x1d9   :  { %v14581_v48 = vadd.f32 %v2793_v6, %v14362_v17  ;;  %v14584_v4 = vadd.f32 %v2813_v57, %v14365_v41  ;;  %v14586_v50 = vpop.f32.mrf.mxu1  ;;  %v4511_v41 = vsel %vm4508_vm12, %v12035_v22, %v12030_v23  ;;  %v4509_v17 = vsel %vm4508_vm12, %v12030_v23, %v12034_v1  ;;  %v12053_v42 = vpop.permute.xlu0 %12052  ;;  %12222 = vrot.lane.b32.xlu1 %v14252_v3, %s12742_s13 }
 0x1da   :  { %17771 = vst [vmem:[#allocation42_spill] sm:$0xff] %v14586_v50  ;;  %v4522_v6 = vsel %vm4508_vm12, %v17709_v40, %v12049_v52  ;;  %v12040_v22 = vunpack.i.h.bf16 %v12038_v26  ;;  %v12039_v57 = vunpack.i.l.bf16 %v12038_v26  ;;  %v34_v26 = vld [vmem:[%s17700_s2 + $0x60] sm:$0xff]  ;;  %12217 = vrot.lane.b32.xlu0 %v14409_v32, %s12742_s13 }
 0x1db   :  { %v14592_v58 = vpop.f32.mrf.mxu0 }
 0x1dc   :  { %17772 = vst [vmem:[#allocation43_spill] sm:$0xff] %v14592_v58  ;;  %11308 = vmatmul.msk.f32.vlgmr.msrb.gmra.mxu1 %vm286_vm2, %v4133_v51  ;;  %v12054_v58 = vunpack.i.l.bf16 %v12053_v42 }
 0x1dd   :  { %11309 = vmatmul.msk.f32.vlgmr.msrb.gmra.mxu2 %vm286_vm2, %v4133_v51  ;;  %11310 = vmatmul.msk.f32.vlgmr.msra.gmra.mxu3 %vm286_vm2, %v4133_v51 }
 0x1de   :  { %11311 = vmatmul.msk.f32.vlgmr.msrb.gmra.mxu0 %vm286_vm2, %v14432_v46  ;;  %4685 = vmatpush.msra.mxu3 %v4523_v18  ;;  %v12055_v18 = vunpack.i.h.bf16 %v12053_v42 }
 0x1df   :  { %4645 = vmatpush.msrb.mxu1 %v4511_v41  ;;  %4665 = vmatpush.msrb.mxu2 %v4509_v17  ;;  %v14625_v41 = vld [vmem:[%s17699_s1 + $0x60] sm:$0xff] }
 0x1e0   :  { %v2873_v1 = vpop.f32.mrf.mxu2  ;;  %v2893_v23 = vpop.f32.mrf.mxu3  ;;  %4716 = vmatpush.msrb.mxu0 %v4522_v6  ;;  %v130_v6 = vmul.f32 0.001, %v14625_v41  ;;  %12197 = vrot.lane.b32.xlu2 %v14356_v16, %s12741_s25 }
 0x1e1   :  { %v14613_v51 = vadd.f32 %v2873_v1, %v14417_v10  ;;  %v14616_v40 = vadd.f32 %v2893_v23, %v14420_v31  ;;  %v14618_v50 = vpop.f32.mrf.mxu1  ;;  %v4516_v10 = vsel %vm4508_vm12, %v12040_v22, %v12044_v56  ;;  %v66_v31 = vmul.f32 0.999, %v34_v26  ;;  %12237 = vrot.lane.b32.xlu1 %v14356_v16, %s12742_s13 }
 0x1e2   :  { %17773 = vst [vmem:[#allocation44_spill] sm:$0xff] %v14618_v50  ;;  %v4520_v1 = vsel %vm4508_vm12, %v12049_v52, %v12039_v57  ;;  %v4518_v23 = vsel %vm4508_vm12, %v12039_v57, %v12040_v22  ;;  %v4514_v26 = vsel %vm4508_vm12, %v12044_v56, %v12055_v18  ;;  %v14649_v50 = vpop.permute.xlu2 %12062  ;;  %v14651_v52 = vpop.permute.xlu0 %12067  ;;  %v12050_v22 = vunpack.i.h.bf16 %v14575_v30  ;;  %12232 = vrot.lane.b32.xlu0 %v14473_v13, %s12742_s13 }
 0x1e3   :  { %v14630_v17 = vpop.f32.mrf.mxu0 }
 0x1e4   :  { %17774 = vst [vmem:[#allocation45_spill] sm:$0xff] %v14630_v17  ;;  %11312 = vmatmul.msk.f32.vlgmr.msra.gmra.mxu1 %vm286_vm2, %v14432_v46  ;;  %v162_v17 = vadd.f32 %v130_v6, %v66_v31  ;;  %v17710_v6 = vunpack.i.h.bf16 %v14649_v50 }
 0x1e5   :  { %11313 = vmatmul.msk.f32.vlgmr.msra.gmra.mxu2 %vm286_vm2, %v14432_v46  ;;  %11314 = vmatmul.msk.f32.vlgmr.msrb.gmra.mxu3 %vm286_vm2, %v14432_v46 }
 0x1e6   :  { %11315 = vmatmul.msk.f32.vlgmr.msra.gmra.mxu0 %vm286_vm2, %v14432_v46  ;;  %4776 = vmatpush.msrb.mxu3 %v4516_v10  ;;  %195 = vst.msk [vmem:[%s17701_s6 + $0x60] sm:$0xff] %vm182_vm1, %v162_v17  ;;  %v12069_v17 = vunpack.i.l.bf16 %v14651_v52 }
 0x1e7   :  { %4736 = vmatpush.msra.mxu1 %v4520_v1  ;;  %4756 = vmatpush.msra.mxu2 %v4518_v23  ;;  %v4512_v23 = vsel %vm4508_vm12, %v12055_v18, %v12050_v22  ;;  %v12060_v18 = vunpack.i.h.bf16 %v14620_v34 }
 0x1e8   :  { %v3015_v56 = vpop.f32.mrf.mxu2  ;;  %v3035_v57 = vpop.f32.mrf.mxu3  ;;  %4796 = vmatpush.msra.mxu0 %v4514_v26  ;;  %v4510_v26 = vsel %vm4508_vm12, %v12050_v22, %v12054_v58 }
 0x1e9   :  { %v14661_v10 = vadd.f32 %v3015_v56, %v14497_v37  ;;  %v14664_v42 = vadd.f32 %v3035_v57, %v14500_v38  ;;  %v14666_v31 = vpop.f32.mrf.mxu1  ;;  %v14678_v37 = vld [vmem:[%s17701_s6 + $0x58] sm:$0xff]  ;;  %v17777_v38 = vunpack.i.h.bf16 %v14573_v47  ;;  %v12073_v56 = vpop.permute.xlu1 %12072  ;;  %v4914_v47 = vsel %vm4901_vm13, %v17710_v6, %v12069_v17 }
 0x1ea   :  { %17775 = vst [vmem:[#allocation46_spill] sm:$0xff] %v14666_v31  ;;  %12247 = vrot.lane.b32.xlu0 %v14542_v55, %s12742_s13 }
 0x1eb   :  { %v14673_v30 = vpop.f32.mrf.mxu0  ;;  %v4524_v1 = vsel %vm4508_vm12, %v12054_v58, %v17777_v38  ;;  %v12064_v58 = vunpack.i.l.bf16 %v14649_v50  ;;  %v12059_v38 = vunpack.i.l.bf16 %v14620_v34  ;;  %vm10010_vm12 = vcmp.lt.s32.totalorder %v12942_v29, 75 }
 0x1ec   :  { %17776 = vst [vmem:[#allocation47_spill] sm:$0xff] %v14673_v30  ;;  %11316 = vmatmul.msk.f32.vlgmr.msrb.gmra.mxu1 %vm286_vm2, %v14432_v46  ;;  %v12075_v30 = vunpack.i.h.bf16 %v12073_v56 }
 0x1ed   :  { %11317 = vmatmul.msk.f32.vlgmr.msrb.gmra.mxu2 %vm286_vm2, %v14432_v46  ;;  %11318 = vmatmul.msk.f32.vlgmr.msra.gmra.mxu3 %vm286_vm2, %v14432_v46  ;;  %v4908_v34 = vsel %vm4901_vm13, %v12060_v18, %v12064_v58 }
 0x1ee   :  { %11319 = vmatmul.msk.f32.vlgmr.msrb.gmra.mxu0 %vm286_vm2, %v14678_v37  ;;  %4856 = vmatpush.msra.mxu3 %v4524_v1 }
 0x1ef   :  { %4816 = vmatpush.msrb.mxu1 %v4512_v23  ;;  %4836 = vmatpush.msrb.mxu2 %v4510_v26  ;;  %v14715_v23 = vpop.permute.xlu2 %12077 }
 0x1f0   :  { %v3095_v22 = vpop.f32.mrf.mxu2  ;;  %v3115_v57 = vpop.f32.mrf.mxu3  ;;  %4938 = vmatpush.msrb.mxu0 %v4914_v47  ;;  %v4906_v47 = vsel %vm4901_vm13, %v12064_v58, %v12075_v30  ;;  %v14747_v58 = vld [vmem:[%s17698_s0 + $0x78] sm:$0xff] }
 0x1f1   :  { %v14706_v46 = vadd.f32 %v3095_v22, %v14550_v24  ;;  %v14709_v6 = vadd.f32 %v3115_v57, %v14553_v21  ;;  %v14711_v1 = vpop.f32.mrf.mxu1  ;;  %v4912_v24 = vsel %vm4901_vm13, %v12069_v17, %v12059_v38  ;;  %v4910_v21 = vsel %vm4901_vm13, %v12059_v38, %v12060_v18  ;;  %v14735_v22 = vpop.permute.xlu1 %12087  ;;  %v14742_v18 = vld [vmem:[%s17698_s0 + $0x68] sm:$0xff] }
 0x1f2   :  { %17778 = vst [vmem:[#allocation48_spill] sm:$0xff] %v14711_v1  ;;  %v14737_v57 = vpop.permute.xlu0 %12082  ;;  %v12074_v17 = vunpack.i.l.bf16 %v12073_v56  ;;  %v14751_v38 = vpack.i.bf16 %v14742_v18, %v14747_v58  ;;  %v12089_v31 = vunpack.i.l.bf16 %v14735_v22  ;;  %12262 = vrot.lane.b32.xlu0 %v14252_v3, %s12743_s26 }
 0x1f3   :  { %v14717_v26 = vpop.f32.mrf.mxu0  ;;  %v17711_v54 = vunpack.i.h.bf16 %v14737_v57 }
 0x1f4   :  { %17779 = vst [vmem:[#allocation49_spill] sm:$0xff] %v14717_v26  ;;  %11320 = vmatmul.msk.f32.vlgmr.msra.gmra.mxu1 %vm286_vm2, %v14678_v37  ;;  %12212 = vrot.lane.b32.xlu2 %v14751_v38, %s12741_s25 }
 0x1f5   :  { %11321 = vmatmul.msk.f32.vlgmr.msra.gmra.mxu2 %vm286_vm2, %v14678_v37  ;;  %11322 = vmatmul.msk.f32.vlgmr.msrb.gmra.mxu3 %vm286_vm2, %v14678_v37 }
 0x1f6   :  { %11323 = vmatmul.msk.f32.vlgmr.msra.gmra.mxu0 %vm286_vm2, %v14678_v37  ;;  %4998 = vmatpush.msrb.mxu3 %v4908_v34  ;;  %v12070_v34 = vunpack.i.h.bf16 %v14651_v52 }
 0x1f7   :  { %4958 = vmatpush.msra.mxu1 %v4912_v24  ;;  %4978 = vmatpush.msra.mxu2 %v4910_v21 }
 0x1f8   :  { %v3186_v26 = vpop.f32.mrf.mxu2  ;;  %v3206_v56 = vpop.f32.mrf.mxu3  ;;  %5018 = vmatpush.msra.mxu0 %v4906_v47  ;;  %v4902_v47 = vsel %vm4901_vm13, %v12070_v34, %v12074_v17  ;;  %12252 = vrot.lane.b32.xlu1 %v14751_v38, %s12742_s13 }
 0x1f9   :  { %v14757_v24 = vadd.f32 %v3186_v26, %v14581_v48  ;;  %v14760_v21 = vadd.f32 %v3206_v56, %v14584_v4  ;;  %v14762_v1 = vpop.f32.mrf.mxu1  ;;  %v17782_v48 = vunpack.i.h.bf16 %v14649_v50  ;;  %v4904_v26 = vsel %vm4901_vm13, %v12075_v30, %v12070_v34  ;;  %v12093_v56 = vpop.permute.xlu2 %12092 }
 0x1fa   :  { %17780 = vst [vmem:[#allocation50_spill] sm:$0xff] %v14762_v1  ;;  %v4915_v50 = vsel %vm4901_vm13, %v17711_v54, %v12089_v31  ;;  %v12080_v30 = vunpack.i.h.bf16 %v14715_v23  ;;  %v12079_v1 = vunpack.i.l.bf16 %v14715_v23  ;;  %v14812_v23 = vld [vmem:[%s17699_s1 + $0x68] sm:$0xff]  ;;  %v14836_v7 = vpop.permute.xlu1 %12102  ;;  %v12094_v62 = vunpack.i.l.bf16 %v12093_v56  ;;  %12277 = vrot.lane.b32.xlu0 %v14356_v16, %s12743_s26 }
 0x1fb   :  { %v14770_v52 = vpop.f32.mrf.mxu0  ;;  %v4916_v4 = vsel %vm4901_vm13, %v12074_v17, %v17782_v48  ;;  %v12084_v17 = vunpack.i.l.bf16 %v14737_v57 }
 0x1fc   :  { %17781 = vst [vmem:[#allocation51_spill] sm:$0xff] %v14770_v52  ;;  %11324 = vmatmul.msk.f32.vlgmr.msrb.gmra.mxu1 %vm286_vm2, %v14678_v37  ;;  %v12095_v52 = vunpack.i.h.bf16 %v12093_v56  ;;  %12227 = vrot.lane.b32.xlu2 %v14487_v45, %s12742_s13 }
 0x1fd   :  { %11325 = vmatmul.msk.f32.vlgmr.msrb.gmra.mxu2 %vm286_vm2, %v14678_v37  ;;  %11326 = vmatmul.msk.f32.vlgmr.msra.gmra.mxu3 %vm286_vm2, %v14678_v37 }
 0x1fe   :  { %11327 = vmatmul.msk.f32.vlgmr.msrb.gmra.mxu0 %vm286_vm2, %v14625_v41  ;;  %5078 = vmatpush.msra.mxu3 %v4916_v4 }
 0x1ff   :  { %5038 = vmatpush.msrb.mxu1 %v4904_v26  ;;  %5058 = vmatpush.msrb.mxu2 %v4902_v47  ;;  %v14807_v26 = vpop.permute.xlu0 %12097 }
 0x200   :  { %v3266_v34 = vpop.f32.mrf.mxu2  ;;  %v3286_v48 = vpop.f32.mrf.mxu3  ;;  %5109 = vmatpush.msrb.mxu0 %v4915_v50  ;;  %12267 = vrot.lane.b32.xlu1 %v14487_v45, %s12743_s26  ;;  %v4919_v45 = vld [vmem:[%s17701_s6 + $0x60] sm:$0xff] }
 0x201   :  { %v14798_v37 = vadd.f32 %v3266_v34, %v14613_v51  ;;  %v14801_v54 = vadd.f32 %v3286_v48, %v14616_v40  ;;  %v14803_v4 = vpop.f32.mrf.mxu1  ;;  %v35_v51 = vld [vmem:[%s17700_s2 + $0x68] sm:$0xff]  ;;  %v4909_v40 = vsel %vm4901_vm13, %v12080_v30, %v12084_v17  ;;  %v131_v34 = vmul.f32 0.001, %v14812_v23 }
 0x202   :  { %17783 = vst [vmem:[#allocation52_spill] sm:$0xff] %v14803_v4  ;;  %v67_v50 = vmul.f32 0.999, %v35_v51  ;;  %v4913_v48 = vsel %vm4901_vm13, %v12089_v31, %v12079_v1  ;;  %v4911_v4 = vsel %vm4901_vm13, %v12079_v1, %v12080_v30  ;;  %v4907_v51 = vsel %vm4901_vm13, %v12084_v17, %v12095_v52  ;;  %v14838_v31 = vpop.permute.xlu2 %12107  ;;  %12292 = vrot.lane.b32.xlu0 %v14751_v38, %s12743_s26 }
 0x203   :  { %v14817_v47 = vpop.f32.mrf.mxu0  ;;  %v12090_v1 = vunpack.i.h.bf16 %v14735_v22 }
 0x204   :  { %17784 = vst [vmem:[#allocation53_spill] sm:$0xff] %v14817_v47  ;;  %11328 = vmatmul.msk.f32.vlgmr.msra.gmra.mxu1 %vm286_vm2, %v14625_v41  ;;  %v163_v47 = vadd.f32 %v131_v34, %v67_v50  ;;  %v12105_v50 = vunpack.i.h.bf16 %v14836_v7  ;;  %12242 = vrot.lane.b32.xlu2 %v14308_v15, %s12742_s13 }
 0x205   :  { %11329 = vmatmul.msk.f32.vlgmr.msra.gmra.mxu2 %vm286_vm2, %v14625_v41  ;;  %11330 = vmatmul.msk.f32.vlgmr.msrb.gmra.mxu3 %vm286_vm2, %v14625_v41  ;;  %v4905_v34 = vsel %vm4901_vm13, %v12095_v52, %v12090_v1  ;;  %v4903_v3 = vsel %vm4901_vm13, %v12090_v1, %v12094_v62  ;;  %v12100_v52 = vunpack.i.h.bf16 %v14807_v26 }
 0x206   :  { %11331 = vmatmul.msk.f32.vlgmr.msra.gmra.mxu0 %vm286_vm2, %v14625_v41  ;;  %5169 = vmatpush.msrb.mxu3 %v4909_v40  ;;  %196 = vst.msk [vmem:[%s17701_s6 + $0x68] sm:$0xff] %vm182_vm1, %v163_v47  ;;  %v12109_v47 = vunpack.i.l.bf16 %v14838_v31 }
 0x207   :  { %5129 = vmatpush.msra.mxu1 %v4913_v48  ;;  %5149 = vmatpush.msra.mxu2 %v4911_v4  ;;  %v12113_v48 = vpop.permute.xlu0 %12112 }
 0x208   :  { %v3408_v30 = vpop.f32.mrf.mxu2  ;;  %v3428_v17 = vpop.f32.mrf.mxu3  ;;  %5189 = vmatpush.msra.mxu0 %v4907_v51  ;;  %v12104_v51 = vunpack.i.l.bf16 %v14836_v7  ;;  %v12115_v7 = vunpack.i.h.bf16 %v12113_v48  ;;  %12282 = vrot.lane.b32.xlu1 %v14308_v15, %s12743_s26 }
 0x209   :  { %v14848_v40 = vadd.f32 %v3408_v30, %v14661_v10  ;;  %v14851_v56 = vadd.f32 %v3428_v17, %v14664_v42  ;;  %v14853_v4 = vpop.f32.mrf.mxu1  ;;  %v17785_v10 = vunpack.i.h.bf16 %v14737_v57  ;;  %v5307_v57 = vsel %vm5294_vm14, %v12105_v50, %v12109_v47 }
 0x20a   :  { %v12099_v30 = vunpack.i.l.bf16 %v14807_v26  ;;  %v5301_v26 = vsel %vm5294_vm14, %v12100_v52, %v12104_v51 }
 0x20b   :  { %v14860_v22 = vpop.f32.mrf.mxu0  ;;  %v4917_v42 = vsel %vm4901_vm13, %v12094_v62, %v17785_v10  ;;  %vm10403_vm13 = vcmp.lt.s32.totalorder %v12942_v29, 74 }
 0x20c   :  { %11332 = vmatmul.msk.f32.vlgmr.msrb.gmra.mxu1 %vm286_vm2, %v14625_v41  ;;  %12257 = vrot.lane.b32.xlu2 %v14409_v32, %s12743_s26  ;;  %v36_v32 = vld [vmem:[%s17700_s2 + $0x70] sm:$0xff] }
 0x20d   :  { %11333 = vmatmul.msk.f32.vlgmr.msrb.gmra.mxu2 %vm286_vm2, %v14625_v41  ;;  %11334 = vmatmul.msk.f32.vlgmr.msra.gmra.mxu3 %vm286_vm2, %v14625_v41 }
 0x20e   :  { %11335 = vmatmul.msk.f32.vlgmr.msrb.gmra.mxu0 %vm286_vm2, %v4919_v45  ;;  %5249 = vmatpush.msra.mxu3 %v4917_v42  ;;  %v14895_v42 = vpop.permute.xlu1 %12117 }
 0x20f   :  { %5209 = vmatpush.msrb.mxu1 %v4905_v34  ;;  %5229 = vmatpush.msrb.mxu2 %v4903_v3  ;;  %v5305_v3 = vsel %vm5294_vm14, %v12109_v47, %v12099_v30  ;;  %v12110_v47 = vunpack.i.h.bf16 %v14838_v31 }
 0x210   :  { %v3488_v62 = vpop.f32.mrf.mxu2  ;;  %v3508_v1 = vpop.f32.mrf.mxu3  ;;  %5331 = vmatpush.msrb.mxu0 %v5307_v57 }
 0x211   :  { %v14888_v41 = vadd.f32 %v3488_v62, %v14706_v46  ;;  %v14891_v17 = vadd.f32 %v3508_v1, %v14709_v6  ;;  %v14893_v10 = vpop.f32.mrf.mxu1  ;;  %v5303_v46 = vsel %vm5294_vm14, %v12099_v30, %v12100_v52  ;;  %v5299_v6 = vsel %vm5294_vm14, %v12104_v51, %v12115_v7  ;;  %v14911_v57 = vpop.permute.xlu2 %12122 }
 0x212   :  { %v14913_v62 = vpop.permute.xlu0 %12127  ;;  %v12114_v1 = vunpack.i.l.bf16 %v12113_v48  ;;  %v17712_v48 = vunpack.i.h.bf16 %v14911_v57 }
 0x213   :  { %v14897_v34 = vpop.f32.mrf.mxu0 }
 0x214   :  { %17786 = vst [vmem:[#allocation54_spill] sm:$0xff] %v14897_v34  ;;  %11336 = vmatmul.msk.f32.vlgmr.msra.gmra.mxu1 %vm286_vm2, %v4919_v45  ;;  %v5309_v15 = vsel %vm5294_vm14, %v12114_v1, %v12105_v50  ;;  %v12120_v50 = vunpack.i.h.bf16 %v14895_v42  ;;  %12272 = vrot.lane.b32.xlu2 %v14473_v13, %s12743_s26 }
 0x215   :  { %11337 = vmatmul.msk.f32.vlgmr.msra.gmra.mxu2 %vm286_vm2, %v4919_v45  ;;  %11338 = vmatmul.msk.f32.vlgmr.msrb.gmra.mxu3 %vm286_vm2, %v4919_v45 }
 0x216   :  { %11339 = vmatmul.msk.f32.vlgmr.msra.gmra.mxu0 %vm286_vm2, %v4919_v45  ;;  %5391 = vmatpush.msrb.mxu3 %v5301_v26 }
 0x217   :  { %5351 = vmatpush.msra.mxu1 %v5305_v3  ;;  %5371 = vmatpush.msra.mxu2 %v5303_v46  ;;  %v12129_v3 = vunpack.i.l.bf16 %v14913_v62  ;;  %v14939_v46 = vpop.permute.xlu1 %12132 }
 0x218   :  { %v3579_v52 = vpop.f32.mrf.mxu2  ;;  %v3599_v30 = vpop.f32.mrf.mxu3  ;;  %5411 = vmatpush.msra.mxu0 %v5299_v6 }
 0x219   :  { %v14919_v51 = vadd.f32 %v3579_v52, %v14757_v24  ;;  %v14922_v26 = vadd.f32 %v3599_v30, %v14760_v21  ;;  %v14924_v34 = vpop.f32.mrf.mxu1  ;;  %v5297_v24 = vsel %vm5294_vm14, %v12115_v7, %v12110_v47  ;;  %v5295_v21 = vsel %vm5294_vm14, %v12110_v47, %v12114_v1 }
 0x21a   :  { %v5308_v16 = vsel %vm5294_vm14, %v17712_v48, %v12129_v3  ;;  %v12124_v7 = vunpack.i.l.bf16 %v14911_v57  ;;  %v12119_v47 = vunpack.i.l.bf16 %v14895_v42  ;;  %v14970_v42 = vld [vmem:[%s17699_s1 + $0x70] sm:$0xff] }
 0x21b   :  { %v14930_v31 = vpop.f32.mrf.mxu0 }
 0x21c   :  { %11340 = vmatmul.msk.f32.vlgmr.msrb.gmra.mxu1 %vm286_vm2, %v4919_v45  ;;  %v5306_v38 = vsel %vm5294_vm14, %v12129_v3, %v12119_v47  ;;  %v14996_v3 = vpop.permute.xlu0 %12142  ;;  %12287 = vrot.lane.b32.xlu2 %v14542_v55, %s12743_s26  ;;  %s12745_s26 = smov 93  }
 0x21d   :  { %11341 = vmatmul.msk.f32.vlgmr.msrb.gmra.mxu2 %vm286_vm2, %v4919_v45  ;;  %11342 = vmatmul.msk.f32.vlgmr.msra.gmra.mxu3 %vm286_vm2, %v4919_v45 }
 0x21e   :  { %11343 = vmatmul.msk.f32.vlgmr.msrb.gmra.mxu0 %vm286_vm2, %v14812_v23  ;;  %5471 = vmatpush.msra.mxu3 %v5309_v15  ;;  %v12135_v15 = vunpack.i.h.bf16 %v14939_v46 }
 0x21f   :  { %5431 = vmatpush.msrb.mxu1 %v5297_v24  ;;  %5451 = vmatpush.msrb.mxu2 %v5295_v21  ;;  %v14965_v24 = vpop.permute.xlu2 %12137  ;;  %v68_v21 = vmul.f32 0.999, %v36_v32  ;;  %v14994_v48 = vpop.permute.xlu1 %12147 }
 0x220   :  { %v3659_v6 = vpop.f32.mrf.mxu2  ;;  %v3679_v1 = vpop.f32.mrf.mxu3  ;;  %5502 = vmatpush.msrb.mxu0 %v5308_v16  ;;  %v132_v16 = vmul.f32 0.001, %v14970_v42 }
 0x221   :  { %v14955_v45 = vadd.f32 %v3659_v6, %v14798_v37  ;;  %v14958_v52 = vadd.f32 %v3679_v1, %v14801_v54  ;;  %v14960_v30 = vpop.f32.mrf.mxu1  ;;  %v5302_v37 = vsel %vm5294_vm14, %v12120_v50, %v12124_v7  ;;  %v5304_v6 = vsel %vm5294_vm14, %v12119_v47, %v12120_v50 }
 0x222   :  { %v5300_v1 = vsel %vm5294_vm14, %v12124_v7, %v12135_v15  ;;  %v164_v32 = vadd.f32 %v132_v16, %v68_v21  ;;  %v12296_v50 = vpack.i.bf16 %v14243_v39, %v14405_v8  ;;  %v12134_v47 = vunpack.i.l.bf16 %v14939_v46 }
 0x223   :  { %v14975_v54 = vpop.f32.mrf.mxu0  ;;  %v12130_v7 = vunpack.i.h.bf16 %v14913_v62  ;;  %v12145_v46 = vunpack.i.h.bf16 %v14996_v3 }
 0x224   :  { %17787 = vst [vmem:[#allocation55_spill] sm:$0xff] %v14975_v54  ;;  %11344 = vmatmul.msk.f32.vlgmr.msra.gmra.mxu1 %vm286_vm2, %v14812_v23  ;;  %v12306_v54 = vpack.i.bf16 %v14248_v2, %v14400_v25  ;;  %12297 = vrot.lane.b32.xlu1 %v12296_v50, %s12744_s11  ;;  %v12149_v25 = vunpack.i.l.bf16 %v14994_v48  ;;  %v12139_v50 = vunpack.i.l.bf16 %v14965_v24 }
 0x225   :  { %11345 = vmatmul.msk.f32.vlgmr.msra.gmra.mxu2 %vm286_vm2, %v14812_v23  ;;  %11346 = vmatmul.msk.f32.vlgmr.msrb.gmra.mxu3 %vm286_vm2, %v14812_v23  ;;  %197 = vst.msk [vmem:[%s17701_s6 + $0x70] sm:$0xff] %vm182_vm1, %v164_v32  ;;  %v5298_v13 = vsel %vm5294_vm14, %v12135_v15, %v12130_v7  ;;  %v15052_v15 = vpack.i.bf16 %v14478_v61, %v14469_v35 }
 0x226   :  { %11347 = vmatmul.msk.f32.vlgmr.msra.gmra.mxu0 %vm286_vm2, %v14812_v23  ;;  %5562 = vmatpush.msrb.mxu3 %v5302_v37 }
 0x227   :  { %5522 = vmatpush.msra.mxu1 %v5306_v38  ;;  %5542 = vmatpush.msra.mxu2 %v5304_v6  ;;  %v12153_v38 = vpop.permute.xlu2 %12152  ;;  %v12140_v6 = vunpack.i.h.bf16 %v14965_v24 }
 0x228   :  { %v3801_v37 = vpop.f32.mrf.mxu2  ;;  %v3821_v21 = vpop.f32.mrf.mxu3  ;;  %5582 = vmatpush.msra.mxu0 %v5300_v1  ;;  %12307 = vrot.lane.b32.xlu0 %v12306_v54, %s12744_s11  ;;  %v5296_v54 = vsel %vm5294_vm14, %v12130_v7, %v12134_v47  ;;  %v12144_v1 = vunpack.i.l.bf16 %v14996_v3  ;;  %v12155_v7 = vunpack.i.h.bf16 %v12153_v38 }
 0x229   :  { %v15010_v39 = vadd.f32 %v3801_v37, %v14848_v40  ;;  %v15013_v8 = vadd.f32 %v3821_v21, %v14851_v56  ;;  %v15015_v2 = vpop.f32.mrf.mxu1  ;;  %v15028_v40 = vld [vmem:[%s17701_s6 + $0x68] sm:$0xff]  ;;  %v17788_v56 = vunpack.i.h.bf16 %v14911_v57  ;;  %v5700_v57 = vsel %vm5687_vm15, %v12145_v46, %v12149_v25  ;;  %v15069_v37 = vpop.permute.xlu0 %12157 }
 0x22a   :  { %v5694_v24 = vsel %vm5687_vm15, %v12140_v6, %v12144_v1  ;;  %v5692_v55 = vsel %vm5687_vm15, %v12144_v1, %v12155_v7 }
 0x22b   :  { %v15023_v62 = vpop.f32.mrf.mxu0  ;;  %v5310_v16 = vsel %vm5294_vm14, %v12134_v47, %v17788_v56  ;;  %v15089_v56 = vpop.permute.xlu1 %12162  ;;  %vm10811_vm14 = vcmask 7168  }
 0x22c   :  { %11348 = vmatmul.msk.f32.vlgmr.msrb.gmra.mxu1 %vm286_vm2, %v14812_v23  ;;  %12312 = vrot.lane.b32.xlu1 %v15052_v15, %s12744_s11 }
 0x22d   :  { %11349 = vmatmul.msk.f32.vlgmr.msrb.gmra.mxu2 %vm286_vm2, %v14812_v23  ;;  %11350 = vmatmul.msk.f32.vlgmr.msra.gmra.mxu3 %vm286_vm2, %v14812_v23 }
 0x22e   :  { %11351 = vmatmul.msk.f32.vlgmr.msrb.gmra.mxu0 %vm286_vm2, %v15028_v40  ;;  %5642 = vmatpush.msra.mxu3 %v5310_v16 }
 0x22f   :  { %5602 = vmatpush.msrb.mxu1 %v5298_v13  ;;  %5622 = vmatpush.msrb.mxu2 %v5296_v54  ;;  %v15091_v16 = vpop.permute.xlu2 %12167  ;;  %v12321_v54 = vpack.i.bf16 %v14536_v9, %v14742_v18  ;;  %v12165_v9 = vunpack.i.h.bf16 %v15089_v56 }
 0x230   :  { %v3881_v23 = vpop.f32.mrf.mxu2  ;;  %v3901_v32 = vpop.f32.mrf.mxu3  ;;  %5724 = vmatpush.msrb.mxu0 %v5700_v57  ;;  %v12154_v57 = vunpack.i.l.bf16 %v12153_v38  ;;  %v12169_v38 = vunpack.i.l.bf16 %v15091_v16 }
 0x231   :  { %v15060_v47 = vadd.f32 %v3881_v23, %v14888_v41  ;;  %v15063_v35 = vadd.f32 %v3901_v32, %v14891_v17  ;;  %v15065_v61 = vpop.f32.mrf.mxu1  ;;  %v5698_v41 = vsel %vm5687_vm15, %v12149_v25, %v12139_v50  ;;  %v5696_v17 = vsel %vm5687_vm15, %v12139_v50, %v12140_v6  ;;  %v15096_v25 = vld [vmem:[%s17698_s0 + $0x40] sm:$0xff]  ;;  %12322 = vrot.lane.b32.xlu0 %v12321_v54, %s12744_s11 }
 0x232   :  { %17789 = vst [vmem:[#allocation56_spill] sm:$0xff] %v15065_v61  ;;  %v12326_v13 = vpack.i.bf16 %v15096_v25, %v14350_v63  ;;  %v12150_v6 = vunpack.i.h.bf16 %v14994_v48  ;;  %v5701_v3 = vsel %vm5687_vm15, %v12165_v9, %v12169_v38 }
 0x233   :  { %v15071_v21 = vpop.f32.mrf.mxu0 }
 0x234   :  { %17790 = vst [vmem:[#allocation57_spill] sm:$0xff] %v15071_v21  ;;  %11352 = vmatmul.msk.f32.vlgmr.msra.gmra.mxu1 %vm286_vm2, %v15028_v40  ;;  %12327 = vrot.lane.b32.xlu1 %v12326_v13, %s12744_s11  ;;  %v12159_v13 = vunpack.i.l.bf16 %v15069_v37 }
 0x235   :  { %11353 = vmatmul.msk.f32.vlgmr.msra.gmra.mxu2 %vm286_vm2, %v15028_v40  ;;  %11354 = vmatmul.msk.f32.vlgmr.msrb.gmra.mxu3 %vm286_vm2, %v15028_v40 }
 0x236   :  { %11355 = vmatmul.msk.f32.vlgmr.msra.gmra.mxu0 %vm286_vm2, %v15028_v40  ;;  %5784 = vmatpush.msrb.mxu3 %v5694_v24  ;;  %v5702_v24 = vsel %vm5687_vm15, %v12154_v57, %v12145_v46  ;;  %v12301_v46 = vpack.i.bf16 %v14483_v27, %v14464_v5 }
 0x237   :  { %5744 = vmatpush.msra.mxu1 %v5698_v41  ;;  %5764 = vmatpush.msra.mxu2 %v5696_v17  ;;  %v15127_v41 = vpop.permute.xlu0 %12172  ;;  %v12160_v17 = vunpack.i.h.bf16 %v15069_v37  ;;  %v37_v37 = vld [vmem:[%s17700_s2 + $0x78] sm:$0xff] }
 0x238   :  { %v3972_v1 = vpop.f32.mrf.mxu2  ;;  %v3992_v23 = vpop.f32.mrf.mxu3  ;;  %5804 = vmatpush.msra.mxu0 %v5692_v55  ;;  %12302 = vrot.lane.b32.xlu2 %v12301_v46, %s12744_s11  ;;  %v12175_v27 = vunpack.i.h.bf16 %v15127_v41 }
 0x239   :  { %v15105_v32 = vadd.f32 %v3972_v1, %v14919_v51  ;;  %v15108_v50 = vadd.f32 %v3992_v23, %v14922_v26  ;;  %v15110_v63 = vpop.f32.mrf.mxu1  ;;  %v5690_v51 = vsel %vm5687_vm15, %v12155_v7, %v12150_v6  ;;  %v5688_v26 = vsel %vm5687_vm15, %v12150_v6, %v12154_v57  ;;  %v15154_v6 = vpop.permute.xlu1 %12177  ;;  %v15159_v1 = vld [vmem:[%s17699_s1 + $0x78] sm:$0xff] }
 0x23a   :  { %17791 = vst [vmem:[#allocation58_spill] sm:$0xff] %v15110_v63  ;;  %v12164_v7 = vunpack.i.l.bf16 %v15089_v56  ;;  %v69_v23 = vmul.f32 0.999, %v37_v37 }
 0x23b   :  { %v15115_v48 = vpop.f32.mrf.mxu0 }
 0x23c   :  { %11356 = vmatmul.msk.f32.vlgmr.msrb.gmra.mxu1 %vm286_vm2, %v15028_v40  ;;  %12342 = vrot.lane.b32.xlu1 %v12301_v46, %s12745_s26 }
 0x23d   :  { %11357 = vmatmul.msk.f32.vlgmr.msrb.gmra.mxu2 %vm286_vm2, %v15028_v40  ;;  %11358 = vmatmul.msk.f32.vlgmr.msra.gmra.mxu3 %vm286_vm2, %v15028_v40 }
 0x23e   :  { %11359 = vmatmul.msk.f32.vlgmr.msrb.gmra.mxu0 %vm286_vm2, %v14970_v42  ;;  %5864 = vmatpush.msra.mxu3 %v5702_v24  ;;  %v133_v24 = vmul.f32 0.001, %v15159_v1 }
 0x23f   :  { %5824 = vmatpush.msrb.mxu1 %v5690_v51  ;;  %5844 = vmatpush.msrb.mxu2 %v5688_v26  ;;  %v5699_v51 = vsel %vm5687_vm15, %v12169_v38, %v12159_v13  ;;  %v5697_v26 = vsel %vm5687_vm15, %v12159_v13, %v12160_v17  ;;  %v15185_v38 = vpop.permute.xlu0 %12187  ;;  %v12697_v13 = vld [vmem:[%s17698_s0 + $0x18] sm:$0xff] }
 0x240   :  { %v4052_v55 = vpop.f32.mrf.mxu2  ;;  %v4072_v40 = vpop.f32.mrf.mxu3  ;;  %5895 = vmatpush.msrb.mxu0 %v5701_v3  ;;  %v5693_v3 = vsel %vm5687_vm15, %v12164_v7, %v12175_v27 }
 0x241   :  { %v15146_v54 = vadd.f32 %v4052_v55, %v14955_v45  ;;  %v15149_v57 = vadd.f32 %v4072_v40, %v14958_v52  ;;  %v15151_v5 = vpop.f32.mrf.mxu1  ;;  %v5695_v52 = vsel %vm5687_vm15, %v12160_v17, %v12164_v7  ;;  %v165_v55 = vadd.f32 %v133_v24, %v69_v23  ;;  %v15183_v40 = vpop.permute.xlu2 %12182  ;;  %v12696_v17 = vld [vmem:[%s17698_s0 + $0x20] sm:$0xff] }
 0x242   :  { %17792 = vst [vmem:[#allocation59_spill] sm:$0xff] %v15151_v5  ;;  %v15193_v37 = vpack.i.bf16 %v12696_v17, %v12697_v13  ;;  %v12174_v7 = vunpack.i.l.bf16 %v15127_v41  ;;  %v12193_v13 = vpop.permute.xlu1 %12192 }
 0x243   :  { %v15164_v45 = vpop.f32.mrf.mxu0  ;;  %198 = vst.msk [vmem:[%s17701_s6 + $0x78] sm:$0xff] %vm182_vm1, %v165_v55  ;;  %v12189_v55 = vunpack.i.l.bf16 %v15185_v38 }
 0x244   :  { %17793 = vst [vmem:[#allocation60_spill] sm:$0xff] %v15164_v45  ;;  %11360 = vmatmul.msk.f32.vlgmr.msra.gmra.mxu1 %vm286_vm2, %v14970_v42  ;;  %12337 = vrot.lane.b32.xlu0 %v15193_v37, %s12745_s26 }
 0x245   :  { %11361 = vmatmul.msk.f32.vlgmr.msra.gmra.mxu2 %vm286_vm2, %v14970_v42  ;;  %11362 = vmatmul.msk.f32.vlgmr.msrb.gmra.mxu3 %vm286_vm2, %v14970_v42 }
 0x246   :  { %11363 = vmatmul.msk.f32.vlgmr.msra.gmra.mxu0 %vm286_vm2, %v14970_v42  ;;  %5955 = vmatpush.msrb.mxu3 %v5695_v52  ;;  %v12170_v52 = vunpack.i.h.bf16 %v15091_v16 }
 0x247   :  { %5915 = vmatpush.msra.mxu1 %v5699_v51  ;;  %5935 = vmatpush.msra.mxu2 %v5697_v26  ;;  %v17713_v26 = vunpack.i.h.bf16 %v15183_v40 }
 0x248   :  { %v4194_v23 = vpop.f32.mrf.mxu2  ;;  %v4214_v24 = vpop.f32.mrf.mxu3  ;;  %5975 = vmatpush.msra.mxu0 %v5693_v3  ;;  %v5691_v46 = vsel %vm5687_vm15, %v12175_v27, %v12170_v52  ;;  %v5689_v3 = vsel %vm5687_vm15, %v12170_v52, %v12174_v7  ;;  %v12699_v27 = vld [vmem:[%s17698_s0 + $0x60] sm:$0xff]  ;;  %v12184_v52 = vunpack.i.l.bf16 %v15183_v40 }
 0x249   :  { %v15203_v17 = vadd.f32 %v4194_v23, %v15010_v39  ;;  %v15206_v41 = vadd.f32 %v4214_v24, %v15013_v8  ;;  %v15208_v51 = vpop.f32.mrf.mxu1  ;;  %v15220_v39 = vld [vmem:[%s17701_s6 + $0x70] sm:$0xff]  ;;  %v5703_v8 = vsel %vm5687_vm15, %v12174_v7, %v12165_v9  ;;  %v6093_v56 = vsel %vm6080_vm0, %v17713_v26, %v12189_v55  ;;  %v12698_v9 = vld [vmem:[%s17698_s0 + $0x58] sm:$0xff] }
 0x24a   :  { %17794 = vst [vmem:[#allocation61_spill] sm:$0xff] %v15208_v51  ;;  %v15248_v7 = vpack.i.bf16 %v12699_v27, %v12698_v9 }
 0x24b   :  { %v15215_v16 = vpop.f32.mrf.mxu0 }
 0x24c   :  { %17795 = vst [vmem:[#allocation62_spill] sm:$0xff] %v15215_v16  ;;  %11364 = vmatmul.msk.f32.vlgmr.msrb.gmra.mxu1 %vm286_vm2, %v14970_v42  ;;  %12317 = vrot.lane.b32.xlu2 %v15248_v7, %s12744_s11  ;;  %v12195_v16 = vunpack.i.h.bf16 %v12193_v13 }
 0x24d   :  { %11365 = vmatmul.msk.f32.vlgmr.msrb.gmra.mxu2 %vm286_vm2, %v14970_v42  ;;  %11366 = vmatmul.msk.f32.vlgmr.msra.gmra.mxu3 %vm286_vm2, %v14970_v42  ;;  %v12180_v42 = vunpack.i.h.bf16 %v15154_v6 }
 0x24e   :  { %11367 = vmatmul.msk.f32.vlgmr.msrb.gmra.mxu0 %vm286_vm2, %v15220_v39  ;;  %6035 = vmatpush.msra.mxu3 %v5703_v8  ;;  %v12179_v8 = vunpack.i.l.bf16 %v15154_v6 }
 0x24f   :  { %5995 = vmatpush.msrb.mxu1 %v5691_v46  ;;  %6015 = vmatpush.msrb.mxu2 %v5689_v3  ;;  %v15265_v46 = vpop.permute.xlu2 %12197  ;;  %v6087_v6 = vsel %vm6080_vm0, %v12180_v42, %v12184_v52 }
 0x250   :  { %v4274_v23 = vpop.f32.mrf.mxu2  ;;  %v4294_v24 = vpop.f32.mrf.mxu3  ;;  %6117 = vmatpush.msrb.mxu0 %v6093_v56  ;;  %12352 = vrot.lane.b32.xlu0 %v15052_v15, %s12745_s26  ;;  %v6085_v15 = vsel %vm6080_vm0, %v12184_v52, %v12195_v16  ;;  %v12701_v52 = vld [vmem:[%s17698_s0 + $0x50] sm:$0xff] }
 0x251   :  { %v15256_v26 = vadd.f32 %v4274_v23, %v15060_v47  ;;  %v15259_v9 = vadd.f32 %v4294_v24, %v15063_v35  ;;  %v15261_v27 = vpop.f32.mrf.mxu1  ;;  %v6091_v47 = vsel %vm6080_vm0, %v12189_v55, %v12179_v8  ;;  %v6089_v35 = vsel %vm6080_vm0, %v12179_v8, %v12180_v42  ;;  %v15285_v56 = vpop.permute.xlu1 %12207  ;;  %v15292_v42 = vld [vmem:[%s17698_s0 + $0x70] sm:$0xff]  ;;  %12357 = vrot.lane.b32.xlu1 %v15248_v7, %s12745_s26 }
 0x252   :  { %17796 = vst [vmem:[#allocation63_spill] sm:$0xff] %v15261_v27  ;;  %v15287_v23 = vpop.permute.xlu0 %12202  ;;  %v12194_v55 = vunpack.i.l.bf16 %v12193_v13  ;;  %v15296_v24 = vpack.i.bf16 %v15292_v42, %v14747_v58  ;;  %v15302_v8 = vpack.i.bf16 %v15096_v25, %v12701_v52  ;;  %v12190_v13 = vunpack.i.h.bf16 %v15185_v38 }
 0x253   :  { %v15267_v3 = vpop.f32.mrf.mxu0  ;;  %v12209_v27 = vunpack.i.l.bf16 %v15285_v56  ;;  %v17714_v25 = vunpack.i.h.bf16 %v15287_v23 }
 0x254   :  { %17797 = vst [vmem:[#allocation64_spill] sm:$0xff] %v15267_v3  ;;  %11368 = vmatmul.msk.f32.vlgmr.msra.gmra.mxu1 %vm286_vm2, %v15220_v39  ;;  %12332 = vrot.lane.b32.xlu2 %v15296_v24, %s12744_s11  ;;  %v6081_v52 = vsel %vm6080_vm0, %v12190_v13, %v12194_v55 }
 0x255   :  { %11369 = vmatmul.msk.f32.vlgmr.msra.gmra.mxu2 %vm286_vm2, %v15220_v39  ;;  %11370 = vmatmul.msk.f32.vlgmr.msrb.gmra.mxu3 %vm286_vm2, %v15220_v39 }
 0x256   :  { %11371 = vmatmul.msk.f32.vlgmr.msra.gmra.mxu0 %vm286_vm2, %v15220_v39  ;;  %6177 = vmatpush.msrb.mxu3 %v6087_v6 }
 0x257   :  { %6137 = vmatpush.msra.mxu1 %v6091_v47  ;;  %6157 = vmatpush.msra.mxu2 %v6089_v35 }
 0x258   :  { %v4365_v6 = vpop.f32.mrf.mxu2  ;;  %v4385_v47 = vpop.f32.mrf.mxu3  ;;  %6197 = vmatpush.msra.mxu0 %v6085_v15  ;;  %12367 = vrot.lane.b32.xlu0 %v15302_v8, %s12745_s26  ;;  %v6083_v15 = vsel %vm6080_vm0, %v12195_v16, %v12190_v13  ;;  %v12702_v16 = vld [vmem:[%s17698_s0] sm:$0xff] }
 0x259   :  { %v15308_v35 = vadd.f32 %v4365_v6, %v15105_v32  ;;  %v15311_v58 = vadd.f32 %v4385_v47, %v15108_v50  ;;  %v15313_v3 = vpop.f32.mrf.mxu1  ;;  %v17799_v32 = vunpack.i.h.bf16 %v15183_v40  ;;  %v15333_v6 = vpop.permute.xlu2 %12212  ;;  %v6094_v40 = vsel %vm6080_vm0, %v17714_v25, %v12209_v27  ;;  %12372 = vrot.lane.b32.xlu1 %v15296_v24, %s12745_s26 }
 0x25a   :  { %17798 = vst [vmem:[#allocation65_spill] sm:$0xff] %v15313_v3  ;;  %v12204_v47 = vunpack.i.l.bf16 %v15287_v23  ;;  %v12215_v51 = vunpack.i.h.bf16 %v15333_v6 }
 0x25b   :  { %v15321_v38 = vpop.f32.mrf.mxu0  ;;  %v6095_v50 = vsel %vm6080_vm0, %v12194_v55, %v17799_v32  ;;  %v12703_v55 = vld [vmem:[%s17698_s0 + $0x10] sm:$0xff] }
 0x25c   :  { %11372 = vmatmul.msk.f32.vlgmr.msrb.gmra.mxu1 %vm286_vm2, %v15220_v39  ;;  %v15351_v13 = vpack.i.bf16 %v12702_v16, %v12703_v55 }
 0x25d   :  { %11373 = vmatmul.msk.f32.vlgmr.msrb.gmra.mxu2 %vm286_vm2, %v15220_v39  ;;  %11374 = vmatmul.msk.f32.vlgmr.msra.gmra.mxu3 %vm286_vm2, %v15220_v39  ;;  %v12200_v39 = vunpack.i.h.bf16 %v15265_v46 }
 0x25e   :  { %11375 = vmatmul.msk.f32.vlgmr.msrb.gmra.mxu0 %vm286_vm2, %v15159_v1  ;;  %6257 = vmatpush.msra.mxu3 %v6095_v50  ;;  %v12199_v50 = vunpack.i.l.bf16 %v15265_v46  ;;  %v15374_v46 = vld [vmem:[%s17699_s1 + $0x80] sm:$0xff] }
 0x25f   :  { %6217 = vmatpush.msrb.mxu1 %v6083_v15  ;;  %6237 = vmatpush.msrb.mxu2 %v6081_v52  ;;  %v15369_v15 = vpop.permute.xlu0 %12217 }
 0x260   :  { %v4445_v32 = vpop.f32.mrf.mxu2  ;;  %v4465_v25 = vpop.f32.mrf.mxu3  ;;  %6288 = vmatpush.msrb.mxu0 %v6094_v40  ;;  %12347 = vrot.lane.b32.xlu2 %v15351_v13, %s12745_s26  ;;  %v134_v40 = vmul.f32 0.001, %v15374_v46  ;;  %v6090_v63 = vsel %vm6080_vm0, %v12199_v50, %v12200_v39 }
 0x261   :  { %v15359_v3 = vadd.f32 %v4445_v32, %v15146_v54  ;;  %v15362_v16 = vadd.f32 %v4465_v25, %v15149_v57  ;;  %v15364_v55 = vpop.f32.mrf.mxu1  ;;  %v38_v54 = vld [vmem:[%s17700_s2 + $0x80] sm:$0xff]  ;;  %v6088_v25 = vsel %vm6080_vm0, %v12200_v39, %v12204_v47  ;;  %v6092_v32 = vsel %vm6080_vm0, %v12209_v27, %v12199_v50  ;;  %v15400_v27 = vpop.permute.xlu2 %12227  ;;  %v12704_v39 = vld [vmem:[%s17698_s0 + $0x8] sm:$0xff]  ;;  %12387 = vrot.lane.b32.xlu1 %v15351_v13, %s12746_s28 }
 0x262   :  { %17800 = vst [vmem:[#allocation66_spill] sm:$0xff] %v15364_v55  ;;  %v70_v52 = vmul.f32 0.999, %v38_v54  ;;  %v6086_v54 = vsel %vm6080_vm0, %v12204_v47, %v12215_v51  ;;  %v15398_v55 = vpop.permute.xlu1 %12222  ;;  %v12705_v50 = vld [vmem:[%s17698_s0 + $0x28] sm:$0xff]  ;;  %v12214_v47 = vunpack.i.l.bf16 %v15333_v6 }
 0x263   :  { %v15379_v57 = vpop.f32.mrf.mxu0  ;;  %v15408_v45 = vpack.i.bf16 %v12704_v39, %v12705_v50 }
 0x264   :  { %17801 = vst [vmem:[#allocation67_spill] sm:$0xff] %v15379_v57  ;;  %11376 = vmatmul.msk.f32.vlgmr.msra.gmra.mxu1 %vm286_vm2, %v15159_v1  ;;  %v166_v57 = vadd.f32 %v134_v40, %v70_v52 }
 0x265   :  { %11377 = vmatmul.msk.f32.vlgmr.msra.gmra.mxu2 %vm286_vm2, %v15159_v1  ;;  %11378 = vmatmul.msk.f32.vlgmr.msrb.gmra.mxu3 %vm286_vm2, %v15159_v1 }
 0x266   :  { %11379 = vmatmul.msk.f32.vlgmr.msra.gmra.mxu0 %vm286_vm2, %v15159_v1  ;;  %6348 = vmatpush.msrb.mxu3 %v6088_v25  ;;  %199 = vst.msk [vmem:[%s17701_s6 + $0x80] sm:$0xff] %vm182_vm1, %v166_v57  ;;  %v12210_v25 = vunpack.i.h.bf16 %v15285_v56  ;;  %v12229_v57 = vunpack.i.l.bf16 %v15400_v27 }
 0x267   :  { %6308 = vmatpush.msra.mxu1 %v6092_v32  ;;  %6328 = vmatpush.msra.mxu2 %v6090_v63  ;;  %v12225_v32 = vunpack.i.h.bf16 %v15398_v55 }
 0x268   :  { %v4587_v52 = vpop.f32.mrf.mxu2  ;;  %v4607_v40 = vpop.f32.mrf.mxu3  ;;  %6368 = vmatpush.msra.mxu0 %v6086_v54  ;;  %12382 = vrot.lane.b32.xlu0 %v15408_v45, %s12746_s28  ;;  %v6084_v50 = vsel %vm6080_vm0, %v12215_v51, %v12210_v25  ;;  %v15456_v51 = vld [vmem:[%s17698_s0 + $0x48] sm:$0xff] }
 0x269   :  { %v15419_v39 = vadd.f32 %v4587_v52, %v15203_v17  ;;  %v15422_v6 = vadd.f32 %v4607_v40, %v15206_v41  ;;  %v15424_v63 = vpop.f32.mrf.mxu1  ;;  %v6098_v17 = vld [vmem:[%s17701_s6 + $0x78] sm:$0xff]  ;;  %v17804_v41 = vunpack.i.h.bf16 %v15287_v23  ;;  %v6082_v52 = vsel %vm6080_vm0, %v12210_v25, %v12214_v47  ;;  %v12233_v40 = vpop.permute.xlu0 %12232 }
 0x26a   :  { %17802 = vst [vmem:[#allocation68_spill] sm:$0xff] %v15424_v63  ;;  %v6486_v23 = vsel %vm6473_vm3, %v12225_v32, %v12229_v57  ;;  %v12224_v25 = vunpack.i.l.bf16 %v15398_v55  ;;  %v12219_v63 = vunpack.i.l.bf16 %v15369_v15  ;;  %v12235_v55 = vunpack.i.h.bf16 %v12233_v40  ;;  %v15472_v61 = vpop.permute.xlu1 %12237 }
 0x26b   :  { %v15431_v56 = vpop.f32.mrf.mxu0  ;;  %v6096_v54 = vsel %vm6080_vm0, %v12214_v47, %v17804_v41  ;;  %v12361_v47 = vpack.i.bf16 %v15456_v51, %v14742_v18  ;;  %v12220_v41 = vunpack.i.h.bf16 %v15369_v15 }
 0x26c   :  { %17803 = vst [vmem:[#allocation69_spill] sm:$0xff] %v15431_v56  ;;  %11380 = vmatmul.msk.f32.vlgmr.msrb.gmra.mxu1 %vm286_vm2, %v15159_v1  ;;  %v6484_v15 = vsel %vm6473_vm3, %v12229_v57, %v12219_v63  ;;  %v12230_v57 = vunpack.i.h.bf16 %v15400_v27 }
 0x26d   :  { %11381 = vmatmul.msk.f32.vlgmr.msrb.gmra.mxu2 %vm286_vm2, %v15159_v1  ;;  %11382 = vmatmul.msk.f32.vlgmr.msra.gmra.mxu3 %vm286_vm2, %v15159_v1 }
 0x26e   :  { %11383 = vmatmul.msk.f32.vlgmr.msrb.gmra.mxu0 %vm286_vm2, %v6098_v17  ;;  %6428 = vmatpush.msra.mxu3 %v6096_v54 }
 0x26f   :  { %6388 = vmatpush.msrb.mxu1 %v6084_v50  ;;  %6408 = vmatpush.msrb.mxu2 %v6082_v52  ;;  %v6480_v52 = vsel %vm6473_vm3, %v12220_v41, %v12224_v25 }
 0x270   :  { %v4667_v1 = vpop.f32.mrf.mxu2  ;;  %v4687_v56 = vpop.f32.mrf.mxu3  ;;  %6510 = vmatpush.msrb.mxu0 %v6486_v23  ;;  %12362 = vrot.lane.b32.xlu2 %v12361_v47, %s12745_s26  ;;  %s12751_s26 = smov 75  }
 0x271   :  { %v15465_v54 = vadd.f32 %v4667_v1, %v15256_v26  ;;  %v15468_v21 = vadd.f32 %v4687_v56, %v15259_v9  ;;  %v15470_v18 = vpop.f32.mrf.mxu1  ;;  %v6482_v26 = vsel %vm6473_vm3, %v12219_v63, %v12220_v41  ;;  %v6478_v9 = vsel %vm6473_vm3, %v12224_v25, %v12235_v55  ;;  %v15488_v56 = vpop.permute.xlu2 %12242  ;;  %12402 = vrot.lane.b32.xlu1 %v12361_v47, %s12746_s28 }
 0x272   :  { %17805 = vst [vmem:[#allocation70_spill] sm:$0xff] %v15470_v18  ;;  %v15490_v23 = vpop.permute.xlu0 %12247  ;;  %v12234_v1 = vunpack.i.l.bf16 %v12233_v40  ;;  %v17715_v18 = vunpack.i.h.bf16 %v15488_v56  ;;  %12397 = vrot.lane.b32.xlu0 %v15248_v7, %s12746_s28 }
 0x273   :  { %v15474_v50 = vpop.f32.mrf.mxu0  ;;  %v12249_v40 = vunpack.i.l.bf16 %v15490_v23 }
 0x274   :  { %17806 = vst [vmem:[#allocation71_spill] sm:$0xff] %v15474_v50  ;;  %11384 = vmatmul.msk.f32.vlgmr.msra.gmra.mxu1 %vm286_vm2, %v6098_v17  ;;  %v6488_v47 = vsel %vm6473_vm3, %v12234_v1, %v12225_v32  ;;  %v12240_v32 = vunpack.i.h.bf16 %v15472_v61 }
 0x275   :  { %11385 = vmatmul.msk.f32.vlgmr.msra.gmra.mxu2 %vm286_vm2, %v6098_v17  ;;  %11386 = vmatmul.msk.f32.vlgmr.msrb.gmra.mxu3 %vm286_vm2, %v6098_v17 }
 0x276   :  { %11387 = vmatmul.msk.f32.vlgmr.msra.gmra.mxu0 %vm286_vm2, %v6098_v17  ;;  %6570 = vmatpush.msrb.mxu3 %v6480_v52 }
 0x277   :  { %6530 = vmatpush.msra.mxu1 %v6484_v15  ;;  %6550 = vmatpush.msra.mxu2 %v6482_v26  ;;  %v15515_v15 = vpop.permute.xlu1 %12252  ;;  %v6487_v26 = vsel %vm6473_vm3, %v17715_v18, %v12249_v40 }
 0x278   :  { %v4758_v63 = vpop.f32.mrf.mxu2  ;;  %v4778_v41 = vpop.f32.mrf.mxu3  ;;  %6590 = vmatpush.msra.mxu0 %v6478_v9  ;;  %12377 = vrot.lane.b32.xlu2 %v15193_v37, %s12746_s28 }
 0x279   :  { %v15495_v50 = vadd.f32 %v4758_v63, %v15308_v35  ;;  %v15498_v25 = vadd.f32 %v4778_v41, %v15311_v58  ;;  %v15500_v52 = vpop.f32.mrf.mxu1  ;;  %v6476_v35 = vsel %vm6473_vm3, %v12235_v55, %v12230_v57  ;;  %v6474_v58 = vsel %vm6473_vm3, %v12230_v57, %v12234_v1  ;;  %12417 = vrot.lane.b32.xlu1 %v15193_v37, %s12747_s18 }
 0x27a   :  { %17807 = vst [vmem:[#allocation72_spill] sm:$0xff] %v15500_v52  ;;  %v12244_v55 = vunpack.i.l.bf16 %v15488_v56  ;;  %v12239_v57 = vunpack.i.l.bf16 %v15472_v61  ;;  %12412 = vrot.lane.b32.xlu0 %v15296_v24, %s12746_s28  ;;  %v15546_v61 = vld [vmem:[%s17699_s1 + $0x88] sm:$0xff] }
 0x27b   :  { %v15506_v27 = vpop.f32.mrf.mxu0 }
 0x27c   :  { %11388 = vmatmul.msk.f32.vlgmr.msrb.gmra.mxu1 %vm286_vm2, %v6098_v17  ;;  %v6485_v24 = vsel %vm6473_vm3, %v12249_v40, %v12239_v57  ;;  %v15572_v40 = vpop.permute.xlu0 %12262 }
 0x27d   :  { %11389 = vmatmul.msk.f32.vlgmr.msrb.gmra.mxu2 %vm286_vm2, %v6098_v17  ;;  %11390 = vmatmul.msk.f32.vlgmr.msra.gmra.mxu3 %vm286_vm2, %v6098_v17 }
 0x27e   :  { %11391 = vmatmul.msk.f32.vlgmr.msrb.gmra.mxu0 %vm286_vm2, %v15374_v46  ;;  %6650 = vmatpush.msra.mxu3 %v6488_v47  ;;  %v12255_v47 = vunpack.i.h.bf16 %v15515_v15 }
 0x27f   :  { %6610 = vmatpush.msrb.mxu1 %v6476_v35  ;;  %6630 = vmatpush.msrb.mxu2 %v6474_v58  ;;  %v15541_v35 = vpop.permute.xlu2 %12257  ;;  %v6481_v58 = vsel %vm6473_vm3, %v12240_v32, %v12244_v55  ;;  %v15570_v52 = vpop.permute.xlu1 %12267 }
 0x280   :  { %v4838_v9 = vpop.f32.mrf.mxu2  ;;  %v4858_v1 = vpop.f32.mrf.mxu3  ;;  %6681 = vmatpush.msrb.mxu0 %v6487_v26 }
 0x281   :  { %v15531_v17 = vadd.f32 %v4838_v9, %v15359_v3  ;;  %v15534_v63 = vadd.f32 %v4858_v1, %v15362_v16  ;;  %v15536_v41 = vpop.f32.mrf.mxu1  ;;  %v39_v3 = vld [vmem:[%s17700_s2 + $0x88] sm:$0xff]  ;;  %v135_v9 = vmul.f32 0.001, %v15546_v61  ;;  %v6483_v1 = vsel %vm6473_vm3, %v12239_v57, %v12240_v32  ;;  %v12707_v57 = vld [vmem:[%s17698_s0 + $0x30] sm:$0xff] }
 0x282   :  { %17808 = vst [vmem:[#allocation73_spill] sm:$0xff] %v15536_v41  ;;  %v71_v26 = vmul.f32 0.999, %v39_v3  ;;  %v6479_v3 = vsel %vm6473_vm3, %v12244_v55, %v12255_v47  ;;  %v12254_v32 = vunpack.i.l.bf16 %v15515_v15  ;;  %v12708_v55 = vld [vmem:[%s17698_s0 + $0x38] sm:$0xff]  ;;  %12427 = vrot.lane.b32.xlu0 %v15351_v13, %s12747_s18 }
 0x283   :  { %v15551_v16 = vpop.f32.mrf.mxu0 }
 0x284   :  { %17809 = vst [vmem:[#allocation74_spill] sm:$0xff] %v15551_v16  ;;  %11392 = vmatmul.msk.f32.vlgmr.msra.gmra.mxu1 %vm286_vm2, %v15374_v46  ;;  %v167_v18 = vadd.f32 %v135_v9, %v71_v26  ;;  %v15581_v26 = vpack.i.bf16 %v12707_v57, %v12708_v55  ;;  %v12269_v55 = vunpack.i.l.bf16 %v15570_v52 }
 0x285   :  { %11393 = vmatmul.msk.f32.vlgmr.msra.gmra.mxu2 %vm286_vm2, %v15374_v46  ;;  %11394 = vmatmul.msk.f32.vlgmr.msrb.gmra.mxu3 %vm286_vm2, %v15374_v46 }
 0x286   :  { %11395 = vmatmul.msk.f32.vlgmr.msra.gmra.mxu0 %vm286_vm2, %v15374_v46  ;;  %6741 = vmatpush.msrb.mxu3 %v6481_v58  ;;  %200 = vst.msk [vmem:[%s17701_s6 + $0x88] sm:$0xff] %vm182_vm1, %v167_v18  ;;  %v12250_v58 = vunpack.i.h.bf16 %v15490_v23  ;;  %v12265_v18 = vunpack.i.h.bf16 %v15572_v40 }
 0x287   :  { %6701 = vmatpush.msra.mxu1 %v6485_v24  ;;  %6721 = vmatpush.msra.mxu2 %v6483_v1 }
 0x288   :  { %v4980_v15 = vpop.f32.mrf.mxu2  ;;  %v5000_v9 = vpop.f32.mrf.mxu3  ;;  %6761 = vmatpush.msra.mxu0 %v6479_v3  ;;  %12392 = vrot.lane.b32.xlu2 %v15581_v26, %s12746_s28 }
 0x289   :  { %v15591_v24 = vadd.f32 %v4980_v15, %v15419_v39  ;;  %v15594_v1 = vadd.f32 %v5000_v9, %v15422_v6  ;;  %v15596_v57 = vpop.f32.mrf.mxu1  ;;  %v6491_v39 = vld [vmem:[%s17701_s6 + $0x80] sm:$0xff]  ;;  %v17812_v6 = vunpack.i.h.bf16 %v15488_v56  ;;  %v6477_v15 = vsel %vm6473_vm3, %v12255_v47, %v12250_v58  ;;  %12432 = vrot.lane.b32.xlu1 %v15581_v26, %s12747_s18 }
 0x28a   :  { %17810 = vst [vmem:[#allocation75_spill] sm:$0xff] %v15596_v57  ;;  %v6475_v9 = vsel %vm6473_vm3, %v12250_v58, %v12254_v32  ;;  %v12273_v57 = vpop.permute.xlu2 %12272  ;;  %v6879_v56 = vsel %vm6866_vm4, %v12265_v18, %v12269_v55  ;;  %v12264_v47 = vunpack.i.l.bf16 %v15572_v40  ;;  %v15642_v40 = vpop.permute.xlu0 %12277 }
 0x28b   :  { %v15605_v23 = vpop.f32.mrf.mxu0  ;;  %v6489_v3 = vsel %vm6473_vm3, %v12254_v32, %v17812_v6  ;;  %v12260_v6 = vunpack.i.h.bf16 %v15541_v35  ;;  %v12275_v41 = vunpack.i.h.bf16 %v12273_v57  ;;  %vm11077_vm3 = vcmask 15360  }
 0x28c   :  { %17811 = vst [vmem:[#allocation76_spill] sm:$0xff] %v15605_v23  ;;  %11396 = vmatmul.msk.f32.vlgmr.msrb.gmra.mxu1 %vm286_vm2, %v15374_v46  ;;  %v12259_v23 = vunpack.i.l.bf16 %v15541_v35 }
 0x28d   :  { %11397 = vmatmul.msk.f32.vlgmr.msrb.gmra.mxu2 %vm286_vm2, %v15374_v46  ;;  %11398 = vmatmul.msk.f32.vlgmr.msra.gmra.mxu3 %vm286_vm2, %v15374_v46  ;;  %v6873_v35 = vsel %vm6866_vm4, %v12260_v6, %v12264_v47 }
 0x28e   :  { %11399 = vmatmul.msk.f32.vlgmr.msrb.gmra.mxu0 %vm286_vm2, %v6491_v39  ;;  %6821 = vmatpush.msra.mxu3 %v6489_v3 }
 0x28f   :  { %6781 = vmatpush.msrb.mxu1 %v6477_v15  ;;  %6801 = vmatpush.msrb.mxu2 %v6475_v9  ;;  %v6871_v9 = vsel %vm6866_vm4, %v12264_v47, %v12275_v41  ;;  %v12270_v47 = vunpack.i.h.bf16 %v15570_v52 }
 0x290   :  { %v5060_v32 = vpop.f32.mrf.mxu2  ;;  %v5080_v58 = vpop.f32.mrf.mxu3  ;;  %6903 = vmatpush.msrb.mxu0 %v6879_v56  ;;  %12407 = vrot.lane.b32.xlu2 %v15302_v8, %s12746_s28 }
 0x291   :  { %v15633_v46 = vadd.f32 %v5060_v32, %v15465_v54  ;;  %v15636_v16 = vadd.f32 %v5080_v58, %v15468_v21  ;;  %v15638_v3 = vpop.f32.mrf.mxu1  ;;  %v6877_v54 = vsel %vm6866_vm4, %v12269_v55, %v12259_v23  ;;  %v6875_v21 = vsel %vm6866_vm4, %v12259_v23, %v12260_v6  ;;  %v15658_v56 = vpop.permute.xlu1 %12282  ;;  %v15665_v55 = vld [vmem:[%s17698_s0 + $0x68] sm:$0xff]  ;;  %12447 = vrot.lane.b32.xlu1 %v15302_v8, %s12747_s18 }
 0x292   :  { %17813 = vst [vmem:[#allocation77_spill] sm:$0xff] %v15638_v3  ;;  %v15660_v32 = vpop.permute.xlu2 %12287  ;;  %v15669_v23 = vpack.i.bf16 %v15456_v51, %v15665_v55  ;;  %v12274_v6 = vunpack.i.l.bf16 %v12273_v57  ;;  %v17716_v51 = vunpack.i.h.bf16 %v15658_v56 }
 0x293   :  { %v15644_v15 = vpop.f32.mrf.mxu0  ;;  %v12289_v57 = vunpack.i.l.bf16 %v15660_v32 }
 0x294   :  { %17814 = vst [vmem:[#allocation78_spill] sm:$0xff] %v15644_v15  ;;  %11400 = vmatmul.msk.f32.vlgmr.msra.gmra.mxu1 %vm286_vm2, %v6491_v39  ;;  %12442 = vrot.lane.b32.xlu0 %v15669_v23, %s12747_s18 }
 0x295   :  { %11401 = vmatmul.msk.f32.vlgmr.msra.gmra.mxu2 %vm286_vm2, %v6491_v39  ;;  %11402 = vmatmul.msk.f32.vlgmr.msrb.gmra.mxu3 %vm286_vm2, %v6491_v39 }
 0x296   :  { %11403 = vmatmul.msk.f32.vlgmr.msra.gmra.mxu0 %vm286_vm2, %v6491_v39  ;;  %6963 = vmatpush.msrb.mxu3 %v6873_v35 }
 0x297   :  { %6923 = vmatpush.msra.mxu1 %v6877_v54  ;;  %6943 = vmatpush.msra.mxu2 %v6875_v21  ;;  %v6881_v54 = vsel %vm6866_vm4, %v12274_v6, %v12265_v18  ;;  %v12293_v21 = vpop.permute.xlu0 %12292  ;;  %v12284_v18 = vunpack.i.l.bf16 %v15658_v56 }
 0x298   :  { %v5151_v58 = vpop.f32.mrf.mxu2  ;;  %v5171_v35 = vpop.f32.mrf.mxu3  ;;  %6983 = vmatpush.msra.mxu0 %v6871_v9  ;;  %v6880_v9 = vsel %vm6866_vm4, %v17716_v51, %v12289_v57  ;;  %12422 = vrot.lane.b32.xlu2 %v15408_v45, %s12747_s18  ;;  %v12295_v51 = vunpack.i.h.bf16 %v12293_v21 }
 0x299   :  { %v15675_v15 = vadd.f32 %v5151_v58, %v15495_v50  ;;  %v15678_v3 = vadd.f32 %v5171_v35, %v15498_v25  ;;  %v15680_v5 = vpop.f32.mrf.mxu1  ;;  %v6869_v50 = vsel %vm6866_vm4, %v12275_v41, %v12270_v47  ;;  %v6867_v25 = vsel %vm6866_vm4, %v12270_v47, %v12274_v6  ;;  %12462 = vrot.lane.b32.xlu1 %v15408_v45, %s12748_s7 }
 0x29a   :  { %17815 = vst [vmem:[#allocation79_spill] sm:$0xff] %v15680_v5  ;;  %v12280_v41 = vunpack.i.h.bf16 %v15642_v40  ;;  %v12279_v58 = vunpack.i.l.bf16 %v15642_v40  ;;  %v15716_v5 = vpop.permute.xlu1 %12297  ;;  %v40_v40 = vld [vmem:[%s17700_s2 + $0x90] sm:$0xff] }
 0x29b   :  { %v15686_v52 = vpop.f32.mrf.mxu0 }
 0x29c   :  { %17816 = vst [vmem:[#allocation80_spill] sm:$0xff] %v15686_v52  ;;  %11404 = vmatmul.msk.f32.vlgmr.msrb.gmra.mxu1 %vm286_vm2, %v6491_v39  ;;  %v12294_v52 = vunpack.i.l.bf16 %v12293_v21  ;;  %12457 = vrot.lane.b32.xlu0 %v15193_v37, %s12748_s7 }
 0x29d   :  { %11405 = vmatmul.msk.f32.vlgmr.msrb.gmra.mxu2 %vm286_vm2, %v6491_v39  ;;  %11406 = vmatmul.msk.f32.vlgmr.msra.gmra.mxu3 %vm286_vm2, %v6491_v39 }
 0x29e   :  { %11407 = vmatmul.msk.f32.vlgmr.msrb.gmra.mxu0 %vm286_vm2, %v15546_v61  ;;  %7043 = vmatpush.msra.mxu3 %v6881_v54 }
 0x29f   :  { %7003 = vmatpush.msrb.mxu1 %v6869_v50  ;;  %7023 = vmatpush.msrb.mxu2 %v6867_v25  ;;  %v15721_v50 = vld [vmem:[%s17699_s1 + $0x90] sm:$0xff] }
 0x2a0   :  { %v5231_v6 = vpop.f32.mrf.mxu2  ;;  %v5251_v47 = vpop.f32.mrf.mxu3  ;;  %7074 = vmatpush.msrb.mxu0 %v6880_v9  ;;  %v136_v9 = vmul.f32 0.001, %v15721_v50  ;;  %12437 = vrot.lane.b32.xlu2 %v15248_v7, %s12747_s18 }
 0x2a1   :  { %v15709_v39 = vadd.f32 %v5231_v6, %v15531_v17  ;;  %v15712_v35 = vadd.f32 %v5251_v47, %v15534_v63  ;;  %v15714_v54 = vpop.f32.mrf.mxu1  ;;  %v6874_v17 = vsel %vm6866_vm4, %v12280_v41, %v12284_v18  ;;  %v72_v63 = vmul.f32 0.999, %v40_v40  ;;  %12477 = vrot.lane.b32.xlu1 %v15248_v7, %s12748_s7 }
 0x2a2   :  { %17817 = vst [vmem:[#allocation81_spill] sm:$0xff] %v15714_v54  ;;  %v6878_v6 = vsel %vm6866_vm4, %v12289_v57, %v12279_v58  ;;  %v6876_v47 = vsel %vm6866_vm4, %v12279_v58, %v12280_v41  ;;  %v6872_v40 = vsel %vm6866_vm4, %v12284_v18, %v12295_v51  ;;  %v15745_v54 = vpop.permute.xlu2 %12302  ;;  %v15747_v57 = vpop.permute.xlu0 %12307  ;;  %v12290_v41 = vunpack.i.h.bf16 %v15660_v32 }
 0x2a3   :  { %v15726_v25 = vpop.f32.mrf.mxu0 }
 0x2a4   :  { %17818 = vst [vmem:[#allocation82_spill] sm:$0xff] %v15726_v25  ;;  %11408 = vmatmul.msk.f32.vlgmr.msra.gmra.mxu1 %vm286_vm2, %v15546_v61  ;;  %v168_v25 = vadd.f32 %v136_v9, %v72_v63  ;;  %v12305_v9 = vunpack.i.h.bf16 %v15745_v54  ;;  %v6868_v37 = vsel %vm6866_vm4, %v12290_v41, %v12294_v52  ;;  %12472 = vrot.lane.b32.xlu0 %v15581_v26, %s12748_s7 }
 0x2a5   :  { %11409 = vmatmul.msk.f32.vlgmr.msra.gmra.mxu2 %vm286_vm2, %v15546_v61  ;;  %11410 = vmatmul.msk.f32.vlgmr.msrb.gmra.mxu3 %vm286_vm2, %v15546_v61 }
 0x2a6   :  { %11411 = vmatmul.msk.f32.vlgmr.msra.gmra.mxu0 %vm286_vm2, %v15546_v61  ;;  %7134 = vmatpush.msrb.mxu3 %v6874_v17  ;;  %201 = vst.msk [vmem:[%s17701_s6 + $0x90] sm:$0xff] %vm182_vm1, %v168_v25  ;;  %v12309_v25 = vunpack.i.l.bf16 %v15747_v57 }
 0x2a7   :  { %7094 = vmatpush.msra.mxu1 %v6878_v6  ;;  %7114 = vmatpush.msra.mxu2 %v6876_v47  ;;  %v6870_v47 = vsel %vm6866_vm4, %v12295_v51, %v12290_v41  ;;  %v12304_v51 = vunpack.i.l.bf16 %v15745_v54 }
 0x2a8   :  { %v5373_v18 = vpop.f32.mrf.mxu2  ;;  %v5393_v58 = vpop.f32.mrf.mxu3  ;;  %7154 = vmatpush.msra.mxu0 %v6872_v40 }
 0x2a9   :  { %v15757_v17 = vadd.f32 %v5373_v18, %v15591_v24  ;;  %v15760_v21 = vadd.f32 %v5393_v58, %v15594_v1  ;;  %v15762_v63 = vpop.f32.mrf.mxu1  ;;  %v6884_v24 = vld [vmem:[%s17701_s6 + $0x88] sm:$0xff]  ;;  %v17821_v1 = vunpack.i.h.bf16 %v15658_v56  ;;  %v12313_v40 = vpop.permute.xlu1 %12312  ;;  %v7270_v56 = vsel %vm7259_vm5, %v12305_v9, %v12309_v25 }
 0x2aa   :  { %17819 = vst [vmem:[#allocation83_spill] sm:$0xff] %v15762_v63  ;;  %v12300_v18 = vunpack.i.h.bf16 %v15716_v5  ;;  %v12299_v58 = vunpack.i.l.bf16 %v15716_v5  ;;  %v15806_v54 = vpop.permute.xlu2 %12317 }
 0x2ab   :  { %v15769_v32 = vpop.f32.mrf.mxu0  ;;  %v6882_v6 = vsel %vm6866_vm4, %v12294_v52, %v17821_v1 }
 0x2ac   :  { %17820 = vst [vmem:[#allocation84_spill] sm:$0xff] %v15769_v32  ;;  %11412 = vmatmul.msk.f32.vlgmr.msrb.gmra.mxu1 %vm286_vm2, %v15546_v61  ;;  %v12315_v32 = vunpack.i.h.bf16 %v12313_v40  ;;  %v7264_v5 = vsel %vm7259_vm5, %v12300_v18, %v12304_v51  ;;  %12487 = vrot.lane.b32.xlu0 %v15302_v8, %s12748_s7 }
 0x2ad   :  { %11413 = vmatmul.msk.f32.vlgmr.msrb.gmra.mxu2 %vm286_vm2, %v15546_v61  ;;  %11414 = vmatmul.msk.f32.vlgmr.msra.gmra.mxu3 %vm286_vm2, %v15546_v61 }
 0x2ae   :  { %11415 = vmatmul.msk.f32.vlgmr.msrb.gmra.mxu0 %vm286_vm2, %v6884_v24  ;;  %7214 = vmatpush.msra.mxu3 %v6882_v6 }
 0x2af   :  { %7174 = vmatpush.msrb.mxu1 %v6870_v47  ;;  %7194 = vmatpush.msrb.mxu2 %v6868_v37  ;;  %v7262_v37 = vsel %vm7259_vm5, %v12304_v51, %v12315_v32 }
 0x2b0   :  { %v5453_v52 = vpop.f32.mrf.mxu2  ;;  %v5473_v41 = vpop.f32.mrf.mxu3  ;;  %7296 = vmatpush.msrb.mxu0 %v7270_v56 }
 0x2b1   :  { %v15797_v61 = vadd.f32 %v5453_v52, %v15633_v46  ;;  %v15800_v1 = vadd.f32 %v5473_v41, %v15636_v16  ;;  %v15802_v6 = vpop.f32.mrf.mxu1  ;;  %v7268_v46 = vsel %vm7259_vm5, %v12309_v25, %v12299_v58  ;;  %v7266_v16 = vsel %vm7259_vm5, %v12299_v58, %v12300_v18  ;;  %v15822_v56 = vpop.permute.xlu1 %12327  ;;  %v15829_v25 = vld [vmem:[%s17698_s0 + $0x78] sm:$0xff] }
 0x2b2   :  { %17822 = vst [vmem:[#allocation85_spill] sm:$0xff] %v15802_v6  ;;  %v15824_v52 = vpop.permute.xlu0 %12322  ;;  %v15833_v18 = vpack.i.bf16 %v15292_v42, %v15829_v25  ;;  %v12310_v41 = vunpack.i.h.bf16 %v15747_v57  ;;  %v12329_v42 = vunpack.i.l.bf16 %v15822_v56 }
 0x2b3   :  { %v15808_v47 = vpop.f32.mrf.mxu0  ;;  %v17717_v57 = vunpack.i.h.bf16 %v15824_v52 }
 0x2b4   :  { %17823 = vst [vmem:[#allocation86_spill] sm:$0xff] %v15808_v47  ;;  %11416 = vmatmul.msk.f32.vlgmr.msra.gmra.mxu1 %vm286_vm2, %v6884_v24  ;;  %12452 = vrot.lane.b32.xlu2 %v15833_v18, %s12747_s18  ;;  %v7272_v7 = vsel %vm7259_vm5, %v12310_v41, %v12305_v9  ;;  %v12320_v9 = vunpack.i.h.bf16 %v15806_v54 }
 0x2b5   :  { %11417 = vmatmul.msk.f32.vlgmr.msra.gmra.mxu2 %vm286_vm2, %v6884_v24  ;;  %11418 = vmatmul.msk.f32.vlgmr.msrb.gmra.mxu3 %vm286_vm2, %v6884_v24  ;;  %v7271_v8 = vsel %vm7259_vm5, %v17717_v57, %v12329_v42 }
 0x2b6   :  { %11419 = vmatmul.msk.f32.vlgmr.msra.gmra.mxu0 %vm286_vm2, %v6884_v24  ;;  %7356 = vmatpush.msrb.mxu3 %v7264_v5  ;;  %v12314_v5 = vunpack.i.l.bf16 %v12313_v40 }
 0x2b7   :  { %7316 = vmatpush.msra.mxu1 %v7268_v46  ;;  %7336 = vmatpush.msra.mxu2 %v7266_v16  ;;  %v12333_v46 = vpop.permute.xlu2 %12332  ;;  %v12324_v16 = vunpack.i.l.bf16 %v15824_v52 }
 0x2b8   :  { %v5544_v51 = vpop.f32.mrf.mxu2  ;;  %v5564_v58 = vpop.f32.mrf.mxu3  ;;  %7376 = vmatpush.msra.mxu0 %v7262_v37  ;;  %12492 = vrot.lane.b32.xlu1 %v15833_v18, %s12748_s7 }
 0x2b9   :  { %v15839_v47 = vadd.f32 %v5544_v51, %v15675_v15  ;;  %v15842_v6 = vadd.f32 %v5564_v58, %v15678_v3  ;;  %v15844_v63 = vpop.f32.mrf.mxu1  ;;  %v7274_v3 = vsel %vm7259_vm5, %v12314_v5, %v12310_v41  ;;  %v7260_v15 = vsel %vm7259_vm5, %v12315_v32, %v12314_v5  ;;  %12502 = vrot.lane.b32.xlu0 %v15408_v45, %s12749_s16 }
 0x2ba   :  { %17824 = vst [vmem:[#allocation87_spill] sm:$0xff] %v15844_v63  ;;  %v12319_v41 = vunpack.i.l.bf16 %v15806_v54  ;;  %v12335_v5 = vunpack.i.h.bf16 %v12333_v46  ;;  %v15889_v54 = vld [vmem:[%s17699_s1 + $0x98] sm:$0xff]  ;;  %v15913_v63 = vpop.permute.xlu1 %12342 }
 0x2bb   :  { %v15852_v40 = vpop.f32.mrf.mxu0 }
 0x2bc   :  { %11420 = vmatmul.msk.f32.vlgmr.msrb.gmra.mxu1 %vm286_vm2, %v6884_v24  ;;  %12467 = vrot.lane.b32.xlu2 %v15351_v13, %s12748_s7 }
 0x2bd   :  { %11421 = vmatmul.msk.f32.vlgmr.msrb.gmra.mxu2 %vm286_vm2, %v6884_v24  ;;  %11422 = vmatmul.msk.f32.vlgmr.msra.gmra.mxu3 %vm286_vm2, %v6884_v24 }
 0x2be   :  { %11423 = vmatmul.msk.f32.vlgmr.msrb.gmra.mxu0 %vm286_vm2, %v15721_v50  ;;  %7436 = vmatpush.msra.mxu3 %v7272_v7  ;;  %v15884_v7 = vpop.permute.xlu0 %12337 }
 0x2bf   :  { %7416 = vmatpush.msrb.mxu2 %v7274_v3  ;;  %7396 = vmatpush.msrb.mxu1 %v7260_v15 }
 0x2c0   :  { %v5624_v32 = vpop.f32.mrf.mxu2  ;;  %v5644_v37 = vpop.f32.mrf.mxu3  ;;  %7467 = vmatpush.msrb.mxu0 %v7271_v8  ;;  %v137_v8 = vmul.f32 0.001, %v15889_v54  ;;  %12507 = vrot.lane.b32.xlu1 %v15351_v13, %s12749_s16  ;;  %v7277_v13 = vld [vmem:[%s17701_s6 + $0x90] sm:$0xff] }
 0x2c1   :  { %v15875_v24 = vadd.f32 %v5624_v32, %v15709_v39  ;;  %v15878_v51 = vadd.f32 %v5644_v37, %v15712_v35  ;;  %v15880_v58 = vpop.f32.mrf.mxu1  ;;  %v41_v39 = vld [vmem:[%s17700_s2 + $0x98] sm:$0xff]  ;;  %v7265_v35 = vsel %vm7259_vm5, %v12320_v9, %v12324_v16  ;;  %v7269_v32 = vsel %vm7259_vm5, %v12329_v42, %v12319_v41  ;;  %v15915_v42 = vpop.permute.xlu2 %12347 }
 0x2c2   :  { %17825 = vst [vmem:[#allocation88_spill] sm:$0xff] %v15880_v58  ;;  %v73_v15 = vmul.f32 0.999, %v41_v39  ;;  %v7267_v37 = vsel %vm7259_vm5, %v12319_v41, %v12320_v9  ;;  %v7263_v39 = vsel %vm7259_vm5, %v12324_v16, %v12335_v5  ;;  %v12330_v9 = vunpack.i.h.bf16 %v15822_v56 }
 0x2c3   :  { %v15894_v3 = vpop.f32.mrf.mxu0 }
 0x2c4   :  { %17826 = vst [vmem:[#allocation89_spill] sm:$0xff] %v15894_v3  ;;  %11424 = vmatmul.msk.f32.vlgmr.msra.gmra.mxu1 %vm286_vm2, %v15721_v50  ;;  %v169_v57 = vadd.f32 %v137_v8, %v73_v15  ;;  %v12334_v15 = vunpack.i.l.bf16 %v12333_v46  ;;  %12482 = vrot.lane.b32.xlu2 %v15669_v23, %s12748_s7 }
 0x2c5   :  { %11425 = vmatmul.msk.f32.vlgmr.msra.gmra.mxu2 %vm286_vm2, %v15721_v50  ;;  %11426 = vmatmul.msk.f32.vlgmr.msrb.gmra.mxu3 %vm286_vm2, %v15721_v50 }
 0x2c6   :  { %11427 = vmatmul.msk.f32.vlgmr.msra.gmra.mxu0 %vm286_vm2, %v15721_v50  ;;  %7527 = vmatpush.msrb.mxu3 %v7265_v35  ;;  %202 = vst.msk [vmem:[%s17701_s6 + $0x98] sm:$0xff] %vm182_vm1, %v169_v57  ;;  %v12349_v57 = vunpack.i.l.bf16 %v15915_v42  ;;  %v7261_v45 = vsel %vm7259_vm5, %v12335_v5, %v12334_v15 }
 0x2c7   :  { %7487 = vmatpush.msra.mxu1 %v7269_v32  ;;  %7507 = vmatpush.msra.mxu2 %v7267_v37  ;;  %v12345_v32 = vunpack.i.h.bf16 %v15913_v63  ;;  %v7275_v37 = vsel %vm7259_vm5, %v12334_v15, %v12330_v9  ;;  %v12339_v15 = vunpack.i.l.bf16 %v15884_v7 }
 0x2c8   :  { %v5766_v41 = vpop.f32.mrf.mxu2  ;;  %v5786_v16 = vpop.f32.mrf.mxu3  ;;  %7547 = vmatpush.msra.mxu0 %v7263_v39  ;;  %12522 = vrot.lane.b32.xlu1 %v15669_v23, %s12749_s16 }
 0x2c9   :  { %v15925_v35 = vadd.f32 %v5766_v41, %v15757_v17  ;;  %v15928_v56 = vadd.f32 %v5786_v16, %v15760_v21  ;;  %v15930_v8 = vpop.f32.mrf.mxu1  ;;  %v17829_v17 = vunpack.i.h.bf16 %v15824_v52  ;;  %v12353_v39 = vpop.permute.xlu0 %12352  ;;  %v7663_v52 = vsel %vm7652_vm6, %v12345_v32, %v12349_v57 }
 0x2ca   :  { %17827 = vst [vmem:[#allocation90_spill] sm:$0xff] %v15930_v8  ;;  %v12344_v41 = vunpack.i.l.bf16 %v15913_v63  ;;  %v12355_v63 = vunpack.i.h.bf16 %v12353_v39 }
 0x2cb   :  { %v15937_v46 = vpop.f32.mrf.mxu0  ;;  %v7273_v21 = vsel %vm7259_vm5, %v12330_v9, %v17829_v17  ;;  %v12340_v9 = vunpack.i.h.bf16 %v15884_v7 }
 0x2cc   :  { %17828 = vst [vmem:[#allocation91_spill] sm:$0xff] %v15937_v46  ;;  %11428 = vmatmul.msk.f32.vlgmr.msrb.gmra.mxu1 %vm286_vm2, %v15721_v50  ;;  %v15972_v46 = vpop.permute.xlu1 %12357 }
 0x2cd   :  { %11429 = vmatmul.msk.f32.vlgmr.msrb.gmra.mxu2 %vm286_vm2, %v15721_v50  ;;  %11430 = vmatmul.msk.f32.vlgmr.msra.gmra.mxu3 %vm286_vm2, %v15721_v50  ;;  %v7657_v7 = vsel %vm7652_vm6, %v12340_v9, %v12344_v41 }
 0x2ce   :  { %11431 = vmatmul.msk.f32.vlgmr.msrb.gmra.mxu0 %vm286_vm2, %v7277_v13  ;;  %7607 = vmatpush.msra.mxu3 %v7273_v21 }
 0x2cf   :  { %7587 = vmatpush.msrb.mxu2 %v7275_v37  ;;  %7567 = vmatpush.msrb.mxu1 %v7261_v45  ;;  %v7661_v45 = vsel %vm7652_vm6, %v12349_v57, %v12339_v15  ;;  %v12711_v57 = vld [vmem:[%s17698_s0 + $0x58] sm:$0xff] }
 0x2d0   :  { %v5846_v5 = vpop.f32.mrf.mxu2  ;;  %v5866_v16 = vpop.f32.mrf.mxu3  ;;  %7689 = vmatpush.msrb.mxu0 %v7663_v52 }
 0x2d1   :  { %v15965_v50 = vadd.f32 %v5846_v5, %v15797_v61  ;;  %v15968_v17 = vadd.f32 %v5866_v16, %v15800_v1  ;;  %v15970_v21 = vpop.f32.mrf.mxu1  ;;  %v7659_v61 = vsel %vm7652_vm6, %v12339_v15, %v12340_v9  ;;  %v7655_v1 = vsel %vm7652_vm6, %v12344_v41, %v12355_v63  ;;  %v15988_v52 = vpop.permute.xlu2 %12362  ;;  %v12712_v9 = vld [vmem:[%s17698_s0 + $0x60] sm:$0xff] }
 0x2d2   :  { %17830 = vst [vmem:[#allocation92_spill] sm:$0xff] %v15970_v21  ;;  %v15990_v5 = vpop.permute.xlu0 %12367  ;;  %v15998_v16 = vpack.i.bf16 %v12712_v9, %v12711_v57  ;;  %v12350_v15 = vunpack.i.h.bf16 %v15915_v42  ;;  %v17718_v57 = vunpack.i.h.bf16 %v15988_v52 }
 0x2d3   :  { %v15974_v37 = vpop.f32.mrf.mxu0  ;;  %v12369_v42 = vunpack.i.l.bf16 %v15990_v5 }
 0x2d4   :  { %17831 = vst [vmem:[#allocation93_spill] sm:$0xff] %v15974_v37  ;;  %11432 = vmatmul.msk.f32.vlgmr.msra.gmra.mxu1 %vm286_vm2, %v7277_v13  ;;  %v12354_v37 = vunpack.i.l.bf16 %v12353_v39  ;;  %12517 = vrot.lane.b32.xlu0 %v15998_v16, %s12749_s16  ;;  %v7665_v23 = vsel %vm7652_vm6, %v12350_v15, %v12345_v32  ;;  %v12713_v32 = vld [vmem:[%s17698_s0 + $0x20] sm:$0xff] }
 0x2d5   :  { %11433 = vmatmul.msk.f32.vlgmr.msra.gmra.mxu2 %vm286_vm2, %v7277_v13  ;;  %11434 = vmatmul.msk.f32.vlgmr.msrb.gmra.mxu3 %vm286_vm2, %v7277_v13 }
 0x2d6   :  { %11435 = vmatmul.msk.f32.vlgmr.msra.gmra.mxu0 %vm286_vm2, %v7277_v13  ;;  %7749 = vmatpush.msrb.mxu3 %v7657_v7 }
 0x2d7   :  { %7709 = vmatpush.msra.mxu1 %v7661_v45  ;;  %7729 = vmatpush.msra.mxu2 %v7659_v61  ;;  %v16024_v45 = vpop.permute.xlu1 %12372  ;;  %v7664_v61 = vsel %vm7652_vm6, %v17718_v57, %v12369_v42 }
 0x2d8   :  { %v5937_v41 = vpop.f32.mrf.mxu2  ;;  %v5957_v7 = vpop.f32.mrf.mxu3  ;;  %7769 = vmatpush.msra.mxu0 %v7655_v1  ;;  %v12364_v1 = vunpack.i.l.bf16 %v15988_v52  ;;  %v12374_v58 = vunpack.i.l.bf16 %v16024_v45 }
 0x2d9   :  { %v16004_v21 = vadd.f32 %v5937_v41, %v15839_v47  ;;  %v16007_v8 = vadd.f32 %v5957_v7, %v15842_v6  ;;  %v16009_v3 = vpop.f32.mrf.mxu1  ;;  %v7667_v6 = vsel %vm7652_vm6, %v12354_v37, %v12350_v15  ;;  %v7653_v47 = vsel %vm7652_vm6, %v12355_v63, %v12354_v37  ;;  %v12714_v63 = vld [vmem:[%s17698_s0 + $0x18] sm:$0xff] }
 0x2da   :  { %17832 = vst [vmem:[#allocation94_spill] sm:$0xff] %v16009_v3  ;;  %v16040_v37 = vpack.i.bf16 %v12713_v32, %v12714_v63  ;;  %v12359_v41 = vunpack.i.l.bf16 %v15972_v46  ;;  %v12375_v63 = vunpack.i.h.bf16 %v16024_v45  ;;  %v16089_v3 = vpop.permute.xlu0 %12382  ;;  %v17838_v45 = vunpack.i.h.bf16 %v15988_v52 }
 0x2db   :  { %v16015_v39 = vpop.f32.mrf.mxu0 }
 0x2dc   :  { %17833 = vst [vmem:[#allocation95_spill] sm:$0xff] %v16015_v39  ;;  %11436 = vmatmul.msk.f32.vlgmr.msrb.gmra.mxu1 %vm286_vm2, %v7277_v13  ;;  %12497 = vrot.lane.b32.xlu2 %v16040_v37, %s12749_s16 }
 0x2dd   :  { %11437 = vmatmul.msk.f32.vlgmr.msrb.gmra.mxu2 %vm286_vm2, %v7277_v13  ;;  %11438 = vmatmul.msk.f32.vlgmr.msra.gmra.mxu3 %vm286_vm2, %v7277_v13  ;;  %v12360_v13 = vunpack.i.h.bf16 %v15972_v46  ;;  %v16063_v46 = vld [vmem:[%s17699_s1 + $0xa0] sm:$0xff] }
 0x2de   :  { %11439 = vmatmul.msk.f32.vlgmr.msrb.gmra.mxu0 %vm286_vm2, %v15889_v54  ;;  %7829 = vmatpush.msra.mxu3 %v7665_v23 }
 0x2df   :  { %7809 = vmatpush.msrb.mxu2 %v7667_v6  ;;  %7789 = vmatpush.msrb.mxu1 %v7653_v47  ;;  %v16058_v6 = vpop.permute.xlu2 %12377  ;;  %v7658_v47 = vsel %vm7652_vm6, %v12360_v13, %v12364_v1  ;;  %v16087_v57 = vpop.permute.xlu1 %12387 }
 0x2e0   :  { %v6017_v9 = vpop.f32.mrf.mxu2  ;;  %v6037_v15 = vpop.f32.mrf.mxu3  ;;  %7860 = vmatpush.msrb.mxu0 %v7664_v61  ;;  %12532 = vrot.lane.b32.xlu0 %v15833_v18, %s12749_s16  ;;  %v7662_v18 = vsel %vm7652_vm6, %v12369_v42, %v12359_v41  ;;  %v12370_v42 = vunpack.i.h.bf16 %v15990_v5 }
 0x2e1   :  { %v16048_v7 = vadd.f32 %v6017_v9, %v15875_v24  ;;  %v16051_v23 = vadd.f32 %v6037_v15, %v15878_v51  ;;  %v16053_v32 = vpop.f32.mrf.mxu1  ;;  %v42_v24 = vld [vmem:[%s17700_s2 + $0xa0] sm:$0xff]  ;;  %v138_v9 = vmul.f32 0.001, %v16063_v46  ;;  %v7660_v15 = vsel %vm7652_vm6, %v12359_v41, %v12360_v13  ;;  %12537 = vrot.lane.b32.xlu1 %v16040_v37, %s12750_s12 }
 0x2e2   :  { %17834 = vst [vmem:[#allocation96_spill] sm:$0xff] %v16053_v32  ;;  %v74_v61 = vmul.f32 0.999, %v42_v24  ;;  %v7656_v24 = vsel %vm7652_vm6, %v12364_v1, %v12375_v63  ;;  %v12715_v13 = vld [vmem:[%s17698_s0] sm:$0xff]  ;;  %v12716_v1 = vld [vmem:[%s17698_s0 + $0x10] sm:$0xff] }
 0x2e3   :  { %v16068_v51 = vpop.f32.mrf.mxu0  ;;  %v16098_v41 = vpack.i.bf16 %v12715_v13, %v12716_v1  ;;  %v12389_v13 = vunpack.i.l.bf16 %v16087_v57  ;;  %v12384_v1 = vunpack.i.l.bf16 %v16089_v3 }
 0x2e4   :  { %17835 = vst [vmem:[#allocation97_spill] sm:$0xff] %v16068_v51  ;;  %11440 = vmatmul.msk.f32.vlgmr.msra.gmra.mxu1 %vm286_vm2, %v15889_v54  ;;  %v170_v51 = vadd.f32 %v138_v9, %v74_v61  ;;  %v17719_v61 = vunpack.i.h.bf16 %v16089_v3  ;;  %12512 = vrot.lane.b32.xlu2 %v15581_v26, %s12749_s16  ;;  %v7654_v9 = vsel %vm7652_vm6, %v12375_v63, %v12374_v58  ;;  %v12718_v63 = vld [vmem:[%s17698_s0 + $0x40] sm:$0xff] }
 0x2e5   :  { %11441 = vmatmul.msk.f32.vlgmr.msra.gmra.mxu2 %vm286_vm2, %v15889_v54  ;;  %11442 = vmatmul.msk.f32.vlgmr.msrb.gmra.mxu3 %vm286_vm2, %v15889_v54 }
 0x2e6   :  { %11443 = vmatmul.msk.f32.vlgmr.msra.gmra.mxu0 %vm286_vm2, %v15889_v54  ;;  %7920 = vmatpush.msrb.mxu3 %v7658_v47  ;;  %203 = vst.msk [vmem:[%s17701_s6 + $0xa0] sm:$0xff] %vm182_vm1, %v170_v51  ;;  %v7668_v51 = vsel %vm7652_vm6, %v12374_v58, %v12370_v42  ;;  %v8056_v52 = vsel %vm8045_vm7, %v17719_v61, %v12389_v13  ;;  %v12717_v58 = vld [vmem:[%s17698_s0 + $0x50] sm:$0xff] }
 0x2e7   :  { %7880 = vmatpush.msra.mxu1 %v7662_v18  ;;  %7900 = vmatpush.msra.mxu2 %v7660_v15 }
 0x2e8   :  { %v6159_v47 = vpop.f32.mrf.mxu2  ;;  %v6179_v32 = vpop.f32.mrf.mxu3  ;;  %7940 = vmatpush.msra.mxu0 %v7656_v24  ;;  %12547 = vrot.lane.b32.xlu0 %v16098_v41, %s12750_s12 }
 0x2e9   :  { %v16104_v5 = vadd.f32 %v6159_v47, %v15925_v35  ;;  %v16107_v18 = vadd.f32 %v6179_v32, %v15928_v56  ;;  %v16109_v15 = vpop.f32.mrf.mxu1  ;;  %v16127_v56 = vld [vmem:[%s17701_s6 + $0x98] sm:$0xff]  ;;  %v7666_v32 = vsel %vm7652_vm6, %v12370_v42, %v17838_v45  ;;  %v12393_v24 = vpop.permute.xlu2 %12392  ;;  %v16155_v42 = vpack.i.bf16 %v12718_v63, %v12717_v58  ;;  %12552 = vrot.lane.b32.xlu1 %v15581_v26, %s12750_s12 }
 0x2ea   :  { %17836 = vst [vmem:[#allocation98_spill] sm:$0xff] %v16109_v15 }
 0x2eb   :  { %v16122_v35 = vpop.f32.mrf.mxu0 }
 0x2ec   :  { %17837 = vst [vmem:[#allocation99_spill] sm:$0xff] %v16122_v35  ;;  %11444 = vmatmul.msk.f32.vlgmr.msrb.gmra.mxu1 %vm286_vm2, %v15889_v54  ;;  %v12395_v35 = vunpack.i.h.bf16 %v12393_v24  ;;  %12527 = vrot.lane.b32.xlu2 %v16155_v42, %s12749_s16 }
 0x2ed   :  { %11445 = vmatmul.msk.f32.vlgmr.msrb.gmra.mxu2 %vm286_vm2, %v15889_v54  ;;  %11446 = vmatmul.msk.f32.vlgmr.msra.gmra.mxu3 %vm286_vm2, %v15889_v54  ;;  %v12380_v54 = vunpack.i.h.bf16 %v16058_v6 }
 0x2ee   :  { %11447 = vmatmul.msk.f32.vlgmr.msrb.gmra.mxu0 %vm286_vm2, %v16127_v56  ;;  %8000 = vmatpush.msra.mxu3 %v7666_v32  ;;  %v12379_v32 = vunpack.i.l.bf16 %v16058_v6 }
 0x2ef   :  { %7980 = vmatpush.msrb.mxu2 %v7668_v51  ;;  %7960 = vmatpush.msrb.mxu1 %v7654_v9  ;;  %v16172_v51 = vpop.permute.xlu0 %12397  ;;  %v8050_v6 = vsel %vm8045_vm7, %v12380_v54, %v12384_v1 }
 0x2f0   :  { %v6239_v47 = vpop.f32.mrf.mxu2  ;;  %v6259_v45 = vpop.f32.mrf.mxu3  ;;  %8082 = vmatpush.msrb.mxu0 %v8056_v52  ;;  %v8048_v52 = vsel %vm8045_vm7, %v12384_v1, %v12395_v35 }
 0x2f1   :  { %v16163_v61 = vadd.f32 %v6239_v47, %v15965_v50  ;;  %v16166_v58 = vadd.f32 %v6259_v45, %v15968_v17  ;;  %v16168_v63 = vpop.f32.mrf.mxu1  ;;  %v8054_v50 = vsel %vm8045_vm7, %v12389_v13, %v12379_v32  ;;  %v8052_v17 = vsel %vm8045_vm7, %v12379_v32, %v12380_v54  ;;  %v16192_v47 = vpop.permute.xlu1 %12402  ;;  %v16199_v13 = vld [vmem:[%s17698_s0 + $0x48] sm:$0xff]  ;;  %12567 = vrot.lane.b32.xlu1 %v16155_v42, %s12750_s12 }
 0x2f2   :  { %17839 = vst [vmem:[#allocation100_spill] sm:$0xff] %v16168_v63  ;;  %v16194_v45 = vpop.permute.xlu2 %12407  ;;  %v12561_v54 = vpack.i.bf16 %v16199_v13, %v15665_v55  ;;  %v12390_v32 = vunpack.i.h.bf16 %v16087_v57  ;;  %v12394_v63 = vunpack.i.l.bf16 %v12393_v24  ;;  %v17720_v55 = vunpack.i.h.bf16 %v16192_v47 }
 0x2f3   :  { %v16174_v9 = vpop.f32.mrf.mxu0  ;;  %v12409_v57 = vunpack.i.l.bf16 %v16194_v45  ;;  %v17843_v24 = vunpack.i.h.bf16 %v16089_v3 }
 0x2f4   :  { %17840 = vst [vmem:[#allocation101_spill] sm:$0xff] %v16174_v9  ;;  %11448 = vmatmul.msk.f32.vlgmr.msra.gmra.mxu1 %vm286_vm2, %v16127_v56  ;;  %12562 = vrot.lane.b32.xlu0 %v12561_v54, %s12750_s12  ;;  %v12400_v54 = vunpack.i.h.bf16 %v16172_v51 }
 0x2f5   :  { %11449 = vmatmul.msk.f32.vlgmr.msra.gmra.mxu2 %vm286_vm2, %v16127_v56  ;;  %11450 = vmatmul.msk.f32.vlgmr.msrb.gmra.mxu3 %vm286_vm2, %v16127_v56  ;;  %v8057_v3 = vsel %vm8045_vm7, %v17720_v55, %v12409_v57 }
 0x2f6   :  { %11451 = vmatmul.msk.f32.vlgmr.msra.gmra.mxu0 %vm286_vm2, %v16127_v56  ;;  %8142 = vmatpush.msrb.mxu3 %v8050_v6 }
 0x2f7   :  { %8102 = vmatpush.msra.mxu1 %v8054_v50  ;;  %8122 = vmatpush.msra.mxu2 %v8052_v17  ;;  %v8058_v17 = vsel %vm8045_vm7, %v12390_v32, %v17843_v24  ;;  %v12399_v24 = vunpack.i.l.bf16 %v16172_v51  ;;  %v16268_v51 = vld [vmem:[%s17699_s1 + $0xa8] sm:$0xff] }
 0x2f8   :  { %v6330_v1 = vpop.f32.mrf.mxu2  ;;  %v6350_v9 = vpop.f32.mrf.mxu3  ;;  %8162 = vmatpush.msra.mxu0 %v8048_v52 }
 0x2f9   :  { %v16207_v6 = vadd.f32 %v6330_v1, %v16004_v21  ;;  %v16210_v15 = vadd.f32 %v6350_v9, %v16007_v8  ;;  %v16212_v39 = vpop.f32.mrf.mxu1  ;;  %v8060_v8 = vsel %vm8045_vm7, %v12394_v63, %v12390_v32  ;;  %v8046_v21 = vsel %vm8045_vm7, %v12395_v35, %v12394_v63  ;;  %v16229_v9 = vpop.permute.xlu0 %12412  ;;  %v12720_v35 = vld [vmem:[%s17698_s0 + $0x8] sm:$0xff] }
 0x2fa   :  { %17841 = vst [vmem:[#allocation102_spill] sm:$0xff] %v16212_v39  ;;  %v12721_v63 = vld [vmem:[%s17698_s0 + $0x28] sm:$0xff]  ;;  %v12415_v55 = vunpack.i.h.bf16 %v16229_v9  ;;  %v8053_v39 = vsel %vm8045_vm7, %v12399_v24, %v12400_v54 }
 0x2fb   :  { %v16217_v50 = vpop.f32.mrf.mxu0  ;;  %v16247_v52 = vpack.i.bf16 %v12720_v35, %v12721_v63 }
 0x2fc   :  { %17842 = vst [vmem:[#allocation103_spill] sm:$0xff] %v16217_v50  ;;  %11452 = vmatmul.msk.f32.vlgmr.msrb.gmra.mxu1 %vm286_vm2, %v16127_v56  ;;  %12577 = vrot.lane.b32.xlu0 %v16040_v37, %s12751_s26 }
 0x2fd   :  { %11453 = vmatmul.msk.f32.vlgmr.msrb.gmra.mxu2 %vm286_vm2, %v16127_v56  ;;  %11454 = vmatmul.msk.f32.vlgmr.msra.gmra.mxu3 %vm286_vm2, %v16127_v56  ;;  %v12404_v56 = vunpack.i.l.bf16 %v16192_v47 }
 0x2fe   :  { %11455 = vmatmul.msk.f32.vlgmr.msrb.gmra.mxu0 %vm286_vm2, %v16063_v46  ;;  %8222 = vmatpush.msra.mxu3 %v8058_v17 }
 0x2ff   :  { %8202 = vmatpush.msrb.mxu2 %v8060_v8  ;;  %8182 = vmatpush.msrb.mxu1 %v8046_v21  ;;  %v16263_v8 = vpop.permute.xlu1 %12417  ;;  %v43_v21 = vld [vmem:[%s17700_s2 + $0xa8] sm:$0xff] }
 0x300   :  { %v6410_v32 = vpop.f32.mrf.mxu2  ;;  %v6430_v1 = vpop.f32.mrf.mxu3  ;;  %8253 = vmatpush.msrb.mxu0 %v8057_v3  ;;  %12542 = vrot.lane.b32.xlu2 %v16247_v52, %s12750_s12  ;;  %v75_v3 = vmul.f32 0.999, %v43_v21  ;;  %v8049_v21 = vsel %vm8045_vm7, %v12404_v56, %v12415_v55 }
 0x301   :  { %v16255_v17 = vadd.f32 %v6410_v32, %v16048_v7  ;;  %v16258_v35 = vadd.f32 %v6430_v1, %v16051_v23  ;;  %v16260_v63 = vpop.f32.mrf.mxu1  ;;  %v8051_v23 = vsel %vm8045_vm7, %v12400_v54, %v12404_v56  ;;  %v139_v32 = vmul.f32 0.001, %v16268_v51  ;;  %12582 = vrot.lane.b32.xlu1 %v16247_v52, %s12751_s26 }
 0x302   :  { %17844 = vst [vmem:[#allocation104_spill] sm:$0xff] %v16260_v63  ;;  %v8055_v1 = vsel %vm8045_vm7, %v12409_v57, %v12399_v24  ;;  %v16292_v63 = vpop.permute.xlu2 %12422  ;;  %v16294_v57 = vpop.permute.xlu0 %12427  ;;  %v12410_v54 = vunpack.i.h.bf16 %v16194_v45 }
 0x303   :  { %v16273_v7 = vpop.f32.mrf.mxu0 }
 0x304   :  { %17845 = vst [vmem:[#allocation105_spill] sm:$0xff] %v16273_v7  ;;  %11456 = vmatmul.msk.f32.vlgmr.msra.gmra.mxu1 %vm286_vm2, %v16063_v46  ;;  %v171_v7 = vadd.f32 %v139_v32, %v75_v3  ;;  %v12414_v3 = vunpack.i.l.bf16 %v16229_v9  ;;  %v12425_v32 = vunpack.i.h.bf16 %v16292_v63  ;;  %12592 = vrot.lane.b32.xlu0 %v15581_v26, %s12751_s26 }
 0x305   :  { %11457 = vmatmul.msk.f32.vlgmr.msra.gmra.mxu2 %vm286_vm2, %v16063_v46  ;;  %11458 = vmatmul.msk.f32.vlgmr.msrb.gmra.mxu3 %vm286_vm2, %v16063_v46 }
 0x306   :  { %11459 = vmatmul.msk.f32.vlgmr.msra.gmra.mxu0 %vm286_vm2, %v16063_v46  ;;  %8313 = vmatpush.msrb.mxu3 %v8051_v23  ;;  %204 = vst.msk [vmem:[%s17701_s6 + $0xa8] sm:$0xff] %vm182_vm1, %v171_v7  ;;  %v12429_v7 = vunpack.i.l.bf16 %v16294_v57 }
 0x307   :  { %8273 = vmatpush.msra.mxu1 %v8055_v1  ;;  %8293 = vmatpush.msra.mxu2 %v8053_v39 }
 0x308   :  { %v6552_v24 = vpop.f32.mrf.mxu2  ;;  %v6572_v56 = vpop.f32.mrf.mxu3  ;;  %8333 = vmatpush.msra.mxu0 %v8049_v21  ;;  %v8061_v21 = vsel %vm8045_vm7, %v12414_v3, %v12410_v54  ;;  %12557 = vrot.lane.b32.xlu2 %v15998_v16, %s12750_s12 }
 0x309   :  { %v16305_v23 = vadd.f32 %v6552_v24, %v16104_v5  ;;  %v16308_v45 = vadd.f32 %v6572_v56, %v16107_v18  ;;  %v16310_v39 = vpop.f32.mrf.mxu1  ;;  %v8063_v5 = vld [vmem:[%s17701_s6 + $0xa0] sm:$0xff]  ;;  %v17848_v18 = vunpack.i.h.bf16 %v16192_v47  ;;  %v8047_v24 = vsel %vm8045_vm7, %v12415_v55, %v12414_v3  ;;  %v12433_v56 = vpop.permute.xlu1 %12432  ;;  %12597 = vrot.lane.b32.xlu1 %v15998_v16, %s12751_s26 }
 0x30a   :  { %17846 = vst [vmem:[#allocation106_spill] sm:$0xff] %v16310_v39  ;;  %v8449_v47 = vsel %vm8438_vm8, %v12425_v32, %v12429_v7  ;;  %v12435_v50 = vunpack.i.h.bf16 %v12433_v56 }
 0x30b   :  { %v16317_v9 = vpop.f32.mrf.mxu0  ;;  %v8059_v1 = vsel %vm8045_vm7, %v12410_v54, %v17848_v18  ;;  %v12420_v18 = vunpack.i.h.bf16 %v16263_v8  ;;  %v12424_v54 = vunpack.i.l.bf16 %v16292_v63  ;;  %v16354_v63 = vpop.permute.xlu2 %12437 }
 0x30c   :  { %17847 = vst [vmem:[#allocation107_spill] sm:$0xff] %v16317_v9  ;;  %11460 = vmatmul.msk.f32.vlgmr.msrb.gmra.mxu1 %vm286_vm2, %v16063_v46  ;;  %v12419_v9 = vunpack.i.l.bf16 %v16263_v8  ;;  %12607 = vrot.lane.b32.xlu0 %v16155_v42, %s12751_s26 }
 0x30d   :  { %11461 = vmatmul.msk.f32.vlgmr.msrb.gmra.mxu2 %vm286_vm2, %v16063_v46  ;;  %11462 = vmatmul.msk.f32.vlgmr.msra.gmra.mxu3 %vm286_vm2, %v16063_v46  ;;  %v8443_v8 = vsel %vm8438_vm8, %v12420_v18, %v12424_v54  ;;  %v8441_v26 = vsel %vm8438_vm8, %v12424_v54, %v12435_v50 }
 0x30e   :  { %11463 = vmatmul.msk.f32.vlgmr.msrb.gmra.mxu0 %vm286_vm2, %v8063_v5  ;;  %8393 = vmatpush.msra.mxu3 %v8059_v1 }
 0x30f   :  { %8373 = vmatpush.msrb.mxu2 %v8061_v21  ;;  %8353 = vmatpush.msrb.mxu1 %v8047_v24 }
 0x310   :  { %v6632_v55 = vpop.f32.mrf.mxu2  ;;  %v6652_v3 = vpop.f32.mrf.mxu3  ;;  %8475 = vmatpush.msrb.mxu0 %v8449_v47 }
 0x311   :  { %v16345_v46 = vadd.f32 %v6632_v55, %v16163_v61  ;;  %v16348_v39 = vadd.f32 %v6652_v3, %v16166_v58  ;;  %v16350_v1 = vpop.f32.mrf.mxu1  ;;  %v8447_v61 = vsel %vm8438_vm8, %v12429_v7, %v12419_v9  ;;  %v8445_v58 = vsel %vm8438_vm8, %v12419_v9, %v12420_v18  ;;  %v16370_v24 = vpop.permute.xlu1 %12447  ;;  %v16377_v7 = vld [vmem:[%s17698_s0 + $0x70] sm:$0xff] }
 0x312   :  { %17849 = vst [vmem:[#allocation108_spill] sm:$0xff] %v16350_v1  ;;  %v16372_v47 = vpop.permute.xlu0 %12442  ;;  %v12571_v9 = vpack.i.bf16 %v16377_v7, %v15829_v25  ;;  %v12430_v18 = vunpack.i.h.bf16 %v16294_v57  ;;  %v12434_v3 = vunpack.i.l.bf16 %v12433_v56  ;;  %v12449_v25 = vunpack.i.l.bf16 %v16370_v24 }
 0x313   :  { %v16356_v21 = vpop.f32.mrf.mxu0  ;;  %v17721_v57 = vunpack.i.h.bf16 %v16372_v47 }
 0x314   :  { %17850 = vst [vmem:[#allocation109_spill] sm:$0xff] %v16356_v21  ;;  %11464 = vmatmul.msk.f32.vlgmr.msra.gmra.mxu1 %vm286_vm2, %v8063_v5  ;;  %12572 = vrot.lane.b32.xlu2 %v12571_v9, %s12750_s12 }
 0x315   :  { %11465 = vmatmul.msk.f32.vlgmr.msra.gmra.mxu2 %vm286_vm2, %v8063_v5  ;;  %11466 = vmatmul.msk.f32.vlgmr.msrb.gmra.mxu3 %vm286_vm2, %v8063_v5 }
 0x316   :  { %11467 = vmatmul.msk.f32.vlgmr.msra.gmra.mxu0 %vm286_vm2, %v8063_v5  ;;  %8535 = vmatpush.msrb.mxu3 %v8443_v8 }
 0x317   :  { %8495 = vmatpush.msra.mxu1 %v8447_v61  ;;  %8515 = vmatpush.msra.mxu2 %v8445_v58  ;;  %v8439_v61 = vsel %vm8438_vm8, %v12435_v50, %v12434_v3  ;;  %v12453_v58 = vpop.permute.xlu2 %12452 }
 0x318   :  { %v6723_v54 = vpop.f32.mrf.mxu2  ;;  %v6743_v55 = vpop.f32.mrf.mxu3  ;;  %8555 = vmatpush.msra.mxu0 %v8441_v26  ;;  %v8450_v26 = vsel %vm8438_vm8, %v17721_v57, %v12449_v25  ;;  %12612 = vrot.lane.b32.xlu1 %v12571_v9, %s12751_s26  ;;  %v12455_v57 = vunpack.i.h.bf16 %v12453_v58 }
 0x319   :  { %v16385_v8 = vadd.f32 %v6723_v54, %v16207_v6  ;;  %v16388_v21 = vadd.f32 %v6743_v55, %v16210_v15  ;;  %v16390_v1 = vpop.f32.mrf.mxu1  ;;  %v8451_v6 = vsel %vm8438_vm8, %v12430_v18, %v12425_v32  ;;  %v8453_v15 = vsel %vm8438_vm8, %v12434_v3, %v12430_v18  ;;  %12622 = vrot.lane.b32.xlu0 %v16247_v52, %s12752_s21 }
 0x31a   :  { %17851 = vst [vmem:[#allocation110_spill] sm:$0xff] %v16390_v1  ;;  %v12440_v32 = vunpack.i.h.bf16 %v16354_v63  ;;  %v12444_v18 = vunpack.i.l.bf16 %v16372_v47  ;;  %v12439_v55 = vunpack.i.l.bf16 %v16354_v63  ;;  %v16433_v63 = vld [vmem:[%s17699_s1 + $0xb0] sm:$0xff] }
 0x31b   :  { %v16397_v56 = vpop.f32.mrf.mxu0 }
 0x31c   :  { %11468 = vmatmul.msk.f32.vlgmr.msrb.gmra.mxu1 %vm286_vm2, %v8063_v5  ;;  %12587 = vrot.lane.b32.xlu2 %v16098_v41, %s12751_s26 }
 0x31d   :  { %11469 = vmatmul.msk.f32.vlgmr.msrb.gmra.mxu2 %vm286_vm2, %v8063_v5  ;;  %11470 = vmatmul.msk.f32.vlgmr.msra.gmra.mxu3 %vm286_vm2, %v8063_v5 }
 0x31e   :  { %11471 = vmatmul.msk.f32.vlgmr.msrb.gmra.mxu0 %vm286_vm2, %v16268_v51  ;;  %8615 = vmatpush.msra.mxu3 %v8451_v6 }
 0x31f   :  { %8595 = vmatpush.msrb.mxu2 %v8453_v15  ;;  %8575 = vmatpush.msrb.mxu1 %v8439_v61  ;;  %v16428_v15 = vpop.permute.xlu0 %12457 }
 0x320   :  { %v6803_v50 = vpop.f32.mrf.mxu2  ;;  %v6823_v54 = vpop.f32.mrf.mxu3  ;;  %8646 = vmatpush.msrb.mxu0 %v8450_v26  ;;  %v140_v26 = vmul.f32 0.001, %v16433_v63  ;;  %12627 = vrot.lane.b32.xlu1 %v16098_v41, %s12752_s21  ;;  %v8456_v41 = vld [vmem:[%s17701_s6 + $0xa8] sm:$0xff] }
 0x321   :  { %v16419_v5 = vadd.f32 %v6803_v50, %v16255_v17  ;;  %v16422_v3 = vadd.f32 %v6823_v54, %v16258_v35  ;;  %v16424_v6 = vpop.f32.mrf.mxu1  ;;  %v44_v17 = vld [vmem:[%s17700_s2 + $0xb0] sm:$0xff]  ;;  %v8444_v35 = vsel %vm8438_vm8, %v12440_v32, %v12444_v18  ;;  %v8448_v50 = vsel %vm8438_vm8, %v12449_v25, %v12439_v55  ;;  %v16459_v25 = vpop.permute.xlu2 %12467  ;;  %12637 = vrot.lane.b32.xlu0 %v15998_v16, %s12752_s21  ;;  %v16593_v16 = vld [vmem:[%s17699_s1 + $0xb8] sm:$0xff] }
 0x322   :  { %v76_v61 = vmul.f32 0.999, %v44_v17  ;;  %v8446_v54 = vsel %vm8438_vm8, %v12439_v55, %v12440_v32  ;;  %v8442_v17 = vsel %vm8438_vm8, %v12444_v18, %v12455_v57  ;;  %v12450_v32 = vunpack.i.h.bf16 %v16370_v24 }
 0x323   :  { %v16438_v9 = vpop.f32.mrf.mxu0 }
 0x324   :  { %17852 = vst [vmem:[#allocation111_spill] sm:$0xff] %v16438_v9  ;;  %11472 = vmatmul.msk.f32.vlgmr.msra.gmra.mxu1 %vm286_vm2, %v16268_v51  ;;  %v172_v1 = vadd.f32 %v140_v26, %v76_v61  ;;  %v16457_v9 = vpop.permute.xlu1 %12462  ;;  %v12454_v61 = vunpack.i.l.bf16 %v12453_v58 }
 0x325   :  { %11473 = vmatmul.msk.f32.vlgmr.msra.gmra.mxu2 %vm286_vm2, %v16268_v51  ;;  %11474 = vmatmul.msk.f32.vlgmr.msrb.gmra.mxu3 %vm286_vm2, %v16268_v51 }
 0x326   :  { %11475 = vmatmul.msk.f32.vlgmr.msra.gmra.mxu0 %vm286_vm2, %v16268_v51  ;;  %8706 = vmatpush.msrb.mxu3 %v8444_v35  ;;  %205 = vst.msk [vmem:[%s17701_s6 + $0xb0] sm:$0xff] %vm182_vm1, %v172_v1  ;;  %v12469_v1 = vunpack.i.l.bf16 %v16459_v25  ;;  %v8440_v52 = vsel %vm8438_vm8, %v12455_v57, %v12454_v61  ;;  %v12464_v57 = vunpack.i.l.bf16 %v16457_v9 }
 0x327   :  { %8666 = vmatpush.msra.mxu1 %v8448_v50  ;;  %8686 = vmatpush.msra.mxu2 %v8446_v54  ;;  %v12465_v50 = vunpack.i.h.bf16 %v16457_v9  ;;  %v8454_v54 = vsel %vm8438_vm8, %v12454_v61, %v12450_v32 }
 0x328   :  { %v6945_v55 = vpop.f32.mrf.mxu2  ;;  %v6965_v18 = vpop.f32.mrf.mxu3  ;;  %8726 = vmatpush.msra.mxu0 %v8442_v17 }
 0x329   :  { %v16469_v35 = vadd.f32 %v6945_v55, %v16305_v23  ;;  %v16472_v24 = vadd.f32 %v6965_v18, %v16308_v45  ;;  %v16474_v26 = vpop.f32.mrf.mxu1  ;;  %v17855_v23 = vunpack.i.h.bf16 %v16372_v47  ;;  %v12473_v17 = vpop.permute.xlu0 %12472  ;;  %v8842_v47 = vsel %vm8831_vm9, %v12465_v50, %v12469_v1 }
 0x32a   :  { %17853 = vst [vmem:[#allocation112_spill] sm:$0xff] %v16474_v26  ;;  %v12460_v18 = vunpack.i.h.bf16 %v16428_v15  ;;  %v12475_v9 = vunpack.i.h.bf16 %v12473_v17 }
 0x32b   :  { %v16481_v58 = vpop.f32.mrf.mxu0  ;;  %v8452_v45 = vsel %vm8438_vm8, %v12450_v32, %v17855_v23  ;;  %v12723_v32 = vld [vmem:[%s17698_s0 + $0x68] sm:$0xff]  ;;  %v12459_v23 = vunpack.i.l.bf16 %v16428_v15 }
 0x32c   :  { %17854 = vst [vmem:[#allocation113_spill] sm:$0xff] %v16481_v58  ;;  %11476 = vmatmul.msk.f32.vlgmr.msrb.gmra.mxu1 %vm286_vm2, %v16268_v51  ;;  %v12601_v55 = vpack.i.bf16 %v16199_v13, %v12723_v32  ;;  %v16519_v32 = vpop.permute.xlu1 %12477 }
 0x32d   :  { %11477 = vmatmul.msk.f32.vlgmr.msrb.gmra.mxu2 %vm286_vm2, %v16268_v51  ;;  %11478 = vmatmul.msk.f32.vlgmr.msra.gmra.mxu3 %vm286_vm2, %v16268_v51  ;;  %v8840_v15 = vsel %vm8831_vm9, %v12469_v1, %v12459_v23 }
 0x32e   :  { %11479 = vmatmul.msk.f32.vlgmr.msrb.gmra.mxu0 %vm286_vm2, %v8456_v41  ;;  %8786 = vmatpush.msra.mxu3 %v8452_v45 }
 0x32f   :  { %8766 = vmatpush.msrb.mxu2 %v8454_v54  ;;  %8746 = vmatpush.msrb.mxu1 %v8440_v52  ;;  %v8836_v52 = vsel %vm8831_vm9, %v12460_v18, %v12464_v57 }
 0x330   :  { %v7025_v61 = vpop.f32.mrf.mxu2  ;;  %v7045_v51 = vpop.f32.mrf.mxu3  ;;  %8868 = vmatpush.msrb.mxu0 %v8842_v47  ;;  %12602 = vrot.lane.b32.xlu2 %v12601_v55, %s12751_s26 }
 0x331   :  { %v16512_v45 = vadd.f32 %v7025_v61, %v16345_v46  ;;  %v16515_v58 = vadd.f32 %v7045_v51, %v16348_v39  ;;  %v16517_v13 = vpop.f32.mrf.mxu1  ;;  %v8838_v46 = vsel %vm8831_vm9, %v12459_v23, %v12460_v18  ;;  %v8834_v39 = vsel %vm8831_vm9, %v12464_v57, %v12475_v9  ;;  %v16535_v47 = vpop.permute.xlu2 %12482  ;;  %12642 = vrot.lane.b32.xlu1 %v12601_v55, %s12752_s21 }
 0x332   :  { %17856 = vst [vmem:[#allocation114_spill] sm:$0xff] %v16517_v13  ;;  %v16537_v61 = vpop.permute.xlu0 %12487  ;;  %v12470_v51 = vunpack.i.h.bf16 %v16459_v25  ;;  %v12474_v23 = vunpack.i.l.bf16 %v12473_v17  ;;  %v17722_v13 = vunpack.i.h.bf16 %v16535_v47 }
 0x333   :  { %v16521_v54 = vpop.f32.mrf.mxu0  ;;  %v12489_v25 = vunpack.i.l.bf16 %v16537_v61 }
 0x334   :  { %17857 = vst [vmem:[#allocation115_spill] sm:$0xff] %v16521_v54  ;;  %11480 = vmatmul.msk.f32.vlgmr.msra.gmra.mxu1 %vm286_vm2, %v8456_v41  ;;  %v8844_v17 = vsel %vm8831_vm9, %v12470_v51, %v12465_v50  ;;  %v16560_v55 = vpop.permute.xlu1 %12492  ;;  %v12480_v50 = vunpack.i.h.bf16 %v16519_v32 }
 0x335   :  { %11481 = vmatmul.msk.f32.vlgmr.msra.gmra.mxu2 %vm286_vm2, %v8456_v41  ;;  %11482 = vmatmul.msk.f32.vlgmr.msrb.gmra.mxu3 %vm286_vm2, %v8456_v41  ;;  %v12494_v26 = vunpack.i.l.bf16 %v16560_v55 }
 0x336   :  { %11483 = vmatmul.msk.f32.vlgmr.msra.gmra.mxu0 %vm286_vm2, %v8456_v41  ;;  %8928 = vmatpush.msrb.mxu3 %v8836_v52 }
 0x337   :  { %8888 = vmatpush.msra.mxu1 %v8840_v15  ;;  %8908 = vmatpush.msra.mxu2 %v8838_v46  ;;  %v8843_v46 = vsel %vm8831_vm9, %v17722_v13, %v12489_v25 }
 0x338   :  { %v7116_v1 = vpop.f32.mrf.mxu2  ;;  %v7136_v18 = vpop.f32.mrf.mxu3  ;;  %8948 = vmatpush.msra.mxu0 %v8834_v39  ;;  %v12484_v39 = vunpack.i.l.bf16 %v16535_v47  ;;  %12617 = vrot.lane.b32.xlu2 %v16040_v37, %s12752_s21 }
 0x339   :  { %v16542_v54 = vadd.f32 %v7116_v1, %v16385_v8  ;;  %v16545_v57 = vadd.f32 %v7136_v18, %v16388_v21  ;;  %v16547_v52 = vpop.f32.mrf.mxu1  ;;  %v8846_v8 = vsel %vm8831_vm9, %v12474_v23, %v12470_v51  ;;  %v8832_v21 = vsel %vm8831_vm9, %v12475_v9, %v12474_v23  ;;  %10397 = vrot.lane.b32.xlu1 %v16377_v7, %s12752_s21 }
 0x33a   :  { %17858 = vst [vmem:[#allocation116_spill] sm:$0xff] %v16547_v52  ;;  %v12479_v1 = vunpack.i.l.bf16 %v16519_v32  ;;  %v16588_v32 = vpop.permute.xlu2 %12497 }
 0x33b   :  { %v16551_v15 = vpop.f32.mrf.mxu0 }
 0x33c   :  { %11484 = vmatmul.msk.f32.vlgmr.msrb.gmra.mxu1 %vm286_vm2, %v8456_v41  ;;  %v8841_v7 = vsel %vm8831_vm9, %v12489_v25, %v12479_v1  ;;  %v12724_v25 = vld [vmem:[%s17698_s0 + $0x30] sm:$0xff] }
 0x33d   :  { %11485 = vmatmul.msk.f32.vlgmr.msrb.gmra.mxu2 %vm286_vm2, %v8456_v41  ;;  %11486 = vmatmul.msk.f32.vlgmr.msra.gmra.mxu3 %vm286_vm2, %v8456_v41 }
 0x33e   :  { %11487 = vmatmul.msk.f32.vlgmr.msrb.gmra.mxu0 %vm286_vm2, %v16433_v63  ;;  %9008 = vmatpush.msra.mxu3 %v8844_v17  ;;  %v12495_v17 = vunpack.i.h.bf16 %v16560_v55 }
 0x33f   :  { %8988 = vmatpush.msrb.mxu2 %v8846_v8  ;;  %8968 = vmatpush.msrb.mxu1 %v8832_v21  ;;  %v8837_v8 = vsel %vm8831_vm9, %v12480_v50, %v12484_v39  ;;  %v141_v21 = vmul.f32 0.001, %v16593_v16 }
 0x340   :  { %v7196_v9 = vpop.f32.mrf.mxu2  ;;  %v7216_v51 = vpop.f32.mrf.mxu3  ;;  %9039 = vmatpush.msrb.mxu0 %v8843_v46  ;;  %v8839_v46 = vsel %vm8831_vm9, %v12479_v1, %v12480_v50  ;;  %v12725_v50 = vld [vmem:[%s17698_s0 + $0x38] sm:$0xff] }
 0x341   :  { %v16576_v41 = vadd.f32 %v7196_v9, %v16419_v5  ;;  %v16579_v18 = vadd.f32 %v7216_v51, %v16422_v3  ;;  %v16581_v23 = vpop.f32.mrf.mxu1  ;;  %v45_v5 = vld [vmem:[%s17700_s2 + $0xb8] sm:$0xff]  ;;  %v8835_v9 = vsel %vm8831_vm9, %v12484_v39, %v12495_v17  ;;  %v16617_v51 = vpop.permute.xlu1 %12507  ;;  %v12631_v1 = vpack.i.bf16 %v12724_v25, %v12725_v50 }
 0x342   :  { %v77_v37 = vmul.f32 0.999, %v45_v5  ;;  %v16619_v5 = vpop.permute.xlu0 %12502  ;;  %v12490_v39 = vunpack.i.h.bf16 %v16537_v61  ;;  %v12509_v55 = vunpack.i.l.bf16 %v16617_v51  ;;  %v12500_v25 = vunpack.i.h.bf16 %v16588_v32 }
 0x343   :  { %v16598_v3 = vpop.f32.mrf.mxu0  ;;  %12632 = vrot.lane.b32.xlu2 %v12631_v1, %s12752_s21  ;;  %v12504_v50 = vunpack.i.l.bf16 %v16619_v5  ;;  %v12499_v1 = vunpack.i.l.bf16 %v16588_v32 }
 0x344   :  { %17859 = vst [vmem:[#allocation117_spill] sm:$0xff] %v16598_v3  ;;  %11488 = vmatmul.msk.f32.vlgmr.msra.gmra.mxu1 %vm286_vm2, %v16433_v63  ;;  %v173_v13 = vadd.f32 %v141_v21, %v77_v37  ;;  %v12726_v3 = vld [vmem:[%s17698_s0 + $0x78] sm:$0xff] }
 0x345   :  { %11489 = vmatmul.msk.f32.vlgmr.msra.gmra.mxu2 %vm286_vm2, %v16433_v63  ;;  %11490 = vmatmul.msk.f32.vlgmr.msrb.gmra.mxu3 %vm286_vm2, %v16433_v63 }
 0x346   :  { %11491 = vmatmul.msk.f32.vlgmr.msra.gmra.mxu0 %vm286_vm2, %v16433_v63  ;;  %9099 = vmatpush.msrb.mxu3 %v8837_v8  ;;  %206 = vst.msk [vmem:[%s17701_s6 + $0xb8] sm:$0xff] %vm182_vm1, %v173_v13  ;;  %v17862_v13 = vunpack.i.h.bf16 %v16535_v47 }
 0x347   :  { %9059 = vmatpush.msra.mxu1 %v8841_v7  ;;  %9079 = vmatpush.msra.mxu2 %v8839_v46  ;;  %v12505_v7 = vunpack.i.h.bf16 %v16619_v5  ;;  %v8833_v46 = vsel %vm8831_vm9, %v12495_v17, %v12494_v26 }
 0x348   :  { %v7338_v52 = vpop.f32.mrf.mxu2  ;;  %v7358_v8 = vpop.f32.mrf.mxu3  ;;  %9119 = vmatpush.msra.mxu0 %v8835_v9  ;;  %10401 = vrot.lane.b32.xlu0 %v12726_v3, %s12752_s21 }
 0x349   :  { %v16638_v61 = vadd.f32 %v7338_v52, %v16469_v35  ;;  %v16641_v37 = vadd.f32 %v7358_v8, %v16472_v24  ;;  %v16643_v21 = vpop.f32.mrf.mxu1  ;;  %v8849_v35 = vld [vmem:[%s17701_s6 + $0xb0] sm:$0xff]  ;;  %v8845_v24 = vsel %vm8831_vm9, %v12490_v39, %v17862_v13  ;;  %v8847_v52 = vsel %vm8831_vm9, %v12494_v26, %v12490_v39  ;;  %v12513_v9 = vpop.permute.xlu2 %12512 }
 0x34a   :  { %17860 = vst [vmem:[#allocation118_spill] sm:$0xff] %v16643_v21  ;;  %v9235_v47 = vsel %vm9224_vm10, %v12505_v7, %v12509_v55  ;;  %v12515_v13 = vunpack.i.h.bf16 %v12513_v9  ;;  %v12518_v5 = vpop.permute.xlu0 %12517  ;;  %v16698_v32 = vpop.permute.xlu1 %12522 }
 0x34b   :  { %v16649_v3 = vpop.f32.mrf.mxu0  ;;  %12647 = vrot.lane.b32.xlu2 %v16155_v42, %s12752_s21 }
 0x34c   :  { %17861 = vst [vmem:[#allocation119_spill] sm:$0xff] %v16649_v3  ;;  %11492 = vmatmul.msk.f32.vlgmr.msrb.gmra.mxu1 %vm286_vm2, %v16433_v63  ;;  %v9227_v42 = vsel %vm9224_vm10, %v12504_v50, %v12515_v13 }
 0x34d   :  { %11493 = vmatmul.msk.f32.vlgmr.msrb.gmra.mxu2 %vm286_vm2, %v16433_v63  ;;  %11494 = vmatmul.msk.f32.vlgmr.msra.gmra.mxu3 %vm286_vm2, %v16433_v63 }
 0x34e   :  { %11495 = vmatmul.msk.f32.vlgmr.msrb.gmra.mxu0 %vm286_vm2, %v8849_v35  ;;  %9179 = vmatpush.msra.mxu3 %v8845_v24 }
 0x34f   :  { %9159 = vmatpush.msrb.mxu2 %v8847_v52  ;;  %9139 = vmatpush.msrb.mxu1 %v8833_v46  ;;  %v9229_v52 = vsel %vm9224_vm10, %v12500_v25, %v12504_v50 }
 0x350   :  { %v7418_v26 = vpop.f32.mrf.mxu2  ;;  %v7438_v17 = vpop.f32.mrf.mxu3  ;;  %9261 = vmatpush.msrb.mxu0 %v9235_v47  ;;  %v12510_v47 = vunpack.i.h.bf16 %v16617_v51 }
 0x351   :  { %v16675_v39 = vadd.f32 %v7418_v26, %v16512_v45  ;;  %v16678_v63 = vadd.f32 %v7438_v17, %v16515_v58  ;;  %v16680_v8 = vpop.f32.mrf.mxu1  ;;  %v9233_v45 = vsel %vm9224_vm10, %v12509_v55, %v12499_v1  ;;  %v9231_v58 = vsel %vm9224_vm10, %v12499_v1, %v12500_v25  ;;  %v16700_v46 = vpop.permute.xlu2 %12527 }
 0x352   :  { %17863 = vst [vmem:[#allocation120_spill] sm:$0xff] %v16680_v8  ;;  %v12514_v26 = vunpack.i.l.bf16 %v12513_v9  ;;  %v9237_v51 = vsel %vm9224_vm10, %v12510_v47, %v12505_v7  ;;  %v12533_v9 = vpop.permute.xlu0 %12532  ;;  %v12524_v7 = vunpack.i.l.bf16 %v16698_v32 }
 0x353   :  { %v16684_v24 = vpop.f32.mrf.mxu0 }
 0x354   :  { %17864 = vst [vmem:[#allocation121_spill] sm:$0xff] %v16684_v24  ;;  %11496 = vmatmul.msk.f32.vlgmr.msra.gmra.mxu1 %vm286_vm2, %v8849_v35  ;;  %v12529_v24 = vunpack.i.l.bf16 %v16700_v46 }
 0x355   :  { %11497 = vmatmul.msk.f32.vlgmr.msra.gmra.mxu2 %vm286_vm2, %v8849_v35  ;;  %11498 = vmatmul.msk.f32.vlgmr.msrb.gmra.mxu3 %vm286_vm2, %v8849_v35 }
 0x356   :  { %11499 = vmatmul.msk.f32.vlgmr.msra.gmra.mxu0 %vm286_vm2, %v8849_v35  ;;  %9321 = vmatpush.msrb.mxu3 %v9229_v52  ;;  %v12525_v52 = vunpack.i.h.bf16 %v16698_v32  ;;  %v16742_v32 = vld [vmem:[%s17699_s1 + $0xc0] sm:$0xff] }
 0x357   :  { %9281 = vmatpush.msra.mxu1 %v9233_v45  ;;  %9301 = vmatpush.msra.mxu2 %v9231_v58  ;;  %v12520_v58 = vunpack.i.h.bf16 %v12518_v5 }
 0x358   :  { %v7509_v55 = vpop.f32.mrf.mxu2  ;;  %v7529_v25 = vpop.f32.mrf.mxu3  ;;  %9341 = vmatpush.msra.mxu0 %v9227_v42  ;;  %v9236_v45 = vsel %vm9224_vm10, %v12525_v52, %v12529_v24 }
 0x359   :  { %v16704_v17 = vadd.f32 %v7509_v55, %v16542_v54  ;;  %v16707_v50 = vadd.f32 %v7529_v25, %v16545_v57  ;;  %v16709_v1 = vpop.f32.mrf.mxu1  ;;  %v9239_v54 = vsel %vm9224_vm10, %v12514_v26, %v12510_v47  ;;  %v9225_v57 = vsel %vm9224_vm10, %v12515_v13, %v12514_v26 }
 0x35a   :  { %17865 = vst [vmem:[#allocation122_spill] sm:$0xff] %v16709_v1  ;;  %v12519_v13 = vunpack.i.l.bf16 %v12518_v5  ;;  %v12535_v26 = vunpack.i.h.bf16 %v12533_v9  ;;  %v16737_v1 = vpop.permute.xlu1 %12537  ;;  %v46_v5 = vld [vmem:[%s17700_s2 + $0xc0] sm:$0xff] }
 0x35b   :  { %v16713_v8 = vpop.f32.mrf.mxu0 }
 0x35c   :  { %11500 = vmatmul.msk.f32.vlgmr.msrb.gmra.mxu1 %vm286_vm2, %v8849_v35 }
 0x35d   :  { %11501 = vmatmul.msk.f32.vlgmr.msrb.gmra.mxu2 %vm286_vm2, %v8849_v35  ;;  %11502 = vmatmul.msk.f32.vlgmr.msra.gmra.mxu3 %vm286_vm2, %v8849_v35 }
 0x35e   :  { %11503 = vmatmul.msk.f32.vlgmr.msrb.gmra.mxu0 %vm286_vm2, %v16593_v16  ;;  %9401 = vmatpush.msra.mxu3 %v9237_v51 }
 0x35f   :  { %9381 = vmatpush.msrb.mxu2 %v9239_v54  ;;  %9361 = vmatpush.msrb.mxu1 %v9225_v57  ;;  %v142_v54 = vmul.f32 0.001, %v16742_v32  ;;  %v9234_v57 = vsel %vm9224_vm10, %v12529_v24, %v12519_v13  ;;  %v16768_v24 = vpop.permute.xlu0 %12547 }
 0x360   :  { %v7589_v42 = vpop.f32.mrf.mxu2  ;;  %v7609_v47 = vpop.f32.mrf.mxu3  ;;  %9432 = vmatpush.msrb.mxu0 %v9236_v45  ;;  %v9232_v45 = vsel %vm9224_vm10, %v12519_v13, %v12520_v58 }
 0x361   :  { %v16730_v55 = vadd.f32 %v7589_v42, %v16576_v41  ;;  %v16733_v35 = vadd.f32 %v7609_v47, %v16579_v18  ;;  %v16735_v25 = vpop.f32.mrf.mxu1  ;;  %v9230_v41 = vsel %vm9224_vm10, %v12520_v58, %v12524_v7  ;;  %v78_v18 = vmul.f32 0.999, %v46_v5  ;;  %v16766_v5 = vpop.permute.xlu2 %12542 }
 0x362   :  { %v9228_v42 = vsel %vm9224_vm10, %v12524_v7, %v12535_v26  ;;  %v12530_v58 = vunpack.i.h.bf16 %v16700_v46  ;;  %v12545_v46 = vunpack.i.h.bf16 %v16766_v5 }
 0x363   :  { %v16747_v51 = vpop.f32.mrf.mxu0  ;;  %v174_v47 = vadd.f32 %v142_v54, %v78_v18  ;;  %v12534_v18 = vunpack.i.l.bf16 %v12533_v9  ;;  %v9242_v9 = vld [vmem:[%s17701_s6 + $0xb8] sm:$0xff] }
 0x364   :  { %17866 = vst [vmem:[#allocation123_spill] sm:$0xff] %v16747_v51  ;;  %11504 = vmatmul.msk.f32.vlgmr.msra.gmra.mxu1 %vm286_vm2, %v16593_v16 }
 0x365   :  { %11505 = vmatmul.msk.f32.vlgmr.msra.gmra.mxu2 %vm286_vm2, %v16593_v16  ;;  %11506 = vmatmul.msk.f32.vlgmr.msrb.gmra.mxu3 %vm286_vm2, %v16593_v16  ;;  %207 = vst.msk [vmem:[%s17701_s6 + $0xc0] sm:$0xff] %vm182_vm1, %v174_v47  ;;  %v12553_v47 = vpop.permute.xlu1 %12552 }
 0x366   :  { %11507 = vmatmul.msk.f32.vlgmr.msra.gmra.mxu0 %vm286_vm2, %v16593_v16  ;;  %9492 = vmatpush.msrb.mxu3 %v9230_v41 }
 0x367   :  { %9452 = vmatpush.msra.mxu1 %v9234_v57  ;;  %9472 = vmatpush.msra.mxu2 %v9232_v45  ;;  %v12549_v57 = vunpack.i.l.bf16 %v16768_v24 }
 0x368   :  { %v7731_v13 = vpop.f32.mrf.mxu2  ;;  %v7751_v7 = vpop.f32.mrf.mxu3  ;;  %9512 = vmatpush.msra.mxu0 %v9228_v42  ;;  %v9226_v42 = vsel %vm9224_vm10, %v12535_v26, %v12534_v18 }
 0x369   :  { %v16776_v54 = vadd.f32 %v7731_v13, %v16638_v61  ;;  %v16779_v41 = vadd.f32 %v7751_v7, %v16641_v37  ;;  %v16781_v3 = vpop.f32.mrf.mxu1  ;;  %v9238_v61 = vsel %vm9224_vm10, %v12530_v58, %v12525_v52  ;;  %v9240_v37 = vsel %vm9224_vm10, %v12534_v18, %v12530_v58  ;;  %v12558_v21 = vpop.permute.xlu2 %12557 }
 0x36a   :  { %17867 = vst [vmem:[#allocation124_spill] sm:$0xff] %v16781_v3  ;;  %v9628_v13 = vsel %vm9617_vm11, %v12545_v46, %v12549_v57  ;;  %v12540_v52 = vunpack.i.h.bf16 %v16737_v1  ;;  %v12544_v58 = vunpack.i.l.bf16 %v16766_v5  ;;  %v12539_v18 = vunpack.i.l.bf16 %v16737_v1 }
 0x36b   :  { %v16786_v45 = vpop.f32.mrf.mxu0 }
 0x36c   :  { %17868 = vst [vmem:[#allocation125_spill] sm:$0xff] %v16786_v45  ;;  %11508 = vmatmul.msk.f32.vlgmr.msrb.gmra.mxu1 %vm286_vm2, %v16593_v16  ;;  %v9622_v5 = vsel %vm9617_vm11, %v12540_v52, %v12544_v58  ;;  %v9626_v1 = vsel %vm9617_vm11, %v12549_v57, %v12539_v18 }
 0x36d   :  { %11509 = vmatmul.msk.f32.vlgmr.msrb.gmra.mxu2 %vm286_vm2, %v16593_v16  ;;  %11510 = vmatmul.msk.f32.vlgmr.msra.gmra.mxu3 %vm286_vm2, %v16593_v16 }
 0x36e   :  { %11511 = vmatmul.msk.f32.vlgmr.msrb.gmra.mxu0 %vm286_vm2, %v9242_v9  ;;  %9572 = vmatpush.msra.mxu3 %v9238_v61  ;;  %v12555_v61 = vunpack.i.h.bf16 %v12553_v47 }
 0x36f   :  { %9552 = vmatpush.msrb.mxu2 %v9240_v37  ;;  %9532 = vmatpush.msrb.mxu1 %v9226_v42  ;;  %v16831_v37 = vpop.permute.xlu1 %12567  ;;  %v16833_v42 = vpop.permute.xlu0 %12562 }
 0x370   :  { %v7811_v26 = vpop.f32.mrf.mxu2  ;;  %v7831_v7 = vpop.f32.mrf.mxu3  ;;  %9654 = vmatpush.msrb.mxu0 %v9628_v13  ;;  %v12550_v13 = vunpack.i.h.bf16 %v16768_v24 }
 0x371   :  { %v16810_v45 = vadd.f32 %v7811_v26, %v16675_v39  ;;  %v16813_v16 = vadd.f32 %v7831_v7, %v16678_v63  ;;  %v16815_v3 = vpop.f32.mrf.mxu1  ;;  %v9624_v39 = vsel %vm9617_vm11, %v12539_v18, %v12540_v52  ;;  %v9620_v63 = vsel %vm9617_vm11, %v12544_v58, %v12555_v61 }
 0x372   :  { %17869 = vst [vmem:[#allocation126_spill] sm:$0xff] %v16815_v3  ;;  %v12554_v26 = vunpack.i.l.bf16 %v12553_v47  ;;  %v9630_v24 = vsel %vm9617_vm11, %v12550_v13, %v12545_v46  ;;  %v12573_v47 = vpop.permute.xlu2 %12572  ;;  %v12560_v46 = vunpack.i.h.bf16 %v12558_v21 }
 0x373   :  { %v16817_v51 = vpop.f32.mrf.mxu0 }
 0x374   :  { %17870 = vst [vmem:[#allocation127_spill] sm:$0xff] %v16817_v51  ;;  %11512 = vmatmul.msk.f32.vlgmr.msra.gmra.mxu1 %vm286_vm2, %v9242_v9  ;;  %v12565_v51 = vunpack.i.h.bf16 %v16833_v42 }
 0x375   :  { %11513 = vmatmul.msk.f32.vlgmr.msra.gmra.mxu2 %vm286_vm2, %v9242_v9  ;;  %11514 = vmatmul.msk.f32.vlgmr.msrb.gmra.mxu3 %vm286_vm2, %v9242_v9 }
 0x376   :  { %11515 = vmatmul.msk.f32.vlgmr.msra.gmra.mxu0 %vm286_vm2, %v9242_v9  ;;  %9714 = vmatpush.msrb.mxu3 %v9622_v5  ;;  %v12569_v5 = vunpack.i.l.bf16 %v16831_v37 }
 0x377   :  { %9674 = vmatpush.msra.mxu1 %v9626_v1  ;;  %9694 = vmatpush.msra.mxu2 %v9624_v39  ;;  %v12564_v39 = vunpack.i.l.bf16 %v16833_v42  ;;  %v16875_v42 = vld [vmem:[%s17699_s1 + $0xc8] sm:$0xff] }
 0x378   :  { %v7902_v57 = vpop.f32.mrf.mxu2  ;;  %v7922_v52 = vpop.f32.mrf.mxu3  ;;  %9734 = vmatpush.msra.mxu0 %v9620_v63  ;;  %v9629_v1 = vsel %vm9617_vm11, %v12565_v51, %v12569_v5 }
 0x379   :  { %v16837_v7 = vadd.f32 %v7902_v57, %v16704_v17  ;;  %v16840_v58 = vadd.f32 %v7922_v52, %v16707_v50  ;;  %v16842_v18 = vpop.f32.mrf.mxu1  ;;  %v9632_v17 = vsel %vm9617_vm11, %v12554_v26, %v12550_v13  ;;  %v9618_v50 = vsel %vm9617_vm11, %v12555_v61, %v12554_v26 }
 0x37a   :  { %17871 = vst [vmem:[#allocation128_spill] sm:$0xff] %v16842_v18  ;;  %v12559_v61 = vunpack.i.l.bf16 %v12558_v21  ;;  %v12575_v26 = vunpack.i.h.bf16 %v12573_v47  ;;  %v16870_v18 = vpop.permute.xlu0 %12577  ;;  %v47_v21 = vld [vmem:[%s17700_s2 + $0xc8] sm:$0xff] }
 0x37b   :  { %v16846_v3 = vpop.f32.mrf.mxu0 }
 0x37c   :  { %11516 = vmatmul.msk.f32.vlgmr.msrb.gmra.mxu1 %vm286_vm2, %v9242_v9 }
 0x37d   :  { %11517 = vmatmul.msk.f32.vlgmr.msrb.gmra.mxu2 %vm286_vm2, %v9242_v9  ;;  %11518 = vmatmul.msk.f32.vlgmr.msra.gmra.mxu3 %vm286_vm2, %v9242_v9 }
 0x37e   :  { %11519 = vmatmul.msk.f32.vlgmr.msrb.gmra.mxu0 %vm286_vm2, %v16742_v32  ;;  %9794 = vmatpush.msra.mxu3 %v9630_v24 }
 0x37f   :  { %9774 = vmatpush.msrb.mxu2 %v9632_v17  ;;  %9754 = vmatpush.msrb.mxu1 %v9618_v50  ;;  %v143_v17 = vmul.f32 0.001, %v16875_v42  ;;  %v9627_v50 = vsel %vm9617_vm11, %v12569_v5, %v12559_v61  ;;  %v16901_v5 = vpop.permute.xlu2 %12587 }
 0x380   :  { %v7982_v63 = vpop.f32.mrf.mxu2  ;;  %v8002_v13 = vpop.f32.mrf.mxu3  ;;  %9825 = vmatpush.msrb.mxu0 %v9629_v1  ;;  %v9625_v1 = vsel %vm9617_vm11, %v12559_v61, %v12560_v46 }
 0x381   :  { %v16863_v57 = vadd.f32 %v7982_v63, %v16730_v55  ;;  %v16866_v9 = vadd.f32 %v8002_v13, %v16733_v35  ;;  %v16868_v52 = vpop.f32.mrf.mxu1  ;;  %v9623_v55 = vsel %vm9617_vm11, %v12560_v46, %v12564_v39  ;;  %v79_v35 = vmul.f32 0.999, %v47_v21  ;;  %v16899_v21 = vpop.permute.xlu1 %12582 }
 0x382   :  { %v9621_v63 = vsel %vm9617_vm11, %v12564_v39, %v12575_v26  ;;  %v12570_v46 = vunpack.i.h.bf16 %v16831_v37  ;;  %v17723_v37 = vunpack.i.h.bf16 %v16899_v21 }
 0x383   :  { %v16880_v24 = vpop.f32.mrf.mxu0  ;;  %v175_v13 = vadd.f32 %v143_v17, %v79_v35  ;;  %v12574_v35 = vunpack.i.l.bf16 %v12573_v47  ;;  %v16924_v47 = vld [vmem:[%s17701_s6 + $0xc0] sm:$0xff] }
 0x384   :  { %17872 = vst [vmem:[#allocation129_spill] sm:$0xff] %v16880_v24  ;;  %11520 = vmatmul.msk.f32.vlgmr.msra.gmra.mxu1 %vm286_vm2, %v16742_v32 }
 0x385   :  { %11521 = vmatmul.msk.f32.vlgmr.msra.gmra.mxu2 %vm286_vm2, %v16742_v32  ;;  %11522 = vmatmul.msk.f32.vlgmr.msrb.gmra.mxu3 %vm286_vm2, %v16742_v32  ;;  %208 = vst.msk [vmem:[%s17701_s6 + $0xc8] sm:$0xff] %vm182_vm1, %v175_v13  ;;  %v9619_v13 = vsel %vm9617_vm11, %v12575_v26, %v12574_v35  ;;  %v12584_v26 = vunpack.i.l.bf16 %v16899_v21 }
 0x386   :  { %11523 = vmatmul.msk.f32.vlgmr.msra.gmra.mxu0 %vm286_vm2, %v16742_v32  ;;  %9885 = vmatpush.msrb.mxu3 %v9623_v55 }
 0x387   :  { %9845 = vmatpush.msra.mxu1 %v9627_v50  ;;  %9865 = vmatpush.msra.mxu2 %v9625_v1  ;;  %v12589_v50 = vunpack.i.l.bf16 %v16901_v5 }
 0x388   :  { %v8124_v61 = vpop.f32.mrf.mxu2  ;;  %v8144_v39 = vpop.f32.mrf.mxu3  ;;  %9905 = vmatpush.msra.mxu0 %v9621_v63  ;;  %v9633_v63 = vsel %vm9617_vm11, %v12574_v35, %v12570_v46 }
 0x389   :  { %v16909_v17 = vadd.f32 %v8124_v61, %v16776_v54  ;;  %v16912_v55 = vadd.f32 %v8144_v39, %v16779_v41  ;;  %v16914_v24 = vpop.f32.mrf.mxu1  ;;  %v9631_v54 = vsel %vm9617_vm11, %v12570_v46, %v12565_v51  ;;  %v471_v41 = vadd.f32 %v13392_v14, %v13330_v12  ;;  %v16936_v61 = vpop.permute.xlu0 %12592 }
 0x38a   :  { %v491_v39 = vadd.f32 %v13434_v11, %v13335_v43  ;;  %v551_v51 = vadd.f32 %v13440_v28, %v13344_v19  ;;  %v10021_v12 = vsel %vm10010_vm12, %v17723_v37, %v12589_v50  ;;  %v571_v14 = vadd.f32 %v13487_v20, %v13379_v59  ;;  %v17874_v28 = vld [vmem:[#allocation2_spill] sm:$0xff]  ;;  %v17875_v20 = vld [vmem:[#allocation3_spill] sm:$0xff] }
 0x38b   :  { %v16919_v1 = vpop.f32.mrf.mxu0  ;;  %v797_v43 = vadd.f32 %v13595_v33, %v13493_v44  ;;  %v817_v19 = vadd.f32 %v13635_v49, %v13536_v60  ;;  %v877_v11 = vadd.f32 %v13641_v53, %v13549_v0  ;;  %v12580_v59 = vunpack.i.h.bf16 %v16870_v18  ;;  %v17876_v33 = vld [vmem:[#allocation4_spill] sm:$0xff]  ;;  %v17877_v49 = vld [vmem:[#allocation5_spill] sm:$0xff]  ;;  %v17878_v0 = vld [vmem:[#allocation6_spill] sm:$0xff] }
 0x38c   :  { %17873 = vst [vmem:[#allocation130_spill] sm:$0xff] %v16919_v1  ;;  %11524 = vmatmul.msk.f32.vlgmr.msrb.gmra.mxu1 %vm286_vm2, %v16742_v32  ;;  %v1153_v44 = vadd.f32 %v17875_v20, %v471_v41  ;;  %v1154_v60 = vadd.f32 %v17876_v33, %v491_v39  ;;  %v1157_v46 = vadd.f32 %v17877_v49, %v551_v51  ;;  %v12579_v37 = vunpack.i.l.bf16 %v16870_v18  ;;  %v17883_v51 = vld [vmem:[#allocation8_spill] sm:$0xff]  ;;  %v17884_v33 = vld [vmem:[#allocation9_spill] sm:$0xff]  ;;  %v17885_v18 = vld [vmem:[#allocation10_spill] sm:$0xff]  ;;  %v16982_v1 = vpop.permute.xlu1 %12597 }
 0x38d   :  { %11525 = vmatmul.msk.f32.vlgmr.msrb.gmra.mxu2 %vm286_vm2, %v16742_v32  ;;  %11526 = vmatmul.msk.f32.vlgmr.msra.gmra.mxu3 %vm286_vm2, %v16742_v32  ;;  %v897_v32 = vadd.f32 %v17874_v28, %v13588_v36  ;;  %v1158_v53 = vadd.f32 %v17878_v0, %v571_v14  ;;  %v12595_v41 = vunpack.i.h.bf16 %v16936_v61  ;;  %v1325_v20 = vadd.f32 %v17883_v51, %v817_v19  ;;  %v17886_v14 = vld [vmem:[#allocation11_spill] sm:$0xff] }
 0x38e   :  { %11527 = vmatmul.msk.f32.vlgmr.msrb.gmra.mxu0 %vm286_vm2, %v16924_v47  ;;  %9965 = vmatpush.msra.mxu3 %v9631_v54  ;;  %v1328_v49 = vadd.f32 %v17884_v33, %v877_v11  ;;  %v17891_v19 = vld [vmem:[#allocation15_spill] sm:$0xff]  ;;  %v10019_v11 = vsel %vm10010_vm12, %v12589_v50, %v12579_v37 }
 0x38f   :  { %9945 = vmatpush.msrb.mxu2 %v9633_v63  ;;  %9925 = vmatpush.msrb.mxu1 %v9619_v13  ;;  %v17882_v13 = vld [vmem:[#allocation7_spill] sm:$0xff] }
 0x390   :  { %v8204_v35 = vpop.f32.mrf.mxu2  ;;  %v8224_v54 = vpop.f32.mrf.mxu3  ;;  %10047 = vmatpush.msrb.mxu0 %v10021_v12  ;;  %v1324_v39 = vadd.f32 %v17882_v13, %v797_v43  ;;  %v1329_v12 = vadd.f32 %v17885_v18, %v897_v32  ;;  %v17890_v43 = vld [vmem:[#allocation14_spill] sm:$0xff]  ;;  %v10017_v32 = vsel %vm10010_vm12, %v12579_v37, %v12580_v59 }
 0x391   :  { %v16970_v36 = vadd.f32 %v8204_v35, %v16810_v45  ;;  %v16973_v28 = vadd.f32 %v8224_v54, %v16813_v16  ;;  %v16975_v63 = vpop.f32.mrf.mxu1  ;;  %v1546_v45 = vadd.f32 %v17886_v14, %v1153_v44  ;;  %v17887_v35 = vld [vmem:[#allocation12_spill] sm:$0xff]  ;;  %v17888_v16 = vld [vmem:[#allocation13_spill] sm:$0xff]  ;;  %v1551_v13 = vadd.f32 %v17890_v43, %v1158_v53  ;;  %v17895_v14 = vld [vmem:[#allocation19_spill] sm:$0xff]  ;;  %v17012_v37 = vpop.permute.xlu2 %12602 }
 0x392   :  { %17881 = vst [vmem:[#allocation4_spill] sm:$0xff] %v16975_v63  ;;  %v1547_v0 = vadd.f32 %v17887_v35, %v1154_v60  ;;  %v1550_v54 = vadd.f32 %v17888_v16, %v1157_v46  ;;  %v1717_v51 = vadd.f32 %v17891_v19, %v1324_v39  ;;  %v17892_v44 = vld [vmem:[#allocation16_spill] sm:$0xff]  ;;  %v17893_v46 = vld [vmem:[#allocation17_spill] sm:$0xff]  ;;  %v10013_v53 = vsel %vm10010_vm12, %v12584_v26, %v12595_v41  ;;  %v17894_v39 = vld [vmem:[#allocation18_spill] sm:$0xff] }
 0x393   :  { %17879 = vst [vmem:[#allocation2_spill] sm:$0xff] %v16970_v36  ;;  %v10015_v36 = vsel %vm10010_vm12, %v12580_v59, %v12584_v26  ;;  %v1718_v60 = vadd.f32 %v17892_v44, %v1325_v20  ;;  %v1721_v33 = vadd.f32 %v17893_v46, %v1328_v49  ;;  %v1722_v18 = vadd.f32 %v17894_v39, %v1329_v12  ;;  %v17896_v35 = vld [vmem:[#allocation20_spill] sm:$0xff]  ;;  %v17014_v59 = vpop.permute.xlu0 %12607  ;;  %v17897_v20 = vld [vmem:[#allocation21_spill] sm:$0xff]  ;;  %v17898_v43 = vld [vmem:[#allocation22_spill] sm:$0xff] }
 0x394   :  { %17880 = vst [vmem:[#allocation3_spill] sm:$0xff] %v16973_v28  ;;  %v16987_v28 = vpop.f32.mrf.mxu0  ;;  %11528 = vmatmul.msk.f32.vlgmr.msra.gmra.mxu1 %vm286_vm2, %v16924_v47  ;;  %v1939_v50 = vadd.f32 %v17895_v14, %v1546_v45  ;;  %v1940_v16 = vadd.f32 %v17896_v35, %v1547_v0  ;;  %v1943_v49 = vadd.f32 %v17897_v20, %v1550_v54  ;;  %v17899_v44 = vld [vmem:[#allocation23_spill] sm:$0xff]  ;;  %v12590_v12 = vunpack.i.h.bf16 %v16901_v5  ;;  %v17900_v45 = vld [vmem:[#allocation24_spill] sm:$0xff]  ;;  %v17901_v46 = vld [vmem:[#allocation25_spill] sm:$0xff] }
 0x395   :  { %17889 = vst [vmem:[#allocation5_spill] sm:$0xff] %v16987_v28  ;;  %11529 = vmatmul.msk.f32.vlgmr.msra.gmra.mxu2 %vm286_vm2, %v16924_v47  ;;  %11530 = vmatmul.msk.f32.vlgmr.msrb.gmra.mxu3 %vm286_vm2, %v16924_v47  ;;  %v1944_v19 = vadd.f32 %v17898_v43, %v1551_v13  ;;  %v2110_v26 = vadd.f32 %v17899_v44, %v1717_v51  ;;  %v17902_v14 = vld [vmem:[#allocation26_spill] sm:$0xff]  ;;  %v12594_v63 = vunpack.i.l.bf16 %v16936_v61  ;;  %v17905_v20 = vld [vmem:[#allocation29_spill] sm:$0xff]  ;;  %v17907_v44 = vld [vmem:[#allocation31_spill] sm:$0xff] }
 0x396   :  { %11531 = vmatmul.msk.f32.vlgmr.msra.gmra.mxu0 %vm286_vm2, %v16924_v47  ;;  %10107 = vmatpush.msrb.mxu3 %v10015_v36  ;;  %v2111_v0 = vadd.f32 %v17900_v45, %v1718_v60  ;;  %v2114_v39 = vadd.f32 %v17901_v46, %v1721_v33  ;;  %v2115_v36 = vadd.f32 %v17902_v14, %v1722_v18  ;;  %v17904_v33 = vld [vmem:[#allocation28_spill] sm:$0xff]  ;;  %v17906_v61 = vld [vmem:[#allocation30_spill] sm:$0xff] }
 0x397   :  { %10067 = vmatpush.msra.mxu1 %v10019_v11  ;;  %10087 = vmatpush.msra.mxu2 %v10017_v32  ;;  %v12609_v11 = vunpack.i.l.bf16 %v17014_v59  ;;  %v17903_v32 = vld [vmem:[#allocation27_spill] sm:$0xff]  ;;  %v2333_v18 = vadd.f32 %v17904_v33, %v1940_v16  ;;  %v2336_v43 = vadd.f32 %v17905_v20, %v1943_v49  ;;  %v17908_v45 = vld [vmem:[#allocation32_spill] sm:$0xff]  ;;  %v10025_v49 = vsel %vm10010_vm12, %v12594_v63, %v12590_v12 }
 0x398   :  { %v8295_v35 = vpop.f32.mrf.mxu2  ;;  %v8315_v28 = vpop.f32.mrf.mxu3  ;;  %10127 = vmatpush.msra.mxu0 %v10013_v53  ;;  %v2332_v60 = vadd.f32 %v17903_v32, %v1939_v50  ;;  %v2337_v53 = vadd.f32 %v17906_v61, %v1944_v19  ;;  %v2504_v46 = vadd.f32 %v17908_v45, %v2111_v0  ;;  %v17911_v50 = vld [vmem:[#allocation34_spill] sm:$0xff]  ;;  %v17912_v16 = vld [vmem:[#allocation35_spill] sm:$0xff]  ;;  %v10011_v19 = vsel %vm10010_vm12, %v12595_v41, %v12594_v63  ;;  %v17913_v0 = vld [vmem:[#allocation36_spill] sm:$0xff] }
 0x399   :  { %v17025_v54 = vadd.f32 %v8295_v35, %v16837_v7  ;;  %v17028_v13 = vadd.f32 %v8315_v28, %v16840_v58  ;;  %v17030_v5 = vpop.f32.mrf.mxu1  ;;  %v2503_v7 = vadd.f32 %v17907_v44, %v2110_v26  ;;  %v17909_v58 = vld [vmem:[#allocation33_spill] sm:$0xff]  ;;  %v17910_v35 = vunpack.i.h.bf16 %v16899_v21  ;;  %v17055_v26 = vpop.permute.xlu1 %12612  ;;  %v17917_v63 = vld [vmem:[#allocation39_spill] sm:$0xff] }
 0x39a   :  { %v2507_v28 = vadd.f32 %v17909_v58, %v2114_v39  ;;  %v2508_v32 = vadd.f32 %v17911_v50, %v2115_v36  ;;  %v2725_v33 = vadd.f32 %v17912_v16, %v2332_v60  ;;  %v2726_v21 = vadd.f32 %v17913_v0, %v2333_v18  ;;  %v17914_v39 = vld [vmem:[#allocation37_spill] sm:$0xff]  ;;  %v17916_v60 = vld [vmem:[#allocation38_spill] sm:$0xff]  ;;  %v17918_v44 = vld [vmem:[#allocation43_spill] sm:$0xff] }
 0x39b   :  { %v10023_v51 = vsel %vm10010_vm12, %v12590_v12, %v17910_v35  ;;  %v2729_v20 = vadd.f32 %v17914_v39, %v2336_v43  ;;  %v17915_v36 = vunpack.i.h.bf16 %v17012_v37  ;;  %v2730_v61 = vadd.f32 %v17916_v60, %v2337_v53  ;;  %v17919_v18 = vld [vmem:[#allocation40_spill] sm:$0xff]  ;;  %v17920_v58 = vld [vmem:[#allocation41_spill] sm:$0xff]  ;;  %v17921_v16 = vld [vmem:[#allocation42_spill] sm:$0xff] }
 0x39c   :  { %v17041_v14 = vpop.f32.mrf.mxu0  ;;  %11532 = vmatmul.msk.f32.vlgmr.msrb.gmra.mxu1 %vm286_vm2, %v16924_v47  ;;  %v2896_v41 = vadd.f32 %v17917_v63, %v2503_v7  ;;  %v3118_v45 = vadd.f32 %v17918_v44, %v2725_v33  ;;  %v2897_v43 = vadd.f32 %v17919_v18, %v2504_v46  ;;  %v2900_v35 = vadd.f32 %v17920_v58, %v2507_v28  ;;  %v17922_v0 = vld [vmem:[#allocation44_spill] sm:$0xff]  ;;  %v17923_v39 = vld [vmem:[#allocation51_spill] sm:$0xff]  ;;  %v17924_v46 = vld [vmem:[#allocation45_spill] sm:$0xff] }
 0x39d   :  { %11533 = vmatmul.msk.f32.vlgmr.msrb.gmra.mxu2 %vm286_vm2, %v16924_v47  ;;  %11534 = vmatmul.msk.f32.vlgmr.msra.gmra.mxu3 %vm286_vm2, %v16924_v47  ;;  %v10022_v12 = vsel %vm10010_vm12, %v17915_v36, %v12609_v11  ;;  %v12600_v47 = vunpack.i.h.bf16 %v16982_v1  ;;  %v12604_v50 = vunpack.i.l.bf16 %v17012_v37  ;;  %v2901_v53 = vadd.f32 %v17921_v16, %v2508_v32  ;;  %v17927_v58 = vld [vmem:[#allocation48_spill] sm:$0xff]  ;;  %v18009_v29 = vld [vmem:[#allocation3_spill] sm:$0xff] }
 0x39e   :  { %11535 = vmatmul.msk.f32.vlgmr.msrb.gmra.mxu0 %vm286_vm2, %v16875_v42  ;;  %10187 = vmatpush.msra.mxu3 %v10023_v51  ;;  %v3119_v7 = vadd.f32 %v17922_v0, %v2726_v21  ;;  %v3511_v33 = vadd.f32 %v17923_v39, %v3118_v45  ;;  %v12599_v51 = vunpack.i.l.bf16 %v16982_v1  ;;  %v3122_v63 = vadd.f32 %v17924_v46, %v2729_v20  ;;  %v17926_v45 = vld [vmem:[#allocation47_spill] sm:$0xff]  ;;  %v17928_v20 = vld [vmem:[#allocation49_spill] sm:$0xff]  ;;  %v17929_v39 = vld [vmem:[#allocation50_spill] sm:$0xff] }
 0x39f   :  { %10167 = vmatpush.msrb.mxu2 %v10025_v49  ;;  %10147 = vmatpush.msrb.mxu1 %v10011_v19  ;;  %v12615_v32 = vunpack.i.h.bf16 %v17055_v26  ;;  %v17925_v19 = vld [vmem:[#allocation46_spill] sm:$0xff]  ;;  %v3289_v18 = vadd.f32 %v17926_v45, %v2896_v41  ;;  %v3290_v16 = vadd.f32 %v17927_v58, %v2897_v43  ;;  %v3293_v0 = vadd.f32 %v17928_v20, %v2900_v35  ;;  %v17930_v46 = vld [vmem:[#allocation52_spill] sm:$0xff]  ;;  %v17931_v45 = vld [vmem:[#allocation53_spill] sm:$0xff] }
 0x3a0   :  { %v8375_v36 = vpop.f32.mrf.mxu2  ;;  %v8395_v60 = vpop.f32.mrf.mxu3  ;;  %10218 = vmatpush.msrb.mxu0 %v10022_v12  ;;  %v3123_v21 = vadd.f32 %v17925_v19, %v2730_v61  ;;  %v3904_v1 = vadd.f32 %v14930_v31, %v3511_v33  ;;  %v10016_v41 = vsel %vm10010_vm12, %v12600_v47, %v12604_v50  ;;  %v3294_v33 = vadd.f32 %v17929_v39, %v2901_v53 }
 0x3a1   :  { %v17082_v28 = vadd.f32 %v8375_v36, %v16863_v57  ;;  %v17085_v44 = vadd.f32 %v8395_v60, %v16866_v9  ;;  %v17087_v49 = vpop.f32.mrf.mxu1  ;;  %v17094_v12 = vpop.permute.xlu2 %12617  ;;  %v17099_v57 = vld [vmem:[%s17699_s1 + $0xd0] sm:$0xff]  ;;  %v10020_v60 = vsel %vm10010_vm12, %v12609_v11, %v12599_v51  ;;  %v10018_v35 = vsel %vm10010_vm12, %v12599_v51, %v12600_v47 }
 0x3a2   :  { %v48_v9 = vld [vmem:[%s17700_s2 + $0xd0] sm:$0xff]  ;;  %v144_v31 = vmul.f32 0.001, %v17099_v57  ;;  %v4297_v36 = vadd.f32 %v15115_v48, %v3904_v1  ;;  %v3512_v19 = vadd.f32 %v17930_v46, %v3119_v7  ;;  %v3515_v58 = vadd.f32 %v17931_v45, %v3122_v63  ;;  %v17132_v47 = vpop.permute.xlu1 %12627  ;;  %v17134_v7 = vpop.permute.xlu0 %12622 }
 0x3a3   :  { %v80_v43 = vmul.f32 0.999, %v48_v9  ;;  %v10014_v48 = vsel %vm10010_vm12, %v12604_v50, %v12615_v32  ;;  %v3516_v11 = vadd.f32 %v14853_v4, %v3123_v21  ;;  %v3682_v63 = vadd.f32 %v14860_v22, %v3289_v18  ;;  %v17932_v9 = vld [vmem:[#allocation54_spill] sm:$0xff] }
 0x3a4   :  { %v17105_v61 = vpop.f32.mrf.mxu0  ;;  %11536 = vmatmul.msk.f32.vlgmr.msra.gmra.mxu1 %vm286_vm2, %v16875_v42  ;;  %v4690_v53 = vadd.f32 %v15321_v38, %v4297_v36  ;;  %v3683_v1 = vadd.f32 %v14893_v10, %v3290_v16  ;;  %v3686_v20 = vadd.f32 %v17932_v9, %v3293_v0  ;;  %v12610_v50 = vunpack.i.h.bf16 %v17014_v59  ;;  %v17933_v10 = vld [vmem:[#allocation55_spill] sm:$0xff]  ;;  %v17936_v36 = vld [vmem:[#allocation56_spill] sm:$0xff] }
 0x3a5   :  { %11537 = vmatmul.msk.f32.vlgmr.msra.gmra.mxu2 %vm286_vm2, %v16875_v42  ;;  %11538 = vmatmul.msk.f32.vlgmr.msrb.gmra.mxu3 %vm286_vm2, %v16875_v42  ;;  %v176_v51 = vadd.f32 %v144_v31, %v80_v43  ;;  %v3687_v4 = vadd.f32 %v14924_v34, %v3294_v33  ;;  %v3905_v38 = vadd.f32 %v14960_v30, %v3512_v19  ;;  %v12614_v22 = vunpack.i.l.bf16 %v17055_v26  ;;  %v17934_v0 = vld [vmem:[#allocation59_spill] sm:$0xff]  ;;  %v17935_v31 = vld [vmem:[#allocation80_spill] sm:$0xff]  ;;  %v17943_v26 = vld [vmem:[#allocation61_spill] sm:$0xff] }
 0x3a6   :  { %11539 = vmatmul.msk.f32.vlgmr.msra.gmra.mxu0 %vm286_vm2, %v16875_v42  ;;  %10278 = vmatpush.msrb.mxu3 %v10016_v41  ;;  %v5083_v21 = vadd.f32 %v15506_v27, %v4690_v53  ;;  %v3908_v59 = vadd.f32 %v17933_v10, %v3515_v58  ;;  %v3909_v34 = vadd.f32 %v15015_v2, %v3516_v11  ;;  %v12629_v30 = vunpack.i.l.bf16 %v17132_v47  ;;  %v17938_v19 = vld [vmem:[#allocation60_spill] sm:$0xff]  ;;  %v17170_v58 = vld [vmem:[%s17701_s6 + $0xc8] sm:$0xff]  ;;  %v17940_v11 = vld [vmem:[#allocation66_spill] sm:$0xff] }
 0x3a7   :  { %10238 = vmatpush.msra.mxu1 %v10020_v60  ;;  %10258 = vmatpush.msra.mxu2 %v10018_v35  ;;  %209 = vst.msk [vmem:[%s17701_s6 + $0xd0] sm:$0xff] %vm182_vm1, %v176_v51  ;;  %v12625_v27 = vunpack.i.h.bf16 %v17134_v7  ;;  %v4075_v16 = vadd.f32 %v15023_v62, %v3682_v63  ;;  %v4298_v43 = vadd.f32 %v17934_v0, %v3905_v38  ;;  %v17937_v35 = vld [vmem:[#allocation57_spill] sm:$0xff]  ;;  %v17939_v62 = vunpack.i.h.bf16 %v17012_v37  ;;  %v17941_v37 = vld [vmem:[#allocation58_spill] sm:$0xff]  ;;  %v17942_v38 = vld [vmem:[#allocation67_spill] sm:$0xff] }
 0x3a8   :  { %v17143_v41 = vpop.f32.mrf.mxu2  ;;  %v17145_v39 = vpop.f32.mrf.mxu3  ;;  %10298 = vmatpush.msra.mxu0 %v10014_v48  ;;  %v5476_v33 = vadd.f32 %v17935_v31, %v5083_v21  ;;  %v4076_v60 = vadd.f32 %v17936_v36, %v3683_v1  ;;  %v4079_v46 = vadd.f32 %v17937_v35, %v3686_v20  ;;  %v4301_v2 = vadd.f32 %v17938_v19, %v3908_v59  ;;  %v17945_v10 = vld [vmem:[#allocation95_spill] sm:$0xff]  ;;  %v17949_v35 = vld [vmem:[#allocation81_spill] sm:$0xff] }
 0x3a9   :  { %v17154_v18 = vpop.f32.mrf.mxu1  ;;  %v10024_v48 = vsel %vm10010_vm12, %v12610_v50, %v17939_v62  ;;  %v4691_v53 = vadd.f32 %v17940_v11, %v4298_v43  ;;  %v10026_v63 = vsel %vm10010_vm12, %v12614_v22, %v12610_v50  ;;  %v10012_v1 = vsel %vm10010_vm12, %v12615_v32, %v12614_v22  ;;  %v17186_v9 = vpop.permute.xlu2 %12632  ;;  %v17944_v32 = vld [vmem:[#allocation73_spill] sm:$0xff]  ;;  %v17947_v43 = vld [vmem:[#allocation74_spill] sm:$0xff]  ;;  %v17948_v36 = vld [vmem:[#allocation63_spill] sm:$0xff] }
 0x3aa   :  { %v5869_v51 = vadd.f32 %v15852_v40, %v5476_v33  ;;  %v4080_v20 = vadd.f32 %v17941_v37, %v3687_v4  ;;  %v4694_v21 = vadd.f32 %v17942_v38, %v4301_v2  ;;  %v10414_v40 = vsel %vm10403_vm13, %v12625_v27, %v12629_v30  ;;  %v17946_v4 = vld [vmem:[#allocation62_spill] sm:$0xff]  ;;  %v17950_v2 = vld [vmem:[#allocation103_spill] sm:$0xff]  ;;  %v17952_v37 = vld [vmem:[#allocation68_spill] sm:$0xff] }
 0x3ab   :  { %v4302_v50 = vadd.f32 %v17943_v26, %v3909_v34  ;;  %v5084_v22 = vadd.f32 %v17944_v32, %v4691_v53  ;;  %v4468_v0 = vadd.f32 %v17946_v4, %v4075_v16  ;;  %v12624_v33 = vunpack.i.l.bf16 %v17134_v7  ;;  %v17954_v26 = vld [vmem:[#allocation65_spill] sm:$0xff]  ;;  %v17976_v7 = vld [vmem:[#allocation99_spill] sm:$0xff] }
 0x3ac   :  { %v17165_v45 = vpop.f32.mrf.mxu0  ;;  %11540 = vmatmul.msk.f32.vlgmr.msrb.gmra.mxu1 %vm286_vm2, %v16875_v42  ;;  %v6262_v59 = vadd.f32 %v17945_v10, %v5869_v51  ;;  %v5087_v31 = vadd.f32 %v17947_v43, %v4694_v21  ;;  %v4469_v34 = vadd.f32 %v17948_v36, %v4076_v60  ;;  %v12619_v16 = vunpack.i.l.bf16 %v17094_v12  ;;  %v17953_v21 = vld [vmem:[#allocation82_spill] sm:$0xff]  ;;  %v17958_v36 = vld [vmem:[#allocation75_spill] sm:$0xff] }
 0x3ad   :  { %11541 = vmatmul.msk.f32.vlgmr.msrb.gmra.mxu2 %vm286_vm2, %v16875_v42  ;;  %11542 = vmatmul.msk.f32.vlgmr.msra.gmra.mxu3 %vm286_vm2, %v16875_v42  ;;  %v12620_v42 = vunpack.i.h.bf16 %v17094_v12  ;;  %v5477_v19 = vadd.f32 %v17949_v35, %v5084_v22  ;;  %v4695_v38 = vadd.f32 %v17952_v37, %v4302_v50  ;;  %v12635_v60 = vunpack.i.h.bf16 %v17186_v9  ;;  %v17955_v22 = vld [vmem:[#allocation69_spill] sm:$0xff]  ;;  %v17957_v12 = vld [vmem:[#allocation70_spill] sm:$0xff] }
 0x3ae   :  { %11543 = vmatmul.msk.f32.vlgmr.msrb.gmra.mxu0 %vm286_vm2, %v17170_v58  ;;  %10358 = vmatpush.msra.mxu3 %v10024_v48  ;;  %v6655_v62 = vadd.f32 %v17950_v2, %v6262_v59  ;;  %v17951_v48 = vld [vmem:[#allocation64_spill] sm:$0xff]  ;;  %v4473_v32 = vadd.f32 %v17954_v26, %v4080_v20  ;;  %v4861_v10 = vadd.f32 %v17955_v22, %v4468_v0  ;;  %v17959_v35 = vld [vmem:[#allocation89_spill] sm:$0xff] }
 0x3af   :  { %10338 = vmatpush.msrb.mxu2 %v10026_v63  ;;  %10318 = vmatpush.msrb.mxu1 %v10012_v1  ;;  %v4472_v51 = vadd.f32 %v17951_v48, %v4079_v46  ;;  %v5480_v63 = vadd.f32 %v17953_v21, %v5087_v31  ;;  %v17956_v59 = vld [vmem:[#allocation88_spill] sm:$0xff]  ;;  %v5088_v46 = vadd.f32 %v17958_v36, %v4695_v38  ;;  %v17963_v21 = vld [vmem:[#allocation83_spill] sm:$0xff]  ;;  %v12630_v36 = vunpack.i.h.bf16 %v17132_v47 }
 0x3b0   :  { %v17210_v11 = vpop.f32.mrf.mxu2  ;;  %v17212_v53 = vpop.f32.mrf.mxu3  ;;  %10440 = vmatpush.msrb.mxu0 %v10414_v40  ;;  %v5870_v4 = vadd.f32 %v17956_v59, %v5477_v19  ;;  %v7048_v43 = vadd.f32 %v16397_v56, %v6655_v62  ;;  %v4862_v40 = vadd.f32 %v17957_v12, %v4469_v34  ;;  %v10408_v31 = vsel %vm10403_vm13, %v12620_v42, %v12624_v33  ;;  %v17960_v48 = vld [vmem:[#allocation96_spill] sm:$0xff]  ;;  %v17962_v62 = vld [vmem:[#allocation97_spill] sm:$0xff] }
 0x3b1   :  { %v17218_v1 = vpop.f32.mrf.mxu1  ;;  %v5873_v50 = vadd.f32 %v17959_v35, %v5480_v63  ;;  %v10412_v56 = vsel %vm10403_vm13, %v12629_v30, %v12619_v16  ;;  %v10410_v0 = vsel %vm10403_vm13, %v12619_v16, %v12620_v42  ;;  %v17961_v34 = vld [vmem:[#allocation76_spill] sm:$0xff]  ;;  %v5481_v63 = vadd.f32 %v17963_v21, %v5088_v46  ;;  %v17253_v42 = vpop.permute.xlu1 %12642  ;;  %v17967_v12 = vld [vmem:[#allocation105_spill] sm:$0xff]  ;;  %v17968_v46 = vld [vmem:[#allocation90_spill] sm:$0xff] }
 0x3b2   :  { %v6263_v37 = vadd.f32 %v17960_v48, %v5870_v4  ;;  %v7441_v20 = vadd.f32 %v16551_v15, %v7048_v43  ;;  %v5254_v19 = vadd.f32 %v17961_v34, %v4861_v10  ;;  %v10406_v15 = vsel %vm10403_vm13, %v12624_v33, %v12635_v60  ;;  %v17964_v26 = vld [vmem:[#allocation104_spill] sm:$0xff]  ;;  %v17255_v16 = vpop.permute.xlu2 %12647  ;;  %v17965_v10 = vld [vmem:[#allocation71_spill] sm:$0xff] }
 0x3b3   :  { %v6266_v38 = vadd.f32 %v17962_v62, %v5873_v50  ;;  %v4865_v59 = vadd.f32 %v17965_v10, %v4472_v51  ;;  %v17966_v4 = vld [vmem:[#allocation84_spill] sm:$0xff]  ;;  %v17969_v51 = vld [vmem:[#allocation111_spill] sm:$0xff]  ;;  %v10416_v10 = vsel %vm10403_vm13, %v12630_v36, %v12625_v27  ;;  %v17977_v27 = vld [vmem:[#allocation106_spill] sm:$0xff] }
 0x3b4   :  { %v17228_v2 = vpop.f32.mrf.mxu0  ;;  %11544 = vmatmul.msk.f32.vlgmr.msra.gmra.mxu1 %vm286_vm2, %v17170_v58  ;;  %v6656_v30 = vadd.f32 %v17964_v26, %v6263_v37  ;;  %v7834_v22 = vadd.f32 %v16713_v8, %v7441_v20  ;;  %v5647_v43 = vadd.f32 %v17966_v4, %v5254_v19  ;;  %v5874_v8 = vadd.f32 %v17968_v46, %v5481_v63  ;;  %v17973_v63 = vld [vmem:[#allocation98_spill] sm:$0xff]  ;;  %v17978_v46 = vld [vmem:[#allocation123_spill] sm:$0xff] }
 0x3b5   :  { %11545 = vmatmul.msk.f32.vlgmr.msra.gmra.mxu2 %vm286_vm2, %v17170_v58  ;;  %11546 = vmatmul.msk.f32.vlgmr.msrb.gmra.mxu3 %vm286_vm2, %v17170_v58  ;;  %v6659_v33 = vadd.f32 %v17967_v12, %v6266_v38  ;;  %v12634_v37 = vunpack.i.l.bf16 %v17186_v9 }
 0x3b6   :  { %11547 = vmatmul.msk.f32.vlgmr.msra.gmra.mxu0 %vm286_vm2, %v17170_v58  ;;  %10500 = vmatpush.msrb.mxu3 %v10408_v31  ;;  %v7049_v35 = vadd.f32 %v16424_v6, %v6656_v30  ;;  %v8227_v50 = vadd.f32 %v16846_v3, %v7834_v22  ;;  %v17970_v6 = vld [vmem:[#allocation72_spill] sm:$0xff]  ;;  %v17971_v3 = vld [vmem:[#allocation77_spill] sm:$0xff]  ;;  %v6267_v26 = vadd.f32 %v17973_v63, %v5874_v8 }
 0x3b7   :  { %10460 = vmatpush.msra.mxu1 %v10412_v56  ;;  %10480 = vmatpush.msra.mxu2 %v10410_v0  ;;  %v7052_v20 = vadd.f32 %v17969_v51, %v6659_v33  ;;  %v12645_v56 = vunpack.i.h.bf16 %v17253_v42  ;;  %v12649_v0 = vunpack.i.l.bf16 %v17255_v16  ;;  %v4866_v19 = vadd.f32 %v17970_v6, %v4473_v32  ;;  %v17981_v51 = vld [vmem:[#allocation112_spill] sm:$0xff]  ;;  %v17982_v6 = vld [vmem:[#allocation129_spill] sm:$0xff] }
 0x3b8   :  { %v17264_v31 = vpop.f32.mrf.mxu2  ;;  %v8708_v48 = vpop.f32.mrf.mxu3  ;;  %10520 = vmatpush.msra.mxu0 %v10406_v15  ;;  %v5255_v62 = vadd.f32 %v17971_v3, %v4862_v40  ;;  %v7442_v38 = vadd.f32 %v16581_v23, %v7049_v35  ;;  %v8620_v9 = vadd.f32 %v17041_v14, %v8227_v50  ;;  %v17972_v15 = vld [vmem:[#allocation91_spill] sm:$0xff]  ;;  %v10418_v23 = vsel %vm10403_vm13, %v12634_v37, %v12630_v36  ;;  %v17984_v63 = vld [vmem:[#allocation92_spill] sm:$0xff] }
 0x3b9   :  { %v17269_v34 = vadd.f32 %v8708_v48, %v17028_v13  ;;  %v17271_v47 = vpop.f32.mrf.mxu1  ;;  %v6040_v21 = vadd.f32 %v17972_v15, %v5647_v43  ;;  %v17974_v13 = vld [vmem:[#allocation117_spill] sm:$0xff]  ;;  %v10404_v14 = vsel %vm10403_vm13, %v12635_v60, %v12634_v37  ;;  %v12638_v40 = vpop.permute.xlu0 %12637  ;;  %v17975_v43 = vld [vmem:[#allocation78_spill] sm:$0xff]  ;;  %v6660_v36 = vadd.f32 %v17977_v27, %v6267_v26  ;;  %v17980_v50 = vld [vmem:[#allocation107_spill] sm:$0xff] }
 0x3ba   :  { %v7445_v30 = vadd.f32 %v17974_v13, %v7052_v20  ;;  %v7835_v32 = vadd.f32 %v16735_v25, %v7442_v38  ;;  %v5258_v12 = vadd.f32 %v17975_v43, %v4865_v59  ;;  %v10415_v25 = vsel %vm10403_vm13, %v12645_v56, %v12649_v0  ;;  %v17979_v59 = vld [vmem:[#allocation85_spill] sm:$0xff] }
 0x3bb   :  { %v6433_v33 = vadd.f32 %v17976_v7, %v6040_v21  ;;  %v5648_v35 = vadd.f32 %v17979_v59, %v5255_v62  ;;  %v12640_v37 = vunpack.i.h.bf16 %v12638_v40  ;;  %v7053_v20 = vadd.f32 %v17981_v51, %v6660_v36  ;;  %v17983_v21 = vld [vmem:[#allocation86_spill] sm:$0xff]  ;;  %v17985_v13 = vld [vmem:[#allocation113_spill] sm:$0xff]  ;;  %v17990_v36 = vld [vmem:[#allocation119_spill] sm:$0xff] }
 0x3bc   :  { %v8870_v22 = vpop.f32.mrf.mxu0  ;;  %11548 = vmatmul.msk.f32.vlgmr.msrb.gmra.mxu1 %vm286_vm2, %v17170_v58  ;;  %v7838_v60 = vadd.f32 %v17978_v46, %v7445_v30  ;;  %v8228_v8 = vadd.f32 %v16868_v52, %v7835_v32  ;;  %v12639_v15 = vunpack.i.l.bf16 %v12638_v40  ;;  %v5651_v62 = vadd.f32 %v17983_v21, %v5258_v12  ;;  %v17986_v32 = vld [vmem:[#allocation79_spill] sm:$0xff]  ;;  %v17988_v40 = vld [vmem:[#allocation93_spill] sm:$0xff]  ;;  %v17989_v12 = vld [vmem:[#allocation100_spill] sm:$0xff] }
 0x3bd   :  { %v17287_v4 = vadd.f32 %v8870_v22, %v8620_v9  ;;  %11549 = vmatmul.msk.f32.vlgmr.msrb.gmra.mxu2 %vm286_vm2, %v17170_v58  ;;  %11550 = vmatmul.msk.f32.vlgmr.msra.gmra.mxu3 %vm286_vm2, %v17170_v58  ;;  %v6826_v48 = vadd.f32 %v17980_v50, %v6433_v33  ;;  %v12644_v58 = vunpack.i.l.bf16 %v17253_v42  ;;  %v6041_v26 = vadd.f32 %v17984_v63, %v5648_v35  ;;  %v10398_v33 = vpop.permute.xlu1 %10397  ;;  %v17992_v50 = vld [vmem:[#allocation87_spill] sm:$0xff]  ;;  %v17993_v51 = vld [vmem:[#allocation101_spill] sm:$0xff]  ;;  %v18005_v42 = vld [vmem:[#allocation110_spill] sm:$0xff] }
 0x3be   :  { %11551 = vmatmul.msk.f32.vlgmr.msrb.gmra.mxu0 %vm286_vm2, %v17099_v57  ;;  %10580 = vmatpush.msra.mxu3 %v10416_v10  ;;  %v8231_v3 = vadd.f32 %v17982_v6, %v7838_v60  ;;  %v8621_v38 = vadd.f32 %v17087_v49, %v8228_v8  ;;  %v17991_v8 = vld [vmem:[#allocation124_spill] sm:$0xff]  ;;  %v10411_v35 = vsel %vm10403_vm13, %v12639_v15, %v12640_v37 }
 0x3bf   :  { %10560 = vmatpush.msrb.mxu2 %v10418_v23  ;;  %10540 = vmatpush.msrb.mxu1 %v10404_v14  ;;  %v7219_v30 = vadd.f32 %v17985_v13, %v6826_v48  ;;  %v5259_v23 = vadd.f32 %v17986_v32, %v4866_v19  ;;  %v17987_v14 = vld [vmem:[#allocation118_spill] sm:$0xff]  ;;  %v6434_v27 = vadd.f32 %v17989_v12, %v6041_v26 }
 0x3c0   :  { %v17316_v52 = vpop.f32.mrf.mxu2  ;;  %v8788_v9 = vpop.f32.mrf.mxu3  ;;  %10611 = vmatpush.msrb.mxu0 %v10415_v25  ;;  %v7446_v43 = vadd.f32 %v17987_v14, %v7053_v20  ;;  %v8624_v49 = vadd.f32 %v17105_v61, %v8231_v3  ;;  %v6044_v25 = vadd.f32 %v17988_v40, %v5651_v62  ;;  %v10413_v61 = vsel %vm10403_vm13, %v12649_v0, %v12639_v15  ;;  %v17994_v3 = vld [vmem:[#allocation108_spill] sm:$0xff]  ;;  %v17997_v26 = vld [vmem:[#allocation114_spill] sm:$0xff] }
 0x3c1   :  { %v17322_v22 = vadd.f32 %v8788_v9, %v17085_v44  ;;  %v8890_v10 = vpop.f32.mrf.mxu1  ;;  %v7612_v46 = vadd.f32 %v17990_v36, %v7219_v30  ;;  %v10409_v44 = vsel %vm10403_vm13, %v12640_v37, %v12644_v58  ;;  %v5652_v48 = vadd.f32 %v17992_v50, %v5259_v23  ;;  %v17995_v9 = vld [vmem:[#allocation125_spill] sm:$0xff]  ;;  %v17998_v30 = vld [vmem:[#allocation130_spill] sm:$0xff]  ;;  %v18001_v40 = vld [vmem:[#allocation120_spill] sm:$0xff] }
 0x3c2   :  { %v17327_v7 = vadd.f32 %v8890_v10, %v8621_v38  ;;  %v7839_v59 = vadd.f32 %v17991_v8, %v7446_v43  ;;  %v6437_v20 = vadd.f32 %v17993_v51, %v6044_v25  ;;  %v10407_v6 = vsel %vm10403_vm13, %v12644_v58, %v10398_v33  ;;  %v17996_v37 = vld [vmem:[#allocation109_spill] sm:$0xff]  ;;  %v17999_v14 = vld [vmem:[#allocation94_spill] sm:$0xff]  ;;  %v10421_v8 = vld [vmem:[%s17701_s6 + $0xd0] sm:$0xff] }
 0x3c3   :  { %v6827_v38 = vadd.f32 %v17994_v3, %v6434_v27  ;;  %v8005_v0 = vadd.f32 %v17995_v9, %v7612_v46  ;;  %v8622_v62 = vadd.f32 %v17143_v41, %v16909_v17  ;;  %v8623_v63 = vadd.f32 %v17145_v39, %v16912_v55  ;;  %v18003_v46 = vld [vmem:[#allocation121_spill] sm:$0xff]  ;;  %v18006_v51 = vld [vmem:[#allocation127_spill] sm:$0xff] }
 0x3c4   :  { %v8950_v60 = vpop.f32.mrf.mxu0  ;;  %11552 = vmatmul.msk.f32.vlgmr.msra.gmra.mxu1 %vm286_vm2, %v17099_v57  ;;  %v8232_v21 = vadd.f32 %v16914_v24, %v7839_v59  ;;  %v6830_v15 = vadd.f32 %v17996_v37, %v6437_v20  ;;  %v12650_v58 = vunpack.i.h.bf16 %v17255_v16  ;;  %v6045_v43 = vadd.f32 %v17999_v14, %v5652_v48  ;;  %v10402_v16 = vpop.permute.xlu0 %10401 }
 0x3c5   :  { %v17335_v19 = vadd.f32 %v8950_v60, %v8624_v49  ;;  %11553 = vmatmul.msk.f32.vlgmr.msra.gmra.mxu2 %vm286_vm2, %v17099_v57  ;;  %11554 = vmatmul.msk.f32.vlgmr.msrb.gmra.mxu3 %vm286_vm2, %v17099_v57  ;;  %v7220_v13 = vadd.f32 %v17997_v26, %v6827_v38  ;;  %v8398_v24 = vadd.f32 %v17998_v30, %v8005_v0  ;;  %v18000_v49 = vld [vmem:[#allocation115_spill] sm:$0xff]  ;;  %v18008_v38 = vld [vmem:[#allocation2_spill] sm:$0xff]  ;;  %v18010_v0 = vld [vmem:[#allocation116_spill] sm:$0xff] }
 0x3c6   :  { %11555 = vmatmul.msk.f32.vlgmr.msra.gmra.mxu0 %vm286_vm2, %v17099_v57  ;;  %10671 = vmatpush.msrb.mxu3 %v10409_v44  ;;  %v8625_v10 = vadd.f32 %v17154_v18, %v8232_v21  ;;  %v7223_v17 = vadd.f32 %v18000_v49, %v6830_v15  ;;  %v18002_v18 = vld [vmem:[#allocation102_spill] sm:$0xff]  ;;  %v10417_v59 = vsel %vm10403_vm13, %v12650_v58, %v12645_v56 }
 0x3c7   :  { %10631 = vmatpush.msra.mxu1 %v10413_v61  ;;  %10651 = vmatpush.msra.mxu2 %v10411_v35  ;;  %v7613_v25 = vadd.f32 %v18001_v40, %v7220_v13  ;;  %v8791_v12 = vadd.f32 %v17165_v45, %v8398_v24  ;;  %v6438_v36 = vadd.f32 %v18002_v18, %v6045_v43  ;;  %v18004_v61 = vld [vmem:[#allocation126_spill] sm:$0xff] }
 0x3c8   :  { %v8910_v32 = vpop.f32.mrf.mxu2  ;;  %v8930_v23 = vpop.f32.mrf.mxu3  ;;  %10691 = vmatpush.msra.mxu0 %v10407_v6  ;;  %v7616_v60 = vadd.f32 %v18003_v46, %v7223_v17  ;;  %v10405_v45 = vsel %vm10403_vm13, %v10398_v33, %v10402_v16  ;;  %v10419_v48 = vsel %vm10403_vm13, %v10402_v16, %v12650_v58  ;;  %v18007_v6 = vld [vmem:[#allocation4_spill] sm:$0xff]  ;;  %v8626_v33 = vadd.f32 %v17210_v11, %v18008_v38  ;;  %v18012_v30 = vld [vmem:[#allocation122_spill] sm:$0xff]  ;;  %v17466_v38 = vld [vmem:[%s17699_s1 + $0xf8] sm:$0xff] }
 0x3c9   :  { %v17367_v41 = vadd.f32 %v8910_v32, %v8622_v62  ;;  %v17369_v55 = vadd.f32 %v8930_v23, %v8623_v63  ;;  %v8970_v39 = vpop.f32.mrf.mxu1  ;;  %v8006_v35 = vadd.f32 %v18004_v61, %v7613_v25  ;;  %v6831_v56 = vadd.f32 %v18005_v42, %v6438_v36 }
 0x3ca   :  { %v17373_v27 = vadd.f32 %v8970_v39, %v8625_v10  ;;  %v8009_v20 = vadd.f32 %v18006_v51, %v7616_v60  ;;  %v8627_v9 = vadd.f32 %v17212_v53, %v18009_v29  ;;  %v18013_v53 = vld [vmem:[#allocation128_spill] sm:$0xff]  ;;  %v8793_v43 = vadd.f32 %v17264_v31, %v17025_v54 }
 0x3cb   :  { %v8399_v3 = vadd.f32 %v18007_v6, %v8006_v35  ;;  %v7224_v21 = vadd.f32 %v18010_v0, %v6831_v56  ;;  %v8797_v54 = vadd.f32 %v17316_v52, %v17082_v28 }
 0x3cc   :  { %v9041_v44 = vpop.f32.mrf.mxu0  ;;  %11556 = vmatmul.msk.f32.vlgmr.msrb.gmra.mxu1 %vm286_vm2, %v17099_v57 }
 0x3cd   :  { %v17385_v50 = vadd.f32 %v9041_v44, %v8791_v12  ;;  %11557 = vmatmul.msk.f32.vlgmr.msrb.gmra.mxu2 %vm286_vm2, %v17099_v57  ;;  %11558 = vmatmul.msk.f32.vlgmr.msra.gmra.mxu3 %vm286_vm2, %v17099_v57  ;;  %v18011_v57 = vld [vmem:[#allocation5_spill] sm:$0xff]  ;;  %v8792_v15 = vadd.f32 %v17218_v1, %v8399_v3  ;;  %v7617_v24 = vadd.f32 %v18012_v30, %v7224_v21  ;;  %v17490_v30 = vld [vmem:[%s17699_s1 + $0xf0] sm:$0xff] }
 0x3ce   :  { %11559 = vmatmul.msk.f32.vlgmr.msrb.gmra.mxu0 %vm286_vm2, %v10421_v8  ;;  %10751 = vmatpush.msra.mxu3 %v10417_v59  ;;  %v8402_v37 = vadd.f32 %v18011_v57, %v8009_v20 }
 0x3cf   :  { %10731 = vmatpush.msrb.mxu2 %v10419_v48  ;;  %10711 = vmatpush.msrb.mxu1 %v10405_v45  ;;  %v8010_v23 = vadd.f32 %v18013_v53, %v7617_v24 }
 0x3d0   :  { %v8990_v62 = vpop.f32.mrf.mxu2  ;;  %v9010_v63 = vpop.f32.mrf.mxu3  ;;  %v8795_v11 = vadd.f32 %v17228_v2, %v8402_v37 }
 0x3d1   :  { %v9019_v58 = vadd.f32 %v8990_v62, %v8626_v33  ;;  %v9020_v26 = vadd.f32 %v9010_v63, %v8627_v9  ;;  %v9061_v13 = vpop.f32.mrf.mxu1  ;;  %v8403_v1 = vadd.f32 %v17030_v5, %v8010_v23  ;;  %v17725_v33 = vmov 0  }
 0x3d2   :  { %v9185_v10 = vadd.f32 %v9061_v13, %v8792_v15  ;;  %12651 = vset.pattern.permute.xlu1 %v17725_v33  ;;  %v149_v9 = vmul.f32 0.001, %v17466_v38  ;;  %12654 = vset.pattern.permute.xlu0 %v17725_v33  ;;  %v52_v13 = vld [vmem:[%s17700_s2 + $0xf0] sm:$0xff] }
 0x3d3   :  { %v8796_v2 = vadd.f32 %v17271_v47, %v8403_v1  ;;  %v84_v24 = vmul.f32 0.999, %v52_v13 }
 0x3d4   :  { %v9121_v32 = vpop.f32.mrf.mxu0  ;;  %11560 = vmatmul.msk.f32.vlgmr.msra.gmra.mxu1 %vm286_vm2, %v10421_v8 }
 0x3d5   :  { %v9188_v14 = vadd.f32 %v9121_v32, %v8795_v11  ;;  %11561 = vmatmul.msk.f32.vlgmr.msra.gmra.mxu2 %vm286_vm2, %v10421_v8  ;;  %11562 = vmatmul.msk.f32.vlgmr.msrb.gmra.mxu3 %vm286_vm2, %v10421_v8  ;;  %v148_v11 = vmul.f32 0.001, %v17490_v30 }
 0x3d6   :  { %11563 = vmatmul.msk.f32.vlgmr.msra.gmra.mxu0 %vm286_vm2, %v10421_v8 }
 0x3d7   :  { %v180_v32 = vadd.f32 %v148_v11, %v84_v24 }
 0x3d8   :  { %v9081_v49 = vpop.f32.mrf.mxu2  ;;  %v9101_v17 = vpop.f32.mrf.mxu3 }
 0x3d9   :  { %v9186_v39 = vadd.f32 %v9081_v49, %v8793_v43  ;;  %v9187_v16 = vadd.f32 %v9101_v17, %v17269_v34  ;;  %v9141_v40 = vpop.f32.mrf.mxu1  ;;  %213 = vst.msk [vmem:[%s17701_s6 + $0xf0] sm:$0xff] %vm182_vm1, %v180_v32 }
 0x3da   :  { %v9189_v25 = vadd.f32 %v9141_v40, %v8796_v2 }
 0x3dc   :  { %v9263_v12 = vpop.f32.mrf.mxu0  ;;  %11564 = vmatmul.msk.f32.vlgmr.msrb.gmra.mxu1 %vm286_vm2, %v10421_v8 }
 0x3dd   :  { %v17421_v18 = vadd.f32 %v9263_v12, %v17287_v4  ;;  %11565 = vmatmul.msk.f32.vlgmr.msrb.gmra.mxu2 %vm286_vm2, %v10421_v8  ;;  %11566 = vmatmul.msk.f32.vlgmr.msra.gmra.mxu3 %vm286_vm2, %v10421_v8 }
 0x3e0   :  { %v9161_v5 = vpop.f32.mrf.mxu2  ;;  %v9181_v31 = vpop.f32.mrf.mxu3  ;;  %v17512_v40 = vld [vmem:[%s17701_s6 + $0xf0] sm:$0xff] }
 0x3e1   :  { %v9190_v47 = vadd.f32 %v9161_v5, %v8797_v54  ;;  %v9191_v34 = vadd.f32 %v9181_v31, %v17322_v22  ;;  %v9283_v36 = vpop.f32.mrf.mxu1  ;;  %v49_v22 = vld [vmem:[%s17700_s2 + $0xd8] sm:$0xff] }
 0x3e2   :  { %v17430_v46 = vadd.f32 %v9283_v36, %v17327_v7  ;;  %v17446_v7 = vld [vmem:[%s17699_s1 + $0xd8] sm:$0xff] }
 0x3e4   :  { %v9343_v4 = vpop.f32.mrf.mxu0 }
 0x3e5   :  { %v9410_v60 = vadd.f32 %v9343_v4, %v17335_v19 }
 0x3e8   :  { %v9303_v44 = vpop.f32.mrf.mxu2  ;;  %v9323_v59 = vpop.f32.mrf.mxu3 }
 0x3e9   :  { %v17434_v61 = vadd.f32 %v9303_v44, %v17367_v41  ;;  %v17437_v8 = vadd.f32 %v9323_v59, %v17369_v55  ;;  %v9363_v28 = vpop.f32.mrf.mxu1  ;;  %v81_v41 = vmul.f32 0.999, %v49_v22  ;;  %v145_v55 = vmul.f32 0.001, %v17446_v7 }
 0x3ea   :  { %v9411_v52 = vadd.f32 %v9363_v28, %v17373_v27 }
 0x3eb   :  { %v177_v45 = vadd.f32 %v145_v55, %v81_v41 }
 0x3ec   :  { %v9434_v35 = vpop.f32.mrf.mxu0 }
 0x3ed   :  { %v17449_v19 = vadd.f32 %v9434_v35, %v17385_v50  ;;  %210 = vst.msk [vmem:[%s17701_s6 + $0xd8] sm:$0xff] %vm182_vm1, %v177_v45  ;;  %v53_v50 = vld [vmem:[%s17700_s2 + $0xf8] sm:$0xff] }
 0x3ee   :  { %v85_v29 = vmul.f32 0.999, %v53_v50 }
 0x3f0   :  { %v9383_v48 = vpop.f32.mrf.mxu2  ;;  %v9403_v42 = vpop.f32.mrf.mxu3  ;;  %v181_v21 = vadd.f32 %v149_v9, %v85_v29 }
 0x3f1   :  { %v9412_v27 = vadd.f32 %v9383_v48, %v9019_v58  ;;  %v9413_v56 = vadd.f32 %v9403_v42, %v9020_v26  ;;  %v9454_v51 = vpop.f32.mrf.mxu1 }
 0x3f2   :  { %v17456_v20 = vadd.f32 %v9454_v51, %v9185_v10  ;;  %214 = vst.msk [vmem:[%s17701_s6 + $0xf8] sm:$0xff] %vm182_vm1, %v181_v21  ;;  %v17724_v10 = vmov 8   ;;  %v11568_v21 = vld [vmem:[%s17698_s0 + $0x80] ss:$8 sm:$0xf0] }
 0x3f3   :  { %12653 = vset.pattern.permute.xlu2 %v17724_v10 }
 0x3f4   :  { %v9514_v6 = vpop.f32.mrf.mxu0  ;;  %v10829_v0 = vld [vmem:[%s17701_s6 + $0xd8] sm:$0xff] }
 0x3f5   :  { %v17458_v3 = vadd.f32 %v9514_v6, %v9188_v14  ;;  %10899 = vperm.xlu1 %12651, %v10829_v0   ;;  %v11567_v0 = vld [vmem:[%s17698_s0 + $0x80] ss:$8 sm:$0xf] }
 0x3f8   :  { %v9474_v57 = vpop.f32.mrf.mxu2  ;;  %v9494_v37 = vpop.f32.mrf.mxu3 }
 0x3f9   :  { %v17474_v15 = vadd.f32 %v9474_v57, %v9186_v39  ;;  %v17476_v62 = vadd.f32 %v9494_v37, %v9187_v16  ;;  %v9534_v63 = vpop.f32.mrf.mxu1  ;;  %v17498_v14 = vld [vmem:[%s17701_s6 + $0xf8] sm:$0xff] }
 0x3fa   :  { %v17482_v58 = vadd.f32 %v9534_v63, %v9189_v25  ;;  %v17550_v63 = vor.u32 %v11568_v21, %v11567_v0 }
 0x3fc   :  { %v9656_v26 = vpop.f32.mrf.mxu0  ;;  %v10771_v21 = vperm.slane %v17550_v63, 2 }
 0x3fd   :  { %12652 = vset.pattern.permute.xlu1 %v17724_v10  ;;  %v9799_v37 = vadd.f32 %v9656_v26, %v17421_v18 }
 0x3fe   :  { %10920 = vperm.xlu1 %12652, %v17498_v14  }
 0x400   :  { %v9554_v53 = vpop.f32.mrf.mxu2  ;;  %v9574_v23 = vpop.f32.mrf.mxu3 }
 0x401   :  { %v17500_v1 = vadd.f32 %v9554_v53, %v9190_v47  ;;  %v17502_v43 = vadd.f32 %v9574_v23, %v9191_v34  ;;  %v9676_v2 = vpop.f32.mrf.mxu1  ;;  %v10769_v53 = vperm.slane %v17550_v63, 0 }
 0x402   :  { %v9800_v13 = vadd.f32 %v9676_v2, %v17430_v46 }
 0x404   :  { %v9736_v49 = vpop.f32.mrf.mxu0 }
 0x405   :  { %v9803_v17 = vadd.f32 %v9736_v49, %v9410_v60 }
 0x406   :  { %10915 = vperm.xlu1 %12652, %v17512_v40  }
 0x408   :  { %v9696_v39 = vpop.f32.mrf.mxu2  ;;  %v9716_v16 = vpop.f32.mrf.mxu3 }
 0x409   :  { %v9756_v25 = vpop.f32.mrf.mxu1  ;;  %v9801_v26 = vadd.f32 %v9696_v39, %v17434_v61  ;;  %v9802_v46 = vadd.f32 %v9716_v16, %v17437_v8 }
 0x40a   :  { %v9804_v12 = vadd.f32 %v9756_v25, %v9411_v52  ;;  %v10770_v25 = vperm.slane %v17550_v63, 1 }
 0x40c   :  { %v17515_v54 = vpop.f32.mrf.mxu0 }
 0x410   :  { %v9776_v5 = vpop.f32.mrf.mxu2  ;;  %v9796_v31 = vpop.f32.mrf.mxu3 }
 0x411   :  { %v17517_v47 = vadd.f32 %v9776_v5, %v9412_v27  ;;  %v17519_v34 = vadd.f32 %v9796_v31, %v9413_v56  ;;  %v17521_v36 = vpop.f32.mrf.mxu1 }
 0x414   :  { %v17523_v4 = vpop.f32.mrf.mxu0 }
 0x418   :  { %v17525_v60 = vpop.f32.mrf.mxu2  ;;  %v17527_v44 = vpop.f32.mrf.mxu3 }
 0x419   :  { %v17529_v59 = vpop.f32.mrf.mxu1 }
 0x41c   :  { %v10049_v28 = vpop.f32.mrf.mxu0 }
 0x41d   :  { %v10192_v24 = vadd.f32 %v10049_v28, %v9799_v37 }
 0x420   :  { %v17531_v52 = vpop.f32.mrf.mxu2  ;;  %v17533_v35 = vpop.f32.mrf.mxu3 }
 0x421   :  { %v10069_v22 = vpop.f32.mrf.mxu1 }
 0x422   :  { %v10193_v11 = vadd.f32 %v10069_v22, %v9800_v13 }
 0x424   :  { %v10129_v41 = vpop.f32.mrf.mxu0 }
 0x425   :  { %v10196_v2 = vadd.f32 %v10129_v41, %v9803_v17  ;;  %v9970_v41 = vadd.f32 %v17515_v54, %v17449_v19 }
 0x428   :  { %v10089_v55 = vpop.f32.mrf.mxu2  ;;  %v10109_v45 = vpop.f32.mrf.mxu3 }
 0x429   :  { %v10149_v48 = vpop.f32.mrf.mxu1  ;;  %v10194_v22 = vadd.f32 %v10089_v55, %v9801_v26  ;;  %v10195_v0 = vadd.f32 %v10109_v45, %v9802_v46 }
 0x42a   :  { %v10197_v37 = vadd.f32 %v10149_v48, %v9804_v12 }
 0x42c   :  { %v10220_v42 = vpop.f32.mrf.mxu0 }
 0x42d   :  { %v10363_v48 = vadd.f32 %v10220_v42, %v9970_v41 }
 0x430   :  { %v10169_v27 = vpop.f32.mrf.mxu2  ;;  %v10189_v56 = vpop.f32.mrf.mxu3 }
 0x431   :  { %v10240_v51 = vpop.f32.mrf.mxu1  ;;  %v10199_v46 = vadd.f32 %v10189_v56, %v17519_v34  ;;  %v9972_v56 = vadd.f32 %v17525_v60, %v17474_v15 }
 0x434   :  { %v17535_v6 = vpop.f32.mrf.mxu0 }
 0x438   :  { %v17537_v50 = vpop.f32.mrf.mxu2  ;;  %v17539_v29 = vpop.f32.mrf.mxu3 }
 0x439   :  { %v17541_v9 = vpop.f32.mrf.mxu1 }
 0x43c   :  { %v10442_v57 = vpop.f32.mrf.mxu0 }
 0x43d   :  { %v10585_v32 = vadd.f32 %v10442_v57, %v10192_v24  ;;  %v10772_v57 = vperm.slane %v17550_v63, 3  ;;  %v10773_v24 = vperm.slane %v17550_v63, 4 }
 0x43f   :  { %v10785_v33 = vadd.f32 %v10769_v53, %v10585_v32  ;;  %v10774_v32 = vperm.slane %v17550_v63, 5 }
 0x440   :  { %v17554_v23 = vpop.f32.mrf.mxu2  ;;  %v17556_v49 = vpop.f32.mrf.mxu3 }
 0x441   :  { %v10462_v5 = vpop.f32.mrf.mxu1 }
 0x442   :  { %v10586_v31 = vadd.f32 %v10462_v5, %v10193_v11 }
 0x444   :  { %v10522_v10 = vpop.f32.mrf.mxu0  ;;  %v10786_v18 = vadd.f32 %v10770_v25, %v10586_v31 }
 0x445   :  { %v10589_v13 = vadd.f32 %v10522_v10, %v10196_v2  ;;  %v9971_v10 = vadd.f32 %v17521_v36, %v17456_v20  ;;  %v10775_v2 = vperm.slane %v17550_v63, 6 }
 0x446   :  { %v10801_v28 = vmax.f32 %v10785_v33, %v10786_v18  ;;  %v10198_v18 = vadd.f32 %v10169_v27, %v17517_v47  ;;  %v9974_v47 = vadd.f32 %v17523_v4, %v17458_v3 }
 0x447   :  { %v10789_v55 = vadd.f32 %v10773_v24, %v10589_v13 }
 0x448   :  { %v10482_v11 = vpop.f32.mrf.mxu2  ;;  %v10502_v5 = vpop.f32.mrf.mxu3 }
 0x449   :  { %v10587_v31 = vadd.f32 %v10482_v11, %v10194_v22  ;;  %v10588_v61 = vadd.f32 %v10502_v5, %v10195_v0  ;;  %v10542_v39 = vpop.f32.mrf.mxu1  ;;  %v10776_v22 = vperm.slane %v17550_v63, 7 }
 0x44a   :  { %v10590_v8 = vadd.f32 %v10542_v39, %v10197_v37  ;;  %v10364_v37 = vadd.f32 %v10240_v51, %v9971_v10  ;;  %v9973_v51 = vadd.f32 %v17527_v44, %v17476_v62  ;;  %v10367_v39 = vadd.f32 %v17535_v6, %v9974_v47 }
 0x44b   :  { %v10787_v17 = vadd.f32 %v10771_v21, %v10587_v31  ;;  %v10788_v33 = vadd.f32 %v10772_v57, %v10588_v61  ;;  %v9975_v61 = vadd.f32 %v17529_v59, %v17482_v58  ;;  %v9976_v6 = vadd.f32 %v17531_v52, %v17500_v1  ;;  %v50_v52 = vld [vmem:[%s17700_s2 + $0xe0] sm:$0xff] }
 0x44c   :  { %v10613_v16 = vpop.f32.mrf.mxu0  ;;  %v10790_v45 = vadd.f32 %v10774_v32, %v10590_v8  ;;  %v10366_v3 = vadd.f32 %v17539_v29, %v9973_v51  ;;  %v18014_v1 = vmov 0  }
 0x44d   :  { %v10802_v12 = vmax.f32 %v10787_v17, %v10788_v33  ;;  %v10756_v11 = vadd.f32 %v10613_v16, %v10363_v48  ;;  %v10365_v17 = vadd.f32 %v17537_v50, %v9972_v56  ;;  %v9977_v50 = vadd.f32 %v17533_v35, %v17502_v43  ;;  %v114_v35 = vld [vmem:[%s17699_s1 + $0xe0] sm:$0xff] }
 0x44e   :  { %v10806_v26 = vmax.f32 %v10789_v55, %v10790_v45  ;;  %v18015_v43 = vmov 8  }
 0x44f   :  { %v10803_v0 = vmax.f32 %v10801_v28, %v10802_v12  ;;  %v10793_v34 = vadd.f32 %v10769_v53, %v10756_v11  ;;  %v10368_v53 = vadd.f32 %v17541_v9, %v9975_v61  ;;  %v10369_v9 = vadd.f32 %v17554_v23, %v9976_v6 }
 0x450   :  { %v10562_v19 = vpop.f32.mrf.mxu2  ;;  %v10582_v54 = vpop.f32.mrf.mxu3  ;;  %v10370_v12 = vadd.f32 %v17556_v49, %v9977_v50  ;;  %v82_v23 = vmul.f32 0.999, %v50_v52  ;;  %v146_v49 = vmul.f32 0.001, %v114_v35  ;;  %v10965_v50 = vld [vmem:[%s17703_s3 + $0x8] sm:$0xff] }
 0x451   :  { %v10591_v13 = vadd.f32 %v10562_v19, %v10198_v18  ;;  %v10592_v5 = vadd.f32 %v10582_v54, %v10199_v46  ;;  %10804 = vmax.xlane.f32.xlu1 %v10803_v0  ;;  %v10633_v31 = vpop.f32.mrf.mxu1 }
 0x452   :  { %v10757_v20 = vadd.f32 %v10633_v31, %v10364_v37 }
 0x453   :  { %v10791_v36 = vadd.f32 %v10775_v2, %v10591_v13  ;;  %v10792_v42 = vadd.f32 %v10776_v22, %v10592_v5 }
 0x454   :  { %v10794_v27 = vadd.f32 %v10770_v25, %v10757_v20  ;;  %v10693_v28 = vpop.f32.mrf.mxu0 }
 0x455   :  { %v10807_v63 = vmax.f32 %v10791_v36, %v10792_v42  ;;  %v10760_v25 = vadd.f32 %v10693_v28, %v10367_v39 }
 0x456   :  { %v10813_v8 = vmax.f32 %v10793_v34, %v10794_v27 }
 0x457   :  { %v10808_v4 = vmax.f32 %v10806_v26, %v10807_v63  ;;  %v10797_v58 = vadd.f32 %v10773_v24, %v10760_v25 }
 0x458   :  { %v10653_v15 = vpop.f32.mrf.mxu2  ;;  %v10673_v60 = vpop.f32.mrf.mxu3 }
 0x459   :  { %v10758_v33 = vadd.f32 %v10653_v15, %v10365_v17  ;;  %v10759_v62 = vadd.f32 %v10673_v60, %v10366_v3  ;;  %v10713_v44 = vpop.f32.mrf.mxu1  ;;  %v10971_v60 = vld [vmem:[%s17702_s4 + $0x18] sm:$0xff] }
 0x45a   :  { %v10761_v16 = vadd.f32 %v10713_v44, %v10368_v53 }
 0x45b   :  { %v10795_v41 = vadd.f32 %v10771_v21, %v10758_v33  ;;  %v10796_v55 = vadd.f32 %v10772_v57, %v10759_v62 }
 0x45c   :  { %v10798_v59 = vadd.f32 %v10774_v32, %v10761_v16 }
 0x45d   :  { %v10814_v29 = vmax.f32 %v10795_v41, %v10796_v55  ;;  %v10964_v41 = vld [vmem:[%s17703_s3] sm:$0xff] }
 0x45e   :  { %v10818_v45 = vmax.f32 %v10797_v58, %v10798_v59  ;;  %v10969_v59 = vld [vmem:[%s17702_s4 + $0x8] sm:$0xff] }
 0x45f   :  { %v10815_v10 = vmax.f32 %v10813_v8, %v10814_v29 }
 0x460   :  { %v10733_v48 = vpop.f32.mrf.mxu2  ;;  %v10753_v18 = vpop.f32.mrf.mxu3 }
 0x461   :  { %v10762_v26 = vadd.f32 %v10733_v48, %v10369_v9  ;;  %v10763_v21 = vadd.f32 %v10753_v18, %v10370_v12  ;;  %10816 = vmax.xlane.f32.xlu2 %v10815_v10 }
 0x463   :  { %v10799_v57 = vadd.f32 %v10775_v2, %v10762_v26  ;;  %v10800_v24 = vadd.f32 %v10776_v22, %v10763_v21  ;;  %v178_v2 = vadd.f32 %v146_v49, %v82_v23  ;;  %v115_v22 = vld [vmem:[%s17699_s1 + $0xe8] sm:$0xff] }
 0x464   :  { %v147_v37 = vmul.f32 0.001, %v115_v22 }
 0x465   :  { %v10819_v32 = vmax.f32 %v10799_v57, %v10800_v24  ;;  %211 = vst.msk [vmem:[%s17701_s6 + $0xe0] sm:$0xff] %vm182_vm1, %v178_v2 }
 0x467   :  { %v10820_v46 = vmax.f32 %v10818_v45, %v10819_v32  ;;  %v10900_v54 = vpop.permute.xlu1 %10899  ;;  %v10966_v32 = vld [vmem:[%s17703_s3 + $0x10] sm:$0xff] }
 0x469   :  { %10821 = vmax.xlane.f32.xlu0 %v10820_v46  ;;  %10809 = vmax.xlane.f32.xlu2 %v10808_v4  ;;  %v12755_v46 = vmov 1.0  }
 0x46a   :  { %10857 = vperm.xlu1 %12652, %v17466_v38  }
 0x46c   :  { %v10830_v13 = vld [vmem:[%s17701_s6 + $0xe0] sm:$0xff] }
 0x470   :  { %v10921_v5 = vpop.permute.xlu1 %10920 }
 0x472   :  { %12657 = vset.pattern.permute.xlu1 %v18014_v1 }
 0x478   :  { %v10916_v47 = vpop.permute.xlu1 %10915 }
 0x47d   :  { %10836 = vperm.xlu0 %12654, %v17446_v7   ;;  %v51_v7 = vld [vmem:[%s17700_s2 + $0xe8] sm:$0xff] }
 0x47e   :  { %v83_v0 = vmul.f32 0.999, %v51_v7 }
 0x480   :  { %v179_v11 = vadd.f32 %v147_v37, %v83_v0 }
 0x482   :  { %212 = vst.msk [vmem:[%s17701_s6 + $0xe8] sm:$0xff] %vm182_vm1, %v179_v11  ;;  %vm10992_vm1 = vcmask 261120  }
 0x485   :  { %12655 = vset.pattern.permute.xlu0 %v18015_v43 }
 0x486   :  { %10842 = vperm.xlu0 %12655, %v114_v35  }
 0x489   :  { %v10831_v19 = vld [vmem:[%s17701_s6 + $0xe8] sm:$0xff] }
 0x48a   :  { %10910 = vperm.xlu2 %12653, %v10831_v19  }
 0x48e   :  { %12658 = vset.pattern.permute.xlu0 %v18014_v1 }
 0x492   :  { %10905 = vperm.xlu2 %12653, %v10830_v13  }
 0x49a   :  { %10852 = vperm.xlu2 %12653, %v17490_v30  }
 0x4a2   :  { %10847 = vperm.xlu2 %12653, %v115_v22  }
 0x4aa   :  { %12656 = vset.pattern.permute.xlu2 %v18014_v1  ;;  %v10967_v1 = vld [vmem:[%s17703_s3 + $0x18] sm:$0xff] }
 0x4ab   :  { %10989 = vperm.xlu2 %12656, %v10971_v60  }
 0x4b3   :  { %10979 = vperm.xlu2 %12656, %v10969_v59  }
 0x4c4   :  { %v10805_v27 = vpop.xlane.xlu1 %10804 }
 0x4d4   :  { %v10817_v31 = vpop.xlane.xlu2 %10816 }
 0x4dc   :  { %v10822_v20 = vpop.xlane.xlu0 %10821  ;;  %v10810_v34 = vpop.xlane.xlu2 %10809 }
 0x4dd   :  { %v10823_v36 = vsel %vm10811_vm14, %v10817_v31, %v10822_v20  ;;  %v10812_v51 = vsel %vm10811_vm14, %v10805_v27, %v10810_v34  ;;  %v10858_v6 = vpop.permute.xlu1 %10857 }
 0x4de   :  { %v10902_v42 = vadd.f32 %v10900_v54, %v10823_v36 }
 0x4e0   :  { %10946 = vmatpush.msra.mxu1 %v10902_v42 }
 0x4e1   :  { %11573 = vmatmul.msk.f32.vlgmr.msra.gmra.mxu1 %vm286_vm2, %v10830_v13 }
 0x4e4   :  { %v10911_v39 = vpop.permute.xlu2 %10910 }
 0x4e9   :  { %11574 = vmatmul.msk.f32.gmra.mxu1 %vm286_vm2, %v10831_v19 }
 0x4ec   :  { %v10906_v53 = vpop.permute.xlu2 %10905 }
 0x4ef   :  { %v10837_v56 = vpop.permute.xlu0 %10836 }
 0x4f0   :  { %v10839_v63 = vadd.f32 %v10837_v56, %v10812_v51 }
 0x4f1   :  { %11575 = vmatmul.msk.f32.gmra.mxu1 %vm286_vm2, %v17512_v40  ;;  %v10968_v40 = vld [vmem:[%s17702_s4] sm:$0xff] }
 0x4f2   :  { %10883 = vmatpush.msrb.mxu0 %v10839_v63  ;;  %10974 = vperm.xlu0 %12658, %v10968_v40  }
 0x4f3   :  { %11569 = vmatmul.msk.f32.vlgmr.msrb.gmra.mxu0 %vm286_vm2, %v114_v35 }
 0x4f4   :  { %v10853_v55 = vpop.permute.xlu2 %10852 }
 0x4f8   :  { %v10843_v45 = vpop.permute.xlu0 %10842 }
 0x4f9   :  { %11576 = vmatmul.msk.f32.gmra.mxu1 %vm286_vm2, %v17498_v14 }
 0x4fb   :  { %11570 = vmatmul.msk.f32.gmra.mxu0 %vm286_vm2, %v115_v22 }
 0x4fc   :  { %v10848_v10 = vpop.permute.xlu2 %10847 }
 0x503   :  { %11571 = vmatmul.msk.f32.gmra.mxu0 %vm286_vm2, %v17490_v30 }
 0x505   :  { %v10990_v35 = vpop.permute.xlu2 %10989 }
 0x50b   :  { %11572 = vmatmul.msk.f32.gmra.mxu0 %vm286_vm2, %v17466_v38  ;;  %v10970_v38 = vld [vmem:[%s17702_s4 + $0x10] sm:$0xff] }
 0x50c   :  { %10984 = vperm.xlu1 %12657, %v10970_v38  }
 0x50d   :  { %v10980_v22 = vpop.permute.xlu2 %10979 }
 0x55e   :  { %v10948_v28 = vpop.f32.mrf.mxu1 }
 0x55f   :  { %v10949_v33 = vadd.f32 %v10948_v28, %v10906_v53 }
 0x561   :  { %v10960_v16 = vmax.f32 %v10949_v33, 0.0 }
 0x564   :  { %v10975_v19 = vpop.permute.xlu0 %10974 }
 0x566   :  { %v10951_v61 = vpop.f32.mrf.mxu1 }
 0x567   :  { %v10952_v15 = vadd.f32 %v10951_v61, %v10911_v39 }
 0x569   :  { %v10961_v44 = vmax.f32 %v10952_v15, 0.0 }
 0x56e   :  { %v10954_v8 = vpop.f32.mrf.mxu1 }
 0x56f   :  { %v10955_v14 = vadd.f32 %v10954_v8, %v10916_v47 }
 0x570   :  { %v10885_v17 = vpop.f32.mrf.mxu0 }
 0x571   :  { %v10962_v62 = vmax.f32 %v10955_v14, 0.0  ;;  %v10886_v26 = vadd.f32 %v10885_v17, %v10843_v45 }
 0x573   :  { %v11034_v24 = vmul.f32 %v10886_v26, %v10886_v26 }
 0x576   :  { %v10957_v3 = vpop.f32.mrf.mxu1 }
 0x577   :  { %v10958_v4 = vadd.f32 %v10957_v3, %v10921_v5 }
 0x578   :  { %v10888_v25 = vpop.f32.mrf.mxu0 }
 0x579   :  { %v10963_v30 = vmax.f32 %v10958_v4, 0.0  ;;  %v10889_v48 = vadd.f32 %v10888_v25, %v10848_v10 }
 0x57b   :  { %11017 = vmatpush.msra.mxu2 %v10963_v30  ;;  %v11035_v57 = vmul.f32 %v10889_v48, %v10889_v48 }
 0x57d   :  { %11018 = vmatpush.msra.mxu2 %v10962_v62 }
 0x57e   :  { %v10985_v7 = vpop.permute.xlu1 %10984 }
 0x57f   :  { %11019 = vmatpush.msra.mxu2 %v10961_v44 }
 0x580   :  { %v10891_v58 = vpop.f32.mrf.mxu0 }
 0x581   :  { %11020 = vmatpush.msra.mxu2 %v10960_v16  ;;  %v10892_v9 = vadd.f32 %v10891_v58, %v10853_v55 }
 0x582   :  { %11577 = vmatmul.msk.f32.vlgmr.msra.gmra.mxu2 %vm10992_vm1, %v10964_v41 }
 0x583   :  { %v11036_v21 = vmul.f32 %v10892_v9, %v10892_v9 }
 0x588   :  { %v10894_v29 = vpop.f32.mrf.mxu0 }
 0x589   :  { %v10895_v12 = vadd.f32 %v10894_v29, %v10858_v6 }
 0x58a   :  { %11578 = vmatmul.msk.f32.gmra.mxu2 %vm10992_vm1, %v10965_v50 }
 0x58b   :  { %v11037_v18 = vmul.f32 %v10895_v12, %v10895_v12 }
 0x58d   :  { %11053 = vmatpush.msrb.mxu3 %v11037_v18 }
 0x58f   :  { %11054 = vmatpush.msrb.mxu3 %v11036_v21 }
 0x591   :  { %11055 = vmatpush.msrb.mxu3 %v11035_v57 }
 0x592   :  { %11579 = vmatmul.msk.f32.gmra.mxu2 %vm10992_vm1, %v10966_v32 }
 0x593   :  { %11056 = vmatpush.msrb.mxu3 %v11034_v24 }
 0x594   :  { %11581 = vmatmul.msk.f32.vlgmr.msrb.gmra.mxu3 %vm10992_vm1, %v12755_v46 }
 0x59a   :  { %11580 = vmatmul.msk.f32.gmra.mxu2 %vm10992_vm1, %v10967_v1 }
 0x605   :  { %v11022_v43 = vpop.f32.mrf.mxu2 }
 0x606   :  { %v11023_v20 = vadd.f32 %v11022_v43, %v10975_v19 }
 0x608   :  { %v11082_v27 = vmul.f32 %v11023_v20, %v11023_v20 }
 0x60d   :  { %v11025_v52 = vpop.f32.mrf.mxu2 }
 0x60e   :  { %v11026_v13 = vadd.f32 %v11025_v52, %v10980_v22 }
 0x610   :  { %v11083_v47 = vmul.f32 %v11026_v13, %v11026_v13 }
 0x615   :  { %v11028_v23 = vpop.f32.mrf.mxu2 }
 0x616   :  { %v11029_v37 = vadd.f32 %v11028_v23, %v10985_v7 }
 0x617   :  { %v11058_v49 = vpop.f32.mrf.mxu3 }
 0x618   :  { %v11061_v2 = vmax.f32 %v11058_v49, 1e-24  ;;  %v11084_v36 = vmul.f32 %v11029_v37, %v11029_v37 }
 0x61a   :  { %12659 = vrsqrt.f32 %v11061_v2  ;;  %vm11068_vm2 = vweird.f32 %v11061_v2 }
 0x61d   :  { %v11031_v0 = vpop.f32.mrf.mxu2 }
 0x61e   :  { %v11032_v11 = vadd.f32 %v11031_v0, %v10990_v35 }
 0x620   :  { %v12660_v54 = vpop.eup %12659  ;;  %v11085_v5 = vmul.f32 %v11032_v11, %v11032_v11 }
 0x621   :  { %v11063_v31 = vmul.f32 %v12660_v54, %v11061_v2  ;;  %vm11069_vm15 = vweird.f32 %v12660_v54 }
 0x622   :  { %11098 = vmatpush.msra.mxu3 %v11085_v5  ;;  %vm11070_vm0 = vmor %vm11068_vm2, %vm11069_vm15 }
 0x623   :  { %v11064_v42 = vmul.f32 %v12660_v54, %v11063_v31 }
 0x624   :  { %11099 = vmatpush.msra.mxu3 %v11084_v36 }
 0x625   :  { %v11065_v34 = vmul.f32 0.5, %v11064_v42 }
 0x626   :  { %11100 = vmatpush.msra.mxu3 %v11083_v47 }
 0x627   :  { %v11066_v56 = vsub.f32 1.5, %v11065_v34 }
 0x628   :  { %11101 = vmatpush.msra.mxu3 %v11082_v27 }
 0x629   :  { %v11067_v51 = vmul.f32 %v12660_v54, %v11066_v56  ;;  %11582 = vmatmul.msk.f32.vlgmr.msra.gmra.mxu3 %vm10992_vm1, %v12755_v46 }
 0x62b   :  { %v11071_v63 = vsel %vm11070_vm0, %v12660_v54, %v11067_v51 }
 0x62c   :  { %v11072_v28 = vperm.slane %v11071_v63, 0 }
 0x62e   :  { %v11073_v61 = vmul.f32 %v11072_v28, %v10886_v26  ;;  %v11074_v39 = vmul.f32 %v11072_v28, %v10889_v48  ;;  %v11075_v8 = vmul.f32 %v11072_v28, %v10892_v9  ;;  %v11076_v17 = vmul.f32 %v11072_v28, %v10895_v12 }
 0x630   :  { %11078 = vst.msk [vmem:[%s17704_s5] sm:$0xff] %vm11077_vm3, %v11073_v61 }
 0x631   :  { %11079 = vst.msk [vmem:[%s17704_s5 + $0x8] sm:$0xff] %vm11077_vm3, %v11074_v39 }
 0x632   :  { %11080 = vst.msk [vmem:[%s17704_s5 + $0x10] sm:$0xff] %vm11077_vm3, %v11075_v8 }
 0x633   :  { %11081 = vst.msk [vmem:[%s17704_s5 + $0x18] sm:$0xff] %vm11077_vm3, %v11076_v17 }
 0x6ac   :  { %v11103_v40 = vpop.f32.mrf.mxu3 }
 0x6ad   :  { %v11106_v3 = vmax.f32 %v11103_v40, 1e-24 }
 0x6af   :  { %12661 = vrsqrt.f32 %v11106_v3  ;;  %vm11113_vm5 = vweird.f32 %v11106_v3 }
 0x6b5   :  { %v12662_v14 = vpop.eup %12661 }
 0x6b6   :  { %v11108_v4 = vmul.f32 %v12662_v14, %v11106_v3  ;;  %vm11114_vm4 = vweird.f32 %v12662_v14 }
 0x6b7   :  { %vm11115_vm6 = vmor %vm11113_vm5, %vm11114_vm4 }
 0x6b8   :  { %v11109_v53 = vmul.f32 %v12662_v14, %v11108_v4 }
 0x6ba   :  { %v11110_v25 = vmul.f32 0.5, %v11109_v53 }
 0x6bc   :  { %v11111_v15 = vsub.f32 1.5, %v11110_v25 }
 0x6be   :  { %v11112_v30 = vmul.f32 %v12662_v14, %v11111_v15 }
 0x6c0   :  { %v11116_v38 = vsel %vm11115_vm6, %v12662_v14, %v11112_v30 }
 0x6c1   :  { %v11117_v60 = vperm.slane %v11116_v38, 0 }
 0x6c3   :  { %v11118_v33 = vmul.f32 %v11117_v60, %v11023_v20  ;;  %v11119_v62 = vmul.f32 %v11117_v60, %v11026_v13  ;;  %v11120_v44 = vmul.f32 %v11117_v60, %v11029_v37  ;;  %v11121_v16 = vmul.f32 %v11117_v60, %v11032_v11 }
 0x6c5   :  { %11583 = vst.msk [vmem:[%s17704_s5 + $0x20] sm:$0xff] %vm11077_vm3, %v11118_v33 }
 0x6c6   :  { %11584 = vst.msk [vmem:[%s17704_s5 + $0x28] sm:$0xff] %vm11077_vm3, %v11119_v62 }
 0x6c7   :  { %11585 = vst.msk [vmem:[%s17704_s5 + $0x30] sm:$0xff] %vm11077_vm3, %v11120_v44 }
 0x6c8   :  { %11586 = vst.msk [vmem:[%s17704_s5 + $0x38] sm:$0xff] %vm11077_vm3, %v11121_v16 }

</bundles_post_ra>
